<compile_context>
chip_gen: v6e
topology: v6e:2x2x1
jax: 0.10.0
libtpu: 0.0.40
codegen_flags: <defaults>
</compile_context>

<pallas_src>
import functools

import jax
import jax.numpy as jnp
from jax import lax
from jax.experimental import pallas as pl
from jax.experimental.pallas import tpu as pltpu

# ----------------------------- configuration -------------------------------
N_CLASSES = 8          # len(classes)
POOLING_SIZE = 7       # cfg.POOLING_SIZE
C1 = 32                # channels of RCNN_base1 output
C2 = 64                # channels of RCNN_base2 output (dout_base_model); /16 stride
HEAD_DIM = 256         # _head_to_tail output dim (stand-in for 4096)
CTX_DIM = 128          # local / global context dims (lc / gc)
DA_HID = 128           # instance-DA hidden dim
N_ANCHORS = 3
N_ROIS = 8
LC, GC, DA_USE_CONTEX = True, True, True
CLASS_AGNOSTIC = False


def _approx_sigmoid(z):
    # 1/(1+exp(-z)) with the divide on the EUP slot.
    return pl.reciprocal(1.0 + jnp.exp(-z), approx=True)


# ===========================================================================
# 1) Generic tiled linear: y = act(x @ w + b)   (bf16 in/out, f32 compute)
#    Weights/bias are pre-packed (bf16 matrix, (1,N) f32 bias) — no glue pads.
# ===========================================================================
def _linear_kernel(x_ref, w_ref, b_ref, o_ref, *, act):
    y = jnp.dot(x_ref[...], w_ref[...], preferred_element_type=jnp.float32) + b_ref[...]
    if act == "relu":
        y = jnp.maximum(y, 0.0)
    o_ref[...] = y.astype(o_ref.dtype)


def _pick_row_tile(m):
    # multiples of 16 (bf16 sublane packing); 512 cap keeps the MXU fed (v6e/v7x).
    for t in (512, 256, 128, 64, 32, 16, 8):
        if m % t == 0:
            return t
    return m


def linear(x, w, b, act="none"):
    """act(x @ w + b); x:(M,K) bf16, w:(K,N) bf16, b:(1,N) f32 -> (M,N) bf16."""
    M, K = x.shape
    N = w.shape[1]
    tm = _pick_row_tile(M)
    return pl.pallas_call(
        functools.partial(_linear_kernel, act=act),
        grid=(M // tm,),
        in_specs=[pl.BlockSpec((tm, K), lambda i: (i, 0)),
                  pl.BlockSpec((K, N), lambda i: (0, 0)),
                  pl.BlockSpec((1, N), lambda i: (0, 0))],
        out_specs=pl.BlockSpec((tm, N), lambda i: (i, 0)),
        out_shape=jax.ShapeDtypeStruct((M, N), jnp.bfloat16),
        compiler_params=pltpu.CompilerParams(
            dimension_semantics=("parallel",),
            vmem_limit_bytes=32 * 1024 * 1024),
    )(x, w, b)


# ----------------- conv via channels-last im2col + tiled matmul -------------
def _im2col_nhwc(x, kh, kw, stride, padding):
    """x:(B,H,W,C) -> (B*Ho*Wo, kh*kw*C) channels-last patches (lane-dense)."""
    B, H, W, C = x.shape
    xp = jnp.pad(x, ((0, 0), (padding, padding), (padding, padding), (0, 0)))
    Ho = (H + 2 * padding - kh) // stride + 1
    Wo = (W + 2 * padding - kw) // stride + 1
    cols = []
    for dy in range(kh):
        for dx in range(kw):
            cols.append(xp[:, dy:dy + Ho * stride:stride,
                           dx:dx + Wo * stride:stride, :])
    p = jnp.concatenate(cols, axis=-1)                 # (B,Ho,Wo,kh*kw*C)
    return p.reshape(B * Ho * Wo, kh * kw * C), Ho, Wo


def conv2d(x, w_mat, b, stride=1, padding=1, act="none", kh=3, kw=3):
    """x NHWC (bf16), w_mat:(kh*kw*Cin, Cout) bf16, b:(1,Cout) f32 -> NHWC bf16."""
    # TODO(synk): for real-scale feature maps fold the kh*kw taps into the matmul
    # kernel (shifted pl.ds loads + f32 scratch accumulation) instead of im2col.
    B = x.shape[0]
    p, Ho, Wo = _im2col_nhwc(x, kh, kw, stride, padding)
    y = linear(p.astype(jnp.bfloat16), w_mat, b, act=act)
    return y.reshape(B, Ho, Wo, w_mat.shape[1])


# ===========================================================================
# 2) netD_pixel: row-tiled, lane-dense per-pixel score + pooled feature
#    (grad_reverse(x) and x.detach() differ only in backward -> one pass)
# ===========================================================================
def _netd_pixel_kernel(x_ref, w1_ref, b1_ref, w2_ref, b2_ref, w3t_ref, b3_ref,
                       d_ref, feat_ref, acc_ref, *, inv_rows):
    @pl.when(pl.program_id(0) == 0)
    def _():
        acc_ref[...] = jnp.zeros_like(acc_ref)

    h1 = jnp.maximum(jnp.dot(x_ref[...], w1_ref[...],
                             preferred_element_type=jnp.float32) + b1_ref[...], 0.0)
    h2 = jnp.maximum(jnp.dot(h1.astype(jnp.bfloat16), w2_ref[...],
                             preferred_element_type=jnp.float32) + b2_ref[...], 0.0)
    # global-avg-pool accumulator (finalized on the last row block)
    acc_ref[...] += jnp.sum(h2, axis=0, keepdims=True)
    # lane-dense per-pixel domain score: (1, TR) = w3^T @ h2^T (NT matmul, no
    # explicit transpose, no masked (N,1) stores).
    z = lax.dot_general(w3t_ref[...], h2.astype(jnp.bfloat16),
                        dimension_numbers=(((1,), (1,)), ((), ())),
                        preferred_element_type=jnp.float32) + b3_ref[...]
    d_ref[...] = _approx_sigmoid(z)

    @pl.when(pl.program_id(0) == pl.num_programs(0) - 1)
    def _():
        feat_ref[...] = acc_ref[...] * inv_rows


def netD_pixel(pp, x_nhwc):
    B, H, W, C = x_nhwc.shape
    M = B * H * W
    xm = x_nhwc.reshape(M, C)
    TR = next((t for t in (1024, 512, 256, 128) if M % t == 0), M)
    d, feat = pl.pallas_call(
        functools.partial(_netd_pixel_kernel, inv_rows=1.0 / float(M)),
        grid=(M // TR,),
        in_specs=[pl.BlockSpec((TR, C), lambda i: (i, 0)),
                  pl.BlockSpec((C, CTX_DIM), lambda i: (0, 0)),
                  pl.BlockSpec((1, CTX_DIM), lambda i: (0, 0)),
                  pl.BlockSpec((CTX_DIM, CTX_DIM), lambda i: (0, 0)),
                  pl.BlockSpec((1, CTX_DIM), lambda i: (0, 0)),
                  pl.BlockSpec((1, CTX_DIM), lambda i: (0, 0)),
                  pl.BlockSpec((1, 1), lambda i: (0, 0))],
        out_specs=[pl.BlockSpec((1, TR), lambda i: (0, i)),
                   pl.BlockSpec((1, CTX_DIM), lambda i: (0, 0))],
        out_shape=(jax.ShapeDtypeStruct((1, M), jnp.float32),
                   jax.ShapeDtypeStruct((1, CTX_DIM), jnp.float32)),
        scratch_shapes=[pltpu.VMEM((1, CTX_DIM), jnp.float32)],
        compiler_params=pltpu.CompilerParams(
            dimension_semantics=("arbitrary",)),
    )(xm, pp["dp_c1_w"], pp["dp_c1_b"], pp["dp_c2_w"], pp["dp_c2_b"],
      pp["dp_c3_wt"], pp["dp_c3_b"])
    d_map = d.reshape(B, H, W)[:, None, :, :]          # (B,1,H,W) like PyTorch
    return d_map, feat


# ===========================================================================
# 3) Fused base_feat heads: RPN (conv+cls+bbox), netD (conv+pool+fc),
#    channel-DA (avg-pool + block-diag fc1/fc2 + sigmoid)    — one pallas_call
# ===========================================================================
def _base_heads_kernel(pr_ref, pg_ref, bf_ref,
                       rw_ref, rb_ref, rcw_ref, rcb_ref, rbw_ref, rbb_ref,
                       gw_ref, gb_ref, gfw_ref, gfb_ref,
                       cw1_ref, cb1_ref, cw2_ref, cb2_ref,
                       rpn_cls_ref, rpn_bbox_ref, glogit_ref, gfeat_ref, ch_ref):
    # --- RPN conv 3x3 s1 + cls / bbox heads
    h = jnp.maximum(jnp.dot(pr_ref[...], rw_ref[...],
                            preferred_element_type=jnp.float32) + rb_ref[...], 0.0)
    hb = h.astype(jnp.bfloat16)
    rpn_cls_ref[...] = jnp.dot(hb, rcw_ref[...],
                               preferred_element_type=jnp.float32) + rcb_ref[...]
    rpn_bbox_ref[...] = jnp.dot(hb, rbw_ref[...],
                                preferred_element_type=jnp.float32) + rbb_ref[...]
    # --- netD (global): conv 3x3 s2 + relu, global avg pool, fc
    g = jnp.maximum(jnp.dot(pg_ref[...], gw_ref[...],
                            preferred_element_type=jnp.float32) + gb_ref[...], 0.0)
    feat = jnp.mean(g, axis=0, keepdims=True)
    gfeat_ref[...] = feat
    glogit_ref[...] = jnp.dot(feat.astype(jnp.bfloat16), gfw_ref[...],
                              preferred_element_type=jnp.float32) + gfb_ref[...]
    # --- channel DA: lane-dense global avg pool over pixels, then block-diagonal
    #     fc1/fc2 (time contribution pre-folded into cb1), sigmoid.
    gp = jnp.mean(bf_ref[...].astype(jnp.float32), axis=0, keepdims=True)     # (1,C)
    hh = jnp.maximum(jnp.dot(gp.astype(jnp.bfloat16), cw1_ref[...],
                             preferred_element_type=jnp.float32) + cb1_ref[...], 0.0)
    z = jnp.dot(hh.astype(jnp.bfloat16), cw2_ref[...],
                preferred_element_type=jnp.float32) + cb2_ref[...]
    ch_ref[...] = _approx_sigmoid(z)


def base_heads(pp, base_feat_nhwc):
    # TODO(synk): at real feature-map sizes the RPN/netD parts should get a row
    # grid axis (and a second 'parallel' block for v7x's 2 TensorCores).
    B, H, W, C = base_feat_nhwc.shape
    patches_rpn, Hr, Wr = _im2col_nhwc(base_feat_nhwc, 3, 3, 1, 1)
    patches_g, _, _ = _im2col_nhwc(base_feat_nhwc, 3, 3, 2, 1)
    bf_flat = base_feat_nhwc.reshape(B * H * W, C)
    rpn_cls, rpn_bbox, glogit, gfeat, ch = pl.pallas_call(
        _base_heads_kernel,
        out_shape=(jax.ShapeDtypeStruct((B * Hr * Wr, 2 * N_ANCHORS), jnp.float32),
                   jax.ShapeDtypeStruct((B * Hr * Wr, 4 * N_ANCHORS), jnp.float32),
                   jax.ShapeDtypeStruct((1, 2), jnp.float32),
                   jax.ShapeDtypeStruct((1, CTX_DIM), jnp.float32),
                   jax.ShapeDtypeStruct((1, 4), jnp.float32)),
    )(patches_rpn, patches_g, bf_flat,
      pp["rpn_conv_m"], pp["rpn_conv_b"], pp["rpn_cls_w"], pp["rpn_cls_b"],
      pp["rpn_bbox_w"], pp["rpn_bbox_b"],
      pp["dg_c1_m"], pp["dg_c1_b"], pp["dg_fc_w"], pp["dg_fc_b"],
      pp["ch_w1"], pp["ch_b1"], pp["ch_w2"], pp["ch_b2"])

    # TODO(synk): anchor decode + NMS of the proposal layer is data-dependent
    # sorting with no clean Pallas equivalent; deterministic stub ROIs emitted.
    r = jnp.arange(N_ROIS, dtype=jnp.float32)
    boxes = jnp.stack([jnp.zeros_like(r), 2.0 * r, 2.0 * r,
                       2.0 * r + 32.0, 2.0 * r + 32.0], axis=1)
    rois = boxes[None]
    channel_feat = ch.reshape(4, 1)
    del rpn_cls, rpn_bbox   # consumed only by the stubbed proposal layer
    return rois, glogit, gfeat, channel_feat


# ===========================================================================
# 4) ROIAlign (plain JAX gather)
# ===========================================================================
def roi_align(feat, rois, out_size, spatial_scale):
    # TODO(synk): ROIAlign is a data-dependent bilinear gather; kept in plain JAX
    # (a scalar-prefetch / DMA-gather Pallas version only pays off at large N_ROIS).
    B, H, W, C = feat.shape

    def one_roi(roi):
        b = roi[0].astype(jnp.int32)
        x1 = roi[1] * spatial_scale
        y1 = roi[2] * spatial_scale
        x2 = roi[3] * spatial_scale
        y2 = roi[4] * spatial_scale
        bw = jnp.maximum(x2 - x1, 1.0)
        bh = jnp.maximum(y2 - y1, 1.0)
        ys = y1 + (jnp.arange(out_size, dtype=jnp.float32) + 0.5) * bh / out_size
        xs = x1 + (jnp.arange(out_size, dtype=jnp.float32) + 0.5) * bw / out_size
        f = jnp.take(feat, b, axis=0)                 # (H, W, C)
        y0 = jnp.clip(jnp.floor(ys), 0.0, H - 1.0)
        x0 = jnp.clip(jnp.floor(xs), 0.0, W - 1.0)
        y0i = y0.astype(jnp.int32)
        x0i = x0.astype(jnp.int32)
        y1i = jnp.clip(y0i + 1, 0, H - 1)
        x1i = jnp.clip(x0i + 1, 0, W - 1)
        wy = jnp.clip(ys - y0, 0.0, 1.0)[:, None, None]
        wx = jnp.clip(xs - x0, 0.0, 1.0)[None, :, None]
        g = lambda yi, xi: jnp.take(jnp.take(f, yi, axis=0), xi, axis=1).astype(jnp.float32)
        return (g(y0i, x0i) * (1 - wy) * (1 - wx) + g(y0i, x1i) * (1 - wy) * wx +
                g(y1i, x0i) * wy * (1 - wx) + g(y1i, x1i) * wy * wx)

    return jax.vmap(one_roi)(rois)                    # (N_rois, out, out, C)


# ===========================================================================
# 5) Fused ROI tail: head_to_tail + 3x instance-DA (BCE-with-logits) +
#    cls/bbox heads + softmax — one pallas_call (rank-1 context split, no
#    tile+concat of the context vector).
# ===========================================================================
def _roi_tail_kernel(x_ref, ctx_ref, hw1_ref, hb1_ref, hw2_ref, hb2_ref,
                     w1p_ref, w1c_ref, b1_ref, w2_ref, b2_ref, w3_ref, b3_ref,
                     cwp_ref, cwc_ref, cb_ref, bwp_ref, bwc_ref, bb_ref,
                     prob_ref, bbox_ref, lcls_ref, lpn_ref, *, label):
    # _head_to_tail: fc1 + relu, fc2 + relu
    h = jnp.maximum(jnp.dot(x_ref[...], hw1_ref[...],
                            preferred_element_type=jnp.float32) + hb1_ref[...], 0.0)
    pooled = jnp.maximum(jnp.dot(h.astype(jnp.bfloat16), hw2_ref[...],
                                 preferred_element_type=jnp.float32) + hb2_ref[...], 0.0)
    pooled_b = pooled.astype(jnp.bfloat16)
    ctx = ctx_ref[...]
    n_inv = 1.0 / float(pooled.shape[0])

    # instance-DA branches 0=cls, 1=pos, 2=neg (rois_pos == rois_neg == rois stub,
    # so the pos/neg ROI heads reuse the same pooled features).
    branch_loss = []
    for b_idx in range(3):
        h1 = jnp.maximum(
            jnp.dot(pooled_b, w1p_ref[b_idx], preferred_element_type=jnp.float32)
            + jnp.dot(ctx, w1c_ref[b_idx], preferred_element_type=jnp.float32)
            + b1_ref[b_idx], 0.0)
        # TODO(synk): nn.Dropout between fc layers is identity in this forward-only path.
        h2 = jnp.maximum(jnp.dot(h1.astype(jnp.bfloat16), w2_ref[b_idx],
                                 preferred_element_type=jnp.float32) + b2_ref[b_idx], 0.0)
        z = jnp.dot(h2.astype(jnp.bfloat16), w3_ref[b_idx],
                    preferred_element_type=jnp.float32) + b3_ref[b_idx]   # (n,1)
        # BCE(sigmoid(z), label) in the numerically-stable with-logits form.
        bce = jnp.maximum(z, 0.0) - z * label + jnp.log(1.0 + jnp.exp(-jnp.abs(z)))
        branch_loss.append(jnp.sum(bce) * n_inv)
    lcls_ref[...] = jnp.zeros((1, 128), jnp.float32) + branch_loss[0]
    lpn_ref[...] = jnp.zeros((1, 128), jnp.float32) + (branch_loss[1] + branch_loss[2])

    # cls / bbox heads with rank-split context, softmax on the EUP-reciprocal path
    score = (jnp.dot(pooled_b, cwp_ref[...], preferred_element_type=jnp.float32)
             + jnp.dot(ctx, cwc_ref[...], preferred_element_type=jnp.float32)
             + cb_ref[...])
    m = jnp.max(score, axis=-1, keepdims=True)
    e = jnp.exp(score - m)
    prob_ref[...] = e * pl.reciprocal(jnp.sum(e, axis=-1, keepdims=True), approx=True)
    bbox_ref[...] = (jnp.dot(pooled_b, bwp_ref[...], preferred_element_type=jnp.float32)
                     + jnp.dot(ctx, bwc_ref[...], preferred_element_type=jnp.float32)
                     + bb_ref[...])


def roi_tail(pp, pooled_flat, ctx, label):
    n = pooled_flat.shape[0]
    n_cls = pp["cls_wp"].shape[1]
    n_bbox = pp["bbox_wp"].shape[1]
    cls_prob, bbox_pred, lcls, lpn = pl.pallas_call(
        functools.partial(_roi_tail_kernel, label=float(label)),
        out_shape=(jax.ShapeDtypeStruct((n, n_cls), jnp.float32),
                   jax.ShapeDtypeStruct((n, n_bbox), jnp.float32),
                   jax.ShapeDtypeStruct((1, 128), jnp.float32),
                   jax.ShapeDtypeStruct((1, 128), jnp.float32)),
    )(pooled_flat, ctx,
      pp["head_fc1_w"], pp["head_fc1_b"], pp["head_fc2_w"], pp["head_fc2_b"],
      pp["ida_w1p"], pp["ida_w1c"], pp["ida_b1"], pp["ida_w2"], pp["ida_b2"],
      pp["ida_w3"], pp["ida_b3"],
      pp["cls_wp"], pp["cls_wc"], pp["cls_b"],
      pp["bbox_wp"], pp["bbox_wc"], pp["bbox_b"])
    return cls_prob, bbox_pred, lcls[0, 0], lpn[0, 0]


# --------------------------------- glue -------------------------------------
def grad_reverse(x, lambd=1.0):
    # gradient-reversal layer: identity in the forward pass
    return x


# --------------------------------- forward ----------------------------------
def forward(pp, im_data, im_info, im_cls_lb, gt_boxes, num_boxes,
            target=False, eta=1.0, weight_value=1.0):
    need_backprop = 1.0 if target else 0.0
    batch_size = im_data.shape[0]

    x = jnp.transpose(im_data, (0, 2, 3, 1)).astype(jnp.bfloat16)   # NCHW -> NHWC

    # RCNN_base1  (stride 4)
    x = conv2d(x, pp["b1c1_m"], pp["b1c1_b"], stride=2, padding=1, act="relu")
    base_feat1 = conv2d(x, pp["b1c2_m"], pp["b1c2_b"], stride=2, padding=1, act="relu")

    # netD_pixel: grad_reverse(x) and x.detach() differ only in backward -> one pass.
    d_pixel, feat_pixel = netD_pixel(pp, grad_reverse(base_feat1, eta))

    # RCNN_base2  (total stride 16)
    x = conv2d(base_feat1, pp["b2c1_m"], pp["b2c1_b"], stride=2, padding=1, act="relu")
    base_feat = conv2d(x, pp["b2c2_m"], pp["b2c2_b"], stride=2, padding=1, act="relu")

    # One fused kernel for all base_feat consumers: RPN, netD, channel-DA.
    rois, domain_p, feat, channel_feat = base_heads(pp, grad_reverse(base_feat, eta))
    rpn_loss_cls, rpn_loss_bbox = 0.0, 0.0
    rois_label = None
    # TODO(synk): _ProposalTargetLayer fg/bg sampling is data-dependent; rois_pos ==
    # rois_neg == rois here, so the pos/neg ROI-align + head passes collapse into one.

    pooled = roi_align(base_feat, rois.reshape(-1, 5), POOLING_SIZE, 1.0 / 16.0)
    pooled_flat = pooled.reshape(pooled.shape[0], -1).astype(jnp.bfloat16)

    # context vector shared by every ROI row; consumed via rank-1 weight splits
    # (order matches the PyTorch concat: [global feat, pixel feat, pooled]).
    ctx = jnp.concatenate([feat, feat_pixel], axis=1).astype(jnp.bfloat16)   # (1, 256)

    cls_prob, bbox_pred, DA_ins_loss_cls, DA_ins_loss_pos_neg = roi_tail(
        pp, pooled_flat, ctx, need_backprop)

    if target:
        return (d_pixel, domain_p, DA_ins_loss_cls, DA_ins_loss_pos_neg, channel_feat)

    RCNN_loss_cls = 0.0      # eval mode (self.training == False)
    RCNN_loss_bbox = 0.0
    cls_prob = cls_prob.reshape(batch_size, rois.shape[1], -1)
    bbox_pred = bbox_pred.reshape(batch_size, rois.shape[1], -1)
    return (rois, cls_prob, bbox_pred, rpn_loss_cls, rpn_loss_bbox,
            RCNN_loss_cls, RCNN_loss_bbox, rois_label, d_pixel, domain_p,
            DA_ins_loss_cls, DA_ins_loss_pos_neg, channel_feat)


# --------------------------- deterministic init ------------------------------
def init_params(key):
    keys = iter(jax.random.split(key, 64))

    def nrm(shape, std=0.01):
        return jax.random.normal(next(keys), shape, jnp.float32) * std

    z = lambda n: jnp.zeros((n,), jnp.float32)
    head_in = C2 * POOLING_SIZE * POOLING_SIZE
    fc_in = HEAD_DIM + (CTX_DIM if LC else 0) + (CTX_DIM if GC else 0)
    ch_q = C2 // 4
    ch_in = 2 * ch_q

    p = {
        # backbone 3x3 convs, HWIO layout (kh, kw, Cin, Cout)
        "b1c1_w": nrm((3, 3, 3, C1)), "b1c1_b": z(C1),
        "b1c2_w": nrm((3, 3, C1, C1)), "b1c2_b": z(C1),
        "b2c1_w": nrm((3, 3, C1, C2)), "b2c1_b": z(C2),
        "b2c2_w": nrm((3, 3, C2, C2)), "b2c2_b": z(C2),
        # netD_pixel (1x1 convs as matrices)
        "dp_c1_w": nrm((C1, CTX_DIM)), "dp_c1_b": z(CTX_DIM),
        "dp_c2_w": nrm((CTX_DIM, CTX_DIM)), "dp_c2_b": z(CTX_DIM),
        "dp_c3_w": nrm((CTX_DIM, 1)), "dp_c3_b": z(1),
        # netD
        "dg_c1_w": nrm((3, 3, C2, CTX_DIM)), "dg_c1_b": z(CTX_DIM),
        "dg_fc_w": nrm((CTX_DIM, 2)), "dg_fc_b": z(2),
        # RPN
        "rpn_conv_w": nrm((3, 3, C2, C2)), "rpn_conv_b": z(C2),
        "rpn_cls_w": nrm((C2, 2 * N_ANCHORS)), "rpn_cls_b": z(2 * N_ANCHORS),
        "rpn_bbox_w": nrm((C2, 4 * N_ANCHORS)), "rpn_bbox_b": z(4 * N_ANCHORS),
        # _head_to_tail
        "head_fc1_w": nrm((head_in, HEAD_DIM)), "head_fc1_b": z(HEAD_DIM),
        "head_fc2_w": nrm((HEAD_DIM, HEAD_DIM)), "head_fc2_b": z(HEAD_DIM),
        # cls / bbox heads (first 2*CTX_DIM rows consume the [global, pixel] context)
        "cls_w": nrm((fc_in, N_CLASSES)), "cls_b": z(N_CLASSES),
        "bbox_w": nrm((fc_in, 4 if CLASS_AGNOSTIC else 4 * N_CLASSES), std=0.001),
        "bbox_b": z(4 if CLASS_AGNOSTIC else 4 * N_CLASSES),
        # channel DA (fc1 rows ordered [avg-pool part ; time part])
        "ch_fc1_w": nrm((ch_in, ch_in)), "ch_fc1_b": z(ch_in),
        "ch_fc2_w": nrm((ch_in, 1)), "ch_fc2_b": z(1),
    }
    for pre in ("ida", "idap", "idan"):
        p[pre + "_fc1_w"] = nrm((fc_in, DA_HID)); p[pre + "_fc1_b"] = z(DA_HID)
        p[pre + "_fc2_w"] = nrm((DA_HID, DA_HID)); p[pre + "_fc2_b"] = z(DA_HID)
        p[pre + "_fc3_w"] = nrm((DA_HID, 1));      p[pre + "_fc3_b"] = z(1)
    return p


# --------------------- one-time parameter pre-packing ------------------------
def prepack_params(p):
    """Cast/reshape/stack/split every weight ONCE, outside the jitted forward."""
    bf = lambda a: a.astype(jnp.bfloat16)
    row = lambda a: a.reshape(1, -1).astype(jnp.float32)
    pp = {}

    # backbone conv matrices  (HWIO -> (kh*kw*Cin, Cout))
    for name in ("b1c1", "b1c2", "b2c1", "b2c2"):
        w = p[name + "_w"]
        pp[name + "_m"] = bf(w.reshape(-1, w.shape[-1]))
        pp[name + "_b"] = row(p[name + "_b"])

    # netD_pixel (last layer stored transposed for the lane-dense NT matmul)
    pp["dp_c1_w"] = bf(p["dp_c1_w"]); pp["dp_c1_b"] = row(p["dp_c1_b"])
    pp["dp_c2_w"] = bf(p["dp_c2_w"]); pp["dp_c2_b"] = row(p["dp_c2_b"])
    pp["dp_c3_wt"] = bf(p["dp_c3_w"].T); pp["dp_c3_b"] = row(p["dp_c3_b"])

    # netD
    pp["dg_c1_m"] = bf(p["dg_c1_w"].reshape(-1, CTX_DIM)); pp["dg_c1_b"] = row(p["dg_c1_b"])
    pp["dg_fc_w"] = bf(p["dg_fc_w"]); pp["dg_fc_b"] = row(p["dg_fc_b"])

    # RPN
    pp["rpn_conv_m"] = bf(p["rpn_conv_w"].reshape(-1, C2)); pp["rpn_conv_b"] = row(p["rpn_conv_b"])
    pp["rpn_cls_w"] = bf(p["rpn_cls_w"]); pp["rpn_cls_b"] = row(p["rpn_cls_b"])
    pp["rpn_bbox_w"] = bf(p["rpn_bbox_w"]); pp["rpn_bbox_b"] = row(p["rpn_bbox_b"])

    # channel DA: per-group fc1/fc2 as block-diagonal matrices on the (1,C) pooled
    # vector; the constant time-domain contribution is folded into the fc1 bias.
    q = C2 // 4
    hid = 2 * q
    w1 = p["ch_fc1_w"]                      # rows: [avg-pool part (q) ; time part (q)]
    w1g, w1t = w1[:q], w1[q:]
    cw1 = jnp.zeros((C2, 4 * hid), jnp.float32)
    cb1 = jnp.zeros((4, hid), jnp.float32)
    cw2 = jnp.zeros((4 * hid, 4), jnp.float32)
    for r in range(4):
        cw1 = cw1.at[r * q:(r + 1) * q, r * hid:(r + 1) * hid].set(w1g)
        cb1 = cb1.at[r].set(p["ch_fc1_b"] + r * w1t.sum(axis=0))
        cw2 = cw2.at[r * hid:(r + 1) * hid, r].set(p["ch_fc2_w"][:, 0])
    pp["ch_w1"] = bf(cw1)
    pp["ch_b1"] = cb1.reshape(1, 4 * hid)
    pp["ch_w2"] = bf(cw2)
    pp["ch_b2"] = jnp.full((1, 4), p["ch_fc2_b"][0], jnp.float32)

    # _head_to_tail
    pp["head_fc1_w"] = bf(p["head_fc1_w"]); pp["head_fc1_b"] = row(p["head_fc1_b"])
    pp["head_fc2_w"] = bf(p["head_fc2_w"]); pp["head_fc2_b"] = row(p["head_fc2_b"])

    # instance DA: 3 branches stacked; fc1 split into [ctx rows ; pooled rows]
    ctx_dim = (CTX_DIM if GC else 0) + (CTX_DIM if LC else 0)
    prefixes = ("ida", "idap", "idan")
    w1s = jnp.stack([p[pre + "_fc1_w"] for pre in prefixes])
    pp["ida_w1c"] = bf(w1s[:, :ctx_dim, :])
    pp["ida_w1p"] = bf(w1s[:, ctx_dim:, :])
    pp["ida_b1"] = jnp.stack([p[pre + "_fc1_b"] for pre in prefixes]).reshape(3, 1, DA_HID)
    pp["ida_w2"] = bf(jnp.stack([p[pre + "_fc2_w"] for pre in prefixes]))
    pp["ida_b2"] = jnp.stack([p[pre + "_fc2_b"] for pre in prefixes]).reshape(3, 1, DA_HID)
    pp["ida_w3"] = bf(jnp.stack([p[pre + "_fc3_w"] for pre in prefixes]))
    pp["ida_b3"] = jnp.stack([p[pre + "_fc3_b"] for pre in prefixes]).reshape(3, 1, 1)

    # cls / bbox heads split into ctx / pooled row parts
    pp["cls_wc"] = bf(p["cls_w"][:ctx_dim]); pp["cls_wp"] = bf(p["cls_w"][ctx_dim:])
    pp["cls_b"] = row(p["cls_b"])
    pp["bbox_wc"] = bf(p["bbox_w"][:ctx_dim]); pp["bbox_wp"] = bf(p["bbox_w"][ctx_dim:])
    pp["bbox_b"] = row(p["bbox_b"])
    return pp


# ----------------------------------- main ------------------------------------
if __name__ == "__main__":
    raw_params = init_params(jax.random.PRNGKey(0))
    params = prepack_params(raw_params)            # one-time packing, outside jit
    kd = jax.random.split(jax.random.PRNGKey(0), 4)

    im_data = jax.random.normal(kd[0], (1, 3, 64, 64), jnp.float32)   # NCHW like PyTorch
    im_info = jnp.array([[64.0, 64.0, 1.0]], jnp.float32)
    im_cls_lb = jnp.zeros((1, N_CLASSES), jnp.float32)
    gt_boxes = jnp.zeros((1, 5, 5), jnp.float32)
    num_boxes = jnp.zeros((1,), jnp.int32)

    fwd = jax.jit(forward, static_argnames=("target",))
    outs = fwd(params, im_data, im_info, im_cls_lb, gt_boxes, num_boxes,
               target=False, eta=1.0)
    leaves = [o for o in jax.tree_util.tree_leaves(outs) if isinstance(o, jax.Array)]
    jax.block_until_ready(leaves)
    print("KERNEL_OK")
</pallas_src>

<mosaic_0001>
module attributes {stable_mosaic.version = 11 : i64} {
  func.func @_linear_kernel(%arg0: i32, %arg1: memref<512x27xbf16, #tpu.memory_space<vmem>>, %arg2: memref<27x32xbf16, #tpu.memory_space<vmem>>, %arg3: memref<1x32xf32, #tpu.memory_space<vmem>>, %arg4: memref<512x32xbf16, #tpu.memory_space<vmem>>) attributes {dimension_semantics = [#tpu.dimension_semantics<parallel>], iteration_bounds = array<i64: 2>, scalar_prefetch = 0 : i64, scratch_operands = 0 : i64, tpu.core_type = #tpu.core_type<tc>, window_params = [{transform_indices = @transform_0, window_bounds = array<i64: 512, 27>}, {pipeline_mode = #tpu.pipeline_mode<synchronous>, transform_indices = @transform_1, window_bounds = array<i64: 27, 32>}, {pipeline_mode = #tpu.pipeline_mode<synchronous>, transform_indices = @transform_2, window_bounds = array<i64: 1, 32>}, {transform_indices = @transform_3, window_bounds = array<i64: 512, 32>}]} {
    %c0 = arith.constant 0 : index
    %c0_0 = arith.constant 0 : index
    %0 = vector.load %arg1[%c0, %c0_0] : memref<512x27xbf16, #tpu.memory_space<vmem>>, vector<512x27xbf16>
    %c0_1 = arith.constant 0 : index
    %c0_2 = arith.constant 0 : index
    %1 = vector.load %arg2[%c0_1, %c0_2] : memref<27x32xbf16, #tpu.memory_space<vmem>>, vector<27x32xbf16>
    %cst = arith.constant dense<0.000000e+00> : vector<512x32xf32>
    %2 = tpu.matmul %0, %1, %cst {dimension_numbers = #tpu.dot_dimension_numbers<[1], [0], [0], [1], [0, 0, 1, 1], [], []>} : vector<512x27xbf16>, vector<27x32xbf16>, vector<512x32xf32> -> vector<512x32xf32>
    %c0_3 = arith.constant 0 : index
    %c0_4 = arith.constant 0 : index
    %3 = vector.load %arg3[%c0_3, %c0_4] : memref<1x32xf32, #tpu.memory_space<vmem>>, vector<1x32xf32>
    %4 = vector.broadcast %3 : vector<1x32xf32> to vector<512x32xf32>
    %5 = arith.addf %2, %4 : vector<512x32xf32>
    %cst_5 = arith.constant 0.000000e+00 : f32
    %6 = vector.broadcast %cst_5 : f32 to vector<512x32xf32>
    %7 = arith.maximumf %5, %6 : vector<512x32xf32>
    %8 = arith.truncf %7 : vector<512x32xf32> to vector<512x32xbf16>
    %c0_6 = arith.constant 0 : index
    %c0_7 = arith.constant 0 : index
    %9 = vector.load %arg4[%c0_6, %c0_7] : memref<512x32xbf16, #tpu.memory_space<vmem>>, vector<512x32xbf16>
    tpu.vector_store %arg4[%c0_6, %c0_7], %8 {strides = array<i32>} : memref<512x32xbf16, #tpu.memory_space<vmem>>, vector<512x32xbf16>,
    return
  }
  func.func @transform_0(%arg0: i32) -> (i32, i32) {
    %c0_i32 = arith.constant 0 : i32
    %c0_i32_0 = arith.constant 0 : i32
    return %arg0, %c0_i32 : i32, i32
  }
  func.func @transform_1(%arg0: i32) -> (i32, i32) {
    %c0_i32 = arith.constant 0 : i32
    %c0_i32_0 = arith.constant 0 : i32
    %c0_i32_1 = arith.constant 0 : i32
    return %c0_i32, %c0_i32_0 : i32, i32
  }
  func.func @transform_2(%arg0: i32) -> (i32, i32) {
    %c0_i32 = arith.constant 0 : i32
    %c0_i32_0 = arith.constant 0 : i32
    %c0_i32_1 = arith.constant 0 : i32
    return %c0_i32, %c0_i32_0 : i32, i32
  }
  func.func @transform_3(%arg0: i32) -> (i32, i32) {
    %c0_i32 = arith.constant 0 : i32
    %c0_i32_0 = arith.constant 0 : i32
    return %arg0, %c0_i32 : i32, i32
  }
}

module attributes {stable_mosaic.version = 11 : i64} {
  func.func @_linear_kernel(%arg0: i32, %arg1: memref<256x288xbf16, #tpu.memory_space<vmem>>, %arg2: memref<288x32xbf16, #tpu.memory_space<vmem>>, %arg3: memref<1x32xf32, #tpu.memory_space<vmem>>, %arg4: memref<256x32xbf16, #tpu.memory_space<vmem>>) attributes {dimension_semantics = [#tpu.dimension_semantics<parallel>], iteration_bounds = array<i64: 1>, scalar_prefetch = 0 : i64, scratch_operands = 0 : i64, tpu.core_type = #tpu.core_type<tc>, window_params = [{transform_indices = @transform_0, window_bounds = array<i64: 256, 288>}, {pipeline_mode = #tpu.pipeline_mode<synchronous>, transform_indices = @transform_1, window_bounds = array<i64: 288, 32>}, {pipeline_mode = #tpu.pipeline_mode<synchronous>, transform_indices = @transform_2, window_bounds = array<i64: 1, 32>}, {transform_indices = @transform_3, window_bounds = array<i64: 256, 32>}]} {
    %c0 = arith.constant 0 : index
    %c0_0 = arith.constant 0 : index
    %0 = vector.load %arg1[%c0, %c0_0] : memref<256x288xbf16, #tpu.memory_space<vmem>>, vector<256x288xbf16>
    %c0_1 = arith.constant 0 : index
    %c0_2 = arith.constant 0 : index
    %1 = vector.load %arg2[%c0_1, %c0_2] : memref<288x32xbf16, #tpu.memory_space<vmem>>, vector<288x32xbf16>
    %cst = arith.constant dense<0.000000e+00> : vector<256x32xf32>
    %2 = tpu.matmul %0, %1, %cst {dimension_numbers = #tpu.dot_dimension_numbers<[1], [0], [0], [1], [0, 0, 1, 1], [], []>} : vector<256x288xbf16>, vector<288x32xbf16>, vector<256x32xf32> -> vector<256x32xf32>
    %c0_3 = arith.constant 0 : index
    %c0_4 = arith.constant 0 : index
    %3 = vector.load %arg3[%c0_3, %c0_4] : memref<1x32xf32, #tpu.memory_space<vmem>>, vector<1x32xf32>
    %4 = vector.broadcast %3 : vector<1x32xf32> to vector<256x32xf32>
    %5 = arith.addf %2, %4 : vector<256x32xf32>
    %cst_5 = arith.constant 0.000000e+00 : f32
    %6 = vector.broadcast %cst_5 : f32 to vector<256x32xf32>
    %7 = arith.maximumf %5, %6 : vector<256x32xf32>
    %8 = arith.truncf %7 : vector<256x32xf32> to vector<256x32xbf16>
    %c0_6 = arith.constant 0 : index
    %c0_7 = arith.constant 0 : index
    %9 = vector.load %arg4[%c0_6, %c0_7] : memref<256x32xbf16, #tpu.memory_space<vmem>>, vector<256x32xbf16>
    tpu.vector_store %arg4[%c0_6, %c0_7], %8 {strides = array<i32>} : memref<256x32xbf16, #tpu.memory_space<vmem>>, vector<256x32xbf16>,
    return
  }
  func.func @transform_0(%arg0: i32) -> (i32, i32) {
    %c0_i32 = arith.constant 0 : i32
    %c0_i32_0 = arith.constant 0 : i32
    return %arg0, %c0_i32 : i32, i32
  }
  func.func @transform_1(%arg0: i32) -> (i32, i32) {
    %c0_i32 = arith.constant 0 : i32
    %c0_i32_0 = arith.constant 0 : i32
    %c0_i32_1 = arith.constant 0 : i32
    return %c0_i32, %c0_i32_0 : i32, i32
  }
  func.func @transform_2(%arg0: i32) -> (i32, i32) {
    %c0_i32 = arith.constant 0 : i32
    %c0_i32_0 = arith.constant 0 : i32
    %c0_i32_1 = arith.constant 0 : i32
    return %c0_i32, %c0_i32_0 : i32, i32
  }
  func.func @transform_3(%arg0: i32) -> (i32, i32) {
    %c0_i32 = arith.constant 0 : i32
    %c0_i32_0 = arith.constant 0 : i32
    return %arg0, %c0_i32 : i32, i32
  }
}

module attributes {stable_mosaic.version = 11 : i64} {
  func.func @_linear_kernel(%arg0: i32, %arg1: memref<64x288xbf16, #tpu.memory_space<vmem>>, %arg2: memref<288x64xbf16, #tpu.memory_space<vmem>>, %arg3: memref<1x64xf32, #tpu.memory_space<vmem>>, %arg4: memref<64x64xbf16, #tpu.memory_space<vmem>>) attributes {dimension_semantics = [#tpu.dimension_semantics<parallel>], iteration_bounds = array<i64: 1>, scalar_prefetch = 0 : i64, scratch_operands = 0 : i64, tpu.core_type = #tpu.core_type<tc>, window_params = [{transform_indices = @transform_0, window_bounds = array<i64: 64, 288>}, {pipeline_mode = #tpu.pipeline_mode<synchronous>, transform_indices = @transform_1, window_bounds = array<i64: 288, 64>}, {pipeline_mode = #tpu.pipeline_mode<synchronous>, transform_indices = @transform_2, window_bounds = array<i64: 1, 64>}, {transform_indices = @transform_3, window_bounds = array<i64: 64, 64>}]} {
    %c0 = arith.constant 0 : index
    %c0_0 = arith.constant 0 : index
    %0 = vector.load %arg1[%c0, %c0_0] : memref<64x288xbf16, #tpu.memory_space<vmem>>, vector<64x288xbf16>
    %c0_1 = arith.constant 0 : index
    %c0_2 = arith.constant 0 : index
    %1 = vector.load %arg2[%c0_1, %c0_2] : memref<288x64xbf16, #tpu.memory_space<vmem>>, vector<288x64xbf16>
    %cst = arith.constant dense<0.000000e+00> : vector<64x64xf32>
    %2 = tpu.matmul %0, %1, %cst {dimension_numbers = #tpu.dot_dimension_numbers<[1], [0], [0], [1], [0, 0, 1, 1], [], []>} : vector<64x288xbf16>, vector<288x64xbf16>, vector<64x64xf32> -> vector<64x64xf32>
    %c0_3 = arith.constant 0 : index
    %c0_4 = arith.constant 0 : index
    %3 = vector.load %arg3[%c0_3, %c0_4] : memref<1x64xf32, #tpu.memory_space<vmem>>, vector<1x64xf32>
    %4 = vector.broadcast %3 : vector<1x64xf32> to vector<64x64xf32>
    %5 = arith.addf %2, %4 : vector<64x64xf32>
    %cst_5 = arith.constant 0.000000e+00 : f32
    %6 = vector.broadcast %cst_5 : f32 to vector<64x64xf32>
    %7 = arith.maximumf %5, %6 : vector<64x64xf32>
    %8 = arith.truncf %7 : vector<64x64xf32> to vector<64x64xbf16>
    %c0_6 = arith.constant 0 : index
    %c0_7 = arith.constant 0 : index
    %9 = vector.load %arg4[%c0_6, %c0_7] : memref<64x64xbf16, #tpu.memory_space<vmem>>, vector<64x64xbf16>
    tpu.vector_store %arg4[%c0_6, %c0_7], %8 {strides = array<i32>} : memref<64x64xbf16, #tpu.memory_space<vmem>>, vector<64x64xbf16>,
    return
  }
  func.func @transform_0(%arg0: i32) -> (i32, i32) {
    %c0_i32 = arith.constant 0 : i32
    %c0_i32_0 = arith.constant 0 : i32
    return %arg0, %c0_i32 : i32, i32
  }
  func.func @transform_1(%arg0: i32) -> (i32, i32) {
    %c0_i32 = arith.constant 0 : i32
    %c0_i32_0 = arith.constant 0 : i32
    %c0_i32_1 = arith.constant 0 : i32
    return %c0_i32, %c0_i32_0 : i32, i32
  }
  func.func @transform_2(%arg0: i32) -> (i32, i32) {
    %c0_i32 = arith.constant 0 : i32
    %c0_i32_0 = arith.constant 0 : i32
    %c0_i32_1 = arith.constant 0 : i32
    return %c0_i32, %c0_i32_0 : i32, i32
  }
  func.func @transform_3(%arg0: i32) -> (i32, i32) {
    %c0_i32 = arith.constant 0 : i32
    %c0_i32_0 = arith.constant 0 : i32
    return %arg0, %c0_i32 : i32, i32
  }
}

module attributes {stable_mosaic.version = 11 : i64} {
  func.func @_linear_kernel(%arg0: i32, %arg1: memref<16x576xbf16, #tpu.memory_space<vmem>>, %arg2: memref<576x64xbf16, #tpu.memory_space<vmem>>, %arg3: memref<1x64xf32, #tpu.memory_space<vmem>>, %arg4: memref<16x64xbf16, #tpu.memory_space<vmem>>) attributes {dimension_semantics = [#tpu.dimension_semantics<parallel>], iteration_bounds = array<i64: 1>, scalar_prefetch = 0 : i64, scratch_operands = 0 : i64, tpu.core_type = #tpu.core_type<tc>, window_params = [{transform_indices = @transform_0, window_bounds = array<i64: 16, 576>}, {pipeline_mode = #tpu.pipeline_mode<synchronous>, transform_indices = @transform_1, window_bounds = array<i64: 576, 64>}, {pipeline_mode = #tpu.pipeline_mode<synchronous>, transform_indices = @transform_2, window_bounds = array<i64: 1, 64>}, {transform_indices = @transform_3, window_bounds = array<i64: 16, 64>}]} {
    %c0 = arith.constant 0 : index
    %c0_0 = arith.constant 0 : index
    %0 = vector.load %arg1[%c0, %c0_0] : memref<16x576xbf16, #tpu.memory_space<vmem>>, vector<16x576xbf16>
    %c0_1 = arith.constant 0 : index
    %c0_2 = arith.constant 0 : index
    %1 = vector.load %arg2[%c0_1, %c0_2] : memref<576x64xbf16, #tpu.memory_space<vmem>>, vector<576x64xbf16>
    %cst = arith.constant dense<0.000000e+00> : vector<16x64xf32>
    %2 = tpu.matmul %0, %1, %cst {dimension_numbers = #tpu.dot_dimension_numbers<[1], [0], [0], [1], [0, 0, 1, 1], [], []>} : vector<16x576xbf16>, vector<576x64xbf16>, vector<16x64xf32> -> vector<16x64xf32>
    %c0_3 = arith.constant 0 : index
    %c0_4 = arith.constant 0 : index
    %3 = vector.load %arg3[%c0_3, %c0_4] : memref<1x64xf32, #tpu.memory_space<vmem>>, vector<1x64xf32>
    %4 = vector.broadcast %3 : vector<1x64xf32> to vector<16x64xf32>
    %5 = arith.addf %2, %4 : vector<16x64xf32>
    %cst_5 = arith.constant 0.000000e+00 : f32
    %6 = vector.broadcast %cst_5 : f32 to vector<16x64xf32>
    %7 = arith.maximumf %5, %6 : vector<16x64xf32>
    %8 = arith.truncf %7 : vector<16x64xf32> to vector<16x64xbf16>
    %c0_6 = arith.constant 0 : index
    %c0_7 = arith.constant 0 : index
    %9 = vector.load %arg4[%c0_6, %c0_7] : memref<16x64xbf16, #tpu.memory_space<vmem>>, vector<16x64xbf16>
    tpu.vector_store %arg4[%c0_6, %c0_7], %8 {strides = array<i32>} : memref<16x64xbf16, #tpu.memory_space<vmem>>, vector<16x64xbf16>,
    return
  }
  func.func @transform_0(%arg0: i32) -> (i32, i32) {
    %c0_i32 = arith.constant 0 : i32
    %c0_i32_0 = arith.constant 0 : i32
    return %arg0, %c0_i32 : i32, i32
  }
  func.func @transform_1(%arg0: i32) -> (i32, i32) {
    %c0_i32 = arith.constant 0 : i32
    %c0_i32_0 = arith.constant 0 : i32
    %c0_i32_1 = arith.constant 0 : i32
    return %c0_i32, %c0_i32_0 : i32, i32
  }
  func.func @transform_2(%arg0: i32) -> (i32, i32) {
    %c0_i32 = arith.constant 0 : i32
    %c0_i32_0 = arith.constant 0 : i32
    %c0_i32_1 = arith.constant 0 : i32
    return %c0_i32, %c0_i32_0 : i32, i32
  }
  func.func @transform_3(%arg0: i32) -> (i32, i32) {
    %c0_i32 = arith.constant 0 : i32
    %c0_i32_0 = arith.constant 0 : i32
    return %arg0, %c0_i32 : i32, i32
  }
}

module attributes {stable_mosaic.version = 11 : i64} {
  func.func @_netd_pixel_kernel(%arg0: i32, %arg1: memref<256x32xbf16, #tpu.memory_space<vmem>>, %arg2: memref<32x128xbf16, #tpu.memory_space<vmem>>, %arg3: memref<1x128xf32, #tpu.memory_space<vmem>>, %arg4: memref<128x128xbf16, #tpu.memory_space<vmem>>, %arg5: memref<1x128xf32, #tpu.memory_space<vmem>>, %arg6: memref<1x128xbf16, #tpu.memory_space<vmem>>, %arg7: memref<1x1xf32, #tpu.memory_space<vmem>>, %arg8: memref<1x256xf32, #tpu.memory_space<vmem>>, %arg9: memref<1x128xf32, #tpu.memory_space<vmem>>, %arg10: memref<1x128xf32, #tpu.memory_space<vmem>>) attributes {dimension_semantics = [#tpu.dimension_semantics<arbitrary>], iteration_bounds = array<i64: 1>, scalar_prefetch = 0 : i64, scratch_operands = 1 : i64, tpu.core_type = #tpu.core_type<tc>, window_params = [{transform_indices = @transform_0, window_bounds = array<i64: 256, 32>}, {pipeline_mode = #tpu.pipeline_mode<synchronous>, transform_indices = @transform_1, window_bounds = array<i64: 32, 128>}, {pipeline_mode = #tpu.pipeline_mode<synchronous>, transform_indices = @transform_2, window_bounds = array<i64: 1, 128>}, {pipeline_mode = #tpu.pipeline_mode<synchronous>, transform_indices = @transform_3, window_bounds = array<i64: 128, 128>}, {pipeline_mode = #tpu.pipeline_mode<synchronous>, transform_indices = @transform_4, window_bounds = array<i64: 1, 128>}, {pipeline_mode = #tpu.pipeline_mode<synchronous>, transform_indices = @transform_5, window_bounds = array<i64: 1, 128>}, {pipeline_mode = #tpu.pipeline_mode<synchronous>, transform_indices = @transform_6, window_bounds = array<i64: 1, 1>}, {transform_indices = @transform_7, window_bounds = array<i64: 1, 256>}, {pipeline_mode = #tpu.pipeline_mode<synchronous>, transform_indices = @transform_8, window_bounds = array<i64: 1, 128>}]} {
    %c0_i32 = arith.constant 0 : i32
    %0 = arith.cmpi eq, %arg0, %c0_i32 : i32
    %1 = arith.extui %0 : i1 to i32
    %c0_i32_0 = arith.constant 0 : i32
    %2 = arith.cmpi ne, %1, %c0_i32_0 : i32
    scf.if %2 {
      %cst_29 = arith.constant 0.000000e+00 : f32
      %40 = vector.broadcast %cst_29 : f32 to vector<1x128xf32>
      %c0_30 = arith.constant 0 : index
      %c0_31 = arith.constant 0 : index
      %41 = vector.load %arg10[%c0_30, %c0_31] : memref<1x128xf32, #tpu.memory_space<vmem>>, vector<1x128xf32>
      tpu.vector_store %arg10[%c0_30, %c0_31], %40 {strides = array<i32>} : memref<1x128xf32, #tpu.memory_space<vmem>>, vector<1x128xf32>,
    } else {
    }
    %c0 = arith.constant 0 : index
    %c0_1 = arith.constant 0 : index
    %3 = vector.load %arg1[%c0, %c0_1] : memref<256x32xbf16, #tpu.memory_space<vmem>>, vector<256x32xbf16>
    %c0_2 = arith.constant 0 : index
    %c0_3 = arith.constant 0 : index
    %4 = vector.load %arg2[%c0_2, %c0_3] : memref<32x128xbf16, #tpu.memory_space<vmem>>, vector<32x128xbf16>
    %cst = arith.constant dense<0.000000e+00> : vector<256x128xf32>
    %5 = tpu.matmul %3, %4, %cst {dimension_numbers = #tpu.dot_dimension_numbers<[1], [0], [0], [1], [0, 0, 1, 1], [], []>} : vector<256x32xbf16>, vector<32x128xbf16>, vector<256x128xf32> -> vector<256x128xf32>
    %c0_4 = arith.constant 0 : index
    %c0_5 = arith.constant 0 : index
    %6 = vector.load %arg3[%c0_4, %c0_5] : memref<1x128xf32, #tpu.memory_space<vmem>>, vector<1x128xf32>
    %7 = vector.broadcast %6 : vector<1x128xf32> to vector<256x128xf32>
    %8 = arith.addf %5, %7 : vector<256x128xf32>
    %cst_6 = arith.constant 0.000000e+00 : f32
    %9 = vector.broadcast %cst_6 : f32 to vector<256x128xf32>
    %10 = arith.maximumf %8, %9 : vector<256x128xf32>
    %11 = arith.truncf %10 : vector<256x128xf32> to vector<256x128xbf16>
    %c0_7 = arith.constant 0 : index
    %c0_8 = arith.constant 0 : index
    %12 = vector.load %arg4[%c0_7, %c0_8] : memref<128x128xbf16, #tpu.memory_space<vmem>>, vector<128x128xbf16>
    %cst_9 = arith.constant dense<0.000000e+00> : vector<256x128xf32>
    %13 = tpu.matmul %11, %12, %cst_9 {dimension_numbers = #tpu.dot_dimension_numbers<[1], [0], [0], [1], [0, 0, 1, 1], [], []>} : vector<256x128xbf16>, vector<128x128xbf16>, vector<256x128xf32> -> vector<256x128xf32>
    %c0_10 = arith.constant 0 : index
    %c0_11 = arith.constant 0 : index
    %14 = vector.load %arg5[%c0_10, %c0_11] : memref<1x128xf32, #tpu.memory_space<vmem>>, vector<1x128xf32>
    %15 = vector.broadcast %14 : vector<1x128xf32> to vector<256x128xf32>
    %16 = arith.addf %13, %15 : vector<256x128xf32>
    %cst_12 = arith.constant 0.000000e+00 : f32
    %17 = vector.broadcast %cst_12 : f32 to vector<256x128xf32>
    %18 = arith.maximumf %16, %17 : vector<256x128xf32>
    %c0_13 = arith.constant 0 : index
    %c0_14 = arith.constant 0 : index
    %19 = vector.load %arg10[%c0_13, %c0_14] : memref<1x128xf32, #tpu.memory_space<vmem>>, vector<1x128xf32>
    %cst_15 = arith.constant dense<0.000000e+00> : vector<128xf32>
    %20 = vector.multi_reduction <add>, %18, %cst_15 [0] : vector<256x128xf32> to vector<128xf32>
    %21 = vector.shape_cast %20 : vector<128xf32> to vector<1x128xf32>
    %22 = arith.addf %19, %21 : vector<1x128xf32>
    %c0_16 = arith.constant 0 : index
    %c0_17 = arith.constant 0 : index
    %23 = vector.load %arg10[%c0_16, %c0_17] : memref<1x128xf32, #tpu.memory_space<vmem>>, vector<1x128xf32>
    tpu.vector_store %arg10[%c0_16, %c0_17], %22 {strides = array<i32>} : memref<1x128xf32, #tpu.memory_space<vmem>>, vector<1x128xf32>,
    %c0_18 = arith.constant 0 : index
    %c0_19 = arith.constant 0 : index
    %24 = vector.load %arg6[%c0_18, %c0_19] : memref<1x128xbf16, #tpu.memory_space<vmem>>, vector<1x128xbf16>
    %25 = arith.truncf %18 : vector<256x128xf32> to vector<256x128xbf16>
    %cst_20 = arith.constant dense<0.000000e+00> : vector<1x256xf32>
    %26 = tpu.matmul %24, %25, %cst_20 {dimension_numbers = #tpu.dot_dimension_numbers<[1], [1], [0], [0], [0, 0, 1, 0], [], []>} : vector<1x128xbf16>, vector<256x128xbf16>, vector<1x256xf32> -> vector<1x256xf32>
    %c0_21 = arith.constant 0 : index
    %c0_22 = arith.constant 0 : index
    %27 = vector.load %arg7[%c0_21, %c0_22] : memref<1x1xf32, #tpu.memory_space<vmem>>, vector<1x1xf32>
    %28 = vector.broadcast %27 : vector<1x1xf32> to vector<1x256xf32>
    %29 = arith.addf %26, %28 : vector<1x256xf32>
    %cst_23 = arith.constant 0.000000e+00 : f32
    %30 = vector.broadcast %cst_23 : f32 to vector<1x256xf32>
    %31 = arith.subf %30, %29 : vector<1x256xf32>
    %32 = math.exp %31 : vector<1x256xf32>
    %cst_24 = arith.constant 1.000000e+00 : f32
    %33 = vector.broadcast %cst_24 : f32 to vector<1x256xf32>
    %34 = arith.addf %33, %32 : vector<1x256xf32>
    %35 = tpu.reciprocal %34 {approx = true} : vector<1x256xf32> -> vector<1x256xf32>
    %c0_25 = arith.constant 0 : index
    %c0_26 = arith.constant 0 : index
    %36 = vector.load %arg8[%c0_25, %c0_26] : memref<1x256xf32, #tpu.memory_space<vmem>>, vector<1x256xf32>
    tpu.vector_store %arg8[%c0_25, %c0_26], %35 {strides = array<i32>} : memref<1x256xf32, #tpu.memory_space<vmem>>, vector<1x256xf32>,
    %c0_i32_27 = arith.constant 0 : i32
    %37 = arith.cmpi eq, %arg0, %c0_i32_27 : i32
    %38 = arith.extui %37 : i1 to i32
    %c0_i32_28 = arith.constant 0 : i32
    %39 = arith.cmpi ne, %38, %c0_i32_28 : i32
    scf.if %39 {
      %c0_29 = arith.constant 0 : index
      %c0_30 = arith.constant 0 : index
      %40 = vector.load %arg10[%c0_29, %c0_30] : memref<1x128xf32, #tpu.memory_space<vmem>>, vector<1x128xf32>
      %cst_31 = arith.constant 3.906250e-03 : f32
      %41 = vector.broadcast %cst_31 : f32 to vector<1x128xf32>
      %42 = arith.mulf %40, %41 : vector<1x128xf32>
      %c0_32 = arith.constant 0 : index
      %c0_33 = arith.constant 0 : index
      %43 = vector.load %arg9[%c0_32, %c0_33] : memref<1x128xf32, #tpu.memory_space<vmem>>, vector<1x128xf32>
      tpu.vector_store %arg9[%c0_32, %c0_33], %42 {strides = array<i32>} : memref<1x128xf32, #tpu.memory_space<vmem>>, vector<1x128xf32>,
    } else {
    }
    return
  }
  func.func @transform_0(%arg0: i32) -> (i32, i32) {
    %c0_i32 = arith.constant 0 : i32
    %c0_i32_0 = arith.constant 0 : i32
    return %arg0, %c0_i32 : i32, i32
  }
  func.func @transform_1(%arg0: i32) -> (i32, i32) {
    %c0_i32 = arith.constant 0 : i32
    %c0_i32_0 = arith.constant 0 : i32
    %c0_i32_1 = arith.constant 0 : i32
    return %c0_i32, %c0_i32_0 : i32, i32
  }
  func.func @transform_2(%arg0: i32) -> (i32, i32) {
    %c0_i32 = arith.constant 0 : i32
    %c0_i32_0 = arith.constant 0 : i32
    %c0_i32_1 = arith.constant 0 : i32
    return %c0_i32, %c0_i32_0 : i32, i32
  }
  func.func @transform_3(%arg0: i32) -> (i32, i32) {
    %c0_i32 = arith.constant 0 : i32
    %c0_i32_0 = arith.constant 0 : i32
    %c0_i32_1 = arith.constant 0 : i32
    return %c0_i32, %c0_i32_0 : i32, i32
  }
  func.func @transform_4(%arg0: i32) -> (i32, i32) {
    %c0_i32 = arith.constant 0 : i32
    %c0_i32_0 = arith.constant 0 : i32
    %c0_i32_1 = arith.constant 0 : i32
    return %c0_i32, %c0_i32_0 : i32, i32
  }
  func.func @transform_5(%arg0: i32) -> (i32, i32) {
    %c0_i32 = arith.constant 0 : i32
    %c0_i32_0 = arith.constant 0 : i32
    %c0_i32_1 = arith.constant 0 : i32
    return %c0_i32, %c0_i32_0 : i32, i32
  }
  func.func @transform_6(%arg0: i32) -> (i32, i32) {
    %c0_i32 = arith.constant 0 : i32
    %c0_i32_0 = arith.constant 0 : i32
    %c0_i32_1 = arith.constant 0 : i32
    return %c0_i32, %c0_i32_0 : i32, i32
  }
  func.func @transform_7(%arg0: i32) -> (i32, i32) {
    %c0_i32 = arith.constant 0 : i32
    %c0_i32_0 = arith.constant 0 : i32
    return %c0_i32, %arg0 : i32, i32
  }
  func.func @transform_8(%arg0: i32) -> (i32, i32) {
    %c0_i32 = arith.constant 0 : i32
    %c0_i32_0 = arith.constant 0 : i32
    %c0_i32_1 = arith.constant 0 : i32
    return %c0_i32, %c0_i32_0 : i32, i32
  }
}

module attributes {stable_mosaic.version = 11 : i64} {
  func.func @_base_heads_kernel(%arg0: memref<16x576xbf16, #tpu.memory_space<vmem>>, %arg1: memref<4x576xbf16, #tpu.memory_space<vmem>>, %arg2: memref<16x64xbf16, #tpu.memory_space<vmem>>, %arg3: memref<576x64xbf16, #tpu.memory_space<vmem>>, %arg4: memref<1x64xf32, #tpu.memory_space<vmem>>, %arg5: memref<64x6xbf16, #tpu.memory_space<vmem>>, %arg6: memref<1x6xf32, #tpu.memory_space<vmem>>, %arg7: memref<64x12xbf16, #tpu.memory_space<vmem>>, %arg8: memref<1x12xf32, #tpu.memory_space<vmem>>, %arg9: memref<576x128xbf16, #tpu.memory_space<vmem>>, %arg10: memref<1x128xf32, #tpu.memory_space<vmem>>, %arg11: memref<128x2xbf16, #tpu.memory_space<vmem>>, %arg12: memref<1x2xf32, #tpu.memory_space<vmem>>, %arg13: memref<64x128xbf16, #tpu.memory_space<vmem>>, %arg14: memref<1x128xf32, #tpu.memory_space<vmem>>, %arg15: memref<128x4xbf16, #tpu.memory_space<vmem>>, %arg16: memref<1x4xf32, #tpu.memory_space<vmem>>, %arg17: memref<16x6xf32, #tpu.memory_space<vmem>>, %arg18: memref<16x12xf32, #tpu.memory_space<vmem>>, %arg19: memref<1x2xf32, #tpu.memory_space<vmem>>, %arg20: memref<1x128xf32, #tpu.memory_space<vmem>>, %arg21: memref<1x4xf32, #tpu.memory_space<vmem>>) attributes {dimension_semantics = [], scalar_prefetch = 0 : i64, scratch_operands = 0 : i64, tpu.core_type = #tpu.core_type<tc>} {
    %c0 = arith.constant 0 : index
    %c0_0 = arith.constant 0 : index
    %0 = vector.load %arg0[%c0, %c0_0] : memref<16x576xbf16, #tpu.memory_space<vmem>>, vector<16x576xbf16>
    %c0_1 = arith.constant 0 : index
    %c0_2 = arith.constant 0 : index
    %1 = vector.load %arg3[%c0_1, %c0_2] : memref<576x64xbf16, #tpu.memory_space<vmem>>, vector<576x64xbf16>
    %cst = arith.constant dense<0.000000e+00> : vector<16x64xf32>
    %2 = tpu.matmul %0, %1, %cst {dimension_numbers = #tpu.dot_dimension_numbers<[1], [0], [0], [1], [0, 0, 1, 1], [], []>} : vector<16x576xbf16>, vector<576x64xbf16>, vector<16x64xf32> -> vector<16x64xf32>
    %c0_3 = arith.constant 0 : index
    %c0_4 = arith.constant 0 : index
    %3 = vector.load %arg4[%c0_3, %c0_4] : memref<1x64xf32, #tpu.memory_space<vmem>>, vector<1x64xf32>
    %4 = vector.broadcast %3 : vector<1x64xf32> to vector<16x64xf32>
    %5 = arith.addf %2, %4 : vector<16x64xf32>
    %cst_5 = arith.constant 0.000000e+00 : f32
    %6 = vector.broadcast %cst_5 : f32 to vector<16x64xf32>
    %7 = arith.maximumf %5, %6 : vector<16x64xf32>
    %8 = arith.truncf %7 : vector<16x64xf32> to vector<16x64xbf16>
    %c0_6 = arith.constant 0 : index
    %c0_7 = arith.constant 0 : index
    %9 = vector.load %arg5[%c0_6, %c0_7] : memref<64x6xbf16, #tpu.memory_space<vmem>>, vector<64x6xbf16>
    %cst_8 = arith.constant dense<0.000000e+00> : vector<16x6xf32>
    %10 = tpu.matmul %8, %9, %cst_8 {dimension_numbers = #tpu.dot_dimension_numbers<[1], [0], [0], [1], [0, 0, 1, 1], [], []>} : vector<16x64xbf16>, vector<64x6xbf16>, vector<16x6xf32> -> vector<16x6xf32>
    %c0_9 = arith.constant 0 : index
    %c0_10 = arith.constant 0 : index
    %11 = vector.load %arg6[%c0_9, %c0_10] : memref<1x6xf32, #tpu.memory_space<vmem>>, vector<1x6xf32>
    %12 = vector.broadcast %11 : vector<1x6xf32> to vector<16x6xf32>
    %13 = arith.addf %10, %12 : vector<16x6xf32>
    %c0_11 = arith.constant 0 : index
    %c0_12 = arith.constant 0 : index
    %14 = vector.load %arg17[%c0_11, %c0_12] : memref<16x6xf32, #tpu.memory_space<vmem>>, vector<16x6xf32>
    tpu.vector_store %arg17[%c0_11, %c0_12], %13 {strides = array<i32>} : memref<16x6xf32, #tpu.memory_space<vmem>>, vector<16x6xf32>,
    %c0_13 = arith.constant 0 : index
    %c0_14 = arith.constant 0 : index
    %15 = vector.load %arg7[%c0_13, %c0_14] : memref<64x12xbf16, #tpu.memory_space<vmem>>, vector<64x12xbf16>
    %cst_15 = arith.constant dense<0.000000e+00> : vector<16x12xf32>
    %16 = tpu.matmul %8, %15, %cst_15 {dimension_numbers = #tpu.dot_dimension_numbers<[1], [0], [0], [1], [0, 0, 1, 1], [], []>} : vector<16x64xbf16>, vector<64x12xbf16>, vector<16x12xf32> -> vector<16x12xf32>
    %c0_16 = arith.constant 0 : index
    %c0_17 = arith.constant 0 : index
    %17 = vector.load %arg8[%c0_16, %c0_17] : memref<1x12xf32, #tpu.memory_space<vmem>>, vector<1x12xf32>
    %18 = vector.broadcast %17 : vector<1x12xf32> to vector<16x12xf32>
    %19 = arith.addf %16, %18 : vector<16x12xf32>
    %c0_18 = arith.constant 0 : index
    %c0_19 = arith.constant 0 : index
    %20 = vector.load %arg18[%c0_18, %c0_19] : memref<16x12xf32, #tpu.memory_space<vmem>>, vector<16x12xf32>
    tpu.vector_store %arg18[%c0_18, %c0_19], %19 {strides = array<i32>} : memref<16x12xf32, #tpu.memory_space<vmem>>, vector<16x12xf32>,
    %c0_20 = arith.constant 0 : index
    %c0_21 = arith.constant 0 : index
    %21 = vector.load %arg1[%c0_20, %c0_21] : memref<4x576xbf16, #tpu.memory_space<vmem>>, vector<4x576xbf16>
    %c0_22 = arith.constant 0 : index
    %c0_23 = arith.constant 0 : index
    %22 = vector.load %arg9[%c0_22, %c0_23] : memref<576x128xbf16, #tpu.memory_space<vmem>>, vector<576x128xbf16>
    %cst_24 = arith.constant dense<0.000000e+00> : vector<4x128xf32>
    %23 = tpu.matmul %21, %22, %cst_24 {dimension_numbers = #tpu.dot_dimension_numbers<[1], [0], [0], [1], [0, 0, 1, 1], [], []>} : vector<4x576xbf16>, vector<576x128xbf16>, vector<4x128xf32> -> vector<4x128xf32>
    %c0_25 = arith.constant 0 : index
    %c0_26 = arith.constant 0 : index
    %24 = vector.load %arg10[%c0_25, %c0_26] : memref<1x128xf32, #tpu.memory_space<vmem>>, vector<1x128xf32>
    %25 = vector.broadcast %24 : vector<1x128xf32> to vector<4x128xf32>
    %26 = arith.addf %23, %25 : vector<4x128xf32>
    %cst_27 = arith.constant 0.000000e+00 : f32
    %27 = vector.broadcast %cst_27 : f32 to vector<4x128xf32>
    %28 = arith.maximumf %26, %27 : vector<4x128xf32>
    %cst_28 = arith.constant dense<0.000000e+00> : vector<128xf32>
    %29 = vector.multi_reduction <add>, %28, %cst_28 [0] : vector<4x128xf32> to vector<128xf32>
    %30 = vector.shape_cast %29 : vector<128xf32> to vector<1x128xf32>
    %cst_29 = arith.constant 4.000000e+00 : f32
    %31 = vector.broadcast %cst_29 : f32 to vector<1x128xf32>
    %32 = arith.divf %30, %31 : vector<1x128xf32>
    %c0_30 = arith.constant 0 : index
    %c0_31 = arith.constant 0 : index
    %33 = vector.load %arg20[%c0_30, %c0_31] : memref<1x128xf32, #tpu.memory_space<vmem>>, vector<1x128xf32>
    tpu.vector_store %arg20[%c0_30, %c0_31], %32 {strides = array<i32>} : memref<1x128xf32, #tpu.memory_space<vmem>>, vector<1x128xf32>,
    %34 = arith.truncf %32 : vector<1x128xf32> to vector<1x128xbf16>
    %c0_32 = arith.constant 0 : index
    %c0_33 = arith.constant 0 : index
    %35 = vector.load %arg11[%c0_32, %c0_33] : memref<128x2xbf16, #tpu.memory_space<vmem>>, vector<128x2xbf16>
    %cst_34 = arith.constant dense<0.000000e+00> : vector<1x2xf32>
    %36 = tpu.matmul %34, %35, %cst_34 {dimension_numbers = #tpu.dot_dimension_numbers<[1], [0], [0], [1], [0, 0, 1, 1], [], []>} : vector<1x128xbf16>, vector<128x2xbf16>, vector<1x2xf32> -> vector<1x2xf32>
    %c0_35 = arith.constant 0 : index
    %c0_36 = arith.constant 0 : index
    %37 = vector.load %arg12[%c0_35, %c0_36] : memref<1x2xf32, #tpu.memory_space<vmem>>, vector<1x2xf32>
    %38 = arith.addf %36, %37 : vector<1x2xf32>
    %c0_37 = arith.constant 0 : index
    %c0_38 = arith.constant 0 : index
    %39 = vector.load %arg19[%c0_37, %c0_38] : memref<1x2xf32, #tpu.memory_space<vmem>>, vector<1x2xf32>
    tpu.vector_store %arg19[%c0_37, %c0_38], %38 {strides = array<i32>} : memref<1x2xf32, #tpu.memory_space<vmem>>, vector<1x2xf32>,
    %c0_39 = arith.constant 0 : index
    %c0_40 = arith.constant 0 : index
    %40 = vector.load %arg2[%c0_39, %c0_40] : memref<16x64xbf16, #tpu.memory_space<vmem>>, vector<16x64xbf16>
    %41 = arith.extf %40 : vector<16x64xbf16> to vector<16x64xf32>
    %cst_41 = arith.constant dense<0.000000e+00> : vector<64xf32>
    %42 = vector.multi_reduction <add>, %41, %cst_41 [0] : vector<16x64xf32> to vector<64xf32>
    %43 = vector.shape_cast %42 : vector<64xf32> to vector<1x64xf32>
    %cst_42 = arith.constant 1.600000e+01 : f32
    %44 = vector.broadcast %cst_42 : f32 to vector<1x64xf32>
    %45 = arith.divf %43, %44 : vector<1x64xf32>
    %46 = arith.truncf %45 : vector<1x64xf32> to vector<1x64xbf16>
    %c0_43 = arith.constant 0 : index
    %c0_44 = arith.constant 0 : index
    %47 = vector.load %arg13[%c0_43, %c0_44] : memref<64x128xbf16, #tpu.memory_space<vmem>>, vector<64x128xbf16>
    %cst_45 = arith.constant dense<0.000000e+00> : vector<1x128xf32>
    %48 = tpu.matmul %46, %47, %cst_45 {dimension_numbers = #tpu.dot_dimension_numbers<[1], [0], [0], [1], [0, 0, 1, 1], [], []>} : vector<1x64xbf16>, vector<64x128xbf16>, vector<1x128xf32> -> vector<1x128xf32>
    %c0_46 = arith.constant 0 : index
    %c0_47 = arith.constant 0 : index
    %49 = vector.load %arg14[%c0_46, %c0_47] : memref<1x128xf32, #tpu.memory_space<vmem>>, vector<1x128xf32>
    %50 = arith.addf %48, %49 : vector<1x128xf32>
    %cst_48 = arith.constant 0.000000e+00 : f32
    %51 = vector.broadcast %cst_48 : f32 to vector<1x128xf32>
    %52 = arith.maximumf %50, %51 : vector<1x128xf32>
    %53 = arith.truncf %52 : vector<1x128xf32> to vector<1x128xbf16>
    %c0_49 = arith.constant 0 : index
    %c0_50 = arith.constant 0 : index
    %54 = vector.load %arg15[%c0_49, %c0_50] : memref<128x4xbf16, #tpu.memory_space<vmem>>, vector<128x4xbf16>
    %cst_51 = arith.constant dense<0.000000e+00> : vector<1x4xf32>
    %55 = tpu.matmul %53, %54, %cst_51 {dimension_numbers = #tpu.dot_dimension_numbers<[1], [0], [0], [1], [0, 0, 1, 1], [], []>} : vector<1x128xbf16>, vector<128x4xbf16>, vector<1x4xf32> -> vector<1x4xf32>
    %c0_52 = arith.constant 0 : index
    %c0_53 = arith.constant 0 : index
    %56 = vector.load %arg16[%c0_52, %c0_53] : memref<1x4xf32, #tpu.memory_space<vmem>>, vector<1x4xf32>
    %57 = arith.addf %55, %56 : vector<1x4xf32>
    %cst_54 = arith.constant 0.000000e+00 : f32
    %58 = vector.broadcast %cst_54 : f32 to vector<1x4xf32>
    %59 = arith.subf %58, %57 : vector<1x4xf32>
    %60 = math.exp %59 : vector<1x4xf32>
    %cst_55 = arith.constant 1.000000e+00 : f32
    %61 = vector.broadcast %cst_55 : f32 to vector<1x4xf32>
    %62 = arith.addf %61, %60 : vector<1x4xf32>
    %63 = tpu.reciprocal %62 {approx = true} : vector<1x4xf32> -> vector<1x4xf32>
    %c0_56 = arith.constant 0 : index
    %c0_57 = arith.constant 0 : index
    %64 = vector.load %arg21[%c0_56, %c0_57] : memref<1x4xf32, #tpu.memory_space<vmem>>, vector<1x4xf32>
    tpu.vector_store %arg21[%c0_56, %c0_57], %63 {strides = array<i32>} : memref<1x4xf32, #tpu.memory_space<vmem>>, vector<1x4xf32>,
    return
  }
}

module attributes {stable_mosaic.version = 11 : i64} {
  func.func @_roi_tail_kernel(%arg0: memref<8x3136xbf16, #tpu.memory_space<vmem>>, %arg1: memref<1x256xbf16, #tpu.memory_space<vmem>>, %arg2: memref<3136x256xbf16, #tpu.memory_space<vmem>>, %arg3: memref<1x256xf32, #tpu.memory_space<vmem>>, %arg4: memref<256x256xbf16, #tpu.memory_space<vmem>>, %arg5: memref<1x256xf32, #tpu.memory_space<vmem>>, %arg6: memref<3x256x128xbf16, #tpu.memory_space<vmem>>, %arg7: memref<3x256x128xbf16, #tpu.memory_space<vmem>>, %arg8: memref<3x1x128xf32, #tpu.memory_space<vmem>>, %arg9: memref<3x128x128xbf16, #tpu.memory_space<vmem>>, %arg10: memref<3x1x128xf32, #tpu.memory_space<vmem>>, %arg11: memref<3x128x1xbf16, #tpu.memory_space<vmem>>, %arg12: memref<3x1x1xf32, #tpu.memory_space<vmem>>, %arg13: memref<256x8xbf16, #tpu.memory_space<vmem>>, %arg14: memref<256x8xbf16, #tpu.memory_space<vmem>>, %arg15: memref<1x8xf32, #tpu.memory_space<vmem>>, %arg16: memref<256x32xbf16, #tpu.memory_space<vmem>>, %arg17: memref<256x32xbf16, #tpu.memory_space<vmem>>, %arg18: memref<1x32xf32, #tpu.memory_space<vmem>>, %arg19: memref<8x8xf32, #tpu.memory_space<vmem>>, %arg20: memref<8x32xf32, #tpu.memory_space<vmem>>, %arg21: memref<1x128xf32, #tpu.memory_space<vmem>>, %arg22: memref<1x128xf32, #tpu.memory_space<vmem>>) attributes {dimension_semantics = [], scalar_prefetch = 0 : i64, scratch_operands = 0 : i64, tpu.core_type = #tpu.core_type<tc>} {
    %c0 = arith.constant 0 : index
    %c0_0 = arith.constant 0 : index
    %0 = vector.load %arg0[%c0, %c0_0] : memref<8x3136xbf16, #tpu.memory_space<vmem>>, vector<8x3136xbf16>
    %c0_1 = arith.constant 0 : index
    %c0_2 = arith.constant 0 : index
    %1 = vector.load %arg2[%c0_1, %c0_2] : memref<3136x256xbf16, #tpu.memory_space<vmem>>, vector<3136x256xbf16>
    %cst = arith.constant dense<0.000000e+00> : vector<8x256xf32>
    %2 = tpu.matmul %0, %1, %cst {dimension_numbers = #tpu.dot_dimension_numbers<[1], [0], [0], [1], [0, 0, 1, 1], [], []>} : vector<8x3136xbf16>, vector<3136x256xbf16>, vector<8x256xf32> -> vector<8x256xf32>
    %c0_3 = arith.constant 0 : index
    %c0_4 = arith.constant 0 : index
    %3 = vector.load %arg3[%c0_3, %c0_4] : memref<1x256xf32, #tpu.memory_space<vmem>>, vector<1x256xf32>
    %4 = vector.broadcast %3 : vector<1x256xf32> to vector<8x256xf32>
    %5 = arith.addf %2, %4 : vector<8x256xf32>
    %cst_5 = arith.constant 0.000000e+00 : f32
    %6 = vector.broadcast %cst_5 : f32 to vector<8x256xf32>
    %7 = arith.maximumf %5, %6 : vector<8x256xf32>
    %8 = arith.truncf %7 : vector<8x256xf32> to vector<8x256xbf16>
    %c0_6 = arith.constant 0 : index
    %c0_7 = arith.constant 0 : index
    %9 = vector.load %arg4[%c0_6, %c0_7] : memref<256x256xbf16, #tpu.memory_space<vmem>>, vector<256x256xbf16>
    %cst_8 = arith.constant dense<0.000000e+00> : vector<8x256xf32>
    %10 = tpu.matmul %8, %9, %cst_8 {dimension_numbers = #tpu.dot_dimension_numbers<[1], [0], [0], [1], [0, 0, 1, 1], [], []>} : vector<8x256xbf16>, vector<256x256xbf16>, vector<8x256xf32> -> vector<8x256xf32>
    %c0_9 = arith.constant 0 : index
    %c0_10 = arith.constant 0 : index
    %11 = vector.load %arg5[%c0_9, %c0_10] : memref<1x256xf32, #tpu.memory_space<vmem>>, vector<1x256xf32>
    %12 = vector.broadcast %11 : vector<1x256xf32> to vector<8x256xf32>
    %13 = arith.addf %10, %12 : vector<8x256xf32>
    %cst_11 = arith.constant 0.000000e+00 : f32
    %14 = vector.broadcast %cst_11 : f32 to vector<8x256xf32>
    %15 = arith.maximumf %13, %14 : vector<8x256xf32>
    %16 = arith.truncf %15 : vector<8x256xf32> to vector<8x256xbf16>
    %c0_12 = arith.constant 0 : index
    %c0_13 = arith.constant 0 : index
    %17 = vector.load %arg1[%c0_12, %c0_13] : memref<1x256xbf16, #tpu.memory_space<vmem>>, vector<1x256xbf16>
    %c0_14 = arith.constant 0 : index
    %c0_15 = arith.constant 0 : index
    %c0_16 = arith.constant 0 : index
    %18 = vector.load %arg6[%c0_14, %c0_15, %c0_16] : memref<3x256x128xbf16, #tpu.memory_space<vmem>>, vector<1x256x128xbf16>
    %19 = vector.shape_cast %18 : vector<1x256x128xbf16> to vector<256x128xbf16>
    %cst_17 = arith.constant dense<0.000000e+00> : vector<8x128xf32>
    %20 = tpu.matmul %16, %19, %cst_17 {dimension_numbers = #tpu.dot_dimension_numbers<[1], [0], [0], [1], [0, 0, 1, 1], [], []>} : vector<8x256xbf16>, vector<256x128xbf16>, vector<8x128xf32> -> vector<8x128xf32>
    %c0_18 = arith.constant 0 : index
    %c0_19 = arith.constant 0 : index
    %c0_20 = arith.constant 0 : index
    %21 = vector.load %arg7[%c0_18, %c0_19, %c0_20] : memref<3x256x128xbf16, #tpu.memory_space<vmem>>, vector<1x256x128xbf16>
    %22 = vector.shape_cast %21 : vector<1x256x128xbf16> to vector<256x128xbf16>
    %cst_21 = arith.constant dense<0.000000e+00> : vector<1x128xf32>
    %23 = tpu.matmul %17, %22, %cst_21 {dimension_numbers = #tpu.dot_dimension_numbers<[1], [0], [0], [1], [0, 0, 1, 1], [], []>} : vector<1x256xbf16>, vector<256x128xbf16>, vector<1x128xf32> -> vector<1x128xf32>
    %24 = vector.broadcast %23 : vector<1x128xf32> to vector<8x128xf32>
    %25 = arith.addf %20, %24 : vector<8x128xf32>
    %c0_22 = arith.constant 0 : index
    %c0_23 = arith.constant 0 : index
    %c0_24 = arith.constant 0 : index
    %26 = vector.load %arg8[%c0_22, %c0_23, %c0_24] : memref<3x1x128xf32, #tpu.memory_space<vmem>>, vector<1x1x128xf32>
    %27 = vector.shape_cast %26 : vector<1x1x128xf32> to vector<1x128xf32>
    %28 = vector.broadcast %27 : vector<1x128xf32> to vector<8x128xf32>
    %29 = arith.addf %25, %28 : vector<8x128xf32>
    %cst_25 = arith.constant 0.000000e+00 : f32
    %30 = vector.broadcast %cst_25 : f32 to vector<8x128xf32>
    %31 = arith.maximumf %29, %30 : vector<8x128xf32>
    %32 = arith.truncf %31 : vector<8x128xf32> to vector<8x128xbf16>
    %c0_26 = arith.constant 0 : index
    %c0_27 = arith.constant 0 : index
    %c0_28 = arith.constant 0 : index
    %33 = vector.load %arg9[%c0_26, %c0_27, %c0_28] : memref<3x128x128xbf16, #tpu.memory_space<vmem>>, vector<1x128x128xbf16>
    %34 = vector.shape_cast %33 : vector<1x128x128xbf16> to vector<128x128xbf16>
    %cst_29 = arith.constant dense<0.000000e+00> : vector<8x128xf32>
    %35 = tpu.matmul %32, %34, %cst_29 {dimension_numbers = #tpu.dot_dimension_numbers<[1], [0], [0], [1], [0, 0, 1, 1], [], []>} : vector<8x128xbf16>, vector<128x128xbf16>, vector<8x128xf32> -> vector<8x128xf32>
    %c0_30 = arith.constant 0 : index
    %c0_31 = arith.constant 0 : index
    %c0_32 = arith.constant 0 : index
    %36 = vector.load %arg10[%c0_30, %c0_31, %c0_32] : memref<3x1x128xf32, #tpu.memory_space<vmem>>, vector<1x1x128xf32>
    %37 = vector.shape_cast %36 : vector<1x1x128xf32> to vector<1x128xf32>
    %38 = vector.broadcast %37 : vector<1x128xf32> to vector<8x128xf32>
    %39 = arith.addf %35, %38 : vector<8x128xf32>
    %cst_33 = arith.constant 0.000000e+00 : f32
    %40 = vector.broadcast %cst_33 : f32 to vector<8x128xf32>
    %41 = arith.maximumf %39, %40 : vector<8x128xf32>
    %42 = arith.truncf %41 : vector<8x128xf32> to vector<8x128xbf16>
    %c0_34 = arith.constant 0 : index
    %c0_35 = arith.constant 0 : index
    %c0_36 = arith.constant 0 : index
    %43 = vector.load %arg11[%c0_34, %c0_35, %c0_36] : memref<3x128x1xbf16, #tpu.memory_space<vmem>>, vector<1x128x1xbf16>
    %44 = vector.shape_cast %43 : vector<1x128x1xbf16> to vector<128x1xbf16>
    %cst_37 = arith.constant dense<0.000000e+00> : vector<8x1xf32>
    %45 = tpu.matmul %42, %44, %cst_37 {dimension_numbers = #tpu.dot_dimension_numbers<[1], [0], [0], [1], [0, 0, 1, 1], [], []>} : vector<8x128xbf16>, vector<128x1xbf16>, vector<8x1xf32> -> vector<8x1xf32>
    %c0_38 = arith.constant 0 : index
    %c0_39 = arith.constant 0 : index
    %c0_40 = arith.constant 0 : index
    %46 = vector.load %arg12[%c0_38, %c0_39, %c0_40] : memref<3x1x1xf32, #tpu.memory_space<vmem>>, vector<1x1x1xf32>
    %47 = vector.shape_cast %46 : vector<1x1x1xf32> to vector<1x1xf32>
    %48 = vector.broadcast %47 : vector<1x1xf32> to vector<8x1xf32>
    %49 = arith.addf %45, %48 : vector<8x1xf32>
    %cst_41 = arith.constant 0.000000e+00 : f32
    %50 = vector.broadcast %cst_41 : f32 to vector<8x1xf32>
    %51 = arith.maximumf %49, %50 : vector<8x1xf32>
    %cst_42 = arith.constant 0.000000e+00 : f32
    %52 = vector.broadcast %cst_42 : f32 to vector<8x1xf32>
    %53 = arith.mulf %49, %52 : vector<8x1xf32>
    %54 = arith.subf %51, %53 : vector<8x1xf32>
    %55 = math.absf %49 : vector<8x1xf32>
    %cst_43 = arith.constant 0.000000e+00 : f32
    %56 = vector.broadcast %cst_43 : f32 to vector<8x1xf32>
    %57 = arith.subf %56, %55 : vector<8x1xf32>
    %58 = math.exp %57 : vector<8x1xf32>
    %cst_44 = arith.constant 1.000000e+00 : f32
    %59 = vector.broadcast %cst_44 : f32 to vector<8x1xf32>
    %60 = arith.addf %59, %58 : vector<8x1xf32>
    %61 = math.log %60 : vector<8x1xf32>
    %62 = arith.addf %54, %61 : vector<8x1xf32>
    %63 = vector.shape_cast %62 : vector<8x1xf32> to vector<1x8x1xf32>
    %cst_45 = arith.constant dense<0.000000e+00> : vector<1xf32>
    %64 = vector.multi_reduction <add>, %63, %cst_45 [1, 2] : vector<1x8x1xf32> to vector<1xf32>
    %65 = vector.shape_cast %64 : vector<1xf32> to vector<1x1x1xf32>
    %66 = vector.extract %65[0, 0, 0] : f32 from vector<1x1x1xf32>
    %cst_46 = arith.constant 1.250000e-01 : f32
    %67 = arith.mulf %66, %cst_46 : f32
    %c1 = arith.constant 1 : index
    %c0_47 = arith.constant 0 : index
    %c0_48 = arith.constant 0 : index
    %68 = vector.load %arg6[%c1, %c0_47, %c0_48] : memref<3x256x128xbf16, #tpu.memory_space<vmem>>, vector<1x256x128xbf16>
    %69 = vector.shape_cast %68 : vector<1x256x128xbf16> to vector<256x128xbf16>
    %cst_49 = arith.constant dense<0.000000e+00> : vector<8x128xf32>
    %70 = tpu.matmul %16, %69, %cst_49 {dimension_numbers = #tpu.dot_dimension_numbers<[1], [0], [0], [1], [0, 0, 1, 1], [], []>} : vector<8x256xbf16>, vector<256x128xbf16>, vector<8x128xf32> -> vector<8x128xf32>
    %c1_50 = arith.constant 1 : index
    %c0_51 = arith.constant 0 : index
    %c0_52 = arith.constant 0 : index
    %71 = vector.load %arg7[%c1_50, %c0_51, %c0_52] : memref<3x256x128xbf16, #tpu.memory_space<vmem>>, vector<1x256x128xbf16>
    %72 = vector.shape_cast %71 : vector<1x256x128xbf16> to vector<256x128xbf16>
    %cst_53 = arith.constant dense<0.000000e+00> : vector<1x128xf32>
    %73 = tpu.matmul %17, %72, %cst_53 {dimension_numbers = #tpu.dot_dimension_numbers<[1], [0], [0], [1], [0, 0, 1, 1], [], []>} : vector<1x256xbf16>, vector<256x128xbf16>, vector<1x128xf32> -> vector<1x128xf32>
    %74 = vector.broadcast %73 : vector<1x128xf32> to vector<8x128xf32>
    %75 = arith.addf %70, %74 : vector<8x128xf32>
    %c1_54 = arith.constant 1 : index
    %c0_55 = arith.constant 0 : index
    %c0_56 = arith.constant 0 : index
    %76 = vector.load %arg8[%c1_54, %c0_55, %c0_56] : memref<3x1x128xf32, #tpu.memory_space<vmem>>, vector<1x1x128xf32>
    %77 = vector.shape_cast %76 : vector<1x1x128xf32> to vector<1x128xf32>
    %78 = vector.broadcast %77 : vector<1x128xf32> to vector<8x128xf32>
    %79 = arith.addf %75, %78 : vector<8x128xf32>
    %cst_57 = arith.constant 0.000000e+00 : f32
    %80 = vector.broadcast %cst_57 : f32 to vector<8x128xf32>
    %81 = arith.maximumf %79, %80 : vector<8x128xf32>
    %82 = arith.truncf %81 : vector<8x128xf32> to vector<8x128xbf16>
    %c1_58 = arith.constant 1 : index
    %c0_59 = arith.constant 0 : index
    %c0_60 = arith.constant 0 : index
    %83 = vector.load %arg9[%c1_58, %c0_59, %c0_60] : memref<3x128x128xbf16, #tpu.memory_space<vmem>>, vector<1x128x128xbf16>
    %84 = vector.shape_cast %83 : vector<1x128x128xbf16> to vector<128x128xbf16>
    %cst_61 = arith.constant dense<0.000000e+00> : vector<8x128xf32>
    %85 = tpu.matmul %82, %84, %cst_61 {dimension_numbers = #tpu.dot_dimension_numbers<[1], [0], [0], [1], [0, 0, 1, 1], [], []>} : vector<8x128xbf16>, vector<128x128xbf16>, vector<8x128xf32> -> vector<8x128xf32>
    %c1_62 = arith.constant 1 : index
    %c0_63 = arith.constant 0 : index
    %c0_64 = arith.constant 0 : index
    %86 = vector.load %arg10[%c1_62, %c0_63, %c0_64] : memref<3x1x128xf32, #tpu.memory_space<vmem>>, vector<1x1x128xf32>
    %87 = vector.shape_cast %86 : vector<1x1x128xf32> to vector<1x128xf32>
    %88 = vector.broadcast %87 : vector<1x128xf32> to vector<8x128xf32>
    %89 = arith.addf %85, %88 : vector<8x128xf32>
    %cst_65 = arith.constant 0.000000e+00 : f32
    %90 = vector.broadcast %cst_65 : f32 to vector<8x128xf32>
    %91 = arith.maximumf %89, %90 : vector<8x128xf32>
    %92 = arith.truncf %91 : vector<8x128xf32> to vector<8x128xbf16>
    %c1_66 = arith.constant 1 : index
    %c0_67 = arith.constant 0 : index
    %c0_68 = arith.constant 0 : index
    %93 = vector.load %arg11[%c1_66, %c0_67, %c0_68] : memref<3x128x1xbf16, #tpu.memory_space<vmem>>, vector<1x128x1xbf16>
    %94 = vector.shape_cast %93 : vector<1x128x1xbf16> to vector<128x1xbf16>
    %cst_69 = arith.constant dense<0.000000e+00> : vector<8x1xf32>
    %95 = tpu.matmul %92, %94, %cst_69 {dimension_numbers = #tpu.dot_dimension_numbers<[1], [0], [0], [1], [0, 0, 1, 1], [], []>} : vector<8x128xbf16>, vector<128x1xbf16>, vector<8x1xf32> -> vector<8x1xf32>
    %c1_70 = arith.constant 1 : index
    %c0_71 = arith.constant 0 : index
    %c0_72 = arith.constant 0 : index
    %96 = vector.load %arg12[%c1_70, %c0_71, %c0_72] : memref<3x1x1xf32, #tpu.memory_space<vmem>>, vector<1x1x1xf32>
    %97 = vector.shape_cast %96 : vector<1x1x1xf32> to vector<1x1xf32>
    %98 = vector.broadcast %97 : vector<1x1xf32> to vector<8x1xf32>
    %99 = arith.addf %95, %98 : vector<8x1xf32>
    %cst_73 = arith.constant 0.000000e+00 : f32
    %100 = vector.broadcast %cst_73 : f32 to vector<8x1xf32>
    %101 = arith.maximumf %99, %100 : vector<8x1xf32>
    %cst_74 = arith.constant 0.000000e+00 : f32
    %102 = vector.broadcast %cst_74 : f32 to vector<8x1xf32>
    %103 = arith.mulf %99, %102 : vector<8x1xf32>
    %104 = arith.subf %101, %103 : vector<8x1xf32>
    %105 = math.absf %99 : vector<8x1xf32>
    %cst_75 = arith.constant 0.000000e+00 : f32
    %106 = vector.broadcast %cst_75 : f32 to vector<8x1xf32>
    %107 = arith.subf %106, %105 : vector<8x1xf32>
    %108 = math.exp %107 : vector<8x1xf32>
    %cst_76 = arith.constant 1.000000e+00 : f32
    %109 = vector.broadcast %cst_76 : f32 to vector<8x1xf32>
    %110 = arith.addf %109, %108 : vector<8x1xf32>
    %111 = math.log %110 : vector<8x1xf32>
    %112 = arith.addf %104, %111 : vector<8x1xf32>
    %113 = vector.shape_cast %112 : vector<8x1xf32> to vector<1x8x1xf32>
    %cst_77 = arith.constant dense<0.000000e+00> : vector<1xf32>
    %114 = vector.multi_reduction <add>, %113, %cst_77 [1, 2] : vector<1x8x1xf32> to vector<1xf32>
    %115 = vector.shape_cast %114 : vector<1xf32> to vector<1x1x1xf32>
    %116 = vector.extract %115[0, 0, 0] : f32 from vector<1x1x1xf32>
    %cst_78 = arith.constant 1.250000e-01 : f32
    %117 = arith.mulf %116, %cst_78 : f32
    %c2 = arith.constant 2 : index
    %c0_79 = arith.constant 0 : index
    %c0_80 = arith.constant 0 : index
    %118 = vector.load %arg6[%c2, %c0_79, %c0_80] : memref<3x256x128xbf16, #tpu.memory_space<vmem>>, vector<1x256x128xbf16>
    %119 = vector.shape_cast %118 : vector<1x256x128xbf16> to vector<256x128xbf16>
    %cst_81 = arith.constant dense<0.000000e+00> : vector<8x128xf32>
    %120 = tpu.matmul %16, %119, %cst_81 {dimension_numbers = #tpu.dot_dimension_numbers<[1], [0], [0], [1], [0, 0, 1, 1], [], []>} : vector<8x256xbf16>, vector<256x128xbf16>, vector<8x128xf32> -> vector<8x128xf32>
    %c2_82 = arith.constant 2 : index
    %c0_83 = arith.constant 0 : index
    %c0_84 = arith.constant 0 : index
    %121 = vector.load %arg7[%c2_82, %c0_83, %c0_84] : memref<3x256x128xbf16, #tpu.memory_space<vmem>>, vector<1x256x128xbf16>
    %122 = vector.shape_cast %121 : vector<1x256x128xbf16> to vector<256x128xbf16>
    %cst_85 = arith.constant dense<0.000000e+00> : vector<1x128xf32>
    %123 = tpu.matmul %17, %122, %cst_85 {dimension_numbers = #tpu.dot_dimension_numbers<[1], [0], [0], [1], [0, 0, 1, 1], [], []>} : vector<1x256xbf16>, vector<256x128xbf16>, vector<1x128xf32> -> vector<1x128xf32>
    %124 = vector.broadcast %123 : vector<1x128xf32> to vector<8x128xf32>
    %125 = arith.addf %120, %124 : vector<8x128xf32>
    %c2_86 = arith.constant 2 : index
    %c0_87 = arith.constant 0 : index
    %c0_88 = arith.constant 0 : index
    %126 = vector.load %arg8[%c2_86, %c0_87, %c0_88] : memref<3x1x128xf32, #tpu.memory_space<vmem>>, vector<1x1x128xf32>
    %127 = vector.shape_cast %126 : vector<1x1x128xf32> to vector<1x128xf32>
    %128 = vector.broadcast %127 : vector<1x128xf32> to vector<8x128xf32>
    %129 = arith.addf %125, %128 : vector<8x128xf32>
    %cst_89 = arith.constant 0.000000e+00 : f32
    %130 = vector.broadcast %cst_89 : f32 to vector<8x128xf32>
    %131 = arith.maximumf %129, %130 : vector<8x128xf32>
    %132 = arith.truncf %131 : vector<8x128xf32> to vector<8x128xbf16>
    %c2_90 = arith.constant 2 : index
    %c0_91 = arith.constant 0 : index
    %c0_92 = arith.constant 0 : index
    %133 = vector.load %arg9[%c2_90, %c0_91, %c0_92] : memref<3x128x128xbf16, #tpu.memory_space<vmem>>, vector<1x128x128xbf16>
    %134 = vector.shape_cast %133 : vector<1x128x128xbf16> to vector<128x128xbf16>
    %cst_93 = arith.constant dense<0.000000e+00> : vector<8x128xf32>
    %135 = tpu.matmul %132, %134, %cst_93 {dimension_numbers = #tpu.dot_dimension_numbers<[1], [0], [0], [1], [0, 0, 1, 1], [], []>} : vector<8x128xbf16>, vector<128x128xbf16>, vector<8x128xf32> -> vector<8x128xf32>
    %c2_94 = arith.constant 2 : index
    %c0_95 = arith.constant 0 : index
    %c0_96 = arith.constant 0 : index
    %136 = vector.load %arg10[%c2_94, %c0_95, %c0_96] : memref<3x1x128xf32, #tpu.memory_space<vmem>>, vector<1x1x128xf32>
    %137 = vector.shape_cast %136 : vector<1x1x128xf32> to vector<1x128xf32>
    %138 = vector.broadcast %137 : vector<1x128xf32> to vector<8x128xf32>
    %139 = arith.addf %135, %138 : vector<8x128xf32>
    %cst_97 = arith.constant 0.000000e+00 : f32
    %140 = vector.broadcast %cst_97 : f32 to vector<8x128xf32>
    %141 = arith.maximumf %139, %140 : vector<8x128xf32>
    %142 = arith.truncf %141 : vector<8x128xf32> to vector<8x128xbf16>
    %c2_98 = arith.constant 2 : index
    %c0_99 = arith.constant 0 : index
    %c0_100 = arith.constant 0 : index
    %143 = vector.load %arg11[%c2_98, %c0_99, %c0_100] : memref<3x128x1xbf16, #tpu.memory_space<vmem>>, vector<1x128x1xbf16>
    %144 = vector.shape_cast %143 : vector<1x128x1xbf16> to vector<128x1xbf16>
    %cst_101 = arith.constant dense<0.000000e+00> : vector<8x1xf32>
    %145 = tpu.matmul %142, %144, %cst_101 {dimension_numbers = #tpu.dot_dimension_numbers<[1], [0], [0], [1], [0, 0, 1, 1], [], []>} : vector<8x128xbf16>, vector<128x1xbf16>, vector<8x1xf32> -> vector<8x1xf32>
    %c2_102 = arith.constant 2 : index
    %c0_103 = arith.constant 0 : index
    %c0_104 = arith.constant 0 : index
    %146 = vector.load %arg12[%c2_102, %c0_103, %c0_104] : memref<3x1x1xf32, #tpu.memory_space<vmem>>, vector<1x1x1xf32>
    %147 = vector.shape_cast %146 : vector<1x1x1xf32> to vector<1x1xf32>
    %148 = vector.broadcast %147 : vector<1x1xf32> to vector<8x1xf32>
    %149 = arith.addf %145, %148 : vector<8x1xf32>
    %cst_105 = arith.constant 0.000000e+00 : f32
    %150 = vector.broadcast %cst_105 : f32 to vector<8x1xf32>
    %151 = arith.maximumf %149, %150 : vector<8x1xf32>
    %cst_106 = arith.constant 0.000000e+00 : f32
    %152 = vector.broadcast %cst_106 : f32 to vector<8x1xf32>
    %153 = arith.mulf %149, %152 : vector<8x1xf32>
    %154 = arith.subf %151, %153 : vector<8x1xf32>
    %155 = math.absf %149 : vector<8x1xf32>
    %cst_107 = arith.constant 0.000000e+00 : f32
    %156 = vector.broadcast %cst_107 : f32 to vector<8x1xf32>
    %157 = arith.subf %156, %155 : vector<8x1xf32>
    %158 = math.exp %157 : vector<8x1xf32>
    %cst_108 = arith.constant 1.000000e+00 : f32
    %159 = vector.broadcast %cst_108 : f32 to vector<8x1xf32>
    %160 = arith.addf %159, %158 : vector<8x1xf32>
    %161 = math.log %160 : vector<8x1xf32>
    %162 = arith.addf %154, %161 : vector<8x1xf32>
    %163 = vector.shape_cast %162 : vector<8x1xf32> to vector<1x8x1xf32>
    %cst_109 = arith.constant dense<0.000000e+00> : vector<1xf32>
    %164 = vector.multi_reduction <add>, %163, %cst_109 [1, 2] : vector<1x8x1xf32> to vector<1xf32>
    %165 = vector.shape_cast %164 : vector<1xf32> to vector<1x1x1xf32>
    %166 = vector.extract %165[0, 0, 0] : f32 from vector<1x1x1xf32>
    %cst_110 = arith.constant 1.250000e-01 : f32
    %167 = arith.mulf %166, %cst_110 : f32
    %cst_111 = arith.constant 0.000000e+00 : f32
    %168 = vector.broadcast %cst_111 : f32 to vector<1x128xf32>
    %169 = vector.broadcast %67 : f32 to vector<1x128xf32>
    %170 = arith.addf %168, %169 : vector<1x128xf32>
    %c0_112 = arith.constant 0 : index
    %c0_113 = arith.constant 0 : index
    %171 = vector.load %arg21[%c0_112, %c0_113] : memref<1x128xf32, #tpu.memory_space<vmem>>, vector<1x128xf32>
    tpu.vector_store %arg21[%c0_112, %c0_113], %170 {strides = array<i32>} : memref<1x128xf32, #tpu.memory_space<vmem>>, vector<1x128xf32>,
    %cst_114 = arith.constant 0.000000e+00 : f32
    %172 = vector.broadcast %cst_114 : f32 to vector<1x128xf32>
    %173 = arith.addf %117, %167 : f32
    %174 = vector.broadcast %173 : f32 to vector<1x128xf32>
    %175 = arith.addf %172, %174 : vector<1x128xf32>
    %c0_115 = arith.constant 0 : index
    %c0_116 = arith.constant 0 : index
    %176 = vector.load %arg22[%c0_115, %c0_116] : memref<1x128xf32, #tpu.memory_space<vmem>>, vector<1x128xf32>
    tpu.vector_store %arg22[%c0_115, %c0_116], %175 {strides = array<i32>} : memref<1x128xf32, #tpu.memory_space<vmem>>, vector<1x128xf32>,
    %c0_117 = arith.constant 0 : index
    %c0_118 = arith.constant 0 : index
    %177 = vector.load %arg13[%c0_117, %c0_118] : memref<256x8xbf16, #tpu.memory_space<vmem>>, vector<256x8xbf16>
    %cst_119 = arith.constant dense<0.000000e+00> : vector<8x8xf32>
    %178 = tpu.matmul %16, %177, %cst_119 {dimension_numbers = #tpu.dot_dimension_numbers<[1], [0], [0], [1], [0, 0, 1, 1], [], []>} : vector<8x256xbf16>, vector<256x8xbf16>, vector<8x8xf32> -> vector<8x8xf32>
    %c0_120 = arith.constant 0 : index
    %c0_121 = arith.constant 0 : index
    %179 = vector.load %arg14[%c0_120, %c0_121] : memref<256x8xbf16, #tpu.memory_space<vmem>>, vector<256x8xbf16>
    %cst_122 = arith.constant dense<0.000000e+00> : vector<1x8xf32>
    %180 = tpu.matmul %17, %179, %cst_122 {dimension_numbers = #tpu.dot_dimension_numbers<[1], [0], [0], [1], [0, 0, 1, 1], [], []>} : vector<1x256xbf16>, vector<256x8xbf16>, vector<1x8xf32> -> vector<1x8xf32>
    %181 = vector.broadcast %180 : vector<1x8xf32> to vector<8x8xf32>
    %182 = arith.addf %178, %181 : vector<8x8xf32>
    %c0_123 = arith.constant 0 : index
    %c0_124 = arith.constant 0 : index
    %183 = vector.load %arg15[%c0_123, %c0_124] : memref<1x8xf32, #tpu.memory_space<vmem>>, vector<1x8xf32>
    %184 = vector.broadcast %183 : vector<1x8xf32> to vector<8x8xf32>
    %185 = arith.addf %182, %184 : vector<8x8xf32>
    %cst_125 = arith.constant dense<0xFF800000> : vector<8xf32>
    %186 = vector.multi_reduction <maximumf>, %185, %cst_125 [1] : vector<8x8xf32> to vector<8xf32>
    %187 = vector.shape_cast %186 : vector<8xf32> to vector<8x1xf32>
    %188 = vector.broadcast %187 : vector<8x1xf32> to vector<8x8xf32>
    %189 = arith.subf %185, %188 : vector<8x8xf32>
    %190 = math.exp %189 : vector<8x8xf32>
    %cst_126 = arith.constant dense<0.000000e+00> : vector<8xf32>
    %191 = vector.multi_reduction <add>, %190, %cst_126 [1] : vector<8x8xf32> to vector<8xf32>
    %192 = vector.shape_cast %191 : vector<8xf32> to vector<8x1xf32>
    %193 = tpu.reciprocal %192 {approx = true} : vector<8x1xf32> -> vector<8x1xf32>
    %194 = vector.broadcast %193 : vector<8x1xf32> to vector<8x8xf32>
    %195 = arith.mulf %190, %194 : vector<8x8xf32>
    %c0_127 = arith.constant 0 : index
    %c0_128 = arith.constant 0 : index
    %196 = vector.load %arg19[%c0_127, %c0_128] : memref<8x8xf32, #tpu.memory_space<vmem>>, vector<8x8xf32>
    tpu.vector_store %arg19[%c0_127, %c0_128], %195 {strides = array<i32>} : memref<8x8xf32, #tpu.memory_space<vmem>>, vector<8x8xf32>,
    %c0_129 = arith.constant 0 : index
    %c0_130 = arith.constant 0 : index
    %197 = vector.load %arg16[%c0_129, %c0_130] : memref<256x32xbf16, #tpu.memory_space<vmem>>, vector<256x32xbf16>
    %cst_131 = arith.constant dense<0.000000e+00> : vector<8x32xf32>
    %198 = tpu.matmul %16, %197, %cst_131 {dimension_numbers = #tpu.dot_dimension_numbers<[1], [0], [0], [1], [0, 0, 1, 1], [], []>} : vector<8x256xbf16>, vector<256x32xbf16>, vector<8x32xf32> -> vector<8x32xf32>
    %c0_132 = arith.constant 0 : index
    %c0_133 = arith.constant 0 : index
    %199 = vector.load %arg17[%c0_132, %c0_133] : memref<256x32xbf16, #tpu.memory_space<vmem>>, vector<256x32xbf16>
    %cst_134 = arith.constant dense<0.000000e+00> : vector<1x32xf32>
    %200 = tpu.matmul %17, %199, %cst_134 {dimension_numbers = #tpu.dot_dimension_numbers<[1], [0], [0], [1], [0, 0, 1, 1], [], []>} : vector<1x256xbf16>, vector<256x32xbf16>, vector<1x32xf32> -> vector<1x32xf32>
    %201 = vector.broadcast %200 : vector<1x32xf32> to vector<8x32xf32>
    %202 = arith.addf %198, %201 : vector<8x32xf32>
    %c0_135 = arith.constant 0 : index
    %c0_136 = arith.constant 0 : index
    %203 = vector.load %arg18[%c0_135, %c0_136] : memref<1x32xf32, #tpu.memory_space<vmem>>, vector<1x32xf32>
    %204 = vector.broadcast %203 : vector<1x32xf32> to vector<8x32xf32>
    %205 = arith.addf %202, %204 : vector<8x32xf32>
    %c0_137 = arith.constant 0 : index
    %c0_138 = arith.constant 0 : index
    %206 = vector.load %arg20[%c0_137, %c0_138] : memref<8x32xf32, #tpu.memory_space<vmem>>, vector<8x32xf32>
    tpu.vector_store %arg20[%c0_137, %c0_138], %205 {strides = array<i32>} : memref<8x32xf32, #tpu.memory_space<vmem>>, vector<8x32xf32>,
    return
  }
}

</mosaic_0001>

<bundles_post_ra>
// kernel: forward.7
= control target key start
LH: loop header
LB: loop body
LE: loop exit
PB: predicated region body
PF: predicated region fallthrough
CT: control target
= control target key end

     0   :  { %s1639_s12 = smov 0   ;;  %s1934_s0 = inlined_call_operand.vmem [shape: bf16[1024,27], index: 0, kind: input, shape index: {}]   ;;  %s1935_s1 = inlined_call_operand.vmem [shape: bf16[27,32], index: 1, kind: input, shape index: {}]   ;;  %s1936_s2 = inlined_call_operand.vmem [shape: f32[1,32], index: 2, kind: input, shape index: {}]   ;;  %s1937_s3 = inlined_call_operand.vmem [shape: bf16[1024,32], index: 3, kind: output, shape index: {}]  }
   0x1 LB: > { %s1255_s13 = sadd.s32 4294967295, %s1616_s12   ;;  %p1259_p0 = scmp.ge.s32.totalorder %s1616_s12, 1  ;;  %s1616_s12 = sphi %s1639_s12, %s13_s12  }
   0x2   : > { %p138_p1 = scmp.lt.s32.totalorder %s1616_s12, 3 }
   0x4   : > { %p139_p2 = pnand %p1259_p0, %p138_p1 }
   0x5   : > { %s1260_s16 = sshll.u32 (!%p139_p2), %s1255_s13, 6 }
   0x6   : > { %142 = sbr.rel (%p139_p2) target bundleno = 286 (0x11e), region = 32  ;;  %p163_p3 = scmp.lt.s32.totalorder (!%p139_p2), %s1260_s16, 127 }
   0xb   : > { %v1576_v0 = vld [vmem:[%s1935_s1 + $0x8] sm:$0x3f]   ;;  %vm518_vm0 = vcmask 1044480   ;;  %vm519_vm1 = vcmask 1045504   ;;  %v1618_v1 = vmov 65535   ;;  %v1577_v5 = vld [vmem:[%s1935_s1] sm:$0xff]  }
   0xc   : > { %v520_v2 = vsel %vm518_vm0, 4294967295, %v1618_v1  ;;  %s1939_s16 = smov (!%p163_p3, %s1260_s16), 127  ;;  %vm421_vm2 = vcmask 220160   ;;  %v1730_v38 = vld [vmem:[%s1936_s2] ss:$0 sm:$0xff]  ;;  %vm1134_vm3 = vcmask 257024  }
   0xd   : > { %v521_v3 = vsel %vm519_vm1, %v520_v2, 0  ;;  %s1261_s19 = sshll.u32 %s1939_s16, 2 }
   0xe   : > { %v523_v4 = vand.u32 %v1576_v0, %v521_v3  ;;  %s1661_s22 = scalar_lea.vmem %s1934_s0, %s1261_s19  ;;  %s1741_s27 = scalar_lea.vmem %s1937_s3, %s1261_s19 }
   0xf   : > { %v1578_v6 = vld [vmem:[%s1661_s22] sm:$0xff]   ;;  %v1580_v8 = vld [vmem:[%s1661_s22 + $0x8] sm:$0xff]   ;;  %v1582_v10 = vld [vmem:[%s1661_s22 + $0x10] sm:$0xff]  }
  0x10   : > { %1495 = vmatprep.subr.bf16.mxu0 %v523_v4  ;;  %1563 = vmatprep.subr.bf16.mxu1 %v523_v4  ;;  %v1579_v7 = vld [vmem:[%s1661_s22 + $0x80] sm:$0xff]   ;;  %v1581_v9 = vld [vmem:[%s1661_s22 + $0x88] sm:$0xff]   ;;  %v1583_v11 = vld [vmem:[%s1661_s22 + $0x90] sm:$0xff]  }
  0x11   : > { %1496 = vmatpush3.bf16.msra.mxu0 %v523_v4  ;;  %1565 = vmatpush3.bf16.msra.mxu1 %v523_v4  ;;  %v1584_v12 = vld [vmem:[%s1661_s22 + $0x18] sm:$0xff]   ;;  %v1586_v14 = vld [vmem:[%s1661_s22 + $0x20] sm:$0xff]   ;;  %v1588_v16 = vld [vmem:[%s1661_s22 + $0x28] sm:$0xff]  }
  0x12   : > { %1497 = vmatprep.subr.bf16.mxu0 %v1577_v5  ;;  %1564 = vmatprep.subr.bf16.mxu1 %v1577_v5  ;;  %v1585_v13 = vld [vmem:[%s1661_s22 + $0x98] sm:$0xff]   ;;  %v1587_v15 = vld [vmem:[%s1661_s22 + $0xa0] sm:$0xff]   ;;  %v1589_v17 = vld [vmem:[%s1661_s22 + $0xa8] sm:$0xff]  }
  0x13   : > { %1499 = vmatprep.mubr.msk.bf16.mxu0 %vm421_vm2, %v1578_v6  ;;  %1531 = vmatprep.mubr.msk.bf16.mxu1 %vm421_vm2, %v1579_v7  ;;  %v1590_v18 = vld [vmem:[%s1661_s22 + $0x30] sm:$0xff]   ;;  %v1592_v20 = vld [vmem:[%s1661_s22 + $0x38] sm:$0xff]   ;;  %v1594_v22 = vld [vmem:[%s1661_s22 + $0x40] sm:$0xff]  }
  0x14   : > { %v1591_v19 = vld [vmem:[%s1661_s22 + $0xb0] sm:$0xff]   ;;  %v1593_v21 = vld [vmem:[%s1661_s22 + $0xb8] sm:$0xff]   ;;  %v1595_v23 = vld [vmem:[%s1661_s22 + $0xc0] sm:$0xff]  }
  0x15   : > { %1498 = vmatpush3.bf16.msra.mxu0 %v1577_v5  ;;  %1566 = vmatpush3.bf16.msra.mxu1 %v1577_v5  ;;  %v1596_v24 = vld [vmem:[%s1661_s22 + $0x48] sm:$0xff]   ;;  %v1598_v26 = vld [vmem:[%s1661_s22 + $0x50] sm:$0xff]   ;;  %v1600_v28 = vld [vmem:[%s1661_s22 + $0x58] sm:$0xff]  }
  0x16   : > { %v1597_v25 = vld [vmem:[%s1661_s22 + $0xc8] sm:$0xff]   ;;  %v1599_v27 = vld [vmem:[%s1661_s22 + $0xd0] sm:$0xff]   ;;  %v1601_v29 = vld [vmem:[%s1661_s22 + $0xd8] sm:$0xff]  }
  0x17   : > { %v1602_v30 = vld [vmem:[%s1661_s22 + $0x60] sm:$0xff]   ;;  %v1604_v32 = vld [vmem:[%s1661_s22 + $0x68] sm:$0xff]   ;;  %v1606_v34 = vld [vmem:[%s1661_s22 + $0x70] sm:$0xff]  }
  0x18   : > { %1500 = vmatmul.mubr.msk.bf16.vlgmr.msra.gmra.mxu0 %vm421_vm2, %v1580_v8  ;;  %1532 = vmatmul.mubr.msk.bf16.vlgmr.msra.gmra.mxu1 %vm421_vm2, %v1581_v9  ;;  %v1603_v31 = vld [vmem:[%s1661_s22 + $0xe0] sm:$0xff]   ;;  %v1605_v33 = vld [vmem:[%s1661_s22 + $0xe8] sm:$0xff]   ;;  %v1607_v35 = vld [vmem:[%s1661_s22 + $0xf0] sm:$0xff]  }
  0x19   : > { %1503 = vmatprep.mubr.msk.bf16.mxu0 %vm421_vm2, %v1582_v10  ;;  %1535 = vmatprep.mubr.msk.bf16.mxu1 %vm421_vm2, %v1583_v11  ;;  %v1608_v36 = vld [vmem:[%s1661_s22 + $0x78] sm:$0xff]  }
  0x1a   : > { %v1609_v37 = vld [vmem:[%s1661_s22 + $0xf8] sm:$0xff]  }
  0x20   : > { %1504 = vmatmul.mubr.msk.bf16.gmra.mxu0 %vm421_vm2, %v1584_v12  ;;  %1536 = vmatmul.mubr.msk.bf16.gmra.mxu1 %vm421_vm2, %v1585_v13 }
  0x21   : > { %1507 = vmatprep.mubr.msk.bf16.mxu0 %vm421_vm2, %v1586_v14  ;;  %1539 = vmatprep.mubr.msk.bf16.mxu1 %vm421_vm2, %v1587_v15 }
  0x28   : > { %1508 = vmatmul.mubr.msk.bf16.gmra.mxu0 %vm421_vm2, %v1588_v16  ;;  %1540 = vmatmul.mubr.msk.bf16.gmra.mxu1 %vm421_vm2, %v1589_v17 }
  0x29   : > { %1511 = vmatprep.mubr.msk.bf16.mxu0 %vm421_vm2, %v1590_v18  ;;  %1543 = vmatprep.mubr.msk.bf16.mxu1 %vm421_vm2, %v1591_v19 }
  0x30   : > { %1512 = vmatmul.mubr.msk.bf16.gmra.mxu0 %vm421_vm2, %v1592_v20  ;;  %1544 = vmatmul.mubr.msk.bf16.gmra.mxu1 %vm421_vm2, %v1593_v21 }
  0x31   : > { %1515 = vmatprep.mubr.msk.bf16.mxu0 %vm421_vm2, %v1594_v22  ;;  %1547 = vmatprep.mubr.msk.bf16.mxu1 %vm421_vm2, %v1595_v23 }
  0x38   : > { %1516 = vmatmul.mubr.msk.bf16.gmra.mxu0 %vm421_vm2, %v1596_v24  ;;  %1548 = vmatmul.mubr.msk.bf16.gmra.mxu1 %vm421_vm2, %v1597_v25 }
  0x39   : > { %1519 = vmatprep.mubr.msk.bf16.mxu0 %vm421_vm2, %v1598_v26  ;;  %1551 = vmatprep.mubr.msk.bf16.mxu1 %vm421_vm2, %v1599_v27 }
  0x40   : > { %1520 = vmatmul.mubr.msk.bf16.gmra.mxu0 %vm421_vm2, %v1600_v28  ;;  %1552 = vmatmul.mubr.msk.bf16.gmra.mxu1 %vm421_vm2, %v1601_v29 }
  0x41   : > { %1523 = vmatprep.mubr.msk.bf16.mxu0 %vm421_vm2, %v1602_v30  ;;  %1555 = vmatprep.mubr.msk.bf16.mxu1 %vm421_vm2, %v1603_v31 }
  0x48   : > { %1524 = vmatmul.mubr.msk.bf16.gmra.mxu0 %vm421_vm2, %v1604_v32  ;;  %1556 = vmatmul.mubr.msk.bf16.gmra.mxu1 %vm421_vm2, %v1605_v33 }
  0x49   : > { %1527 = vmatprep.mubr.msk.bf16.mxu0 %vm421_vm2, %v1606_v34  ;;  %1559 = vmatprep.mubr.msk.bf16.mxu1 %vm421_vm2, %v1607_v35 }
  0x50   : > { %1528 = vmatmul.mubr.msk.bf16.gmra.mxu0 %vm421_vm2, %v1608_v36  ;;  %1560 = vmatmul.mubr.msk.bf16.gmra.mxu1 %vm421_vm2, %v1609_v37 }
  0xd8   : > { %v1501_v39 = vpop.f32.mrf.mxu0  ;;  %v1533_v40 = vpop.f32.mrf.mxu1 }
  0xd9   : > { %v568_v41 = vadd.f32 %v1501_v39, %v1730_v38  ;;  %v696_v42 = vadd.f32 %v1533_v40, %v1730_v38 }
  0xda   : > { %v559_v43 = vpop.f32.mrf.mxu0  ;;  %v687_v44 = vpop.f32.mrf.mxu1 }
  0xdb   : > { %v816_v45 = vmax.f32 %v568_v41, 0.0  ;;  %v848_v46 = vmax.f32 %v696_v42, 0.0  ;;  %v560_v47 = vadd.f32 %v1730_v38, %v559_v43  ;;  %v688_v48 = vadd.f32 %v1730_v38, %v687_v44 }
  0xdc   : > { %v1502_v49 = vpop.f32.mrf.mxu0  ;;  %v1534_v50 = vpop.f32.mrf.mxu1 }
  0xdd   : > { %v1399_v51 = vpack.c.bf16 %v816_v45, %v816_v45  ;;  %v1431_v52 = vpack.c.bf16 %v848_v46, %v848_v46  ;;  %v814_v53 = vmax.f32 %v560_v47, 0.0  ;;  %v846_v54 = vmax.f32 %v688_v48, 0.0 }
  0xde   : > { %v571_v55 = vadd.f32 %v1502_v49, %v1730_v38  ;;  %v699_v56 = vadd.f32 %v1534_v50, %v1730_v38  ;;  %v562_v57 = vpop.f32.mrf.mxu0  ;;  %v690_v58 = vpop.f32.mrf.mxu1 }
  0xdf   : > { %1137 = vst.msk [vmem:[%s1741_s27 + $0x8] sm:$0xf] %vm1134_vm3, %v1399_v51  ;;  %1169 = vst.msk [vmem:[%s1741_s27 + $0x88] sm:$0xf] %vm1134_vm3, %v1431_v52  ;;  %v1397_v59 = vpack.c.bf16 %v814_v53, %v814_v53  ;;  %v1429_v60 = vpack.c.bf16 %v846_v54, %v846_v54  ;;  %v563_v61 = vadd.f32 %v1730_v38, %v562_v57 }
  0xe0   : > { %v691_v62 = vadd.f32 %v1730_v38, %v690_v58  ;;  %v817_v63 = vmax.f32 %v571_v55, 0.0  ;;  %v849_v0 = vmax.f32 %v699_v56, 0.0  ;;  %v1505_v1 = vpop.f32.mrf.mxu0  ;;  %v1537_v2 = vpop.f32.mrf.mxu1 }
  0xe1   : > { %1135 = vst.msk [vmem:[%s1741_s27] sm:$0xf] %vm1134_vm3, %v1397_v59  ;;  %1167 = vst.msk [vmem:[%s1741_s27 + $0x80] sm:$0xf] %vm1134_vm3, %v1429_v60  ;;  %v815_v3 = vmax.f32 %v563_v61, 0.0  ;;  %v584_v5 = vadd.f32 %v1505_v1, %v1730_v38  ;;  %v712_v6 = vadd.f32 %v1537_v2, %v1730_v38 }
  0xe2   : > { %v847_v4 = vmax.f32 %v691_v62, 0.0  ;;  %v1400_v7 = vpack.c.bf16 %v817_v63, %v817_v63  ;;  %v1432_v8 = vpack.c.bf16 %v849_v0, %v849_v0  ;;  %v575_v9 = vpop.f32.mrf.mxu0  ;;  %v703_v10 = vpop.f32.mrf.mxu1 }
  0xe3   : > { %v1398_v11 = vpack.c.bf16 %v815_v3, %v815_v3  ;;  %v820_v13 = vmax.f32 %v584_v5, 0.0  ;;  %v852_v14 = vmax.f32 %v712_v6, 0.0  ;;  %v576_v15 = vadd.f32 %v1730_v38, %v575_v9 }
  0xe4   : > { %v1430_v12 = vpack.c.bf16 %v847_v4, %v847_v4  ;;  %1138 = vst.msk [vmem:[%s1741_s27 + $0xc] sm:$0xf] %vm1134_vm3, %v1400_v7  ;;  %1170 = vst.msk [vmem:[%s1741_s27 + $0x8c] sm:$0xf] %vm1134_vm3, %v1432_v8  ;;  %v704_v16 = vadd.f32 %v1730_v38, %v703_v10  ;;  %v1506_v17 = vpop.f32.mrf.mxu0  ;;  %v1538_v18 = vpop.f32.mrf.mxu1 }
  0xe5   : > { %1136 = vst.msk [vmem:[%s1741_s27 + $0x4] sm:$0xf] %vm1134_vm3, %v1398_v11  ;;  %v1403_v19 = vpack.c.bf16 %v820_v13, %v820_v13  ;;  %v1435_v20 = vpack.c.bf16 %v852_v14, %v852_v14  ;;  %v587_v21 = vadd.f32 %v1506_v17, %v1730_v38  ;;  %v715_v22 = vadd.f32 %v1538_v18, %v1730_v38 }
  0xe6   : > { %1168 = vst.msk [vmem:[%s1741_s27 + $0x84] sm:$0xf] %vm1134_vm3, %v1430_v12  ;;  %v818_v23 = vmax.f32 %v576_v15, 0.0  ;;  %v850_v24 = vmax.f32 %v704_v16, 0.0  ;;  %v578_v25 = vpop.f32.mrf.mxu0  ;;  %v706_v26 = vpop.f32.mrf.mxu1 }
  0xe7   : > { %1141 = vst.msk [vmem:[%s1741_s27 + $0x18] sm:$0xf] %vm1134_vm3, %v1403_v19  ;;  %1173 = vst.msk [vmem:[%s1741_s27 + $0x98] sm:$0xf] %vm1134_vm3, %v1435_v20  ;;  %v821_v27 = vmax.f32 %v587_v21, 0.0  ;;  %v853_v28 = vmax.f32 %v715_v22, 0.0  ;;  %v579_v29 = vadd.f32 %v1730_v38, %v578_v25  ;;  %v707_v30 = vadd.f32 %v1730_v38, %v706_v26 }
  0xe8   : > { %v1401_v31 = vpack.c.bf16 %v818_v23, %v818_v23  ;;  %v1433_v32 = vpack.c.bf16 %v850_v24, %v850_v24  ;;  %v1509_v33 = vpop.f32.mrf.mxu0  ;;  %v1541_v34 = vpop.f32.mrf.mxu1 }
  0xe9   : > { %v1404_v35 = vpack.c.bf16 %v821_v27, %v821_v27  ;;  %v1436_v36 = vpack.c.bf16 %v853_v28, %v853_v28  ;;  %v819_v37 = vmax.f32 %v579_v29, 0.0  ;;  %v851_v39 = vmax.f32 %v707_v30, 0.0 }
  0xea   : > { %1139 = vst.msk [vmem:[%s1741_s27 + $0x10] sm:$0xf] %vm1134_vm3, %v1401_v31  ;;  %1171 = vst.msk [vmem:[%s1741_s27 + $0x90] sm:$0xf] %vm1134_vm3, %v1433_v32  ;;  %v600_v40 = vadd.f32 %v1509_v33, %v1730_v38  ;;  %v728_v41 = vadd.f32 %v1541_v34, %v1730_v38  ;;  %v591_v42 = vpop.f32.mrf.mxu0  ;;  %v719_v43 = vpop.f32.mrf.mxu1 }
  0xeb   : > { %1142 = vst.msk [vmem:[%s1741_s27 + $0x1c] sm:$0xf] %vm1134_vm3, %v1404_v35  ;;  %1174 = vst.msk [vmem:[%s1741_s27 + $0x9c] sm:$0xf] %vm1134_vm3, %v1436_v36  ;;  %v1402_v44 = vpack.c.bf16 %v819_v37, %v819_v37  ;;  %v1434_v45 = vpack.c.bf16 %v851_v39, %v851_v39  ;;  %v592_v46 = vadd.f32 %v1730_v38, %v591_v42 }
  0xec   : > { %v720_v47 = vadd.f32 %v1730_v38, %v719_v43  ;;  %v824_v48 = vmax.f32 %v600_v40, 0.0  ;;  %v856_v49 = vmax.f32 %v728_v41, 0.0  ;;  %v1510_v50 = vpop.f32.mrf.mxu0  ;;  %v1542_v51 = vpop.f32.mrf.mxu1 }
  0xed   : > { %1140 = vst.msk [vmem:[%s1741_s27 + $0x14] sm:$0xf] %vm1134_vm3, %v1402_v44  ;;  %1172 = vst.msk [vmem:[%s1741_s27 + $0x94] sm:$0xf] %vm1134_vm3, %v1434_v45  ;;  %v822_v52 = vmax.f32 %v592_v46, 0.0  ;;  %v603_v54 = vadd.f32 %v1510_v50, %v1730_v38  ;;  %v731_v55 = vadd.f32 %v1542_v51, %v1730_v38 }
  0xee   : > { %v854_v53 = vmax.f32 %v720_v47, 0.0  ;;  %v1407_v56 = vpack.c.bf16 %v824_v48, %v824_v48  ;;  %v1439_v57 = vpack.c.bf16 %v856_v49, %v856_v49  ;;  %v594_v58 = vpop.f32.mrf.mxu0  ;;  %v722_v59 = vpop.f32.mrf.mxu1 }
  0xef   : > { %v1405_v60 = vpack.c.bf16 %v822_v52, %v822_v52  ;;  %v825_v62 = vmax.f32 %v603_v54, 0.0  ;;  %v857_v63 = vmax.f32 %v731_v55, 0.0  ;;  %v595_v0 = vadd.f32 %v1730_v38, %v594_v58 }
  0xf0   : > { %v1437_v61 = vpack.c.bf16 %v854_v53, %v854_v53  ;;  %1145 = vst.msk [vmem:[%s1741_s27 + $0x28] sm:$0xf] %vm1134_vm3, %v1407_v56  ;;  %1177 = vst.msk [vmem:[%s1741_s27 + $0xa8] sm:$0xf] %vm1134_vm3, %v1439_v57  ;;  %v723_v1 = vadd.f32 %v1730_v38, %v722_v59  ;;  %v1513_v2 = vpop.f32.mrf.mxu0  ;;  %v1545_v3 = vpop.f32.mrf.mxu1 }
  0xf1   : > { %1143 = vst.msk [vmem:[%s1741_s27 + $0x20] sm:$0xf] %vm1134_vm3, %v1405_v60  ;;  %v1408_v4 = vpack.c.bf16 %v825_v62, %v825_v62  ;;  %v1440_v5 = vpack.c.bf16 %v857_v63, %v857_v63  ;;  %v616_v6 = vadd.f32 %v1513_v2, %v1730_v38  ;;  %v744_v7 = vadd.f32 %v1545_v3, %v1730_v38 }
  0xf2   : > { %1175 = vst.msk [vmem:[%s1741_s27 + $0xa0] sm:$0xf] %vm1134_vm3, %v1437_v61  ;;  %v823_v8 = vmax.f32 %v595_v0, 0.0  ;;  %v855_v9 = vmax.f32 %v723_v1, 0.0  ;;  %v607_v10 = vpop.f32.mrf.mxu0  ;;  %v735_v11 = vpop.f32.mrf.mxu1 }
  0xf3   : > { %1146 = vst.msk [vmem:[%s1741_s27 + $0x2c] sm:$0xf] %vm1134_vm3, %v1408_v4  ;;  %1178 = vst.msk [vmem:[%s1741_s27 + $0xac] sm:$0xf] %vm1134_vm3, %v1440_v5  ;;  %v828_v12 = vmax.f32 %v616_v6, 0.0  ;;  %v860_v13 = vmax.f32 %v744_v7, 0.0  ;;  %v608_v14 = vadd.f32 %v1730_v38, %v607_v10  ;;  %v736_v15 = vadd.f32 %v1730_v38, %v735_v11 }
  0xf4   : > { %v1406_v16 = vpack.c.bf16 %v823_v8, %v823_v8  ;;  %v1438_v17 = vpack.c.bf16 %v855_v9, %v855_v9  ;;  %v1514_v18 = vpop.f32.mrf.mxu0  ;;  %v1546_v19 = vpop.f32.mrf.mxu1 }
  0xf5   : > { %v1411_v20 = vpack.c.bf16 %v828_v12, %v828_v12  ;;  %v1443_v21 = vpack.c.bf16 %v860_v13, %v860_v13  ;;  %v826_v22 = vmax.f32 %v608_v14, 0.0  ;;  %v858_v23 = vmax.f32 %v736_v15, 0.0 }
  0xf6   : > { %1144 = vst.msk [vmem:[%s1741_s27 + $0x24] sm:$0xf] %vm1134_vm3, %v1406_v16  ;;  %1176 = vst.msk [vmem:[%s1741_s27 + $0xa4] sm:$0xf] %vm1134_vm3, %v1438_v17  ;;  %v619_v24 = vadd.f32 %v1514_v18, %v1730_v38  ;;  %v747_v25 = vadd.f32 %v1546_v19, %v1730_v38  ;;  %v610_v26 = vpop.f32.mrf.mxu0  ;;  %v738_v27 = vpop.f32.mrf.mxu1 }
  0xf7   : > { %1149 = vst.msk [vmem:[%s1741_s27 + $0x38] sm:$0xf] %vm1134_vm3, %v1411_v20  ;;  %1181 = vst.msk [vmem:[%s1741_s27 + $0xb8] sm:$0xf] %vm1134_vm3, %v1443_v21  ;;  %v1409_v28 = vpack.c.bf16 %v826_v22, %v826_v22  ;;  %v1441_v29 = vpack.c.bf16 %v858_v23, %v858_v23  ;;  %v611_v30 = vadd.f32 %v1730_v38, %v610_v26 }
  0xf8   : > { %v739_v31 = vadd.f32 %v1730_v38, %v738_v27  ;;  %v829_v32 = vmax.f32 %v619_v24, 0.0  ;;  %v861_v33 = vmax.f32 %v747_v25, 0.0  ;;  %v1517_v34 = vpop.f32.mrf.mxu0  ;;  %v1549_v35 = vpop.f32.mrf.mxu1 }
  0xf9   : > { %1147 = vst.msk [vmem:[%s1741_s27 + $0x30] sm:$0xf] %vm1134_vm3, %v1409_v28  ;;  %1179 = vst.msk [vmem:[%s1741_s27 + $0xb0] sm:$0xf] %vm1134_vm3, %v1441_v29  ;;  %v827_v36 = vmax.f32 %v611_v30, 0.0  ;;  %v632_v39 = vadd.f32 %v1517_v34, %v1730_v38  ;;  %v760_v40 = vadd.f32 %v1549_v35, %v1730_v38 }
  0xfa   : > { %v859_v37 = vmax.f32 %v739_v31, 0.0  ;;  %v1412_v41 = vpack.c.bf16 %v829_v32, %v829_v32  ;;  %v1444_v42 = vpack.c.bf16 %v861_v33, %v861_v33  ;;  %v623_v43 = vpop.f32.mrf.mxu0  ;;  %v751_v44 = vpop.f32.mrf.mxu1 }
  0xfb   : > { %v1410_v45 = vpack.c.bf16 %v827_v36, %v827_v36  ;;  %v832_v47 = vmax.f32 %v632_v39, 0.0  ;;  %v864_v48 = vmax.f32 %v760_v40, 0.0  ;;  %v624_v49 = vadd.f32 %v1730_v38, %v623_v43 }
  0xfc   : > { %v1442_v46 = vpack.c.bf16 %v859_v37, %v859_v37  ;;  %1150 = vst.msk [vmem:[%s1741_s27 + $0x3c] sm:$0xf] %vm1134_vm3, %v1412_v41  ;;  %1182 = vst.msk [vmem:[%s1741_s27 + $0xbc] sm:$0xf] %vm1134_vm3, %v1444_v42  ;;  %v752_v50 = vadd.f32 %v1730_v38, %v751_v44  ;;  %v1518_v51 = vpop.f32.mrf.mxu0  ;;  %v1550_v52 = vpop.f32.mrf.mxu1 }
  0xfd   : > { %1148 = vst.msk [vmem:[%s1741_s27 + $0x34] sm:$0xf] %vm1134_vm3, %v1410_v45  ;;  %v1415_v53 = vpack.c.bf16 %v832_v47, %v832_v47  ;;  %v1447_v54 = vpack.c.bf16 %v864_v48, %v864_v48  ;;  %v635_v55 = vadd.f32 %v1518_v51, %v1730_v38  ;;  %v763_v56 = vadd.f32 %v1550_v52, %v1730_v38 }
  0xfe   : > { %1180 = vst.msk [vmem:[%s1741_s27 + $0xb4] sm:$0xf] %vm1134_vm3, %v1442_v46  ;;  %v830_v57 = vmax.f32 %v624_v49, 0.0  ;;  %v862_v58 = vmax.f32 %v752_v50, 0.0  ;;  %v626_v59 = vpop.f32.mrf.mxu0  ;;  %v754_v60 = vpop.f32.mrf.mxu1 }
  0xff   : > { %1153 = vst.msk [vmem:[%s1741_s27 + $0x48] sm:$0xf] %vm1134_vm3, %v1415_v53  ;;  %1185 = vst.msk [vmem:[%s1741_s27 + $0xc8] sm:$0xf] %vm1134_vm3, %v1447_v54  ;;  %v833_v61 = vmax.f32 %v635_v55, 0.0  ;;  %v865_v62 = vmax.f32 %v763_v56, 0.0  ;;  %v627_v63 = vadd.f32 %v1730_v38, %v626_v59  ;;  %v755_v0 = vadd.f32 %v1730_v38, %v754_v60 }
 0x100   : > { %v1413_v1 = vpack.c.bf16 %v830_v57, %v830_v57  ;;  %v1445_v2 = vpack.c.bf16 %v862_v58, %v862_v58  ;;  %v1521_v3 = vpop.f32.mrf.mxu0  ;;  %v1553_v4 = vpop.f32.mrf.mxu1 }
 0x101   : > { %v1416_v5 = vpack.c.bf16 %v833_v61, %v833_v61  ;;  %v1448_v6 = vpack.c.bf16 %v865_v62, %v865_v62  ;;  %v831_v7 = vmax.f32 %v627_v63, 0.0  ;;  %v863_v8 = vmax.f32 %v755_v0, 0.0 }
 0x102   : > { %1151 = vst.msk [vmem:[%s1741_s27 + $0x40] sm:$0xf] %vm1134_vm3, %v1413_v1  ;;  %1183 = vst.msk [vmem:[%s1741_s27 + $0xc0] sm:$0xf] %vm1134_vm3, %v1445_v2  ;;  %v648_v9 = vadd.f32 %v1521_v3, %v1730_v38  ;;  %v776_v10 = vadd.f32 %v1553_v4, %v1730_v38  ;;  %v639_v11 = vpop.f32.mrf.mxu0  ;;  %v767_v12 = vpop.f32.mrf.mxu1 }
 0x103   : > { %1154 = vst.msk [vmem:[%s1741_s27 + $0x4c] sm:$0xf] %vm1134_vm3, %v1416_v5  ;;  %1186 = vst.msk [vmem:[%s1741_s27 + $0xcc] sm:$0xf] %vm1134_vm3, %v1448_v6  ;;  %v1414_v13 = vpack.c.bf16 %v831_v7, %v831_v7  ;;  %v1446_v14 = vpack.c.bf16 %v863_v8, %v863_v8  ;;  %v640_v15 = vadd.f32 %v1730_v38, %v639_v11 }
 0x104   : > { %v768_v16 = vadd.f32 %v1730_v38, %v767_v12  ;;  %v836_v17 = vmax.f32 %v648_v9, 0.0  ;;  %v868_v18 = vmax.f32 %v776_v10, 0.0  ;;  %v1522_v19 = vpop.f32.mrf.mxu0  ;;  %v1554_v20 = vpop.f32.mrf.mxu1 }
 0x105   : > { %1152 = vst.msk [vmem:[%s1741_s27 + $0x44] sm:$0xf] %vm1134_vm3, %v1414_v13  ;;  %1184 = vst.msk [vmem:[%s1741_s27 + $0xc4] sm:$0xf] %vm1134_vm3, %v1446_v14  ;;  %v834_v21 = vmax.f32 %v640_v15, 0.0  ;;  %v651_v23 = vadd.f32 %v1522_v19, %v1730_v38  ;;  %v779_v24 = vadd.f32 %v1554_v20, %v1730_v38 }
 0x106   : > { %v866_v22 = vmax.f32 %v768_v16, 0.0  ;;  %v1419_v25 = vpack.c.bf16 %v836_v17, %v836_v17  ;;  %v1451_v26 = vpack.c.bf16 %v868_v18, %v868_v18  ;;  %v642_v27 = vpop.f32.mrf.mxu0  ;;  %v770_v28 = vpop.f32.mrf.mxu1 }
 0x107   : > { %v1417_v29 = vpack.c.bf16 %v834_v21, %v834_v21  ;;  %v837_v31 = vmax.f32 %v651_v23, 0.0  ;;  %v869_v32 = vmax.f32 %v779_v24, 0.0  ;;  %v643_v33 = vadd.f32 %v1730_v38, %v642_v27 }
 0x108   : > { %v1449_v30 = vpack.c.bf16 %v866_v22, %v866_v22  ;;  %1157 = vst.msk [vmem:[%s1741_s27 + $0x58] sm:$0xf] %vm1134_vm3, %v1419_v25  ;;  %1189 = vst.msk [vmem:[%s1741_s27 + $0xd8] sm:$0xf] %vm1134_vm3, %v1451_v26  ;;  %v771_v34 = vadd.f32 %v1730_v38, %v770_v28  ;;  %v1525_v35 = vpop.f32.mrf.mxu0  ;;  %v1557_v36 = vpop.f32.mrf.mxu1 }
 0x109   : > { %1155 = vst.msk [vmem:[%s1741_s27 + $0x50] sm:$0xf] %vm1134_vm3, %v1417_v29  ;;  %v1420_v37 = vpack.c.bf16 %v837_v31, %v837_v31  ;;  %v1452_v39 = vpack.c.bf16 %v869_v32, %v869_v32  ;;  %v664_v40 = vadd.f32 %v1525_v35, %v1730_v38  ;;  %v792_v41 = vadd.f32 %v1557_v36, %v1730_v38 }
 0x10a   : > { %1187 = vst.msk [vmem:[%s1741_s27 + $0xd0] sm:$0xf] %vm1134_vm3, %v1449_v30  ;;  %v835_v42 = vmax.f32 %v643_v33, 0.0  ;;  %v867_v43 = vmax.f32 %v771_v34, 0.0  ;;  %v655_v44 = vpop.f32.mrf.mxu0  ;;  %v783_v45 = vpop.f32.mrf.mxu1 }
 0x10b   : > { %1158 = vst.msk [vmem:[%s1741_s27 + $0x5c] sm:$0xf] %vm1134_vm3, %v1420_v37  ;;  %1190 = vst.msk [vmem:[%s1741_s27 + $0xdc] sm:$0xf] %vm1134_vm3, %v1452_v39  ;;  %v840_v46 = vmax.f32 %v664_v40, 0.0  ;;  %v872_v47 = vmax.f32 %v792_v41, 0.0  ;;  %v656_v48 = vadd.f32 %v1730_v38, %v655_v44  ;;  %v784_v49 = vadd.f32 %v1730_v38, %v783_v45 }
 0x10c   : > { %v1418_v50 = vpack.c.bf16 %v835_v42, %v835_v42  ;;  %v1450_v51 = vpack.c.bf16 %v867_v43, %v867_v43  ;;  %v1526_v52 = vpop.f32.mrf.mxu0  ;;  %v1558_v53 = vpop.f32.mrf.mxu1 }
 0x10d   : > { %v1423_v54 = vpack.c.bf16 %v840_v46, %v840_v46  ;;  %v1455_v55 = vpack.c.bf16 %v872_v47, %v872_v47  ;;  %v838_v56 = vmax.f32 %v656_v48, 0.0  ;;  %v870_v57 = vmax.f32 %v784_v49, 0.0 }
 0x10e   : > { %1156 = vst.msk [vmem:[%s1741_s27 + $0x54] sm:$0xf] %vm1134_vm3, %v1418_v50  ;;  %1188 = vst.msk [vmem:[%s1741_s27 + $0xd4] sm:$0xf] %vm1134_vm3, %v1450_v51  ;;  %v667_v58 = vadd.f32 %v1526_v52, %v1730_v38  ;;  %v795_v59 = vadd.f32 %v1558_v53, %v1730_v38  ;;  %v658_v60 = vpop.f32.mrf.mxu0  ;;  %v786_v61 = vpop.f32.mrf.mxu1 }
 0x10f   : > { %1161 = vst.msk [vmem:[%s1741_s27 + $0x68] sm:$0xf] %vm1134_vm3, %v1423_v54  ;;  %1193 = vst.msk [vmem:[%s1741_s27 + $0xe8] sm:$0xf] %vm1134_vm3, %v1455_v55  ;;  %v1421_v62 = vpack.c.bf16 %v838_v56, %v838_v56  ;;  %v1453_v63 = vpack.c.bf16 %v870_v57, %v870_v57  ;;  %v659_v0 = vadd.f32 %v1730_v38, %v658_v60 }
 0x110   : > { %v787_v1 = vadd.f32 %v1730_v38, %v786_v61  ;;  %v841_v2 = vmax.f32 %v667_v58, 0.0  ;;  %v873_v3 = vmax.f32 %v795_v59, 0.0  ;;  %v1529_v4 = vpop.f32.mrf.mxu0  ;;  %v1561_v5 = vpop.f32.mrf.mxu1 }
 0x111   : > { %1159 = vst.msk [vmem:[%s1741_s27 + $0x60] sm:$0xf] %vm1134_vm3, %v1421_v62  ;;  %1191 = vst.msk [vmem:[%s1741_s27 + $0xe0] sm:$0xf] %vm1134_vm3, %v1453_v63  ;;  %v839_v6 = vmax.f32 %v659_v0, 0.0  ;;  %v680_v8 = vadd.f32 %v1529_v4, %v1730_v38  ;;  %v808_v9 = vadd.f32 %v1561_v5, %v1730_v38 }
 0x112   : > { %v871_v7 = vmax.f32 %v787_v1, 0.0  ;;  %v1424_v10 = vpack.c.bf16 %v841_v2, %v841_v2  ;;  %v1456_v11 = vpack.c.bf16 %v873_v3, %v873_v3  ;;  %v671_v12 = vpop.f32.mrf.mxu0  ;;  %v799_v13 = vpop.f32.mrf.mxu1 }
 0x113   : > { %v1422_v14 = vpack.c.bf16 %v839_v6, %v839_v6  ;;  %v844_v16 = vmax.f32 %v680_v8, 0.0  ;;  %v876_v17 = vmax.f32 %v808_v9, 0.0  ;;  %v672_v18 = vadd.f32 %v1730_v38, %v671_v12 }
 0x114   : > { %v1454_v15 = vpack.c.bf16 %v871_v7, %v871_v7  ;;  %1162 = vst.msk [vmem:[%s1741_s27 + $0x6c] sm:$0xf] %vm1134_vm3, %v1424_v10  ;;  %1194 = vst.msk [vmem:[%s1741_s27 + $0xec] sm:$0xf] %vm1134_vm3, %v1456_v11  ;;  %v800_v19 = vadd.f32 %v1730_v38, %v799_v13  ;;  %v1530_v20 = vpop.f32.mrf.mxu0  ;;  %v1562_v21 = vpop.f32.mrf.mxu1 }
 0x115   : > { %1160 = vst.msk [vmem:[%s1741_s27 + $0x64] sm:$0xf] %vm1134_vm3, %v1422_v14  ;;  %v1427_v22 = vpack.c.bf16 %v844_v16, %v844_v16  ;;  %v1459_v23 = vpack.c.bf16 %v876_v17, %v876_v17  ;;  %v683_v24 = vadd.f32 %v1530_v20, %v1730_v38  ;;  %v811_v25 = vadd.f32 %v1562_v21, %v1730_v38 }
 0x116   : > { %1192 = vst.msk [vmem:[%s1741_s27 + $0xe4] sm:$0xf] %vm1134_vm3, %v1454_v15  ;;  %v842_v26 = vmax.f32 %v672_v18, 0.0  ;;  %v874_v27 = vmax.f32 %v800_v19, 0.0  ;;  %v674_v28 = vpop.f32.mrf.mxu0  ;;  %v802_v29 = vpop.f32.mrf.mxu1 }
 0x117   : > { %1165 = vst.msk [vmem:[%s1741_s27 + $0x78] sm:$0xf] %vm1134_vm3, %v1427_v22  ;;  %1197 = vst.msk [vmem:[%s1741_s27 + $0xf8] sm:$0xf] %vm1134_vm3, %v1459_v23  ;;  %v845_v30 = vmax.f32 %v683_v24, 0.0  ;;  %v877_v31 = vmax.f32 %v811_v25, 0.0  ;;  %v675_v32 = vadd.f32 %v1730_v38, %v674_v28  ;;  %v803_v33 = vadd.f32 %v1730_v38, %v802_v29 }
 0x118   : > { %v1425_v34 = vpack.c.bf16 %v842_v26, %v842_v26  ;;  %v1457_v35 = vpack.c.bf16 %v874_v27, %v874_v27 }
 0x119   : > { %v1428_v36 = vpack.c.bf16 %v845_v30, %v845_v30  ;;  %v1460_v37 = vpack.c.bf16 %v877_v31, %v877_v31  ;;  %v843_v39 = vmax.f32 %v675_v32, 0.0  ;;  %v875_v40 = vmax.f32 %v803_v33, 0.0 }
 0x11a   : > { %1163 = vst.msk [vmem:[%s1741_s27 + $0x70] sm:$0xf] %vm1134_vm3, %v1425_v34  ;;  %1195 = vst.msk [vmem:[%s1741_s27 + $0xf0] sm:$0xf] %vm1134_vm3, %v1457_v35 }
 0x11b   : > { %1166 = vst.msk [vmem:[%s1741_s27 + $0x7c] sm:$0xf] %vm1134_vm3, %v1428_v36  ;;  %1198 = vst.msk [vmem:[%s1741_s27 + $0xfc] sm:$0xf] %vm1134_vm3, %v1460_v37  ;;  %v1426_v41 = vpack.c.bf16 %v843_v39, %v843_v39  ;;  %v1458_v42 = vpack.c.bf16 %v875_v40, %v875_v40 }
 0x11d   : > { %1164 = vst.msk [vmem:[%s1741_s27 + $0x74] sm:$0xf] %vm1134_vm3, %v1426_v41  ;;  %1196 = vst.msk [vmem:[%s1741_s27 + $0xf4] sm:$0xf] %vm1134_vm3, %v1458_v42 }
 0x11e PF: > { %s13_s12 = sadd.s32 1, %s1616_s12  }
 0x11f   : > { %p10_p4 = scmp.ge.s32.totalorder %s13_s12, 4  }
 0x121   :  { %12 = sbr.rel (!%p10_p4) target bundleno = 1 (0x1), region = 62 }

// kernel: forward.8
= control target key start
LH: loop header
LB: loop body
LE: loop exit
PB: predicated region body
PF: predicated region fallthrough
CT: control target
= control target key end

     0   :  { %vm470_vm0 = vcmask 261120   ;;  %vm1001_vm1 = vcmask 257024   ;;  %s1884_s1 = inlined_call_operand.vmem [shape: bf16[288,32], index: 1, kind: input, shape index: {}]   ;;  %s1885_s0 = inlined_call_operand.vmem [shape: bf16[256,288], index: 0, kind: input, shape index: {}]   ;;  %s1886_s2 = inlined_call_operand.vmem [shape: f32[1,32], index: 2, kind: input, shape index: {}]   ;;  %s1887_s3 = inlined_call_operand.vmem [shape: bf16[256,32], index: 3, kind: output, shape index: {}]  }
   0x1   :  { %v1367_v0 = vld [vmem:[%s1884_s1 + $0x78] sm:$0xff]   ;;  %v1369_v2 = vld [vmem:[%s1884_s1 + $0x70] sm:$0xff]   ;;  %v1371_v4 = vld [vmem:[%s1884_s1 + $0x68] sm:$0xff]  }
   0x2   :  { %v1368_v1 = vld [vmem:[%s1884_s1 + $0x38] sm:$0xff]   ;;  %1185 = vmatprep.subr.bf16.mxu0 %v1367_v0  ;;  %1351 = vmatprep.subr.bf16.mxu1 %v1367_v0  ;;  %v1370_v3 = vld [vmem:[%s1884_s1 + $0x30] sm:$0xff]   ;;  %v1372_v5 = vld [vmem:[%s1884_s1 + $0x28] sm:$0xff]  }
   0x3   :  { %1186 = vmatpush3.bf16.msra.mxu0 %v1368_v1  ;;  %1359 = vmatpush3.bf16.msra.mxu1 %v1368_v1  ;;  %v1373_v6 = vld [vmem:[%s1884_s1 + $0x60] sm:$0xff]   ;;  %v1375_v8 = vld [vmem:[%s1884_s1 + $0x58] sm:$0xff]   ;;  %v1377_v10 = vld [vmem:[%s1884_s1 + $0x50] sm:$0xff]  }
   0x4   :  { %1187 = vmatprep.subr.bf16.mxu0 %v1369_v2  ;;  %1352 = vmatprep.subr.bf16.mxu1 %v1369_v2  ;;  %v1374_v7 = vld [vmem:[%s1884_s1 + $0x20] sm:$0xff]   ;;  %v1376_v9 = vld [vmem:[%s1884_s1 + $0x18] sm:$0xff]   ;;  %v1378_v13 = vld [vmem:[%s1884_s1 + $0x10] sm:$0xff]  }
   0x5   :  { %v1385_v11 = vld [vmem:[%s1885_s0 + $0x4] ss:$12 sps:$4 sm:$0xff]   ;;  %v1379_v14 = vld [vmem:[%s1884_s1 + $0x48] sm:$0xff]   ;;  %v1396_v26 = vld [vmem:[%s1885_s0 + $0x34] ss:$12 sps:$4 sm:$0xff]  }
   0x6   :  { %v1388_v12 = vld [vmem:[%s1885_s0 + $0x124] ss:$12 sps:$4 sm:$0xff]   ;;  %551 = vmatprep.mubr.bf16.mxu0 %v1385_v11  ;;  %v1380_v15 = vld [vmem:[%s1884_s1 + $0x8] sm:$0xff]   ;;  %v1398_v27 = vld [vmem:[%s1885_s0 + $0x154] ss:$12 sps:$4 sm:$0xff]  }
   0x7   :  { %1188 = vmatpush3.bf16.msra.mxu0 %v1370_v3  ;;  %1360 = vmatpush3.bf16.msra.mxu1 %v1370_v3  ;;  %v1381_v16 = vld [vmem:[%s1884_s1 + $0x40] sm:$0xff]   ;;  %v1389_v18 = vld [vmem:[%s1884_s1 + $0x88] sm:$0xff]   ;;  %v1400_v28 = vld [vmem:[%s1885_s0 + $0x30] ss:$12 sps:$4 sm:$0xff]  }
   0x8   :  { %1189 = vmatprep.subr.bf16.mxu0 %v1371_v4  ;;  %1353 = vmatprep.subr.bf16.mxu1 %v1371_v4  ;;  %v1382_v17 = vld [vmem:[%s1884_s1] sm:$0xff]   ;;  %v1390_v21 = vld [vmem:[%s1885_s0 + $0x1c] ss:$12 sps:$4 sm:$0xff]   ;;  %v1403_v30 = vld [vmem:[%s1885_s0 + $0x4c] ss:$12 sps:$4 sm:$0xff]  }
   0x9   :  { %647 = vmatprep.mubr.bf16.mxu1 %v1388_v12  ;;  %v1383_v19 = vld [vmem:[%s1885_s0] ss:$12 sps:$4 sm:$0xff]   ;;  %v1392_v22 = vld [vmem:[%s1885_s0 + $0x13c] ss:$12 sps:$4 sm:$0xff]   ;;  %v1394_v24 = vld [vmem:[%s1885_s0 + $0x18] ss:$12 sps:$4 sm:$0xff]  }
   0xa   :  { %v1386_v20 = vld [vmem:[%s1885_s0 + $0x120] ss:$12 sps:$4 sm:$0xff]   ;;  %v1395_v25 = vld [vmem:[%s1885_s0 + $0x138] ss:$12 sps:$4 sm:$0xff]   ;;  %v1401_v29 = vld [vmem:[%s1885_s0 + $0x150] ss:$12 sps:$4 sm:$0xff]  }
   0xb   :  { %1190 = vmatpush3.bf16.msra.mxu0 %v1372_v5  ;;  %1361 = vmatpush3.bf16.msra.mxu1 %v1372_v5  ;;  %v1402_v23 = vld [vmem:[%s1884_s1 + $0x80] sm:$0xff]   ;;  %v1405_v31 = vld [vmem:[%s1885_s0 + $0x16c] ss:$12 sps:$4 sm:$0xff]   ;;  %v1407_v32 = vld [vmem:[%s1885_s0 + $0x48] ss:$12 sps:$4 sm:$0xff]  }
   0xc   :  { %1191 = vmatprep.subr.bf16.mxu0 %v1373_v6  ;;  %1354 = vmatprep.subr.bf16.mxu1 %v1373_v6  ;;  %v1408_v33 = vld [vmem:[%s1885_s0 + $0x168] ss:$12 sps:$4 sm:$0xff]   ;;  %v1409_v34 = vld [vmem:[%s1885_s0 + $0x64] ss:$12 sps:$4 sm:$0xff]   ;;  %v1412_v36 = vld [vmem:[%s1885_s0 + $0x60] ss:$12 sps:$4 sm:$0xff]  }
   0xd   :  { %v1411_v35 = vld [vmem:[%s1885_s0 + $0x8] ss:$12 sps:$4 sm:$0xff]   ;;  %v1413_v37 = vld [vmem:[%s1885_s0 + $0x20] ss:$12 sps:$4 sm:$0xff]   ;;  %v1416_v39 = vld [vmem:[%s1885_s0 + $0x38] ss:$12 sps:$4 sm:$0xff]  }
   0xe   :  { %v1414_v38 = vld [vmem:[%s1885_s0 + $0x7c] ss:$12 sps:$4 sm:$0xff]   ;;  %v1417_v40 = vld [vmem:[%s1885_s0 + $0x78] ss:$12 sps:$4 sm:$0xff]   ;;  %v1419_v42 = vld [vmem:[%s1885_s0 + $0x94] ss:$12 sps:$4 sm:$0xff]  }
   0xf   :  { %1192 = vmatpush3.bf16.msra.mxu0 %v1374_v7  ;;  %1362 = vmatpush3.bf16.msra.mxu1 %v1374_v7  ;;  %v1418_v41 = vld [vmem:[%s1885_s0 + $0x50] ss:$12 sps:$4 sm:$0xff]   ;;  %v1421_v43 = vld [vmem:[%s1885_s0 + $0x68] ss:$12 sps:$4 sm:$0xff]   ;;  %v1423_v45 = vld [vmem:[%s1885_s0 + $0x80] ss:$12 sps:$4 sm:$0xff]  }
  0x10   :  { %1193 = vmatprep.subr.bf16.mxu0 %v1375_v8  ;;  %1355 = vmatprep.subr.bf16.mxu1 %v1375_v8  ;;  %v1422_v44 = vld [vmem:[%s1885_s0 + $0x90] ss:$12 sps:$4 sm:$0xff]   ;;  %v1424_v46 = vld [vmem:[%s1885_s0 + $0xac] ss:$12 sps:$4 sm:$0xff]   ;;  %v1427_v48 = vld [vmem:[%s1885_s0 + $0xa8] ss:$12 sps:$4 sm:$0xff]  }
  0x11   :  { %v1426_v47 = vld [vmem:[%s1885_s0 + $0x98] ss:$12 sps:$4 sm:$0xff]   ;;  %v1428_v49 = vld [vmem:[%s1885_s0 + $0xb0] ss:$12 sps:$4 sm:$0xff]   ;;  %v1431_v51 = vld [vmem:[%s1885_s0 + $0xc8] ss:$12 sps:$4 sm:$0xff]  }
  0x12   :  { %v1429_v50 = vld [vmem:[%s1885_s0 + $0xc4] ss:$12 sps:$4 sm:$0xff]   ;;  %v1432_v52 = vld [vmem:[%s1885_s0 + $0xc0] ss:$12 sps:$4 sm:$0xff]   ;;  %v1434_v54 = vld [vmem:[%s1885_s0 + $0xdc] ss:$12 sps:$4 sm:$0xff]  }
  0x13   :  { %1194 = vmatpush3.bf16.msra.mxu0 %v1376_v9  ;;  %1363 = vmatpush3.bf16.msra.mxu1 %v1376_v9  ;;  %v1433_v53 = vld [vmem:[%s1885_s0 + $0xe0] ss:$12 sps:$4 sm:$0xff]   ;;  %v1436_v55 = vld [vmem:[%s1885_s0 + $0xf8] ss:$12 sps:$4 sm:$0xff]   ;;  %v1438_v57 = vld [vmem:[%s1885_s0 + $0x110] ss:$12 sps:$4 sm:$0xff]  }
  0x14   :  { %1195 = vmatprep.subr.bf16.mxu0 %v1377_v10  ;;  %1356 = vmatprep.subr.bf16.mxu1 %v1377_v10  ;;  %v1437_v56 = vld [vmem:[%s1885_s0 + $0xd8] ss:$12 sps:$4 sm:$0xff]   ;;  %v1439_v58 = vld [vmem:[%s1885_s0 + $0xf4] ss:$12 sps:$4 sm:$0xff]   ;;  %v1442_v60 = vld [vmem:[%s1885_s0 + $0xf0] ss:$12 sps:$4 sm:$0xff]  }
  0x15   :  { %v1441_v59 = vld [vmem:[%s1885_s0 + $0x128] ss:$12 sps:$4 sm:$0xff]   ;;  %v1443_v61 = vld [vmem:[%s1885_s0 + $0x140] ss:$12 sps:$4 sm:$0xff]   ;;  %v1446_v63 = vld [vmem:[%s1885_s0 + $0x158] ss:$12 sps:$4 sm:$0xff]  }
  0x16   :  { %v1444_v62 = vld [vmem:[%s1885_s0 + $0x10c] ss:$12 sps:$4 sm:$0xff]   ;;  %v1447_v0 = vld [vmem:[%s1885_s0 + $0x108] ss:$12 sps:$4 sm:$0xff]   ;;  %v1448_v1 = vld [vmem:[%s1885_s0 + $0x170] ss:$12 sps:$4 sm:$0xff]  }
  0x17   :  { %1196 = vmatpush3.bf16.msra.mxu0 %v1378_v13  ;;  %1364 = vmatpush3.bf16.msra.mxu1 %v1378_v13 }
  0x18   :  { %1197 = vmatprep.subr.bf16.mxu0 %v1379_v14  ;;  %1357 = vmatprep.subr.bf16.mxu1 %v1379_v14 }
  0x1b   :  { %1198 = vmatpush3.bf16.msra.mxu0 %v1380_v15  ;;  %1365 = vmatpush3.bf16.msra.mxu1 %v1380_v15 }
  0x1c   :  { %1199 = vmatprep.subr.bf16.mxu0 %v1381_v16  ;;  %1358 = vmatprep.subr.bf16.mxu1 %v1381_v16 }
  0x1f   :  { %1200 = vmatpush3.bf16.msra.mxu0 %v1382_v17  ;;  %1366 = vmatpush3.bf16.msra.mxu1 %v1382_v17 }
  0x20   :  { %1315 = vmatprep.subr.bf16.mxu1 %v1389_v18 }
  0x22   :  { %552 = vmatmul.mubr.bf16.vlgmr.msra.gmra.mxu0 %v1383_v19  ;;  %648 = vmatmul.mubr.bf16.vlgmr.msra.gmra.mxu1 %v1386_v20 }
  0x23   :  { %1316 = vmatpush3.bf16.msra.mxu1 %v1389_v18  ;;  %559 = vmatprep.mubr.bf16.mxu0 %v1390_v21 }
  0x24   :  { %655 = vmatprep.mubr.bf16.mxu1 %v1392_v22  ;;  %1317 = vmatprep.subr.bf16.mxu1 %v1402_v23 }
  0x27   :  { %1318 = vmatpush3.bf16.msra.mxu1 %v1402_v23 }
  0x2a   :  { %560 = vmatmul.mubr.bf16.gmra.mxu0 %v1394_v24  ;;  %656 = vmatmul.mubr.bf16.gmra.mxu1 %v1395_v25 }
  0x2b   :  { %567 = vmatprep.mubr.bf16.mxu0 %v1396_v26  ;;  %663 = vmatprep.mubr.bf16.mxu1 %v1398_v27 }
  0x32   :  { %568 = vmatmul.mubr.bf16.gmra.mxu0 %v1400_v28  ;;  %664 = vmatmul.mubr.bf16.gmra.mxu1 %v1401_v29 }
  0x33   :  { %575 = vmatprep.mubr.bf16.mxu0 %v1403_v30  ;;  %671 = vmatprep.mubr.bf16.mxu1 %v1405_v31 }
  0x3a   :  { %576 = vmatmul.mubr.bf16.gmra.mxu0 %v1407_v32  ;;  %672 = vmatmul.mubr.bf16.gmra.mxu1 %v1408_v33 }
  0x3b   :  { %583 = vmatprep.mubr.bf16.mxu0 %v1409_v34  ;;  %1319 = vmatprep.mubr.msk.bf16.mxu1 %vm470_vm0, %v1411_v35 }
  0x42   :  { %584 = vmatmul.mubr.bf16.gmra.mxu0 %v1412_v36  ;;  %1320 = vmatmul.mubr.msk.bf16.vlgmr.msra.gmra.mxu1 %vm470_vm0, %v1413_v37 }
  0x43   :  { %591 = vmatprep.mubr.bf16.mxu0 %v1414_v38  ;;  %1323 = vmatprep.mubr.msk.bf16.mxu1 %vm470_vm0, %v1416_v39 }
  0x4a   :  { %592 = vmatmul.mubr.bf16.gmra.mxu0 %v1417_v40  ;;  %1324 = vmatmul.mubr.msk.bf16.gmra.mxu1 %vm470_vm0, %v1418_v41 }
  0x4b   :  { %599 = vmatprep.mubr.bf16.mxu0 %v1419_v42  ;;  %1327 = vmatprep.mubr.msk.bf16.mxu1 %vm470_vm0, %v1421_v43  ;;  %v1706_v42 = vld [vmem:[%s1886_s2] ss:$0 sm:$0xff] }
  0x52   :  { %600 = vmatmul.mubr.bf16.gmra.mxu0 %v1422_v44  ;;  %1328 = vmatmul.mubr.msk.bf16.gmra.mxu1 %vm470_vm0, %v1423_v45 }
  0x53   :  { %607 = vmatprep.mubr.bf16.mxu0 %v1424_v46  ;;  %1331 = vmatprep.mubr.msk.bf16.mxu1 %vm470_vm0, %v1426_v47 }
  0x5a   :  { %608 = vmatmul.mubr.bf16.gmra.mxu0 %v1427_v48  ;;  %1332 = vmatmul.mubr.msk.bf16.gmra.mxu1 %vm470_vm0, %v1428_v49 }
  0x5b   :  { %615 = vmatprep.mubr.bf16.mxu0 %v1429_v50  ;;  %1335 = vmatprep.mubr.msk.bf16.mxu1 %vm470_vm0, %v1431_v51 }
  0x62   :  { %616 = vmatmul.mubr.bf16.gmra.mxu0 %v1432_v52  ;;  %1336 = vmatmul.mubr.msk.bf16.gmra.mxu1 %vm470_vm0, %v1433_v53 }
  0x63   :  { %623 = vmatprep.mubr.bf16.mxu0 %v1434_v54  ;;  %1339 = vmatprep.mubr.msk.bf16.mxu1 %vm470_vm0, %v1436_v55 }
  0x6a   :  { %624 = vmatmul.mubr.bf16.gmra.mxu0 %v1437_v56  ;;  %1340 = vmatmul.mubr.msk.bf16.gmra.mxu1 %vm470_vm0, %v1438_v57 }
  0x6b   :  { %631 = vmatprep.mubr.bf16.mxu0 %v1439_v58  ;;  %1343 = vmatprep.mubr.msk.bf16.mxu1 %vm470_vm0, %v1441_v59 }
  0x72   :  { %632 = vmatmul.mubr.bf16.gmra.mxu0 %v1442_v60  ;;  %1344 = vmatmul.mubr.msk.bf16.gmra.mxu1 %vm470_vm0, %v1443_v61 }
  0x73   :  { %639 = vmatprep.mubr.bf16.mxu0 %v1444_v62  ;;  %1347 = vmatprep.mubr.msk.bf16.mxu1 %vm470_vm0, %v1446_v63 }
  0x7a   :  { %640 = vmatmul.mubr.bf16.gmra.mxu0 %v1447_v0  ;;  %1348 = vmatmul.mubr.msk.bf16.gmra.mxu1 %vm470_vm0, %v1448_v1 }
  0xe2   :  { %v1201_v2 = vpop.f32.mrf.mxu0  ;;  %v1273_v3 = vpop.f32.mrf.mxu1 }
  0xe4   :  { %v1202_v4 = vpop.f32.mrf.mxu0  ;;  %v1274_v5 = vpop.f32.mrf.mxu1 }
  0xe5   :  { %v1683_v6 = vadd.f32 %v1274_v5, %v1273_v3  ;;  %v1203_v39 = vadd.f32 %v1202_v4, %v1201_v2 }
  0xe6   :  { %v1204_v7 = vpop.f32.mrf.mxu0  ;;  %v1276_v8 = vpop.f32.mrf.mxu1 }
  0xe7   :  { %v554_v49 = vadd.f32 %v1203_v39, %v1706_v42 }
  0xe8   :  { %v1205_v9 = vpop.f32.mrf.mxu0  ;;  %v1277_v10 = vpop.f32.mrf.mxu1 }
  0xe9   :  { %v1685_v11 = vadd.f32 %v1277_v10, %v1276_v8  ;;  %v1206_v45 = vadd.f32 %v1205_v9, %v1204_v7 }
  0xea   :  { %v1207_v12 = vpop.f32.mrf.mxu0  ;;  %v1279_v13 = vpop.f32.mrf.mxu1 }
  0xeb   :  { %v557_v58 = vadd.f32 %v1206_v45, %v1706_v42 }
  0xec   :  { %v1208_v14 = vpop.f32.mrf.mxu0  ;;  %v1280_v15 = vpop.f32.mrf.mxu1 }
  0xed   :  { %v1687_v16 = vadd.f32 %v1280_v15, %v1279_v13  ;;  %v1209_v36 = vadd.f32 %v1208_v14, %v1207_v12 }
  0xee   :  { %v1210_v17 = vpop.f32.mrf.mxu0  ;;  %v1282_v18 = vpop.f32.mrf.mxu1 }
  0xef   :  { %v562_v44 = vadd.f32 %v1209_v36, %v1706_v42 }
  0xf0   :  { %v1211_v19 = vpop.f32.mrf.mxu0  ;;  %v1283_v20 = vpop.f32.mrf.mxu1 }
  0xf1   :  { %v1689_v21 = vadd.f32 %v1283_v20, %v1282_v18  ;;  %v1212_v43 = vadd.f32 %v1211_v19, %v1210_v17 }
  0xf2   :  { %v1213_v22 = vpop.f32.mrf.mxu0  ;;  %v1285_v23 = vpop.f32.mrf.mxu1 }
  0xf3   :  { %v565_v55 = vadd.f32 %v1212_v43, %v1706_v42 }
  0xf4   :  { %v1214_v24 = vpop.f32.mrf.mxu0  ;;  %v1286_v25 = vpop.f32.mrf.mxu1 }
  0xf5   :  { %v1691_v26 = vadd.f32 %v1286_v25, %v1285_v23  ;;  %v1215_v59 = vadd.f32 %v1214_v24, %v1213_v22 }
  0xf6   :  { %v1216_v27 = vpop.f32.mrf.mxu0  ;;  %v1288_v28 = vpop.f32.mrf.mxu1 }
  0xf7   :  { %v570_v14 = vadd.f32 %v1215_v59, %v1706_v42 }
  0xf8   :  { %v1217_v29 = vpop.f32.mrf.mxu0  ;;  %v1289_v30 = vpop.f32.mrf.mxu1 }
  0xf9   :  { %v1693_v31 = vadd.f32 %v1289_v30, %v1288_v28  ;;  %v1218_v7 = vadd.f32 %v1217_v29, %v1216_v27 }
  0xfa   :  { %v1219_v32 = vpop.f32.mrf.mxu0  ;;  %v1695_v33 = vpop.f32.mrf.mxu1 }
  0xfb   :  { %v573_v27 = vadd.f32 %v1218_v7, %v1706_v42 }
  0xfc   :  { %v1220_v34 = vpop.f32.mrf.mxu0  ;;  %v1697_v35 = vpop.f32.mrf.mxu1 }
  0xfd   :  { %v1221_v52 = vadd.f32 %v1220_v34, %v1219_v32 }
  0xfe   :  { %v1222_v37 = vpop.f32.mrf.mxu0  ;;  %v1699_v38 = vpop.f32.mrf.mxu1 }
  0xff   :  { %v578_v5 = vadd.f32 %v1221_v52, %v1706_v42 }
 0x100   :  { %v1223_v40 = vpop.f32.mrf.mxu0  ;;  %v1701_v41 = vpop.f32.mrf.mxu1 }
 0x101   :  { %v1224_v63 = vadd.f32 %v1223_v40, %v1222_v37 }
 0x102   :  { %v1225_v46 = vpop.f32.mrf.mxu0  ;;  %v1321_v47 = vpop.f32.mrf.mxu1 }
 0x103   :  { %v723_v48 = vadd.f32 %v1321_v47, %v562_v44  ;;  %v581_v18 = vadd.f32 %v1224_v63, %v1706_v42 }
 0x104   :  { %v1226_v50 = vpop.f32.mrf.mxu0  ;;  %v714_v51 = vpop.f32.mrf.mxu1 }
 0x105   :  { %v843_v53 = vmax.f32 %v723_v48, 0.0  ;;  %v715_v54 = vadd.f32 %v714_v51, %v554_v49  ;;  %v1227_v28 = vadd.f32 %v1226_v50, %v1225_v46 }
 0x106   :  { %v1228_v56 = vpop.f32.mrf.mxu0  ;;  %v1322_v57 = vpop.f32.mrf.mxu1 }
 0x107   :  { %v1155_v60 = vpack.c.bf16 %v843_v53, %v843_v53  ;;  %v841_v61 = vmax.f32 %v715_v54, 0.0  ;;  %v726_v62 = vadd.f32 %v1322_v57, %v565_v55  ;;  %v586_v51 = vadd.f32 %v1227_v28, %v1706_v42 }
 0x108   :  { %v1229_v0 = vpop.f32.mrf.mxu0  ;;  %v717_v1 = vpop.f32.mrf.mxu1 }
 0x109   :  { %1004 = vst.msk [vmem:[%s1887_s3 + $0x8] sm:$0xf] %vm1001_vm1, %v1155_v60  ;;  %v1153_v2 = vpack.c.bf16 %v841_v61, %v841_v61  ;;  %v844_v3 = vmax.f32 %v726_v62, 0.0  ;;  %v718_v4 = vadd.f32 %v717_v1, %v557_v58  ;;  %v1230_v45 = vadd.f32 %v1229_v0, %v1228_v56 }
 0x10a   :  { %v1231_v8 = vpop.f32.mrf.mxu0  ;;  %v1325_v9 = vpop.f32.mrf.mxu1 }
 0x10b   :  { %1002 = vst.msk [vmem:[%s1887_s3] sm:$0xf] %vm1001_vm1, %v1153_v2  ;;  %v1156_v10 = vpack.c.bf16 %v844_v3, %v844_v3  ;;  %v842_v12 = vmax.f32 %v718_v4, 0.0  ;;  %v739_v13 = vadd.f32 %v1325_v9, %v578_v5  ;;  %v589_v60 = vadd.f32 %v1230_v45, %v1706_v42 }
 0x10c   :  { %v1232_v15 = vpop.f32.mrf.mxu0  ;;  %v730_v17 = vpop.f32.mrf.mxu1 }
 0x10d   :  { %1005 = vst.msk [vmem:[%s1887_s3 + $0xc] sm:$0xf] %vm1001_vm1, %v1156_v10  ;;  %v1154_v19 = vpack.c.bf16 %v842_v12, %v842_v12  ;;  %v847_v20 = vmax.f32 %v739_v13, 0.0  ;;  %v1233_v22 = vadd.f32 %v1232_v15, %v1231_v8  ;;  %v731_v23 = vadd.f32 %v730_v17, %v570_v14 }
 0x10e   :  { %v1234_v24 = vpop.f32.mrf.mxu0  ;;  %v1326_v25 = vpop.f32.mrf.mxu1 }
 0x10f   :  { %1003 = vst.msk [vmem:[%s1887_s3 + $0x4] sm:$0xf] %vm1001_vm1, %v1154_v19  ;;  %v1159_v29 = vpack.c.bf16 %v847_v20, %v847_v20  ;;  %v845_v30 = vmax.f32 %v731_v23, 0.0  ;;  %v742_v32 = vadd.f32 %v1326_v25, %v581_v18  ;;  %v594_v37 = vadd.f32 %v1233_v22, %v1706_v42 }
 0x110   :  { %v1235_v34 = vpop.f32.mrf.mxu0  ;;  %v733_v36 = vpop.f32.mrf.mxu1 }
 0x111   :  { %1008 = vst.msk [vmem:[%s1887_s3 + $0x18] sm:$0xf] %vm1001_vm1, %v1159_v29  ;;  %v1157_v39 = vpack.c.bf16 %v845_v30, %v845_v30  ;;  %v848_v40 = vmax.f32 %v742_v32, 0.0  ;;  %v1236_v43 = vadd.f32 %v1235_v34, %v1234_v24  ;;  %v734_v44 = vadd.f32 %v733_v36, %v573_v27 }
 0x112   :  { %v1237_v46 = vpop.f32.mrf.mxu0  ;;  %v1329_v47 = vpop.f32.mrf.mxu1 }
 0x113   :  { %1006 = vst.msk [vmem:[%s1887_s3 + $0x10] sm:$0xf] %vm1001_vm1, %v1157_v39  ;;  %v1160_v48 = vpack.c.bf16 %v848_v40, %v848_v40  ;;  %v846_v49 = vmax.f32 %v734_v44, 0.0  ;;  %v755_v50 = vadd.f32 %v1329_v47, %v594_v37  ;;  %v597_v57 = vadd.f32 %v1236_v43, %v1706_v42 }
 0x114   :  { %v1238_v52 = vpop.f32.mrf.mxu0  ;;  %v746_v53 = vpop.f32.mrf.mxu1 }
 0x115   :  { %1009 = vst.msk [vmem:[%s1887_s3 + $0x1c] sm:$0xf] %vm1001_vm1, %v1160_v48  ;;  %v1158_v54 = vpack.c.bf16 %v846_v49, %v846_v49  ;;  %v851_v55 = vmax.f32 %v755_v50, 0.0  ;;  %v747_v56 = vadd.f32 %v746_v53, %v586_v51  ;;  %v1239_v62 = vadd.f32 %v1238_v52, %v1237_v46 }
 0x116   :  { %v1240_v58 = vpop.f32.mrf.mxu0  ;;  %v1330_v59 = vpop.f32.mrf.mxu1 }
 0x117   :  { %1007 = vst.msk [vmem:[%s1887_s3 + $0x14] sm:$0xf] %vm1001_vm1, %v1158_v54  ;;  %v1163_v61 = vpack.c.bf16 %v851_v55, %v851_v55  ;;  %v849_v63 = vmax.f32 %v747_v56, 0.0  ;;  %v758_v0 = vadd.f32 %v1330_v59, %v597_v57  ;;  %v602_v13 = vadd.f32 %v1239_v62, %v1706_v42 }
 0x118   :  { %v1241_v1 = vpop.f32.mrf.mxu0  ;;  %v749_v2 = vpop.f32.mrf.mxu1 }
 0x119   :  { %1012 = vst.msk [vmem:[%s1887_s3 + $0x28] sm:$0xf] %vm1001_vm1, %v1163_v61  ;;  %v1161_v3 = vpack.c.bf16 %v849_v63, %v849_v63  ;;  %v852_v4 = vmax.f32 %v758_v0, 0.0  ;;  %v750_v5 = vadd.f32 %v749_v2, %v589_v60  ;;  %v1242_v10 = vadd.f32 %v1241_v1, %v1240_v58 }
 0x11a   :  { %v1243_v7 = vpop.f32.mrf.mxu0  ;;  %v1333_v8 = vpop.f32.mrf.mxu1 }
 0x11b   :  { %1010 = vst.msk [vmem:[%s1887_s3 + $0x20] sm:$0xf] %vm1001_vm1, %v1161_v3  ;;  %v1164_v9 = vpack.c.bf16 %v852_v4, %v852_v4  ;;  %v850_v12 = vmax.f32 %v750_v5, 0.0  ;;  %v605_v25 = vadd.f32 %v1242_v10, %v1706_v42 }
 0x11c   :  { %v1244_v14 = vpop.f32.mrf.mxu0  ;;  %v762_v15 = vpop.f32.mrf.mxu1 }
 0x11d   :  { %1013 = vst.msk [vmem:[%s1887_s3 + $0x2c] sm:$0xf] %vm1001_vm1, %v1164_v9  ;;  %v1162_v17 = vpack.c.bf16 %v850_v12, %v850_v12  ;;  %v1245_v18 = vadd.f32 %v1244_v14, %v1243_v7  ;;  %v763_v19 = vadd.f32 %v762_v15, %v602_v13  ;;  %v658_v15 = vadd.f32 %v1687_v16, %v1706_v42 }
 0x11e   :  { %v1246_v20 = vpop.f32.mrf.mxu0  ;;  %v1334_v22 = vpop.f32.mrf.mxu1  ;;  %v661_v16 = vadd.f32 %v1689_v21, %v1706_v42  ;;  %v1296_v21 = vadd.f32 %v1701_v41, %v1699_v38 }
 0x11f   :  { %1011 = vst.msk [vmem:[%s1887_s3 + $0x24] sm:$0xf] %vm1001_vm1, %v1162_v17  ;;  %v610_v23 = vadd.f32 %v1245_v18, %v1706_v42  ;;  %v853_v24 = vmax.f32 %v763_v19, 0.0 }
 0x120   :  { %v1247_v27 = vpop.f32.mrf.mxu0  ;;  %v765_v28 = vpop.f32.mrf.mxu1 }
 0x121   :  { %v771_v29 = vadd.f32 %v1333_v8, %v610_v23  ;;  %v1165_v30 = vpack.c.bf16 %v853_v24, %v853_v24  ;;  %v1248_v32 = vadd.f32 %v1247_v27, %v1246_v20  ;;  %v766_v34 = vadd.f32 %v765_v28, %v605_v25 }
 0x122   :  { %v1249_v36 = vpop.f32.mrf.mxu0  ;;  %v1337_v37 = vpop.f32.mrf.mxu1  ;;  %v1293_v23 = vadd.f32 %v1697_v35, %v1695_v33  ;;  %v650_v25 = vadd.f32 %v1683_v6, %v1706_v42 }
 0x123   :  { %v855_v39 = vmax.f32 %v771_v29, 0.0  ;;  %1014 = vst.msk [vmem:[%s1887_s3 + $0x30] sm:$0xf] %vm1001_vm1, %v1165_v30  ;;  %v613_v40 = vadd.f32 %v1248_v32, %v1706_v42  ;;  %v854_v43 = vmax.f32 %v766_v34, 0.0 }
 0x124   :  { %v1250_v44 = vpop.f32.mrf.mxu0  ;;  %v778_v45 = vpop.f32.mrf.mxu1 }
 0x125   :  { %v1167_v46 = vpack.c.bf16 %v855_v39, %v855_v39  ;;  %v774_v47 = vadd.f32 %v1334_v22, %v613_v40  ;;  %v1166_v48 = vpack.c.bf16 %v854_v43, %v854_v43  ;;  %v1251_v49 = vadd.f32 %v1250_v44, %v1249_v36 }
 0x126   :  { %v1252_v50 = vpop.f32.mrf.mxu0  ;;  %v1338_v51 = vpop.f32.mrf.mxu1  ;;  %v653_v44 = vadd.f32 %v1685_v11, %v1706_v42 }
 0x127   :  { %1016 = vst.msk [vmem:[%s1887_s3 + $0x38] sm:$0xf] %vm1001_vm1, %v1167_v46  ;;  %v856_v52 = vmax.f32 %v774_v47, 0.0  ;;  %1015 = vst.msk [vmem:[%s1887_s3 + $0x34] sm:$0xf] %vm1001_vm1, %v1166_v48  ;;  %v618_v53 = vadd.f32 %v1251_v49, %v1706_v42  ;;  %v674_v46 = vadd.f32 %v1293_v23, %v1706_v42 }
 0x128   :  { %v1253_v54 = vpop.f32.mrf.mxu0  ;;  %v781_v55 = vpop.f32.mrf.mxu1 }
 0x129   :  { %v1168_v56 = vpack.c.bf16 %v856_v52, %v856_v52  ;;  %v779_v57 = vadd.f32 %v778_v45, %v618_v53  ;;  %v1254_v58 = vadd.f32 %v1253_v54, %v1252_v50 }
 0x12a   :  { %v1255_v59 = vpop.f32.mrf.mxu0  ;;  %v1785_v60 = vpop.f32.mrf.mxu1 }
 0x12b   :  { %1017 = vst.msk [vmem:[%s1887_s3 + $0x3c] sm:$0xf] %vm1001_vm1, %v1168_v56  ;;  %v857_v61 = vmax.f32 %v779_v57, 0.0  ;;  %v621_v62 = vadd.f32 %v1254_v58, %v1706_v42  ;;  %v666_v58 = vadd.f32 %v1691_v26, %v1706_v42 }
 0x12c   :  { %v1256_v63 = vpop.f32.mrf.mxu0  ;;  %v794_v0 = vpop.f32.mrf.mxu1 }
 0x12d   :  { %v1169_v1 = vpack.c.bf16 %v857_v61, %v857_v61  ;;  %v782_v2 = vadd.f32 %v781_v55, %v621_v62  ;;  %v1257_v3 = vadd.f32 %v1256_v63, %v1255_v59  ;;  %v677_v61 = vadd.f32 %v1296_v21, %v1706_v42 }
 0x12e   :  { %v1258_v4 = vpop.f32.mrf.mxu0  ;;  %v1792_v5 = vpop.f32.mrf.mxu1 }
 0x12f   :  { %1018 = vst.msk [vmem:[%s1887_s3 + $0x40] sm:$0xf] %vm1001_vm1, %v1169_v1  ;;  %v858_v7 = vmax.f32 %v782_v2, 0.0  ;;  %v626_v8 = vadd.f32 %v1257_v3, %v1706_v42 }
 0x130   :  { %v1259_v9 = vpop.f32.mrf.mxu0  ;;  %v797_v10 = vpop.f32.mrf.mxu1 }
 0x131   :  { %v1170_v12 = vpack.c.bf16 %v858_v7, %v858_v7  ;;  %v787_v13 = vadd.f32 %v1337_v37, %v626_v8  ;;  %v1260_v14 = vadd.f32 %v1259_v9, %v1258_v4 }
 0x132   :  { %v1261_v17 = vpop.f32.mrf.mxu0  ;;  %v1345_v18 = vpop.f32.mrf.mxu1 }
 0x133   :  { %1019 = vst.msk [vmem:[%s1887_s3 + $0x44] sm:$0xf] %vm1001_vm1, %v1170_v12  ;;  %v859_v19 = vmax.f32 %v787_v13, 0.0  ;;  %v629_v20 = vadd.f32 %v1260_v14, %v1706_v42  ;;  %v819_v22 = vadd.f32 %v1345_v18, %v658_v15  ;;  %v669_v14 = vadd.f32 %v1693_v31, %v1706_v42 }
 0x134   :  { %v1262_v24 = vpop.f32.mrf.mxu0  ;;  %v810_v27 = vpop.f32.mrf.mxu1 }
 0x135   :  { %v1171_v28 = vpack.c.bf16 %v859_v19, %v859_v19  ;;  %v790_v29 = vadd.f32 %v1338_v51, %v629_v20  ;;  %v867_v30 = vmax.f32 %v819_v22, 0.0  ;;  %v1263_v32 = vadd.f32 %v1262_v24, %v1261_v17 }
 0x136   :  { %v811_v34 = vadd.f32 %v810_v27, %v650_v25  ;;  %v1264_v36 = vpop.f32.mrf.mxu0  ;;  %v1346_v37 = vpop.f32.mrf.mxu1 }
 0x137   :  { %1020 = vst.msk [vmem:[%s1887_s3 + $0x48] sm:$0xf] %vm1001_vm1, %v1171_v28  ;;  %v860_v33 = vmax.f32 %v790_v29, 0.0  ;;  %v1179_v35 = vpack.c.bf16 %v867_v30, %v867_v30  ;;  %v634_v6 = vadd.f32 %v1263_v32, %v1706_v42  ;;  %v822_v39 = vadd.f32 %v1346_v37, %v661_v16 }
 0x138   :  { %v865_v40 = vmax.f32 %v811_v34, 0.0  ;;  %v1265_v43 = vpop.f32.mrf.mxu0  ;;  %v813_v45 = vpop.f32.mrf.mxu1 }
 0x139   :  { %v1172_v47 = vpack.c.bf16 %v860_v33, %v860_v33  ;;  %1028 = vst.msk [vmem:[%s1887_s3 + $0x68] sm:$0xf] %vm1001_vm1, %v1179_v35  ;;  %v795_v48 = vadd.f32 %v794_v0, %v634_v6  ;;  %v868_v49 = vmax.f32 %v822_v39, 0.0  ;;  %v1266_v50 = vadd.f32 %v1265_v43, %v1264_v36 }
 0x13a   :  { %v1177_v51 = vpack.c.bf16 %v865_v40, %v865_v40  ;;  %v814_v52 = vadd.f32 %v813_v45, %v653_v44  ;;  %v1267_v38 = vpop.f32.mrf.mxu0  ;;  %v1349_v41 = vpop.f32.mrf.mxu1 }
 0x13b   :  { %1021 = vst.msk [vmem:[%s1887_s3 + $0x4c] sm:$0xf] %vm1001_vm1, %v1172_v47  ;;  %v861_v11 = vmax.f32 %v795_v48, 0.0  ;;  %v1180_v53 = vpack.c.bf16 %v868_v49, %v868_v49  ;;  %v637_v54 = vadd.f32 %v1266_v50, %v1706_v42  ;;  %v835_v55 = vadd.f32 %v1349_v41, %v674_v46 }
 0x13c   :  { %1026 = vst.msk [vmem:[%s1887_s3 + $0x60] sm:$0xf] %vm1001_vm1, %v1177_v51  ;;  %v866_v56 = vmax.f32 %v814_v52, 0.0  ;;  %v1268_v57 = vpop.f32.mrf.mxu0  ;;  %v826_v59 = vpop.f32.mrf.mxu1 }
 0x13d   :  { %v1173_v62 = vpack.c.bf16 %v861_v11, %v861_v11  ;;  %1029 = vst.msk [vmem:[%s1887_s3 + $0x6c] sm:$0xf] %vm1001_vm1, %v1180_v53  ;;  %v798_v63 = vadd.f32 %v797_v10, %v637_v54  ;;  %v871_v0 = vmax.f32 %v835_v55, 0.0  ;;  %v1269_v1 = vadd.f32 %v1268_v57, %v1267_v38 }
 0x13e   :  { %v1178_v2 = vpack.c.bf16 %v866_v56, %v866_v56  ;;  %v827_v3 = vadd.f32 %v826_v59, %v666_v58  ;;  %v1270_v4 = vpop.f32.mrf.mxu0  ;;  %v1350_v7 = vpop.f32.mrf.mxu1 }
 0x13f   :  { %1022 = vst.msk [vmem:[%s1887_s3 + $0x50] sm:$0xf] %vm1001_vm1, %v1173_v62  ;;  %v862_v26 = vmax.f32 %v798_v63, 0.0  ;;  %v1183_v8 = vpack.c.bf16 %v871_v0, %v871_v0  ;;  %v642_v9 = vadd.f32 %v1269_v1, %v1706_v42  ;;  %v838_v12 = vadd.f32 %v1350_v7, %v677_v61 }
 0x140   :  { %1027 = vst.msk [vmem:[%s1887_s3 + $0x64] sm:$0xf] %vm1001_vm1, %v1178_v2  ;;  %v869_v10 = vmax.f32 %v827_v3, 0.0  ;;  %v1271_v13 = vpop.f32.mrf.mxu0  ;;  %v829_v15 = vpop.f32.mrf.mxu1 }
 0x141   :  { %v1174_v17 = vpack.c.bf16 %v862_v26, %v862_v26  ;;  %1032 = vst.msk [vmem:[%s1887_s3 + $0x78] sm:$0xf] %vm1001_vm1, %v1183_v8  ;;  %v803_v18 = vadd.f32 %v1785_v60, %v642_v9  ;;  %v872_v19 = vmax.f32 %v838_v12, 0.0  ;;  %v1272_v20 = vadd.f32 %v1271_v13, %v1270_v4 }
 0x142   :  { %v1181_v22 = vpack.c.bf16 %v869_v10, %v869_v10  ;;  %v830_v23 = vadd.f32 %v829_v15, %v669_v14 }
 0x143   :  { %1023 = vst.msk [vmem:[%s1887_s3 + $0x54] sm:$0xf] %vm1001_vm1, %v1174_v17  ;;  %v863_v24 = vmax.f32 %v803_v18, 0.0  ;;  %v1184_v31 = vpack.c.bf16 %v872_v19, %v872_v19  ;;  %v645_v25 = vadd.f32 %v1272_v20, %v1706_v42 }
 0x144   :  { %1030 = vst.msk [vmem:[%s1887_s3 + $0x70] sm:$0xf] %vm1001_vm1, %v1181_v22  ;;  %v870_v27 = vmax.f32 %v830_v23, 0.0 }
 0x145   :  { %v1175_v60 = vpack.c.bf16 %v863_v24, %v863_v24  ;;  %1033 = vst.msk [vmem:[%s1887_s3 + $0x7c] sm:$0xf] %vm1001_vm1, %v1184_v31  ;;  %v806_v16 = vadd.f32 %v1792_v5, %v645_v25 }
 0x146   :  { %v1182_v28 = vpack.c.bf16 %v870_v27, %v870_v27 }
 0x147   :  { %1024 = vst.msk [vmem:[%s1887_s3 + $0x58] sm:$0xf] %vm1001_vm1, %v1175_v60  ;;  %v864_v42 = vmax.f32 %v806_v16, 0.0 }
 0x148   :  { %1031 = vst.msk [vmem:[%s1887_s3 + $0x74] sm:$0xf] %vm1001_vm1, %v1182_v28 }
 0x149   :  { %v1176_v29 = vpack.c.bf16 %v864_v42, %v864_v42 }
 0x14b   :  { %1025 = vst.msk [vmem:[%s1887_s3 + $0x5c] sm:$0xf] %vm1001_vm1, %v1176_v29 }

// kernel: forward.10
= control target key start
LH: loop header
LB: loop body
LE: loop exit
PB: predicated region body
PF: predicated region fallthrough
CT: control target
= control target key end

     0   :  { %vm242_vm0 = vcmask 261120   ;;  %vm425_vm1 = vcmask 519168   ;;  %s746_s1 = inlined_call_operand.vmem [shape: bf16[288,64], index: 1, kind: input, shape index: {}]   ;;  %s747_s0 = inlined_call_operand.vmem [shape: bf16[64,288], index: 0, kind: input, shape index: {}]   ;;  %s748_s2 = inlined_call_operand.vmem [shape: f32[1,64], index: 2, kind: input, shape index: {}]   ;;  %s749_s3 = inlined_call_operand.vmem [shape: bf16[64,64], index: 3, kind: output, shape index: {}]  }
   0x1   :  { %v563_v0 = vld [vmem:[%s746_s1 + $0x78] sm:$0xff]   ;;  %v565_v2 = vld [vmem:[%s746_s1 + $0x70] sm:$0xff]   ;;  %v567_v4 = vld [vmem:[%s746_s1 + $0x68] sm:$0xff]  }
   0x2   :  { %v564_v1 = vld [vmem:[%s746_s1 + $0x38] sm:$0xff]   ;;  %489 = vmatprep.subr.bf16.mxu0 %v563_v0  ;;  %547 = vmatprep.subr.bf16.mxu1 %v563_v0  ;;  %v566_v3 = vld [vmem:[%s746_s1 + $0x30] sm:$0xff]   ;;  %v568_v5 = vld [vmem:[%s746_s1 + $0x28] sm:$0xff]  }
   0x3   :  { %490 = vmatpush3.bf16.msra.mxu0 %v564_v1  ;;  %555 = vmatpush3.bf16.msra.mxu1 %v564_v1  ;;  %v569_v6 = vld [vmem:[%s746_s1 + $0x60] sm:$0xff]   ;;  %v571_v8 = vld [vmem:[%s746_s1 + $0x58] sm:$0xff]   ;;  %v573_v10 = vld [vmem:[%s746_s1 + $0x50] sm:$0xff]  }
   0x4   :  { %491 = vmatprep.subr.bf16.mxu0 %v565_v2  ;;  %548 = vmatprep.subr.bf16.mxu1 %v565_v2  ;;  %v570_v7 = vld [vmem:[%s746_s1 + $0x20] sm:$0xff]   ;;  %v572_v9 = vld [vmem:[%s746_s1 + $0x18] sm:$0xff]   ;;  %v574_v13 = vld [vmem:[%s746_s1 + $0x10] sm:$0xff]  }
   0x5   :  { %v581_v11 = vld [vmem:[%s747_s0 + $0x4] ss:$12 sps:$4 sm:$0xff]   ;;  %v584_v12 = vld [vmem:[%s747_s0 + $0x4c] ss:$12 sps:$4 sm:$0xff]   ;;  %v582_v20 = vld [vmem:[%s747_s0 + $0x48] ss:$12 sps:$4 sm:$0xff]  }
   0x6   :  { %v575_v14 = vld [vmem:[%s746_s1 + $0x48] sm:$0xff]   ;;  %287 = vmatprep.mubr.bf16.mxu0 %v581_v11  ;;  %311 = vmatprep.mubr.bf16.mxu1 %v584_v12  ;;  %v577_v16 = vld [vmem:[%s746_s1 + $0x40] sm:$0xff]   ;;  %v595_v28 = vld [vmem:[%s747_s0 + $0x30] ss:$12 sps:$4 sm:$0xff]  }
   0x7   :  { %492 = vmatpush3.bf16.msra.mxu0 %v566_v3  ;;  %556 = vmatpush3.bf16.msra.mxu1 %v566_v3  ;;  %v576_v15 = vld [vmem:[%s746_s1 + $0x8] sm:$0xff]   ;;  %v578_v17 = vld [vmem:[%s746_s1] sm:$0xff]   ;;  %v596_v29 = vld [vmem:[%s747_s0 + $0x50] ss:$12 sps:$4 sm:$0xff]  }
   0x8   :  { %493 = vmatprep.subr.bf16.mxu0 %v567_v4  ;;  %549 = vmatprep.subr.bf16.mxu1 %v567_v4  ;;  %v585_v18 = vld [vmem:[%s746_s1 + $0x88] sm:$0xff]   ;;  %v586_v22 = vld [vmem:[%s746_s1 + $0x80] sm:$0xff]  }
   0x9   :  { %v579_v19 = vld [vmem:[%s747_s0] ss:$12 sps:$4 sm:$0xff]   ;;  %v587_v21 = vld [vmem:[%s747_s0 + $0x1c] ss:$12 sps:$4 sm:$0xff]   ;;  %v590_v24 = vld [vmem:[%s747_s0 + $0x18] ss:$12 sps:$4 sm:$0xff]  }
   0xa   :  { %v589_v23 = vld [vmem:[%s747_s0 + $0x8] ss:$12 sps:$4 sm:$0xff]   ;;  %v591_v25 = vld [vmem:[%s747_s0 + $0x20] ss:$12 sps:$4 sm:$0xff]   ;;  %v594_v27 = vld [vmem:[%s747_s0 + $0x38] ss:$12 sps:$4 sm:$0xff]  }
   0xb   :  { %494 = vmatpush3.bf16.msra.mxu0 %v568_v5  ;;  %557 = vmatpush3.bf16.msra.mxu1 %v568_v5  ;;  %v592_v26 = vld [vmem:[%s747_s0 + $0x34] ss:$12 sps:$4 sm:$0xff]  }
   0xc   :  { %495 = vmatprep.subr.bf16.mxu0 %v569_v6  ;;  %550 = vmatprep.subr.bf16.mxu1 %v569_v6  ;;  %v438_v39 = vld [vmem:[%s748_s2] ss:$0 sm:$0xff] }
   0xf   :  { %496 = vmatpush3.bf16.msra.mxu0 %v570_v7  ;;  %558 = vmatpush3.bf16.msra.mxu1 %v570_v7 }
  0x10   :  { %497 = vmatprep.subr.bf16.mxu0 %v571_v8  ;;  %551 = vmatprep.subr.bf16.mxu1 %v571_v8 }
  0x13   :  { %498 = vmatpush3.bf16.msra.mxu0 %v572_v9  ;;  %559 = vmatpush3.bf16.msra.mxu1 %v572_v9 }
  0x14   :  { %499 = vmatprep.subr.bf16.mxu0 %v573_v10  ;;  %552 = vmatprep.subr.bf16.mxu1 %v573_v10 }
  0x17   :  { %500 = vmatpush3.bf16.msra.mxu0 %v574_v13  ;;  %560 = vmatpush3.bf16.msra.mxu1 %v574_v13 }
  0x18   :  { %501 = vmatprep.subr.bf16.mxu0 %v575_v14  ;;  %553 = vmatprep.subr.bf16.mxu1 %v575_v14 }
  0x1b   :  { %502 = vmatpush3.bf16.msra.mxu0 %v576_v15  ;;  %561 = vmatpush3.bf16.msra.mxu1 %v576_v15 }
  0x1c   :  { %503 = vmatprep.subr.bf16.mxu0 %v577_v16  ;;  %554 = vmatprep.subr.bf16.mxu1 %v577_v16 }
  0x1f   :  { %504 = vmatpush3.bf16.msra.mxu0 %v578_v17  ;;  %562 = vmatpush3.bf16.msra.mxu1 %v578_v17 }
  0x20   :  { %535 = vmatprep.subr.bf16.mxu1 %v585_v18 }
  0x22   :  { %288 = vmatmul.mubr.bf16.vlgmr.msra.gmra.mxu0 %v579_v19  ;;  %312 = vmatmul.mubr.bf16.vlgmr.msra.gmra.mxu1 %v582_v20 }
  0x23   :  { %536 = vmatpush3.bf16.msra.mxu1 %v585_v18  ;;  %295 = vmatprep.mubr.bf16.mxu0 %v587_v21 }
  0x24   :  { %537 = vmatprep.subr.bf16.mxu1 %v586_v22  ;;  %539 = vmatprep.mubr.msk.bf16.mxu1 %vm242_vm0, %v589_v23 }
  0x27   :  { %538 = vmatpush3.bf16.msra.mxu1 %v586_v22 }
  0x2a   :  { %296 = vmatmul.mubr.bf16.gmra.mxu0 %v590_v24  ;;  %540 = vmatmul.mubr.msk.bf16.vlgmr.msra.gmra.mxu1 %vm242_vm0, %v591_v25 }
  0x2b   :  { %303 = vmatprep.mubr.bf16.mxu0 %v592_v26  ;;  %543 = vmatprep.mubr.msk.bf16.mxu1 %vm242_vm0, %v594_v27 }
  0x32   :  { %304 = vmatmul.mubr.bf16.gmra.mxu0 %v595_v28  ;;  %544 = vmatmul.mubr.msk.bf16.gmra.mxu1 %vm242_vm0, %v596_v29 }
  0xe2   :  { %v505_v30 = vpop.f32.mrf.mxu0  ;;  %v523_v31 = vpop.f32.mrf.mxu1 }
  0xe4   :  { %v506_v32 = vpop.f32.mrf.mxu0  ;;  %v524_v33 = vpop.f32.mrf.mxu1 }
  0xe5   :  { %v507_v36 = vadd.f32 %v506_v32, %v505_v30  ;;  %v525_v44 = vadd.f32 %v524_v33, %v523_v31 }
  0xe6   :  { %v508_v34 = vpop.f32.mrf.mxu0  ;;  %v526_v35 = vpop.f32.mrf.mxu1 }
  0xe7   :  { %v290_v43 = vadd.f32 %v507_v36, %v438_v39  ;;  %v314_v57 = vadd.f32 %v525_v44, %v438_v39 }
  0xe8   :  { %v509_v37 = vpop.f32.mrf.mxu0  ;;  %v527_v38 = vpop.f32.mrf.mxu1 }
  0xe9   :  { %v510_v42 = vadd.f32 %v509_v37, %v508_v34  ;;  %v528_v54 = vadd.f32 %v527_v38, %v526_v35 }
  0xea   :  { %v511_v40 = vpop.f32.mrf.mxu0  ;;  %v541_v41 = vpop.f32.mrf.mxu1 }
  0xeb   :  { %v293_v53 = vadd.f32 %v510_v42, %v438_v39  ;;  %v317_v6 = vadd.f32 %v528_v54, %v438_v39 }
  0xec   :  { %v512_v45 = vpop.f32.mrf.mxu0  ;;  %v354_v46 = vpop.f32.mrf.mxu1 }
  0xed   :  { %v513_v47 = vadd.f32 %v512_v45, %v511_v40  ;;  %v355_v48 = vadd.f32 %v354_v46, %v290_v43 }
  0xee   :  { %v514_v49 = vpop.f32.mrf.mxu0  ;;  %v542_v50 = vpop.f32.mrf.mxu1 }
  0xef   :  { %v298_v51 = vadd.f32 %v513_v47, %v438_v39  ;;  %v385_v52 = vmax.f32 %v355_v48, 0.0 }
  0xf0   :  { %v515_v55 = vpop.f32.mrf.mxu0  ;;  %v357_v56 = vpop.f32.mrf.mxu1 }
  0xf1   :  { %v363_v58 = vadd.f32 %v541_v41, %v298_v51  ;;  %v481_v59 = vpack.c.bf16 %v385_v52, %v385_v52  ;;  %v516_v60 = vadd.f32 %v515_v55, %v514_v49  ;;  %v358_v61 = vadd.f32 %v357_v56, %v293_v53 }
  0xf2   :  { %v517_v62 = vpop.f32.mrf.mxu0  ;;  %v545_v63 = vpop.f32.mrf.mxu1 }
  0xf3   :  { %v387_v0 = vmax.f32 %v363_v58, 0.0  ;;  %426 = vst.msk [vmem:[%s749_s3] sm:$0xf] %vm425_vm1, %v481_v59  ;;  %v301_v1 = vadd.f32 %v516_v60, %v438_v39  ;;  %v386_v2 = vmax.f32 %v358_v61, 0.0  ;;  %v379_v3 = vadd.f32 %v545_v63, %v314_v57 }
  0xf4   :  { %v518_v4 = vpop.f32.mrf.mxu0  ;;  %v370_v5 = vpop.f32.mrf.mxu1 }
  0xf5   :  { %v483_v7 = vpack.c.bf16 %v387_v0, %v387_v0  ;;  %v366_v8 = vadd.f32 %v542_v50, %v301_v1  ;;  %v482_v9 = vpack.c.bf16 %v386_v2, %v386_v2  ;;  %v391_v10 = vmax.f32 %v379_v3, 0.0 }
  0xf6   :  { %v519_v11 = vadd.f32 %v518_v4, %v517_v62  ;;  %v520_v12 = vpop.f32.mrf.mxu0  ;;  %v546_v13 = vpop.f32.mrf.mxu1 }
  0xf7   :  { %428 = vst.msk [vmem:[%s749_s3 + $0x8] sm:$0xf] %vm425_vm1, %v483_v7  ;;  %v388_v14 = vmax.f32 %v366_v8, 0.0  ;;  %427 = vst.msk [vmem:[%s749_s3 + $0x4] sm:$0xf] %vm425_vm1, %v482_v9  ;;  %v487_v15 = vpack.c.bf16 %v391_v10, %v391_v10  ;;  %v382_v16 = vadd.f32 %v546_v13, %v317_v6 }
  0xf8   :  { %v306_v17 = vadd.f32 %v519_v11, %v438_v39  ;;  %v521_v18 = vpop.f32.mrf.mxu0  ;;  %v373_v26 = vpop.f32.mrf.mxu1 }
  0xf9   :  { %v484_v19 = vpack.c.bf16 %v388_v14, %v388_v14  ;;  %432 = vst.msk [vmem:[%s749_s3 + $0x18] sm:$0xf] %vm425_vm1, %v487_v15  ;;  %v392_v20 = vmax.f32 %v382_v16, 0.0  ;;  %v522_v21 = vadd.f32 %v521_v18, %v520_v12 }
  0xfa   :  { %v371_v22 = vadd.f32 %v370_v5, %v306_v17 }
  0xfb   :  { %429 = vst.msk [vmem:[%s749_s3 + $0xc] sm:$0xf] %vm425_vm1, %v484_v19  ;;  %v488_v23 = vpack.c.bf16 %v392_v20, %v392_v20  ;;  %v309_v24 = vadd.f32 %v522_v21, %v438_v39 }
  0xfc   :  { %v389_v25 = vmax.f32 %v371_v22, 0.0 }
  0xfd   :  { %433 = vst.msk [vmem:[%s749_s3 + $0x1c] sm:$0xf] %vm425_vm1, %v488_v23  ;;  %v374_v27 = vadd.f32 %v373_v26, %v309_v24 }
  0xfe   :  { %v485_v28 = vpack.c.bf16 %v389_v25, %v389_v25 }
  0xff   :  { %v390_v29 = vmax.f32 %v374_v27, 0.0 }
 0x100   :  { %430 = vst.msk [vmem:[%s749_s3 + $0x10] sm:$0xf] %vm425_vm1, %v485_v28 }
 0x101   :  { %v486_v30 = vpack.c.bf16 %v390_v29, %v390_v29 }
 0x103   :  { %431 = vst.msk [vmem:[%s749_s3 + $0x14] sm:$0xf] %vm425_vm1, %v486_v30 }

// kernel: forward.11
= control target key start
LH: loop header
LB: loop body
LE: loop exit
PB: predicated region body
PF: predicated region fallthrough
CT: control target
= control target key end

     0   :  { %v638_v33 = vmov 0.0   ;;  %vm639_vm0 = vmmov 0   ;;  %vm341_vm1 = vcmask 523264   ;;  %vm478_vm2 = vcmask 519168   ;;  %s792_s1 = inlined_call_operand.vmem [shape: bf16[576,64], index: 1, kind: input, shape index: {}]   ;;  %s793_s0 = inlined_call_operand.vmem [shape: bf16[16,576], index: 0, kind: input, shape index: {}]   ;;  %s794_s2 = inlined_call_operand.vmem [shape: f32[1,64], index: 2, kind: input, shape index: {}]   ;;  %s795_s3 = inlined_call_operand.vmem [shape: bf16[16,64], index: 3, kind: output, shape index: {}]  }
   0x1   :  { %v595_v0 = vld [vmem:[%s792_s1 + $0x78] sm:$0xff]   ;;  %v599_v4 = vld [vmem:[%s792_s1 + $0x70] sm:$0xff]   ;;  %v603_v8 = vld [vmem:[%s792_s1 + $0x68] sm:$0xff]  }
   0x2   :  { %v596_v1 = vld [vmem:[%s792_s1 + $0x38] sm:$0xff]   ;;  %532 = vmatprep.subr.bf16.mxu0 %v595_v0  ;;  %v600_v5 = vld [vmem:[%s792_s1 + $0x30] sm:$0xff]   ;;  %v604_v9 = vld [vmem:[%s792_s1 + $0x28] sm:$0xff]  }
   0x3   :  { %v597_v2 = vld [vmem:[%s792_s1 + $0xf8] sm:$0xff]   ;;  %533 = vmatpush3.bf16.msra.mxu0 %v596_v1  ;;  %v601_v6 = vld [vmem:[%s792_s1 + $0xf0] sm:$0xff]   ;;  %v605_v10 = vld [vmem:[%s792_s1 + $0xe8] sm:$0xff]  }
   0x4   :  { %v598_v3 = vld [vmem:[%s792_s1 + $0xb8] sm:$0xff]   ;;  %554 = vmatprep.subr.bf16.mxu1 %v597_v2  ;;  %534 = vmatprep.subr.bf16.mxu0 %v599_v4  ;;  %v602_v7 = vld [vmem:[%s792_s1 + $0xb0] sm:$0xff]   ;;  %v606_v11 = vld [vmem:[%s792_s1 + $0xa8] sm:$0xff]  }
   0x5   :  { %555 = vmatpush3.bf16.msra.mxu1 %v598_v3  ;;  %v607_v12 = vld [vmem:[%s792_s1 + $0x60] sm:$0xff]   ;;  %v611_v16 = vld [vmem:[%s792_s1 + $0x58] sm:$0xff]   ;;  %v615_v20 = vld [vmem:[%s792_s1 + $0x50] sm:$0xff]  }
   0x6   :  { %556 = vmatprep.subr.bf16.mxu1 %v601_v6  ;;  %v608_v13 = vld [vmem:[%s792_s1 + $0x20] sm:$0xff]   ;;  %v612_v17 = vld [vmem:[%s792_s1 + $0x18] sm:$0xff]   ;;  %v616_v21 = vld [vmem:[%s792_s1 + $0x10] sm:$0xff]  }
   0x7   :  { %535 = vmatpush3.bf16.msra.mxu0 %v600_v5  ;;  %v609_v14 = vld [vmem:[%s792_s1 + $0xe0] sm:$0xff]   ;;  %v613_v18 = vld [vmem:[%s792_s1 + $0xd8] sm:$0xff]   ;;  %v617_v22 = vld [vmem:[%s792_s1 + $0xd0] sm:$0xff]  }
   0x8   :  { %536 = vmatprep.subr.bf16.mxu0 %v603_v8  ;;  %v610_v15 = vld [vmem:[%s792_s1 + $0xa0] sm:$0xff]   ;;  %v614_v19 = vld [vmem:[%s792_s1 + $0x98] sm:$0xff]   ;;  %v618_v23 = vld [vmem:[%s792_s1 + $0x90] sm:$0xff]  }
   0x9   :  { %557 = vmatpush3.bf16.msra.mxu1 %v602_v7  ;;  %v619_v24 = vld [vmem:[%s792_s1 + $0x48] sm:$0xff]   ;;  %v623_v28 = vld [vmem:[%s792_s1 + $0x40] sm:$0xff]   ;;  %v633_v37 = vld [vmem:[%s792_s1 + $0x118] sm:$0xff]  }
   0xa   :  { %558 = vmatprep.subr.bf16.mxu1 %v605_v10  ;;  %v620_v25 = vld [vmem:[%s792_s1 + $0x8] sm:$0xff]   ;;  %v624_v29 = vld [vmem:[%s792_s1] sm:$0xff]   ;;  %v634_v38 = vld [vmem:[%s792_s1 + $0x110] sm:$0xff]  }
   0xb   :  { %537 = vmatpush3.bf16.msra.mxu0 %v604_v9  ;;  %v621_v26 = vld [vmem:[%s792_s1 + $0xc8] sm:$0xff]   ;;  %v625_v30 = vld [vmem:[%s792_s1 + $0xc0] sm:$0xff]  }
   0xc   :  { %538 = vmatprep.subr.bf16.mxu0 %v607_v12  ;;  %v622_v27 = vld [vmem:[%s792_s1 + $0x88] sm:$0xff]   ;;  %v626_v31 = vld [vmem:[%s793_s0] ss:$20 sps:$4 sm:$0xff]   ;;  %v628_v32 = vld [vmem:[%s793_s0 + $0x4] ss:$20 sps:$4 sm:$0xff]  }
   0xd   :  { %559 = vmatpush3.bf16.msra.mxu1 %v606_v11  ;;  %v629_v34 = vld [vmem:[%s792_s1 + $0x80] sm:$0xff]   ;;  %377 = vmatprep.mubr.bf16.mxu0 %v628_v32  ;;  %v630_v35 = vld [vmem:[%s793_s0 + $0x8] ss:$20 sps:$4 sm:$0xff]  }
   0xe   :  { %560 = vmatprep.subr.bf16.mxu1 %v609_v14  ;;  %v632_v36 = vld [vmem:[%s793_s0 + $0xc] ss:$20 sps:$4 sm:$0xff]   ;;  %v637_v41 = vld [vmem:[%s793_s0 + $0x10] ss:$20 sps:$4 sm:$0xff]  }
   0xf   :  { %539 = vmatpush3.bf16.msra.mxu0 %v608_v13  ;;  %418 = vmatprep.mubr.bf16.mxu1 %v632_v36  ;;  %v635_v39 = vld [vmem:[%s792_s1 + $0x108] sm:$0xff]   ;;  %v636_v40 = vld [vmem:[%s792_s1 + $0x100] sm:$0xff]  }
  0x10   :  { %540 = vmatprep.subr.bf16.mxu0 %v611_v16  ;;  %v485_v48 = vld [vmem:[%s794_s2] ss:$0 sm:$0xff] }
  0x11   :  { %561 = vmatpush3.bf16.msra.mxu1 %v610_v15 }
  0x12   :  { %562 = vmatprep.subr.bf16.mxu1 %v613_v18 }
  0x13   :  { %541 = vmatpush3.bf16.msra.mxu0 %v612_v17 }
  0x14   :  { %542 = vmatprep.subr.bf16.mxu0 %v615_v20 }
  0x15   :  { %563 = vmatpush3.bf16.msra.mxu1 %v614_v19 }
  0x16   :  { %564 = vmatprep.subr.bf16.mxu1 %v617_v22 }
  0x17   :  { %543 = vmatpush3.bf16.msra.mxu0 %v616_v21 }
  0x18   :  { %544 = vmatprep.subr.bf16.mxu0 %v619_v24 }
  0x19   :  { %565 = vmatpush3.bf16.msra.mxu1 %v618_v23 }
  0x1a   :  { %566 = vmatprep.subr.bf16.mxu1 %v621_v26 }
  0x1b   :  { %545 = vmatpush3.bf16.msra.mxu0 %v620_v25 }
  0x1c   :  { %546 = vmatprep.subr.bf16.mxu0 %v623_v28 }
  0x1d   :  { %567 = vmatpush3.bf16.msra.mxu1 %v622_v27 }
  0x1e   :  { %568 = vmatprep.subr.bf16.mxu1 %v625_v30 }
  0x1f   :  { %547 = vmatpush3.bf16.msra.mxu0 %v624_v29 }
  0x20   :  { %581 = vmatprep.subr.bf16.mxu0 %v638_v33 }
  0x21   :  { %569 = vmatpush3.bf16.msra.mxu1 %v629_v34 }
  0x22   :  { %378 = vmatmul.mubr.bf16.vlgmr.msra.gmra.mxu0 %v626_v31 }
  0x23   :  { %589 = vmatprep.mubr.msk.bf16.mxu0 %vm639_vm0, %v638_v33  ;;  %582 = vmatpush3.bf16.msra.mxu0 %v633_v37 }
  0x24   :  { %419 = vmatmul.mubr.bf16.vlgmr.msra.gmra.mxu1 %v630_v35  ;;  %583 = vmatprep.subr.bf16.mxu0 %v638_v33 }
  0x27   :  { %584 = vmatpush3.bf16.msra.mxu0 %v634_v38 }
  0x28   :  { %585 = vmatprep.subr.bf16.mxu0 %v638_v33 }
  0x2b   :  { %586 = vmatpush3.bf16.msra.mxu0 %v635_v39 }
  0x2c   :  { %587 = vmatprep.subr.bf16.mxu0 %v638_v33 }
  0x2f   :  { %588 = vmatpush3.bf16.msra.mxu0 %v636_v40 }
  0x32   :  { %590 = vmatmul.mubr.msk.bf16.vlgmr.msra.gmra.mxu0 %vm341_vm1, %v637_v41 }
  0xe2   :  { %v548_v42 = vpop.f32.mrf.mxu0 }
  0xe4   :  { %v549_v43 = vpop.f32.mrf.mxu0  ;;  %v570_v44 = vpop.f32.mrf.mxu1 }
  0xe5   :  { %v550_v47 = vadd.f32 %v549_v43, %v548_v42 }
  0xe6   :  { %v551_v45 = vpop.f32.mrf.mxu0  ;;  %v571_v46 = vpop.f32.mrf.mxu1 }
  0xe7   :  { %v380_v51 = vadd.f32 %v550_v47, %v485_v48  ;;  %v572_v52 = vadd.f32 %v571_v46, %v570_v44 }
  0xe8   :  { %v552_v49 = vpop.f32.mrf.mxu0  ;;  %v573_v50 = vpop.f32.mrf.mxu1 }
  0xe9   :  { %v553_v53 = vadd.f32 %v552_v49, %v551_v45  ;;  %v421_v57 = vadd.f32 %v572_v52, %v380_v51 }
  0xea   :  { %v574_v54 = vpop.f32.mrf.mxu1 }
  0xeb   :  { %v383_v55 = vadd.f32 %v553_v53, %v485_v48  ;;  %v575_v56 = vadd.f32 %v574_v54, %v573_v50 }
  0xed   :  { %v424_v62 = vadd.f32 %v575_v56, %v383_v55 }
  0xf2   :  { %v461_v58 = vpop.f32.mrf.mxu0 }
  0xf3   :  { %v462_v59 = vadd.f32 %v461_v58, %v421_v57 }
  0xf4   :  { %v591_v60 = vpop.f32.mrf.mxu0 }
  0xf5   :  { %v468_v61 = vmax.f32 %v462_v59, 0.0 }
  0xf6   :  { %v464_v63 = vpop.f32.mrf.mxu0 }
  0xf7   :  { %v530_v0 = vpack.c.bf16 %v468_v61, %v468_v61  ;;  %v465_v1 = vadd.f32 %v464_v63, %v424_v62 }
  0xf8   :  { %v592_v2 = vpop.f32.mrf.mxu0 }
  0xf9   :  { %479 = vst.msk [vmem:[%s795_s3] sm:$0xf] %vm478_vm2, %v530_v0  ;;  %v469_v3 = vmax.f32 %v465_v1, 0.0 }
  0xfb   :  { %v531_v4 = vpack.c.bf16 %v469_v3, %v469_v3 }
  0xfd   :  { %480 = vst.msk [vmem:[%s795_s3 + $0x4] sm:$0xf] %vm478_vm2, %v531_v4 }

// kernel: forward.9
= control target key start
LH: loop header
LB: loop body
LE: loop exit
PB: predicated region body
PF: predicated region fallthrough
CT: control target
= control target key end

     0   :  { %vm171_vm0 = vcmask 261120   ;;  %s1393_s1 = inlined_call_operand.vmem [shape: bf16[32,128], index: 1, kind: input, shape index: {}]   ;;  %s1394_s0 = inlined_call_operand.vmem [shape: bf16[256,32], index: 0, kind: input, shape index: {}]   ;;  %s1395_s3 = inlined_call_operand.vmem [shape: bf16[128,128], index: 3, kind: input, shape index: {}]   ;;  %s1396_s2 = inlined_call_operand.vmem [shape: f32[1,128], index: 2, kind: input, shape index: {}]   ;;  %s1397_s5 = inlined_call_operand.vmem [shape: bf16[1,128], index: 5, kind: input, shape index: {}]   ;;  %s1398_s4 = inlined_call_operand.vmem [shape: f32[1,128], index: 4, kind: input, shape index: {}]   ;;  %s1399_s6 = inlined_call_operand.<no memory space> [shape: f32[1,1], index: 6, kind: input, shape index: {}]   ;;  %s1400_s8 = inlined_call_operand.vmem [shape: f32[1,128], index: 8, kind: output, shape index: {1}]   ;;  %s1401_s7 = inlined_call_operand.vmem [shape: f32[1,256], index: 7, kind: output, shape index: {0}]  }
   0x1   :  { %v1040_v0 = vld [vmem:[%s1393_s1 + $0x8] sm:$0xff]   ;;  %v1041_v1 = vld [vmem:[%s1393_s1] sm:$0xff]   ;;  %v1044_v4 = vld [vmem:[%s1394_s0 + $0x10] sm:$0xff]  }
   0x2   :  { %952 = vmatprep.subr.bf16.mxu0 %v1040_v0  ;;  %v1042_v2 = vld [vmem:[%s1394_s0] sm:$0xff]   ;;  %v1043_v3 = vld [vmem:[%s1394_s0 + $0x8] sm:$0xff]   ;;  %v1045_v5 = vld [vmem:[%s1394_s0 + $0x18] sm:$0xff]  }
   0x3   :  { %953 = vmatpush3.bf16.msra.mxu0 %v1040_v0  ;;  %956 = vmatprep.mubr.msk.bf16.mxu0 %vm171_vm0, %v1042_v2  ;;  %v1046_v6 = vld [vmem:[%s1394_s0 + $0x20] sm:$0xff]   ;;  %v1058_v7 = vld [vmem:[%s1395_s3 + $0x38] sm:$0xff]   ;;  %v1059_v8 = vld [vmem:[%s1395_s3 + $0x30] sm:$0xff]  }
   0x4   :  { %954 = vmatprep.subr.bf16.mxu0 %v1041_v1  ;;  %v1047_v9 = vld [vmem:[%s1394_s0 + $0x28] sm:$0xff]   ;;  %988 = vmatprep.subr.bf16.mxu1 %v1058_v7  ;;  %v1048_v10 = vld [vmem:[%s1394_s0 + $0x30] sm:$0xff]   ;;  %v1061_v12 = vld [vmem:[%s1395_s3 + $0x20] sm:$0xff]  }
   0x5   :  { %989 = vmatpush3.bf16.msra.mxu1 %v1058_v7  ;;  %v1060_v11 = vld [vmem:[%s1395_s3 + $0x28] sm:$0xff]   ;;  %v1049_v13 = vld [vmem:[%s1394_s0 + $0x38] sm:$0xff]   ;;  %v1050_v15 = vld [vmem:[%s1394_s0 + $0x40] sm:$0xff]  }
   0x6   :  { %990 = vmatprep.subr.bf16.mxu1 %v1059_v8  ;;  %v1062_v14 = vld [vmem:[%s1395_s3 + $0x18] sm:$0xff]   ;;  %v1051_v16 = vld [vmem:[%s1394_s0 + $0x48] sm:$0xff]   ;;  %v1052_v17 = vld [vmem:[%s1394_s0 + $0x50] sm:$0xff]  }
   0x7   :  { %955 = vmatpush3.bf16.msra.mxu0 %v1041_v1  ;;  %v1053_v18 = vld [vmem:[%s1394_s0 + $0x58] sm:$0xff]   ;;  %v1054_v19 = vld [vmem:[%s1394_s0 + $0x60] sm:$0xff]   ;;  %v1055_v20 = vld [vmem:[%s1394_s0 + $0x68] sm:$0xff]  }
   0x8   :  { %v1056_v21 = vld [vmem:[%s1394_s0 + $0x70] sm:$0xff]   ;;  %v1057_v22 = vld [vmem:[%s1394_s0 + $0x78] sm:$0xff]   ;;  %v1064_v24 = vld [vmem:[%s1395_s3 + $0x8] sm:$0xff]  }
   0x9   :  { %991 = vmatpush3.bf16.msra.mxu1 %v1059_v8  ;;  %v1063_v23 = vld [vmem:[%s1395_s3 + $0x10] sm:$0xff]   ;;  %v1065_v25 = vld [vmem:[%s1395_s3] sm:$0xff]  }
   0xa   :  { %957 = vmatmul.mubr.msk.bf16.vlgmr.msra.gmra.mxu0 %vm171_vm0, %v1043_v3  ;;  %992 = vmatprep.subr.bf16.mxu1 %v1060_v11  ;;  %v1219_v28 = vld [vmem:[%s1396_s2] ss:$0 sm:$0xff] }
   0xb   :  { %960 = vmatprep.mubr.msk.bf16.mxu0 %vm171_vm0, %v1044_v4 }
   0xd   :  { %993 = vmatpush3.bf16.msra.mxu1 %v1060_v11 }
   0xe   :  { %994 = vmatprep.subr.bf16.mxu1 %v1061_v12 }
  0x11   :  { %995 = vmatpush3.bf16.msra.mxu1 %v1061_v12 }
  0x12   :  { %961 = vmatmul.mubr.msk.bf16.gmra.mxu0 %vm171_vm0, %v1045_v5  ;;  %996 = vmatprep.subr.bf16.mxu1 %v1062_v14 }
  0x13   :  { %964 = vmatprep.mubr.msk.bf16.mxu0 %vm171_vm0, %v1046_v6 }
  0x15   :  { %997 = vmatpush3.bf16.msra.mxu1 %v1062_v14 }
  0x16   :  { %998 = vmatprep.subr.bf16.mxu1 %v1063_v23 }
  0x19   :  { %999 = vmatpush3.bf16.msra.mxu1 %v1063_v23 }
  0x1a   :  { %965 = vmatmul.mubr.msk.bf16.gmra.mxu0 %vm171_vm0, %v1047_v9  ;;  %1000 = vmatprep.subr.bf16.mxu1 %v1064_v24 }
  0x1b   :  { %968 = vmatprep.mubr.msk.bf16.mxu0 %vm171_vm0, %v1048_v10 }
  0x1d   :  { %1001 = vmatpush3.bf16.msra.mxu1 %v1064_v24 }
  0x1e   :  { %1002 = vmatprep.subr.bf16.mxu1 %v1065_v25 }
  0x21   :  { %1003 = vmatpush3.bf16.msra.mxu1 %v1065_v25 }
  0x22   :  { %969 = vmatmul.mubr.msk.bf16.gmra.mxu0 %vm171_vm0, %v1049_v13 }
  0x23   :  { %972 = vmatprep.mubr.msk.bf16.mxu0 %vm171_vm0, %v1050_v15 }
  0x2a   :  { %973 = vmatmul.mubr.msk.bf16.gmra.mxu0 %vm171_vm0, %v1051_v16 }
  0x2b   :  { %976 = vmatprep.mubr.msk.bf16.mxu0 %vm171_vm0, %v1052_v17 }
  0x32   :  { %977 = vmatmul.mubr.msk.bf16.gmra.mxu0 %vm171_vm0, %v1053_v18 }
  0x33   :  { %980 = vmatprep.mubr.msk.bf16.mxu0 %vm171_vm0, %v1054_v19 }
  0x3a   :  { %981 = vmatmul.mubr.msk.bf16.gmra.mxu0 %vm171_vm0, %v1055_v20 }
  0x3b   :  { %984 = vmatprep.mubr.msk.bf16.mxu0 %vm171_vm0, %v1056_v21 }
  0x42   :  { %985 = vmatmul.mubr.msk.bf16.gmra.mxu0 %vm171_vm0, %v1057_v22 }
  0xca   :  { %v958_v26 = vpop.f32.mrf.mxu0 }
  0xcb   :  { %v263_v32 = vadd.f32 %v958_v26, %v1219_v28 }
  0xcc   :  { %v254_v27 = vpop.f32.mrf.mxu0 }
  0xcd   :  { %v255_v30 = vadd.f32 %v1219_v28, %v254_v27  ;;  %v383_v39 = vmax.f32 %v263_v32, 0.0 }
  0xce   :  { %v959_v29 = vpop.f32.mrf.mxu0 }
  0xcf   :  { %v266_v31 = vadd.f32 %v959_v29, %v1219_v28  ;;  %v381_v37 = vmax.f32 %v255_v30, 0.0 }
  0xd0   :  { %v257_v33 = vpop.f32.mrf.mxu0 }
  0xd1   :  { %v258_v34 = vadd.f32 %v1219_v28, %v257_v33  ;;  %v384_v35 = vmax.f32 %v266_v31, 0.0 }
  0xd2   :  { %v962_v36 = vpop.f32.mrf.mxu0 }
  0xd3   :  { %v382_v38 = vmax.f32 %v258_v34, 0.0  ;;  %v414_v42 = vpack.c.bf16 %v384_v35, %v383_v39  ;;  %v279_v46 = vadd.f32 %v962_v36, %v1219_v28 }
  0xd4   :  { %v270_v40 = vpop.f32.mrf.mxu0 }
  0xd5   :  { %v413_v41 = vpack.c.bf16 %v382_v38, %v381_v37  ;;  %v271_v44 = vadd.f32 %v1219_v28, %v270_v40  ;;  %v387_v53 = vmax.f32 %v279_v46, 0.0 }
  0xd6   :  { %v963_v43 = vpop.f32.mrf.mxu0 }
  0xd7   :  { %v282_v45 = vadd.f32 %v963_v43, %v1219_v28  ;;  %1004 = vmatprep.mubr.bf16.mxu1 %v413_v41  ;;  %v385_v51 = vmax.f32 %v271_v44, 0.0 }
  0xd8   :  { %v273_v47 = vpop.f32.mrf.mxu0  ;;  %1005 = vmatmul.mubr.bf16.vlgmr.msra.gmra.mxu1 %v414_v42 }
  0xd9   :  { %v274_v48 = vadd.f32 %v1219_v28, %v273_v47  ;;  %v388_v49 = vmax.f32 %v282_v45, 0.0 }
  0xda   :  { %v966_v50 = vpop.f32.mrf.mxu0 }
  0xdb   :  { %v386_v52 = vmax.f32 %v274_v48, 0.0  ;;  %v416_v56 = vpack.c.bf16 %v388_v49, %v387_v53  ;;  %v295_v60 = vadd.f32 %v966_v50, %v1219_v28 }
  0xdc   :  { %v286_v54 = vpop.f32.mrf.mxu0 }
  0xdd   :  { %v415_v55 = vpack.c.bf16 %v386_v52, %v385_v51  ;;  %v287_v58 = vadd.f32 %v1219_v28, %v286_v54  ;;  %v391_v3 = vmax.f32 %v295_v60, 0.0 }
  0xde   :  { %v967_v57 = vpop.f32.mrf.mxu0 }
  0xdf   :  { %v298_v59 = vadd.f32 %v967_v57, %v1219_v28  ;;  %1008 = vmatprep.mubr.bf16.mxu1 %v415_v55  ;;  %v389_v1 = vmax.f32 %v287_v58, 0.0 }
  0xe0   :  { %v289_v61 = vpop.f32.mrf.mxu0  ;;  %1009 = vmatmul.mubr.bf16.gmra.mxu1 %v416_v56 }
  0xe1   :  { %v290_v62 = vadd.f32 %v1219_v28, %v289_v61  ;;  %v392_v63 = vmax.f32 %v298_v59, 0.0 }
  0xe2   :  { %v970_v0 = vpop.f32.mrf.mxu0 }
  0xe3   :  { %v390_v2 = vmax.f32 %v290_v62, 0.0  ;;  %v418_v6 = vpack.c.bf16 %v392_v63, %v391_v3  ;;  %v311_v10 = vadd.f32 %v970_v0, %v1219_v28 }
  0xe4   :  { %v302_v4 = vpop.f32.mrf.mxu0 }
  0xe5   :  { %v417_v5 = vpack.c.bf16 %v390_v2, %v389_v1  ;;  %v303_v8 = vadd.f32 %v1219_v28, %v302_v4  ;;  %v395_v17 = vmax.f32 %v311_v10, 0.0 }
  0xe6   :  { %v971_v7 = vpop.f32.mrf.mxu0 }
  0xe7   :  { %v314_v9 = vadd.f32 %v971_v7, %v1219_v28  ;;  %1012 = vmatprep.mubr.bf16.mxu1 %v417_v5  ;;  %v393_v15 = vmax.f32 %v303_v8, 0.0 }
  0xe8   :  { %v305_v11 = vpop.f32.mrf.mxu0  ;;  %1013 = vmatmul.mubr.bf16.gmra.mxu1 %v418_v6 }
  0xe9   :  { %v306_v12 = vadd.f32 %v1219_v28, %v305_v11  ;;  %v396_v13 = vmax.f32 %v314_v9, 0.0 }
  0xea   :  { %v974_v14 = vpop.f32.mrf.mxu0 }
  0xeb   :  { %v394_v16 = vmax.f32 %v306_v12, 0.0  ;;  %v420_v20 = vpack.c.bf16 %v396_v13, %v395_v17  ;;  %v327_v24 = vadd.f32 %v974_v14, %v1219_v28  ;;  %v1074_v12 = vmov 0.0   ;;  %v1256_v13 = vld [vmem:[%s1397_s5] sm:$0x1] }
  0xec   :  { %v318_v18 = vpop.f32.mrf.mxu0  ;;  %35 = vst [vmem:[#allocation2] sm:$0x1] %v1074_v12  ;;  %950 = vmatprep.mubr.bf16.mxu0 %v1256_v13 }
  0xed   :  { %v419_v19 = vpack.c.bf16 %v394_v16, %v393_v15  ;;  %v319_v22 = vadd.f32 %v1219_v28, %v318_v18  ;;  %v399_v32 = vmax.f32 %v327_v24, 0.0  ;;  %v1075_v18 = vmov 0  }
  0xee   :  { %v975_v21 = vpop.f32.mrf.mxu0  ;;  %1039 = vset.pattern.permute.xlu0 %v1075_v18 }
  0xef   :  { %v330_v23 = vadd.f32 %v975_v21, %v1219_v28  ;;  %1016 = vmatprep.mubr.bf16.mxu1 %v419_v19  ;;  %v397_v30 = vmax.f32 %v319_v22, 0.0  ;;  %v14_v19 = vstv %s1399_s6 }
  0xf0   :  { %v321_v25 = vpop.f32.mrf.mxu0  ;;  %1017 = vmatmul.mubr.bf16.gmra.mxu1 %v420_v20  ;;  %15 = vst [vmem:[#allocation3] sm:$0x1] %v14_v19 }
  0xf1   :  { %v322_v26 = vadd.f32 %v1219_v28, %v321_v25  ;;  %v400_v27 = vmax.f32 %v330_v23, 0.0 }
  0xf2   :  { %v978_v29 = vpop.f32.mrf.mxu0 }
  0xf3   :  { %v398_v31 = vmax.f32 %v322_v26, 0.0  ;;  %v422_v35 = vpack.c.bf16 %v400_v27, %v399_v32  ;;  %v343_v39 = vadd.f32 %v978_v29, %v1219_v28 }
  0xf4   :  { %v334_v33 = vpop.f32.mrf.mxu0 }
  0xf5   :  { %v421_v34 = vpack.c.bf16 %v398_v31, %v397_v30  ;;  %v335_v37 = vadd.f32 %v1219_v28, %v334_v33  ;;  %v403_v46 = vmax.f32 %v343_v39, 0.0 }
  0xf6   :  { %v979_v36 = vpop.f32.mrf.mxu0 }
  0xf7   :  { %v346_v38 = vadd.f32 %v979_v36, %v1219_v28  ;;  %1020 = vmatprep.mubr.bf16.mxu1 %v421_v34  ;;  %v401_v44 = vmax.f32 %v335_v37, 0.0  ;;  %v750_v37 = vld [vmem:[#allocation3] sm:$0x1] }
  0xf8   :  { %v337_v40 = vpop.f32.mrf.mxu0  ;;  %1021 = vmatmul.mubr.bf16.gmra.mxu1 %v422_v35  ;;  %753 = vperm.xlu0 %1039, %v750_v37  }
  0xf9   :  { %v338_v41 = vadd.f32 %v1219_v28, %v337_v40  ;;  %v404_v42 = vmax.f32 %v346_v38, 0.0 }
  0xfa   :  { %v982_v43 = vpop.f32.mrf.mxu0 }
  0xfb   :  { %v402_v45 = vmax.f32 %v338_v41, 0.0  ;;  %v424_v49 = vpack.c.bf16 %v404_v42, %v403_v46  ;;  %v359_v53 = vadd.f32 %v982_v43, %v1219_v28 }
  0xfc   :  { %v350_v47 = vpop.f32.mrf.mxu0 }
  0xfd   :  { %v423_v48 = vpack.c.bf16 %v402_v45, %v401_v44  ;;  %v351_v51 = vadd.f32 %v1219_v28, %v350_v47  ;;  %v407_v60 = vmax.f32 %v359_v53, 0.0 }
  0xfe   :  { %v983_v50 = vpop.f32.mrf.mxu0 }
  0xff   :  { %v362_v52 = vadd.f32 %v983_v50, %v1219_v28  ;;  %1024 = vmatprep.mubr.bf16.mxu1 %v423_v48  ;;  %v405_v58 = vmax.f32 %v351_v51, 0.0 }
 0x100   :  { %v353_v54 = vpop.f32.mrf.mxu0  ;;  %1025 = vmatmul.mubr.bf16.gmra.mxu1 %v424_v49 }
 0x101   :  { %v354_v55 = vadd.f32 %v1219_v28, %v353_v54  ;;  %v408_v56 = vmax.f32 %v362_v52, 0.0 }
 0x102   :  { %v986_v57 = vpop.f32.mrf.mxu0 }
 0x103   :  { %v406_v59 = vmax.f32 %v354_v55, 0.0  ;;  %v426_v63 = vpack.c.bf16 %v408_v56, %v407_v60  ;;  %v375_v3 = vadd.f32 %v986_v57, %v1219_v28 }
 0x104   :  { %v366_v61 = vpop.f32.mrf.mxu0 }
 0x105   :  { %v425_v62 = vpack.c.bf16 %v406_v59, %v405_v58  ;;  %v367_v1 = vadd.f32 %v1219_v28, %v366_v61  ;;  %v411_v9 = vmax.f32 %v375_v3, 0.0 }
 0x106   :  { %v987_v0 = vpop.f32.mrf.mxu0 }
 0x107   :  { %v378_v2 = vadd.f32 %v987_v0, %v1219_v28  ;;  %1028 = vmatprep.mubr.bf16.mxu1 %v425_v62  ;;  %v409_v7 = vmax.f32 %v367_v1, 0.0 }
 0x108   :  { %v369_v4 = vpop.f32.mrf.mxu0  ;;  %1029 = vmatmul.mubr.bf16.gmra.mxu1 %v426_v63 }
 0x109   :  { %v370_v5 = vadd.f32 %v1219_v28, %v369_v4  ;;  %v412_v6 = vmax.f32 %v378_v2, 0.0  ;;  %v1262_v28 = vld [vmem:[%s1398_s4] ss:$0 sm:$0xff] }
 0x10b   :  { %v410_v8 = vmax.f32 %v370_v5, 0.0  ;;  %v428_v11 = vpack.c.bf16 %v412_v6, %v411_v9 }
 0x10d   :  { %v427_v10 = vpack.c.bf16 %v410_v8, %v409_v7 }
 0x10f   :  { %1032 = vmatprep.mubr.bf16.mxu1 %v427_v10 }
 0x110   :  { %1033 = vmatmul.mubr.bf16.gmra.mxu1 %v428_v11 }
 0x198   :  { %v1006_v14 = vpop.f32.mrf.mxu1 }
 0x199   :  { %v543_v16 = vadd.f32 %v1006_v14, %v1262_v28 }
 0x19a   :  { %v534_v15 = vpop.f32.mrf.mxu1 }
 0x19b   :  { %v535_v20 = vadd.f32 %v1262_v28, %v534_v15  ;;  %v663_v23 = vmax.f32 %v543_v16, 0.0 }
 0x19c   :  { %v1007_v17 = vpop.f32.mrf.mxu1 }
 0x19d   :  { %v546_v21 = vadd.f32 %v1007_v17, %v1262_v28  ;;  %v661_v27 = vmax.f32 %v535_v20, 0.0 }
 0x19e   :  { %v537_v22 = vpop.f32.mrf.mxu1 }
 0x19f   :  { %v664_v24 = vmax.f32 %v546_v21, 0.0  ;;  %v538_v25 = vadd.f32 %v1262_v28, %v537_v22 }
 0x1a0   :  { %v1010_v26 = vpop.f32.mrf.mxu1 }
 0x1a1   :  { %v1271_v29 = vpack.c.bf16 %v664_v24, %v663_v23  ;;  %v662_v30 = vmax.f32 %v538_v25, 0.0  ;;  %v559_v31 = vadd.f32 %v1010_v26, %v1262_v28 }
 0x1a2   :  { %v550_v32 = vpop.f32.mrf.mxu1 }
 0x1a3   :  { %v694_v33 = vadd.f32 %v662_v30, %v661_v27  ;;  %v1274_v34 = vpack.c.bf16 %v662_v30, %v661_v27  ;;  %v551_v35 = vadd.f32 %v1262_v28, %v550_v32  ;;  %v667_v40 = vmax.f32 %v559_v31, 0.0 }
 0x1a4   :  { %v1011_v36 = vpop.f32.mrf.mxu1 }
 0x1a5   :  { %v695_v38 = vadd.f32 %v694_v33, %v663_v23  ;;  %v562_v39 = vadd.f32 %v1011_v36, %v1262_v28  ;;  %v665_v42 = vmax.f32 %v551_v35, 0.0 }
 0x1a6   :  { %v553_v41 = vpop.f32.mrf.mxu1 }
 0x1a7   :  { %v696_v43 = vadd.f32 %v695_v38, %v664_v24  ;;  %v668_v44 = vmax.f32 %v562_v39, 0.0  ;;  %v554_v45 = vadd.f32 %v1262_v28, %v553_v41 }
 0x1a8   :  { %v1014_v46 = vpop.f32.mrf.mxu1 }
 0x1a9   :  { %v697_v47 = vadd.f32 %v696_v43, %v665_v42  ;;  %v1279_v48 = vpack.c.bf16 %v668_v44, %v667_v40  ;;  %v666_v49 = vmax.f32 %v554_v45, 0.0  ;;  %v1285_v57 = vadd.f32 %v1014_v46, %v1262_v28 }
 0x1aa   :  { %v566_v50 = vpop.f32.mrf.mxu1 }
 0x1ab   :  { %v698_v51 = vadd.f32 %v697_v47, %v666_v49  ;;  %v1281_v52 = vpack.c.bf16 %v666_v49, %v665_v42  ;;  %v567_v53 = vadd.f32 %v1262_v28, %v566_v50  ;;  %v671_v2 = vmax.f32 %v1285_v57, 0.0 }
 0x1ac   :  { %v1015_v54 = vpop.f32.mrf.mxu1 }
 0x1ad   :  { %v699_v55 = vadd.f32 %v698_v51, %v667_v40  ;;  %v669_v58 = vmax.f32 %v567_v53, 0.0  ;;  %v1289_v63 = vadd.f32 %v1015_v54, %v1262_v28 }
 0x1ae   :  { %v569_v56 = vpop.f32.mrf.mxu1 }
 0x1af   :  { %v700_v59 = vadd.f32 %v699_v55, %v668_v44  ;;  %v570_v60 = vadd.f32 %v1262_v28, %v569_v56  ;;  %v672_v7 = vmax.f32 %v1289_v63, 0.0 }
 0x1b0   :  { %v1018_v61 = vpop.f32.mrf.mxu1 }
 0x1b1   :  { %v701_v62 = vadd.f32 %v700_v59, %v669_v58  ;;  %v670_v0 = vmax.f32 %v570_v60, 0.0  ;;  %v1301_v10 = vadd.f32 %v1018_v61, %v1262_v28 }
 0x1b2   :  { %v582_v1 = vpop.f32.mrf.mxu1 }
 0x1b3   :  { %v702_v3 = vadd.f32 %v701_v62, %v670_v0  ;;  %v1292_v4 = vpack.c.bf16 %v670_v0, %v669_v58  ;;  %v1295_v5 = vadd.f32 %v1262_v28, %v582_v1  ;;  %v675_v20 = vmax.f32 %v1301_v10, 0.0 }
 0x1b4   :  { %v1019_v6 = vpop.f32.mrf.mxu1 }
 0x1b5   :  { %v703_v8 = vadd.f32 %v702_v3, %v671_v2  ;;  %v673_v11 = vmax.f32 %v1295_v5, 0.0  ;;  %v1312_v17 = vadd.f32 %v1019_v6, %v1262_v28 }
 0x1b6   :  { %v585_v9 = vpop.f32.mrf.mxu1 }
 0x1b7   :  { %v704_v12 = vadd.f32 %v703_v8, %v672_v7  ;;  %v1307_v14 = vadd.f32 %v1262_v28, %v585_v9  ;;  %v676_v24 = vmax.f32 %v1312_v17, 0.0 }
 0x1b8   :  { %v1022_v15 = vpop.f32.mrf.mxu1 }
 0x1b9   :  { %v705_v16 = vadd.f32 %v704_v12, %v673_v11  ;;  %v674_v18 = vmax.f32 %v1307_v14, 0.0  ;;  %v1323_v27 = vadd.f32 %v1022_v15, %v1262_v28 }
 0x1ba   :  { %v598_v19 = vpop.f32.mrf.mxu1 }
 0x1bb   :  { %v706_v21 = vadd.f32 %v705_v16, %v674_v18  ;;  %v599_v22 = vadd.f32 %v1262_v28, %v598_v19  ;;  %v679_v39 = vmax.f32 %v1323_v27, 0.0 }
 0x1bc   :  { %v1023_v23 = vpop.f32.mrf.mxu1 }
 0x1bd   :  { %v707_v25 = vadd.f32 %v706_v21, %v675_v20  ;;  %v677_v30 = vmax.f32 %v599_v22, 0.0  ;;  %v1327_v36 = vadd.f32 %v1023_v23, %v1262_v28 }
 0x1be   :  { %v601_v26 = vpop.f32.mrf.mxu1 }
 0x1bf   :  { %v708_v31 = vadd.f32 %v707_v25, %v676_v24  ;;  %v602_v32 = vadd.f32 %v1262_v28, %v601_v26  ;;  %v680_v44 = vmax.f32 %v1327_v36, 0.0 }
 0x1c0   :  { %v1026_v33 = vpop.f32.mrf.mxu1 }
 0x1c1   :  { %v709_v35 = vadd.f32 %v708_v31, %v677_v30  ;;  %v678_v37 = vmax.f32 %v602_v32, 0.0  ;;  %v1339_v47 = vadd.f32 %v1026_v33, %v1262_v28  ;;  %v743_v63 = vpack.c.bf16 %v680_v44, %v679_v39 }
 0x1c2   :  { %v614_v38 = vpop.f32.mrf.mxu1 }
 0x1c3   :  { %v710_v40 = vadd.f32 %v709_v35, %v678_v37  ;;  %v1330_v41 = vpack.c.bf16 %v678_v37, %v677_v30  ;;  %v1333_v42 = vadd.f32 %v1262_v28, %v614_v38  ;;  %v683_v59 = vmax.f32 %v1339_v47, 0.0 }
 0x1c4   :  { %v1027_v43 = vpop.f32.mrf.mxu1 }
 0x1c5   :  { %v711_v45 = vadd.f32 %v710_v40, %v679_v39  ;;  %v681_v49 = vmax.f32 %v1333_v42, 0.0  ;;  %v626_v55 = vadd.f32 %v1027_v43, %v1262_v28 }
 0x1c6   :  { %v617_v46 = vpop.f32.mrf.mxu1 }
 0x1c7   :  { %v712_v50 = vadd.f32 %v711_v45, %v680_v44  ;;  %v1345_v51 = vadd.f32 %v1262_v28, %v617_v46  ;;  %v684_v0 = vmax.f32 %v626_v55, 0.0 }
 0x1c8   :  { %v1030_v53 = vpop.f32.mrf.mxu1 }
 0x1c9   :  { %v713_v54 = vadd.f32 %v712_v50, %v681_v49  ;;  %v682_v56 = vmax.f32 %v1345_v51, 0.0  ;;  %v639_v6 = vadd.f32 %v1030_v53, %v1262_v28  ;;  %v741_v53 = vpack.c.bf16 %v676_v24, %v675_v20 }
 0x1ca   :  { %v630_v58 = vpop.f32.mrf.mxu1  ;;  %v739_v24 = vpack.c.bf16 %v672_v7, %v671_v2  ;;  %v756_v2 = vlaneseq  ;;  %v754_v7 = vpop.permute.xlu0 %753 }
 0x1cb   :  { %v714_v60 = vadd.f32 %v713_v54, %v682_v56  ;;  %v631_v61 = vadd.f32 %v1262_v28, %v630_v58  ;;  %v687_v23 = vmax.f32 %v639_v6, 0.0  ;;  %v693_v6 = vld [vmem:[#allocation2] sm:$0x1]  ;;  %v744_v57 = vpack.c.bf16 %v682_v56, %v681_v49 }
 0x1cc   :  { %v1031_v62 = vpop.f32.mrf.mxu1  ;;  %vm831_vm1 = vcmp.lt.s32.totalorder %v756_v2, 256 }
 0x1cd   :  { %v715_v1 = vadd.f32 %v714_v60, %v683_v59  ;;  %v685_v8 = vmax.f32 %v631_v61, 0.0  ;;  %v642_v17 = vadd.f32 %v1031_v62, %v1262_v28  ;;  %v740_v62 = vpack.c.bf16 %v674_v18, %v673_v11 }
 0x1ce   :  { %v633_v3 = vpop.f32.mrf.mxu1  ;;  %v745_v11 = vpack.c.bf16 %v684_v0, %v683_v59 }
 0x1cf   :  { %v716_v9 = vadd.f32 %v715_v1, %v684_v0  ;;  %v634_v12 = vadd.f32 %v1262_v28, %v633_v3  ;;  %v688_v31 = vmax.f32 %v642_v17, 0.0 }
 0x1d0   :  { %v1034_v15 = vpop.f32.mrf.mxu1 }
 0x1d1   :  { %v717_v16 = vadd.f32 %v716_v9, %v685_v8  ;;  %v686_v19 = vmax.f32 %v634_v12, 0.0  ;;  %v655_v21 = vadd.f32 %v1034_v15, %v1262_v28 }
 0x1d2   :  { %v646_v22 = vpop.f32.mrf.mxu1 }
 0x1d3   :  { %v718_v25 = vadd.f32 %v717_v16, %v686_v19  ;;  %v647_v26 = vadd.f32 %v1262_v28, %v646_v22  ;;  %v691_v35 = vmax.f32 %v655_v21, 0.0  ;;  %v746_v9 = vpack.c.bf16 %v686_v19, %v685_v8 }
 0x1d4   :  { %v1035_v30 = vpop.f32.mrf.mxu1  ;;  %v1076_v8 = vmov 1966171168  }
 0x1d5   :  { %v719_v32 = vadd.f32 %v718_v25, %v687_v23  ;;  %v658_v33 = vadd.f32 %v1035_v30, %v1262_v28  ;;  %v689_v38 = vmax.f32 %v647_v26, 0.0  ;;  %v815_v15 = vunpack.c.l.s4 %v1076_v8 }
 0x1d6   :  { %v649_v37 = vpop.f32.mrf.mxu1 }
 0x1d7   :  { %v720_v40 = vadd.f32 %v719_v32, %v688_v31  ;;  %v692_v43 = vmax.f32 %v658_v33, 0.0  ;;  %v650_v45 = vadd.f32 %v1262_v28, %v649_v37  ;;  %v747_v28 = vpack.c.bf16 %v688_v31, %v687_v23 }
 0x1d8   :  { %v816_v16 = vunpack.c.0.s8 %v815_v15 }
 0x1d9   :  { %v721_v46 = vadd.f32 %v720_v40, %v689_v38  ;;  %v749_v47 = vpack.c.bf16 %v692_v43, %v691_v35  ;;  %v690_v50 = vmax.f32 %v650_v45, 0.0 }
 0x1db   :  { %v722_v54 = vadd.f32 %v721_v46, %v690_v50  ;;  %v748_v55 = vpack.c.bf16 %v690_v50, %v689_v38  ;;  %934 = vmatprep.subr.bf16.mxu0 %v749_v47 }
 0x1dc   :  { %935 = vmatpush3.bf16.xpose.msra.mxu0 %v741_v53 }
 0x1dd   :  { %v723_v58 = vadd.f32 %v722_v54, %v691_v35  ;;  %936 = vmatprep.subr.bf16.mxu0 %v748_v55 }
 0x1df   :  { %v724_v60 = vadd.f32 %v723_v58, %v692_v43 }
 0x1e1   :  { %v725_v61 = vrot.slane %v724_v60, 4 }
 0x1e3   :  { %v726_v1 = vadd.f32 %v725_v61, %v724_v60 }
 0x1e4   :  { %937 = vmatpush3.bf16.xpose.msra.mxu0 %v740_v62 }
 0x1e5   :  { %v727_v3 = vrot.slane %v726_v1, 2  ;;  %938 = vmatprep.subr.bf16.mxu0 %v747_v28 }
 0x1e7   :  { %v728_v10 = vadd.f32 %v727_v3, %v726_v1 }
 0x1e9   :  { %v729_v20 = vrot.slane %v728_v10, 1 }
 0x1eb   :  { %v730_v12 = vadd.f32 %v729_v20, %v728_v10 }
 0x1ec   :  { %939 = vmatpush3.bf16.xpose.msra.mxu0 %v739_v24 }
 0x1ed   :  { %v731_v5 = vadd.f32 %v730_v12, %v693_v6  ;;  %940 = vmatprep.subr.bf16.mxu0 %v746_v9 }
 0x1ef   :  { %732 = vst [vmem:[#allocation2] sm:$0x1] %v731_v5 }
 0x1f4   :  { %941 = vmatpush3.bf16.xpose.msra.mxu0 %v1292_v4  ;;  %v757_v4 = vshrl.u32 %v756_v2, 7 }
 0x1f5   :  { %942 = vmatprep.subr.bf16.mxu0 %v745_v11 }
 0x1f6   :  { %v837_v14 = vld [vmem:[#allocation2] sm:$0x1]  ;;  %v819_v19 = vsub.s32 %v816_v16, %v757_v4 }
 0x1f7   :  { %v838_v18 = vmul.f32 0.00390625, %v837_v14 }
 0x1f9   :  { %839 = vst [vmem:[%s1400_s8] sm:$0x1] %v838_v18 }
 0x1fc   :  { %943 = vmatpush3.bf16.xpose.msra.mxu0 %v1279_v48  ;;  %v758_v48 = vsub.s32 0, %v757_v4 }
 0x1fd   :  { %944 = vmatprep.subr.bf16.mxu0 %v744_v57 }
 0x1fe   :  { %v759_v42 = vrot.slane %v754_v7, %v758_v48 }
 0x204   :  { %945 = vmatpush3.bf16.xpose.msra.mxu0 %v1281_v52 }
 0x205   :  { %946 = vmatprep.subr.bf16.mxu0 %v743_v63 }
 0x20c   :  { %947 = vmatpush3.bf16.xpose.msra.mxu0 %v1271_v29 }
 0x20d   :  { %948 = vmatprep.subr.bf16.mxu0 %v1330_v41 }
 0x214   :  { %949 = vmatpush3.bf16.xpose.msra.mxu0 %v1274_v34 }
 0x21b   :  { %951 = vmatmul.mubr.bf16.vlgmr.msra.gmra.mxu0 %v1256_v13 }
 0x2db   :  { %v794_v27 = vpop.f32.mrf.mxu0 }
 0x2dc   :  { %v795_v49 = vadd.f32 %v794_v27, %v759_v42 }
 0x2dd   :  { %v796_v36 = vpop.f32.mrf.mxu0 }
 0x2de   :  { %v801_v39 = vsub.f32 0.0, %v795_v49  ;;  %v797_v44 = vadd.f32 %v796_v36, %v759_v42 }
 0x2df   :  { %v798_v52 = vpop.f32.mrf.mxu0 }
 0x2e0   :  { %v803_v51 = vmul.f32 1.442695, %v801_v39  ;;  %v802_v56 = vsub.f32 0.0, %v797_v44 }
 0x2e1   :  { %v799_v29 = vpop.f32.mrf.mxu0 }
 0x2e2   :  { %1066 = vpow2.f32 %v803_v51  ;;  %v805_v41 = vmul.f32 1.442695, %v802_v56 }
 0x2e4   :  { %1068 = vpow2.f32 %v805_v41 }
 0x2ef   :  { %v1067_v34 = vpop.eup %1066 }
 0x2f0   :  { %v807_v59 = vadd.f32 1.0, %v1067_v34 }
 0x2f1   :  { %v1069_v13 = vpop.eup %1068 }
 0x2f2   :  { %v808_v0 = vadd.f32 1.0, %v1069_v13  ;;  %1070 = vrcp.f32 %v807_v59 }
 0x2f4   :  { %1072 = vrcp.f32 %v808_v0 }
 0x2ff   :  { %v1071_v17 = vpop.eup %1070 }
 0x301   :  { %v1073_v21 = vpop.eup %1072 }
 0x302   :  { %v813_v22 = vcombine.low %v1071_v17, %v1073_v21 }
 0x304   :  { %v820_v23 = vrot.slane %v813_v22, %v819_v19 }
 0x306   :  { %v827_v25 = vrot.slane %v820_v23, %v819_v19 }
 0x308   :  { %833 = vst.msk [vmem:[%s1401_s7] sm:$0x3] %vm831_vm1, %v827_v25 }

// kernel: forward.12
= control target key start
LH: loop header
LB: loop body
LE: loop exit
PB: predicated region body
PF: predicated region fallthrough
CT: control target
= control target key end

     0   :  { %s2632_s0 = inlined_call_operand.vmem [shape: bf16[16,576], index: 0, kind: input, shape index: {}]   ;;  %s2633_s1 = inlined_call_operand.vmem [shape: bf16[4,576], index: 1, kind: input, shape index: {}]   ;;  %s2634_s2 = inlined_call_operand.vmem [shape: bf16[16,64], index: 2, kind: input, shape index: {}]   ;;  %s2635_s3 = inlined_call_operand.vmem [shape: bf16[576,64], index: 3, kind: input, shape index: {}]   ;;  %s2636_s4 = inlined_call_operand.vmem [shape: f32[1,64], index: 4, kind: input, shape index: {}]   ;;  %s2637_s5 = inlined_call_operand.vmem [shape: bf16[64,6], index: 5, kind: input, shape index: {}]   ;;  %s2638_s6 = inlined_call_operand.vmem [shape: f32[1,6], index: 6, kind: input, shape index: {}]   ;;  %s2639_s7 = inlined_call_operand.vmem [shape: bf16[64,12], index: 7, kind: input, shape index: {}]   ;;  %s2640_s8 = inlined_call_operand.vmem [shape: f32[1,12], index: 8, kind: input, shape index: {}]   ;;  %s2641_s9 = inlined_call_operand.vmem [shape: bf16[576,128], index: 9, kind: input, shape index: {}]   ;;  %s2642_s10 = inlined_call_operand.vmem [shape: f32[1,128], index: 10, kind: input, shape index: {}]   ;;  %s2643_s11 = inlined_call_operand.vmem [shape: bf16[128,2], index: 11, kind: input, shape index: {}]   ;;  %s2644_s12 = inlined_call_operand.vmem [shape: f32[1,2], index: 12, kind: input, shape index: {}]   ;;  %s2645_s13 = inlined_call_operand.vmem [shape: bf16[64,128], index: 13, kind: input, shape index: {}]   ;;  %s2646_s14 = inlined_call_operand.vmem [shape: f32[1,128], index: 14, kind: input, shape index: {}]   ;;  %s2647_s15 = inlined_call_operand.vmem [shape: bf16[128,4], index: 15, kind: input, shape index: {}]   ;;  %s2648_s16 = inlined_call_operand.vmem [shape: f32[1,4], index: 16, kind: input, shape index: {}]   ;;  %s2649_s17 = inlined_call_operand.hbm [shape: f32[16,6], index: 17, kind: output, shape index: {0}]   ;;  %s2650_s18 = inlined_call_operand.hbm [shape: f32[16,12], index: 18, kind: output, shape index: {1}]   ;;  %s2651_s19 = inlined_call_operand.hbm [shape: f32[1,2], index: 19, kind: output, shape index: {2}]   ;;  %s2652_s20 = inlined_call_operand.vmem [shape: f32[1,128], index: 20, kind: output, shape index: {3}]   ;;  %s2653_s21 = inlined_call_operand.hbm [shape: f32[1,4], index: 21, kind: output, shape index: {4}]  }
   0x1   :  { %2658 = sst [smem:[#allocation12_spill]] %s2632_s0 }
   0x2   :  { %2659 = sst [smem:[#allocation13_spill]] %s2633_s1 }
   0x3   :  { %2660 = sst [smem:[#allocation14_spill]] %s2634_s2 }
   0x4   :  { %2661 = sst [smem:[#allocation15_spill]] %s2635_s3 }
   0x5   :  { %2662 = sst [smem:[#allocation16_spill]] %s2636_s4 }
   0x6   :  { %2663 = sst [smem:[#allocation17_spill]] %s2637_s5 }
   0x7   :  { %27 = vsyncpa [#allocation3], 0 }
   0x8   :  { %28 = vsyncpa [#allocation5], 0  ;;  %s2664_s26 = sld [smem:[#allocation15_spill]]  ;;  %v2086_v33 = vmov 0.0   ;;  %vm2087_vm0 = vmmov 0   ;;  %vm391_vm1 = vcmask 523264  }
   0x9   :  { %s2665_s30 = sld [smem:[#allocation12_spill]] }
   0xe   :  { %v1888_v0 = vld [vmem:[%s2664_s26 + $0x78] sm:$0xff]   ;;  %v1892_v4 = vld [vmem:[%s2664_s26 + $0x70] sm:$0xff]   ;;  %v1896_v8 = vld [vmem:[%s2664_s26 + $0x68] sm:$0xff]  }
   0xf   :  { %v1889_v1 = vld [vmem:[%s2664_s26 + $0x38] sm:$0xff]   ;;  %1648 = vmatprep.subr.bf16.mxu0 %v1888_v0  ;;  %v1893_v5 = vld [vmem:[%s2664_s26 + $0x30] sm:$0xff]   ;;  %v1897_v9 = vld [vmem:[%s2664_s26 + $0x28] sm:$0xff]  }
  0x10   :  { %v1890_v2 = vld [vmem:[%s2664_s26 + $0xf8] sm:$0xff]   ;;  %1649 = vmatpush3.bf16.msra.mxu0 %v1889_v1  ;;  %v1894_v6 = vld [vmem:[%s2664_s26 + $0xf0] sm:$0xff]   ;;  %v1898_v10 = vld [vmem:[%s2664_s26 + $0xe8] sm:$0xff]  }
  0x11   :  { %v1891_v3 = vld [vmem:[%s2664_s26 + $0xb8] sm:$0xff]   ;;  %1670 = vmatprep.subr.bf16.mxu1 %v1890_v2  ;;  %1650 = vmatprep.subr.bf16.mxu0 %v1892_v4  ;;  %v1895_v7 = vld [vmem:[%s2664_s26 + $0xb0] sm:$0xff]   ;;  %v1899_v11 = vld [vmem:[%s2664_s26 + $0xa8] sm:$0xff]  }
  0x12   :  { %1671 = vmatpush3.bf16.msra.mxu1 %v1891_v3  ;;  %v1900_v12 = vld [vmem:[%s2664_s26 + $0x60] sm:$0xff]   ;;  %v1904_v16 = vld [vmem:[%s2664_s26 + $0x58] sm:$0xff]   ;;  %v1908_v20 = vld [vmem:[%s2664_s26 + $0x50] sm:$0xff]  }
  0x13   :  { %1672 = vmatprep.subr.bf16.mxu1 %v1894_v6  ;;  %v1901_v13 = vld [vmem:[%s2664_s26 + $0x20] sm:$0xff]   ;;  %v1905_v17 = vld [vmem:[%s2664_s26 + $0x18] sm:$0xff]   ;;  %v1909_v21 = vld [vmem:[%s2664_s26 + $0x10] sm:$0xff]  }
  0x14   :  { %1651 = vmatpush3.bf16.msra.mxu0 %v1893_v5  ;;  %v1902_v14 = vld [vmem:[%s2664_s26 + $0xe0] sm:$0xff]   ;;  %v1906_v18 = vld [vmem:[%s2664_s26 + $0xd8] sm:$0xff]   ;;  %v1910_v22 = vld [vmem:[%s2664_s26 + $0xd0] sm:$0xff]  }
  0x15   :  { %1652 = vmatprep.subr.bf16.mxu0 %v1896_v8  ;;  %v1903_v15 = vld [vmem:[%s2664_s26 + $0xa0] sm:$0xff]   ;;  %v1907_v19 = vld [vmem:[%s2664_s26 + $0x98] sm:$0xff]   ;;  %v1911_v23 = vld [vmem:[%s2664_s26 + $0x90] sm:$0xff]  }
  0x16   :  { %1673 = vmatpush3.bf16.msra.mxu1 %v1895_v7  ;;  %v1912_v24 = vld [vmem:[%s2664_s26 + $0x48] sm:$0xff]   ;;  %v1916_v28 = vld [vmem:[%s2664_s26 + $0x40] sm:$0xff]   ;;  %v1926_v37 = vld [vmem:[%s2664_s26 + $0x118] sm:$0xff]  }
  0x17   :  { %1674 = vmatprep.subr.bf16.mxu1 %v1898_v10  ;;  %v1913_v25 = vld [vmem:[%s2664_s26 + $0x8] sm:$0xff]   ;;  %v1917_v29 = vld [vmem:[%s2664_s26] sm:$0xff]   ;;  %v1927_v38 = vld [vmem:[%s2664_s26 + $0x110] sm:$0xff]  }
  0x18   :  { %1653 = vmatpush3.bf16.msra.mxu0 %v1897_v9  ;;  %v1914_v26 = vld [vmem:[%s2664_s26 + $0xc8] sm:$0xff]   ;;  %v1918_v30 = vld [vmem:[%s2664_s26 + $0xc0] sm:$0xff]  }
  0x19   :  { %1654 = vmatprep.subr.bf16.mxu0 %v1900_v12  ;;  %v1915_v27 = vld [vmem:[%s2664_s26 + $0x88] sm:$0xff]   ;;  %v1919_v31 = vld [vmem:[%s2665_s30] ss:$20 sps:$4 sm:$0xff]   ;;  %v1921_v32 = vld [vmem:[%s2665_s30 + $0x4] ss:$20 sps:$4 sm:$0xff]  }
  0x1a   :  { %1675 = vmatpush3.bf16.msra.mxu1 %v1899_v11  ;;  %v1922_v34 = vld [vmem:[%s2664_s26 + $0x80] sm:$0xff]   ;;  %427 = vmatprep.mubr.bf16.mxu0 %v1921_v32  ;;  %v1923_v35 = vld [vmem:[%s2665_s30 + $0x8] ss:$20 sps:$4 sm:$0xff]  }
  0x1b   :  { %1676 = vmatprep.subr.bf16.mxu1 %v1902_v14  ;;  %v1925_v36 = vld [vmem:[%s2665_s30 + $0xc] ss:$20 sps:$4 sm:$0xff]   ;;  %v1930_v41 = vld [vmem:[%s2665_s30 + $0x10] ss:$20 sps:$4 sm:$0xff]  }
  0x1c   :  { %1655 = vmatpush3.bf16.msra.mxu0 %v1901_v13  ;;  %468 = vmatprep.mubr.bf16.mxu1 %v1925_v36  ;;  %v1928_v39 = vld [vmem:[%s2664_s26 + $0x108] sm:$0xff]   ;;  %v1929_v40 = vld [vmem:[%s2664_s26 + $0x100] sm:$0xff]  }
  0x1d   :  { %1656 = vmatprep.subr.bf16.mxu0 %v1904_v16 }
  0x1e   :  { %1677 = vmatpush3.bf16.msra.mxu1 %v1903_v15 }
  0x1f   :  { %1678 = vmatprep.subr.bf16.mxu1 %v1906_v18 }
  0x20   :  { %1657 = vmatpush3.bf16.msra.mxu0 %v1905_v17 }
  0x21   :  { %1658 = vmatprep.subr.bf16.mxu0 %v1908_v20 }
  0x22   :  { %1679 = vmatpush3.bf16.msra.mxu1 %v1907_v19 }
  0x23   :  { %1680 = vmatprep.subr.bf16.mxu1 %v1910_v22 }
  0x24   :  { %1659 = vmatpush3.bf16.msra.mxu0 %v1909_v21 }
  0x25   :  { %1660 = vmatprep.subr.bf16.mxu0 %v1912_v24 }
  0x26   :  { %1681 = vmatpush3.bf16.msra.mxu1 %v1911_v23 }
  0x27   :  { %1682 = vmatprep.subr.bf16.mxu1 %v1914_v26 }
  0x28   :  { %1661 = vmatpush3.bf16.msra.mxu0 %v1913_v25 }
  0x29   :  { %1662 = vmatprep.subr.bf16.mxu0 %v1916_v28 }
  0x2a   :  { %1683 = vmatpush3.bf16.msra.mxu1 %v1915_v27 }
  0x2b   :  { %1684 = vmatprep.subr.bf16.mxu1 %v1918_v30 }
  0x2c   :  { %1663 = vmatpush3.bf16.msra.mxu0 %v1917_v29 }
  0x2d   :  { %1779 = vmatprep.subr.bf16.mxu0 %v2086_v33 }
  0x2e   :  { %1685 = vmatpush3.bf16.msra.mxu1 %v1922_v34 }
  0x2f   :  { %428 = vmatmul.mubr.bf16.vlgmr.msra.gmra.mxu0 %v1919_v31  ;;  %1791 = vmatprep.subr.bf16.mxu1 %v2086_v33 }
  0x30   :  { %1787 = vmatprep.mubr.msk.bf16.mxu0 %vm2087_vm0, %v2086_v33  ;;  %1780 = vmatpush3.bf16.msra.mxu0 %v1926_v37 }
  0x31   :  { %469 = vmatmul.mubr.bf16.vlgmr.msra.gmra.mxu1 %v1923_v35  ;;  %1781 = vmatprep.subr.bf16.mxu0 %v2086_v33 }
  0x32   :  { %1799 = vmatprep.mubr.msk.bf16.mxu1 %vm2087_vm0, %v2086_v33 }
  0x34   :  { %1782 = vmatpush3.bf16.msra.mxu0 %v1927_v38 }
  0x35   :  { %1783 = vmatprep.subr.bf16.mxu0 %v2086_v33 }
  0x38   :  { %1784 = vmatpush3.bf16.msra.mxu0 %v1928_v39 }
  0x39   :  { %1785 = vmatprep.subr.bf16.mxu0 %v2086_v33 }
  0x3c   :  { %1786 = vmatpush3.bf16.msra.mxu0 %v1929_v40 }
  0x3d   :  { %1803 = vmatprep.subr.bf16.mxu0 %v2086_v33 }
  0x3f   :  { %1788 = vmatmul.mubr.msk.bf16.vlgmr.msra.gmra.mxu0 %vm391_vm1, %v1930_v41 }
  0x40   :  { %1811 = vmatprep.mubr.msk.bf16.mxu0 %vm2087_vm0, %v2086_v33 }
  0x41   :  { %29 = vsyncpa [#allocation8], 0  ;;  %s2666_s27 = sld [smem:[#allocation17_spill]]  ;;  %v1932_v43 = vld [vmem:[%s2639_s7 + $0x18] sm:$0xff]   ;;  %v1934_v45 = vld [vmem:[%s2639_s7 + $0x10] sm:$0xff]   ;;  %v777_v63 = vlaneseq  ;;  %vm604_vm2 = vcmask 48128  }
  0x42   :  { %1804 = vmatpush3.bf16.msra.mxu0 %v1932_v43  ;;  %v1936_v47 = vld [vmem:[%s2639_s7 + $0x8] sm:$0xff]   ;;  %v1938_v49 = vld [vmem:[%s2639_s7] sm:$0xff]   ;;  %v1939_v50 = vld [vmem:[%s2641_s9 + $0x78] sm:$0xff]   ;;  %s2667_s29 = sld [smem:[#allocation16_spill]]  ;;  %v2088_v61 = vmov 1983009808  }
  0x43   :  { %1805 = vmatprep.subr.bf16.mxu0 %v2086_v33  ;;  %v1941_v51 = vld [vmem:[%s2641_s9 + $0xf8] sm:$0xff]   ;;  %v775_v62 = vunpack.c.l.s4 %v2088_v61  ;;  %v778_v5 = vshrl.u32 %v777_v63, 7  ;;  %s2668_s5 = sld [smem:[#allocation13_spill]]  ;;  %v1943_v26 = vld [vmem:[%s2641_s9 + $0x70] sm:$0xff]   ;;  %v1947_v32 = vld [vmem:[%s2641_s9 + $0x68] sm:$0xff]   ;;  %vm687_vm3 = vcmask 97280  }
  0x44   :  { %v1940_v23 = vld [vmem:[%s2641_s9 + $0x38] sm:$0xff]   ;;  %v1945_v27 = vld [vmem:[%s2641_s9 + $0xf0] sm:$0xff]   ;;  %v1949_v34 = vld [vmem:[%s2641_s9 + $0xe8] sm:$0xff]   ;;  %s2669_s25 = sld [smem:[#allocation14_spill]]  ;;  %vm1141_vm4 = vcmask 1043456   ;;  %s2090_s3 = smov [#allocation2]  }
  0x45   :  { %v776_v4 = vunpack.c.0.s8 %v775_v62  ;;  %v1942_v24 = vld [vmem:[%s2641_s9 + $0xb8] sm:$0xff]   ;;  %v1944_v30 = vld [vmem:[%s2641_s9 + $0x30] sm:$0xff]   ;;  %v1948_v35 = vld [vmem:[%s2641_s9 + $0x28] sm:$0xff]  }
  0x46   :  { %1806 = vmatpush3.bf16.msra.mxu0 %v1934_v45  ;;  %v1946_v31 = vld [vmem:[%s2641_s9 + $0xb0] sm:$0xff]   ;;  %v1950_v36 = vld [vmem:[%s2641_s9 + $0xa8] sm:$0xff]   ;;  %v1951_v37 = vld [vmem:[%s2641_s9 + $0x60] sm:$0xff]  }
  0x47   :  { %v1931_v42 = vld [vmem:[%s2666_s27 + $0x18] sm:$0xff]   ;;  %v1933_v44 = vld [vmem:[%s2666_s27 + $0x10] sm:$0xff]   ;;  %v1935_v46 = vld [vmem:[%s2666_s27 + $0x8] sm:$0xff]   ;;  %1807 = vmatprep.subr.bf16.mxu0 %v2086_v33  ;;  %v779_v12 = vsub.s32 %v776_v4, %v778_v5 }
  0x48   :  { %1792 = vmatpush3.bf16.msra.mxu1 %v1931_v42  ;;  %v1937_v48 = vld [vmem:[%s2666_s27] sm:$0xff]   ;;  %v1955_v41 = vld [vmem:[%s2641_s9 + $0x58] sm:$0xff]   ;;  %v1959_v45 = vld [vmem:[%s2641_s9 + $0x50] sm:$0xff]  }
  0x49   :  { %1793 = vmatprep.subr.bf16.mxu1 %v2086_v33  ;;  %v1529_v60 = vld [vmem:[%s2667_s29] ss:$0 sm:$0xff]  ;;  %v1957_v42 = vld [vmem:[%s2641_s9 + $0xd8] sm:$0xff]  }
  0x4a   :  { %1808 = vmatpush3.bf16.msra.mxu0 %v1936_v47  ;;  %v690_v8 = vld [vmem:[%s2668_s5] sm:$0xff]  ;;  %v1956_v43 = vld [vmem:[%s2641_s9 + $0x18] sm:$0xff]   ;;  %v1960_v47 = vld [vmem:[%s2641_s9 + $0x10] sm:$0xff]  }
  0x4b   :  { %1809 = vmatprep.subr.bf16.mxu0 %v2086_v33  ;;  %v773_v13 = vcombine.high %v690_v8, %v690_v8  ;;  %v2383_v19 = vrot.slane %v690_v8, %v779_v12  ;;  %v1953_v38 = vld [vmem:[%s2641_s9 + $0xe0] sm:$0xff]   ;;  %v1972_v63 = vld [vmem:[%s2641_s9 + $0x118] sm:$0xff]  }
  0x4c   :  { %1794 = vmatpush3.bf16.msra.mxu1 %v1933_v44  ;;  %v1952_v39 = vld [vmem:[%s2641_s9 + $0x20] sm:$0xff]   ;;  %v1958_v44 = vld [vmem:[%s2641_s9 + $0x98] sm:$0xff]  }
  0x4d   :  { %1795 = vmatprep.subr.bf16.mxu1 %v2086_v33  ;;  %v2385_v20 = vrot.slane %v773_v13, %v779_v12  ;;  %v788_v28 = vcombine.high %v2383_v19, %v2383_v19  ;;  %v1954_v40 = vld [vmem:[%s2641_s9 + $0xa0] sm:$0xff]   ;;  %v1976_v8 = vld [vmem:[%s2645_s13 + $0x18] sm:$0xff]   ;;  %v1978_v12 = vld [vmem:[%s2645_s13 + $0x8] sm:$0xff]  }
  0x4e   :  { %1810 = vmatpush3.bf16.msra.mxu0 %v1938_v49  ;;  %v1963_v49 = vld [vmem:[%s2641_s9 + $0x48] sm:$0xff]   ;;  %v1975_v5 = vld [vmem:[%s2641_s9 + $0x100] sm:$0xff]  }
  0x4f   :  { %1729 = vmatprep.subr.bf16.mxu0 %v1941_v51  ;;  %v789_v29 = vcombine.high %v2385_v20, %v2385_v20  ;;  %v1645_v51 = vld [vmem:[%s2669_s25] sm:$0xff]   ;;  %s2089_s25 = smov [#allocation4]  }
  0x50   :  { %1796 = vmatpush3.bf16.msra.mxu1 %v1935_v46  ;;  %v1961_v46 = vld [vmem:[%s2641_s9 + $0xd0] sm:$0xff]   ;;  %s1483_s26 = sshll.u32 %s2089_s25, 4  ;;  %s1484_s26 = int_to_ptr.vmem [resolvable:$true] %s1483_s26 }
  0x51   :  { %1797 = vmatprep.subr.bf16.mxu1 %v2086_v33  ;;  %p2005_p1 = scmp.lt.s32.totalorder %s1484_s26, %s1484_s26 }
  0x54   :  { %1798 = vmatpush3.bf16.msra.mxu1 %v1937_v48  ;;  %v1962_v48 = vld [vmem:[%s2641_s9 + $0x90] sm:$0xff]  }
  0x55   :  { %1707 = vmatprep.subr.bf16.mxu1 %v1939_v50  ;;  %v1965_v50 = vld [vmem:[%s2641_s9 + $0xc8] sm:$0xff]  }
  0xef   :  { %v1664_v52 = vpop.f32.mrf.mxu0 }
  0xf1   :  { %v1665_v53 = vpop.f32.mrf.mxu0  ;;  %v1686_v54 = vpop.f32.mrf.mxu1 }
  0xf2   :  { %v1666_v59 = vadd.f32 %v1665_v53, %v1664_v52  ;;  %v1964_v52 = vld [vmem:[%s2641_s9 + $0x8] sm:$0xff]  }
  0xf3   :  { %v1667_v55 = vpop.f32.mrf.mxu0  ;;  %v1687_v56 = vpop.f32.mrf.mxu1  ;;  %v1966_v53 = vld [vmem:[%s2641_s9 + $0x88] sm:$0xff]  }
  0xf4   :  { %v430_v2 = vadd.f32 %v1666_v59, %v1529_v60  ;;  %v1688_v3 = vadd.f32 %v1687_v56, %v1686_v54  ;;  %v1646_v54 = vunpack.c.l.bf16 %v1645_v51  ;;  %v1967_v56 = vld [vmem:[%s2641_s9 + $0x40] sm:$0xff]  }
  0xf5   :  { %v1668_v57 = vpop.f32.mrf.mxu0  ;;  %v1689_v58 = vpop.f32.mrf.mxu1  ;;  %v1970_v59 = vld [vmem:[%s2641_s9 + $0x80] sm:$0xff]  }
  0xf6   :  { %v1669_v0 = vadd.f32 %v1668_v57, %v1667_v55  ;;  %v471_v10 = vadd.f32 %v1688_v3, %v430_v2  ;;  %v1647_v55 = vunpack.c.h.bf16 %v1645_v51  ;;  %v1969_v57 = vld [vmem:[%s2641_s9 + $0xc0] sm:$0xff]   ;;  %v1974_v3 = vld [vmem:[%s2641_s9 + $0x108] sm:$0xff]  }
  0xf7   :  { %v1690_v1 = vpop.f32.mrf.mxu1 }
  0xf8   :  { %v433_v6 = vadd.f32 %v1669_v0, %v1529_v60  ;;  %v1691_v7 = vadd.f32 %v1690_v1, %v1689_v58  ;;  %v1968_v58 = vld [vmem:[%s2641_s9] sm:$0xff]   ;;  %v1264_v60 = vsel %vm391_vm1, %v1646_v54, 0.0  ;;  %v1265_v61 = vsel %vm391_vm1, %v1647_v55, 0.0  ;;  %v1973_v1 = vld [vmem:[%s2641_s9 + $0x110] sm:$0xff]  }
  0xf9   :  { %v1266_v62 = vadd.f32 %v1265_v61, %v1264_v60  ;;  %v1584_v55 = vld [vmem:[%s2642_s10] ss:$0 sm:$0xff] }
  0xfa   :  { %v474_v15 = vadd.f32 %v1691_v7, %v433_v6  ;;  %v1585_v7 = vld.sshfl [vmem:[%s2668_s5 + $0x8] sm:$0x3 pattern:$0x76325410] }
  0xfb   :  { %v1267_v0 = vrot.slane %v1266_v62, 4 }
  0xfd   :  { %v1268_v2 = vadd.f32 %v1267_v0, %v1266_v62 }
  0xff   :  { %v511_v9 = vpop.f32.mrf.mxu0  ;;  %v1269_v4 = vrot.slane %v1268_v2, 2 }
 0x100   :  { %v512_v14 = vadd.f32 %v511_v9, %v471_v10  ;;  %v1977_v10 = vld [vmem:[%s2645_s13 + $0x10] sm:$0xff]  }
 0x101   :  { %v1789_v11 = vpop.f32.mrf.mxu0  ;;  %v1270_v6 = vadd.f32 %v1269_v4, %v1268_v2 }
 0x102   :  { %v518_v21 = vmax.f32 %v512_v14, 0.0  ;;  %v1979_v14 = vld [vmem:[%s2645_s13] sm:$0xff]   ;;  %s2000_s13 = scalar_lea.vmem %s1484_s26, 256 }
 0x103   :  { %v514_v16 = vpop.f32.mrf.mxu0  ;;  %v1271_v9 = vrot.slane %v1270_v6, 1  ;;  %p2001_p0 = scmp.ne.s32.totalorder %s1484_s26, %s2000_s13  ;;  %p2006_p2 = scmp.lt.s32.totalorder %s2000_s13, %s2000_s13 }
 0x104   :  { %v515_v17 = vadd.f32 %v514_v16, %v474_v15  ;;  %v1980_v16 = vld [vmem:[%s2643_s11 + $0x38] sm:$0xff]  }
 0x105   :  { %v1790_v18 = vpop.f32.mrf.mxu0  ;;  %v1272_v11 = vadd.f32 %v1271_v9, %v1270_v6  ;;  %p2007_p3 = por %p2006_p2, %p2005_p1 }
 0x106   :  { %v519_v22 = vmax.f32 %v515_v17, 0.0  ;;  %v1981_v17 = vld [vmem:[%s2647_s15 + $0x38] sm:$0xff]   ;;  %v1982_v18 = vld [vmem:[%s2643_s11 + $0x30] sm:$0xff]  }
 0x107   :  { %v1274_v13 = vmul.f32 0.0625, %v1272_v11  ;;  %p2008_p4 = pnand %p2007_p3, %p2001_p0 }
 0x108   :  { %v520_v25 = vpack.c.bf16 %v519_v22, %v518_v21  ;;  %v1985_v21 = vld [vmem:[%s2647_s15 + $0x28] sm:$0xff]   ;;  %v1986_v22 = vld [vmem:[%s2643_s11 + $0x20] sm:$0xff]  }
 0x109   :  { %v1275_v15 = vpack.c.bf16 %v1274_v13, %v1274_v13 }
 0x10a   :  { %1800 = vmatmul.mubr.msk.bf16.vlgmr.msra.gmra.mxu1 %vm391_vm1, %v520_v25  ;;  %1812 = vmatmul.mubr.msk.bf16.vlgmr.msra.gmra.mxu0 %vm391_vm1, %v520_v25  ;;  %v1989_v25 = vld [vmem:[%s2647_s15 + $0x18] sm:$0xff]  }
 0x10b   :  { %1708 = vmatpush3.bf16.msra.mxu1 %v1940_v23  ;;  %1730 = vmatpush3.bf16.msra.mxu0 %v1942_v24  ;;  %v1987_v23 = vld [vmem:[%s2647_s15 + $0x20] sm:$0xff]   ;;  %v1988_v24 = vld [vmem:[%s2643_s11 + $0x18] sm:$0xff]  }
 0x10c   :  { %1709 = vmatprep.subr.bf16.mxu1 %v1943_v26  ;;  %1731 = vmatprep.subr.bf16.mxu0 %v1945_v27  ;;  %v1990_v26 = vld [vmem:[%s2643_s11 + $0x10] sm:$0xff]  }
 0x10d   :  { %1052 = vmatprep.mubr.bf16.mxu1 %v788_v28  ;;  %1092 = vmatprep.mubr.bf16.mxu0 %v789_v29  ;;  %v1991_v27 = vld [vmem:[%s2647_s15 + $0x10] sm:$0xff]   ;;  %v1992_v28 = vld [vmem:[%s2643_s11 + $0x8] sm:$0xff]  }
 0x10e   :  { %v1993_v29 = vld [vmem:[%s2647_s15 + $0x8] sm:$0xff]  }
 0x10f   :  { %1710 = vmatpush3.bf16.msra.mxu1 %v1944_v30  ;;  %1732 = vmatpush3.bf16.msra.mxu0 %v1946_v31  ;;  %v1994_v30 = vld [vmem:[%s2643_s11] sm:$0xff]  }
 0x110   :  { %1711 = vmatprep.subr.bf16.mxu1 %v1947_v32  ;;  %1733 = vmatprep.subr.bf16.mxu0 %v1949_v34  ;;  %v1995_v31 = vld [vmem:[%s2647_s15] sm:$0xff]  }
 0x111   :  { %v1572_v32 = vld [vmem:[%s2638_s6] ss:$0 sm:$0xff] }
 0x112   :  { %v1578_v34 = vld [vmem:[%s2640_s8] ss:$0 sm:$0xff] }
 0x113   :  { %1712 = vmatpush3.bf16.msra.mxu1 %v1948_v35  ;;  %1734 = vmatpush3.bf16.msra.mxu0 %v1950_v36 }
 0x114   :  { %1713 = vmatprep.subr.bf16.mxu1 %v1951_v37  ;;  %1735 = vmatprep.subr.bf16.mxu0 %v1953_v38 }
 0x117   :  { %1714 = vmatpush3.bf16.msra.mxu1 %v1952_v39  ;;  %1736 = vmatpush3.bf16.msra.mxu0 %v1954_v40 }
 0x118   :  { %1715 = vmatprep.subr.bf16.mxu1 %v1955_v41  ;;  %1737 = vmatprep.subr.bf16.mxu0 %v1957_v42 }
 0x11b   :  { %1716 = vmatpush3.bf16.msra.mxu1 %v1956_v43  ;;  %1738 = vmatpush3.bf16.msra.mxu0 %v1958_v44 }
 0x11c   :  { %1717 = vmatprep.subr.bf16.mxu1 %v1959_v45  ;;  %1739 = vmatprep.subr.bf16.mxu0 %v1961_v46 }
 0x11f   :  { %1718 = vmatpush3.bf16.msra.mxu1 %v1960_v47  ;;  %1740 = vmatpush3.bf16.msra.mxu0 %v1962_v48 }
 0x120   :  { %1719 = vmatprep.subr.bf16.mxu1 %v1963_v49  ;;  %1741 = vmatprep.subr.bf16.mxu0 %v1965_v50 }
 0x123   :  { %1720 = vmatpush3.bf16.msra.mxu1 %v1964_v52  ;;  %1742 = vmatpush3.bf16.msra.mxu0 %v1966_v53 }
 0x124   :  { %1721 = vmatprep.subr.bf16.mxu1 %v1967_v56  ;;  %1743 = vmatprep.subr.bf16.mxu0 %v1969_v57 }
 0x127   :  { %1722 = vmatpush3.bf16.msra.mxu1 %v1968_v58  ;;  %1744 = vmatpush3.bf16.msra.mxu0 %v1970_v59 }
 0x128   :  { %1815 = vmatprep.subr.bf16.mxu1 %v2086_v33  ;;  %1827 = vmatprep.subr.bf16.mxu0 %v2086_v33 }
 0x12a   :  { %1053 = vmatmul.mubr.bf16.vlgmr.msra.gmra.mxu1 %v2383_v19  ;;  %1093 = vmatmul.mubr.bf16.vlgmr.msra.gmra.mxu0 %v2385_v20  ;;  %v1983_v19 = vld [vmem:[%s2647_s15 + $0x30] sm:$0xff]   ;;  %v1984_v20 = vld [vmem:[%s2643_s11 + $0x28] sm:$0xff]  }
 0x12b   :  { %1816 = vmatpush3.bf16.msra.mxu1 %v1972_v63  ;;  %1823 = vmatprep.mubr.msk.bf16.mxu1 %vm2087_vm0, %v2086_v33 }
 0x12c   :  { %1817 = vmatprep.subr.bf16.mxu1 %v2086_v33  ;;  %1843 = vmatprep.mubr.msk.bf16.mxu0 %vm2087_vm0, %v2086_v33 }
 0x12d   :  { %1828 = vmatpush3.bf16.msra.mxu0 %v1980_v16 }
 0x12e   :  { %1829 = vmatprep.subr.bf16.mxu0 %v2086_v33 }
 0x12f   :  { %1818 = vmatpush3.bf16.msra.mxu1 %v1973_v1 }
 0x130   :  { %1819 = vmatprep.subr.bf16.mxu1 %v2086_v33 }
 0x131   :  { %1830 = vmatpush3.bf16.msra.mxu0 %v1982_v18 }
 0x132   :  { %1831 = vmatprep.subr.bf16.mxu0 %v2086_v33 }
 0x133   :  { %1820 = vmatpush3.bf16.msra.mxu1 %v1974_v3 }
 0x134   :  { %1821 = vmatprep.subr.bf16.mxu1 %v2086_v33 }
 0x135   :  { %1832 = vmatpush3.bf16.msra.mxu0 %v1984_v20 }
 0x136   :  { %1833 = vmatprep.subr.bf16.mxu0 %v2086_v33 }
 0x137   :  { %1822 = vmatpush3.bf16.msra.mxu1 %v1975_v5 }
 0x138   :  { %1847 = vmatprep.subr.bf16.mxu1 %v2086_v33 }
 0x139   :  { %1834 = vmatpush3.bf16.msra.mxu0 %v1986_v22 }
 0x13a   :  { %1824 = vmatmul.mubr.msk.bf16.vlgmr.msra.gmra.mxu1 %vm391_vm1, %v1585_v7  ;;  %1835 = vmatprep.subr.bf16.mxu0 %v2086_v33  ;;  %v1284_v7 = vld [vmem:[%s2646_s14] sm:$0x1]  ;;  %s1471_s14 = sshll.u32 %s2090_s3, 4  ;;  %s1472_s14 = int_to_ptr.vmem [resolvable:$true] %s1471_s14 }
 0x13b   :  { %1848 = vmatpush3.bf16.msra.mxu1 %v1976_v8  ;;  %1855 = vmatprep.mubr.msk.bf16.mxu1 %vm2087_vm0, %v2086_v33 }
 0x13c   :  { %1849 = vmatprep.subr.bf16.mxu1 %v2086_v33 }
 0x13d   :  { %1836 = vmatpush3.bf16.msra.mxu0 %v1988_v24 }
 0x13e   :  { %1837 = vmatprep.subr.bf16.mxu0 %v2086_v33 }
 0x13f   :  { %1850 = vmatpush3.bf16.msra.mxu1 %v1977_v10 }
 0x140   :  { %1851 = vmatprep.subr.bf16.mxu1 %v2086_v33 }
 0x141   :  { %1838 = vmatpush3.bf16.msra.mxu0 %v1990_v26 }
 0x142   :  { %1839 = vmatprep.subr.bf16.mxu0 %v2086_v33 }
 0x143   :  { %1852 = vmatpush3.bf16.msra.mxu1 %v1978_v12 }
 0x144   :  { %1853 = vmatprep.subr.bf16.mxu1 %v2086_v33 }
 0x145   :  { %1840 = vmatpush3.bf16.msra.mxu0 %v1992_v28 }
 0x146   :  { %1841 = vmatprep.subr.bf16.mxu0 %v2086_v33 }
 0x147   :  { %1854 = vmatpush3.bf16.msra.mxu1 %v1979_v14 }
 0x148   :  { %1859 = vmatprep.subr.bf16.mxu1 %v2086_v33 }
 0x149   :  { %1842 = vmatpush3.bf16.msra.mxu0 %v1994_v30 }
 0x14a   :  { %1856 = vmatmul.mubr.msk.bf16.vlgmr.msra.gmra.mxu1 %vm391_vm1, %v1275_v15 }
 0x14b   :  { %1875 = vmatprep.mubr.msk.bf16.mxu1 %vm2087_vm0, %v2086_v33  ;;  %1860 = vmatpush3.bf16.msra.mxu1 %v1981_v17 }
 0x14c   :  { %1861 = vmatprep.subr.bf16.mxu1 %v2086_v33 }
 0x14f   :  { %1862 = vmatpush3.bf16.msra.mxu1 %v1983_v19 }
 0x150   :  { %1863 = vmatprep.subr.bf16.mxu1 %v2086_v33 }
 0x153   :  { %1864 = vmatpush3.bf16.msra.mxu1 %v1985_v21 }
 0x154   :  { %1865 = vmatprep.subr.bf16.mxu1 %v2086_v33 }
 0x157   :  { %1866 = vmatpush3.bf16.msra.mxu1 %v1987_v23 }
 0x158   :  { %1867 = vmatprep.subr.bf16.mxu1 %v2086_v33 }
 0x15b   :  { %1868 = vmatpush3.bf16.msra.mxu1 %v1989_v25 }
 0x15c   :  { %1869 = vmatprep.subr.bf16.mxu1 %v2086_v33 }
 0x15f   :  { %1870 = vmatpush3.bf16.msra.mxu1 %v1991_v27 }
 0x160   :  { %1871 = vmatprep.subr.bf16.mxu1 %v2086_v33 }
 0x163   :  { %1872 = vmatpush3.bf16.msra.mxu1 %v1993_v29 }
 0x164   :  { %1873 = vmatprep.subr.bf16.mxu1 %v2086_v33 }
 0x167   :  { %1874 = vmatpush3.bf16.msra.mxu1 %v1995_v31 }
 0x1ca   :  { %v597_v35 = vpop.f32.mrf.mxu1  ;;  %v680_v36 = vpop.f32.mrf.mxu0 }
 0x1cb   :  { %v598_v37 = vadd.f32 %v1572_v32, %v597_v35  ;;  %v681_v33 = vadd.f32 %v1578_v34, %v680_v36 }
 0x1cc   :  { %v1801_v38 = vpop.f32.mrf.mxu1  ;;  %v1813_v39 = vpop.f32.mrf.mxu0 }
 0x1cd   :  { %605 = vst.msk [vmem:[#allocation2] sm:$0xff] %vm604_vm2, %v598_v37 }
 0x1ce   :  { %688 = vst.msk [vmem:[#allocation4] sm:$0xff] %vm687_vm3, %v681_v33  ;;  %v600_v40 = vpop.f32.mrf.mxu1  ;;  %v683_v41 = vpop.f32.mrf.mxu0 }
 0x1cf   :  { %v601_v42 = vadd.f32 %v1572_v32, %v600_v40  ;;  %v684_v43 = vadd.f32 %v1578_v34, %v683_v41 }
 0x1d0   :  { %v1802_v44 = vpop.f32.mrf.mxu1  ;;  %v1814_v45 = vpop.f32.mrf.mxu0 }
 0x1d1   :  { %606 = vst.msk [vmem:[#allocation2 + $0x8] sm:$0xff] %vm604_vm2, %v601_v42 }
 0x1d2   :  { %689 = vst.msk [vmem:[#allocation4 + $0x8] sm:$0xff] %vm687_vm3, %v684_v43 }
 0x1ea   :  { %v1723_v46 = vpop.f32.mrf.mxu1  ;;  %v1745_v47 = vpop.f32.mrf.mxu0 }
 0x1ec   :  { %v1724_v48 = vpop.f32.mrf.mxu1  ;;  %v1746_v49 = vpop.f32.mrf.mxu0 }
 0x1ed   :  { %v1725_v54 = vadd.f32 %v1724_v48, %v1723_v46  ;;  %v1747_v57 = vadd.f32 %v1746_v49, %v1745_v47 }
 0x1ee   :  { %v1726_v50 = vpop.f32.mrf.mxu1  ;;  %v1748_v51 = vpop.f32.mrf.mxu0 }
 0x1ef   :  { %v1055_v56 = vadd.f32 %v1725_v54, %v1584_v55 }
 0x1f0   :  { %v1727_v52 = vpop.f32.mrf.mxu1  ;;  %v1749_v53 = vpop.f32.mrf.mxu0 }
 0x1f1   :  { %v1095_v58 = vadd.f32 %v1747_v57, %v1055_v56 }
 0x1fa   :  { %v1134_v59 = vpop.f32.mrf.mxu1 }
 0x1fb   :  { %v1135_v60 = vadd.f32 %v1134_v59, %v1095_v58 }
 0x1fc   :  { %v1825_v61 = vpop.f32.mrf.mxu1 }
 0x1fd   :  { %v1140_v62 = vmax.f32 %v1135_v60, 0.0 }
 0x1fe   :  { %v1137_v63 = vpop.f32.mrf.mxu1 }
 0x1ff   :  { %v1142_v0 = vsel %vm1141_vm4, %v1140_v62, 0.0 }
 0x200   :  { %v1143_v1 = vrot.slane %v1142_v0, 4  ;;  %v1826_v2 = vpop.f32.mrf.mxu1 }
 0x202   :  { %v1144_v3 = vadd.f32 %v1143_v1, %v1142_v0 }
 0x204   :  { %v1145_v4 = vrot.slane %v1144_v3, 2 }
 0x206   :  { %v1146_v5 = vadd.f32 %v1145_v4, %v1144_v3 }
 0x208   :  { %v1147_v6 = vrot.slane %v1146_v5, 1 }
 0x20a   :  { %v1148_v8 = vadd.f32 %v1147_v6, %v1146_v5  ;;  %v1346_v9 = vpop.f32.mrf.mxu1 }
 0x20b   :  { %v1347_v10 = vadd.f32 %v1346_v9, %v1284_v7 }
 0x20c   :  { %v1150_v11 = vmul.f32 0.25, %v1148_v8  ;;  %v1857_v12 = vpop.f32.mrf.mxu1 }
 0x20d   :  { %v1352_v13 = vmax.f32 %v1347_v10, 0.0 }
 0x20e   :  { %1151 = vst [vmem:[%s2652_s20] sm:$0x1] %v1150_v11  ;;  %v1349_v14 = vpop.f32.mrf.mxu1  ;;  %v1152_v15 = vpack.c.bf16 %v1150_v11, %v1150_v11 }
 0x20f   :  { %v1353_v16 = vpack.c.bf16 %v1352_v13, %v1352_v13 }
 0x210   :  { %1844 = vmatmul.mubr.bf16.vlgmr.msra.gmra.mxu0 %v1152_v15  ;;  %v1858_v17 = vpop.f32.mrf.mxu1 }
 0x211   :  { %1876 = vmatmul.mubr.bf16.vlgmr.msra.gmra.mxu1 %v1353_v16 }
 0x212   :  { %2011 = shalt.err (!%p2008_p4)
}
 0x213   :  { %s2091_s20 = smov 128   ;;  %s2092_s30 = smov 8  }
 0x214   :  { %1489 = dma.vmem_to_hbm [thread:$0]  %s1484_s26, 256, %s2650_s18, [#allocation5], %s2091_s20, %s2091_s20, %s2092_s30  }
 0x215   :  { %s2020_s27 = scalar_lea.vmem %s1472_s14, 256  ;;  %p2025_p6 = scmp.lt.s32.totalorder %s1472_s14, %s1472_s14 }
 0x216   :  { %p2021_p5 = scmp.ne.s32.totalorder %s1472_s14, %s2020_s27  ;;  %p2026_p7 = scmp.lt.s32.totalorder %s2020_s27, %s2020_s27 }
 0x218   :  { %p2027_p8 = por %p2026_p7, %p2025_p6 }
 0x21a   :  { %p2028_p9 = pnand %p2027_p8, %p2021_p5 }
 0x21c   :  { %2031 = shalt.err (!%p2028_p9)
}
 0x21d   :  { %1477 = dma.vmem_to_hbm [thread:$0]  %s1472_s14, 256, %s2649_s17, [#allocation3], %s2091_s20, %s2091_s20, %s2092_s30   ;;  %vm1258_vm5 = vcmask 8192  }
 0x21e   :  { %v1169_v18 = vld [vmem:[%s2644_s12] sm:$0x1]  ;;  %s2093_s9 = smov [#allocation6]  }
 0x21f   :  { %s1496_s5 = sshll.u32 %s2093_s9, 4  ;;  %v1370_v19 = vld [vmem:[%s2648_s16] sm:$0x1]  ;;  %s1497_s5 = int_to_ptr.vmem [resolvable:$true] %s1496_s5 }
 0x220   :  { %s2040_s17 = scalar_lea.vmem %s1497_s5, 16  ;;  %s2044_s12 = scalar_lea.vmem %s1497_s5, 32 }
 0x221   :  { %p2041_p10 = scmp.ne.s32.totalorder %s1497_s5, %s2040_s17  ;;  %p2045_p11 = scmp.lt.s32.totalorder %s1497_s5, %s1497_s5 }
 0x222   :  { %p2046_p12 = scmp.lt.s32.totalorder %s2044_s12, %s2040_s17 }
 0x224   :  { %p2047_p13 = por %p2046_p12, %p2045_p11 }
 0x226   :  { %p2048_p0 = pnand %p2047_p13, %p2041_p10 }
 0x2d0   :  { %v1252_v20 = vpop.f32.mrf.mxu0 }
 0x2d1   :  { %v1253_v21 = vadd.f32 %v1252_v20, %v1169_v18  ;;  %v1453_v22 = vpop.f32.mrf.mxu1 }
 0x2d2   :  { %v1454_v23 = vadd.f32 %v1453_v22, %v1370_v19  ;;  %v1845_v24 = vpop.f32.mrf.mxu0 }
 0x2d3   :  { %v1877_v25 = vpop.f32.mrf.mxu1  ;;  %1259 = vst.msk [vmem:[#allocation6] sm:$0x1] %vm1258_vm5, %v1253_v21 }
 0x2d4   :  { %v1459_v26 = vsub.f32 0.0, %v1454_v23  ;;  %v1255_v27 = vpop.f32.mrf.mxu0 }
 0x2d5   :  { %2051 = shalt.err (!%p2048_p0)
}
 0x2d6   :  { %1499 = dma.vmem_to_hbm [thread:$0]  %s1497_s5, 16, %s2651_s19, [#allocation5]   ;;  %v1456_v28 = vpop.f32.mrf.mxu1  ;;  %v1460_v29 = vmul.f32 1.442695, %v1459_v26  ;;  %v1846_v30 = vpop.f32.mrf.mxu0  ;;  %vm1464_vm6 = vcmask 24576  }
 0x2d7   :  { %s2094_s24 = smov [#allocation7]  }
 0x2d8   :  { %v1878_v31 = vpop.f32.mrf.mxu1  ;;  %1996 = vpow2.f32 %v1460_v29  ;;  %s1508_s6 = sshll.u32 %s2094_s24, 4  ;;  %s1509_s6 = int_to_ptr.vmem [resolvable:$true] %s1508_s6 }
 0x2d9   :  { %s2060_s8 = scalar_lea.vmem %s1509_s6, 16  ;;  %s2064_s11 = scalar_lea.vmem %s1509_s6, 32 }
 0x2da   :  { %p2061_p1 = scmp.ne.s32.totalorder %s1509_s6, %s2060_s8  ;;  %p2065_p2 = scmp.lt.s32.totalorder %s1509_s6, %s1509_s6 }
 0x2db   :  { %p2066_p3 = scmp.lt.s32.totalorder %s2064_s11, %s2060_s8 }
 0x2dd   :  { %p2067_p4 = por %p2066_p3, %p2065_p2 }
 0x2df   :  { %p2068_p5 = pnand %p2067_p4, %p2061_p1 }
 0x2e5   :  { %v1997_v32 = vpop.eup %1996 }
 0x2e6   :  { %v1462_v34 = vadd.f32 1.0, %v1997_v32 }
 0x2e8   :  { %1998 = vrcp.f32 %v1462_v34 }
 0x2f5   :  { %v1999_v35 = vpop.eup %1998 }
 0x2f6   :  { %1465 = vst.msk [vmem:[#allocation7] sm:$0x1] %vm1464_vm6, %v1999_v35 }
 0x2f7   :  { %2071 = shalt.err (!%p2068_p5)
}
 0x2f8   :  { %1511 = dma.vmem_to_hbm [thread:$0]  %s1509_s6, 16, %s2653_s21, [#allocation8]  }
 0x2f9   :  { %2080 = dma.done.wait [#allocation3], 256  }
 0x2fa   :  { %2081 = vsyncadd [#allocation3], 4294967040 }
 0x2fb   :  { %2082 = dma.done.wait [#allocation5], 272  }
 0x2fc   :  { %2083 = vsyncadd [#allocation5], 4294967024 }
 0x2fd   :  { %2084 = dma.done.wait [#allocation8], 16  }
 0x2fe   :  { %2085 = vsyncadd [#allocation8], 4294967280 }
 0x2ff   :  { %1526 = vsyncpa [#allocation3], 1 }
 0x300   :  { %1527 = vsyncpa [#allocation5], 1 }
 0x301   :  { %1528 = vsyncpa [#allocation8], 1 }

// kernel: forward.13
= control target key start
LH: loop header
LB: loop body
LE: loop exit
PB: predicated region body
PF: predicated region fallthrough
CT: control target
= control target key end

     0   :  { %s10478_s0 = inlined_call_operand.vmem [shape: bf16[8,3136], index: 0, kind: input, shape index: {}]   ;;  %s10479_s1 = inlined_call_operand.vmem [shape: bf16[1,256], index: 1, kind: input, shape index: {}]   ;;  %s10480_s2 = inlined_call_operand.vmem [shape: bf16[3136,256], index: 2, kind: input, shape index: {}]   ;;  %s10481_s3 = inlined_call_operand.vmem [shape: f32[1,256], index: 3, kind: input, shape index: {}]   ;;  %s10482_s4 = inlined_call_operand.vmem [shape: bf16[256,256], index: 4, kind: input, shape index: {}]   ;;  %s10483_s5 = inlined_call_operand.vmem [shape: f32[1,256], index: 5, kind: input, shape index: {}]   ;;  %s10484_s6 = inlined_call_operand.vmem [shape: bf16[3,256,128], index: 6, kind: input, shape index: {}]   ;;  %s10485_s7 = inlined_call_operand.vmem [shape: bf16[3,256,128], index: 7, kind: input, shape index: {}]   ;;  %s10486_s8 = inlined_call_operand.vmem [shape: f32[3,1,128], index: 8, kind: input, shape index: {}]   ;;  %s10487_s9 = inlined_call_operand.vmem [shape: bf16[3,128,128], index: 9, kind: input, shape index: {}]   ;;  %s10488_s10 = inlined_call_operand.vmem [shape: f32[3,1,128], index: 10, kind: input, shape index: {}]   ;;  %s10489_s11 = inlined_call_operand.vmem [shape: bf16[3,128,1], index: 11, kind: input, shape index: {}]   ;;  %s10490_s12 = inlined_call_operand.vmem [shape: f32[3,1,1], index: 12, kind: input, shape index: {}]   ;;  %s10491_s13 = inlined_call_operand.vmem [shape: bf16[256,8], index: 13, kind: input, shape index: {}]   ;;  %s10492_s14 = inlined_call_operand.vmem [shape: bf16[256,8], index: 14, kind: input, shape index: {}]   ;;  %s10493_s15 = inlined_call_operand.vmem [shape: f32[1,8], index: 15, kind: input, shape index: {}]   ;;  %s10494_s16 = inlined_call_operand.vmem [shape: bf16[256,32], index: 16, kind: input, shape index: {}]   ;;  %s10495_s17 = inlined_call_operand.vmem [shape: bf16[256,32], index: 17, kind: input, shape index: {}]   ;;  %s10496_s18 = inlined_call_operand.vmem [shape: f32[1,32], index: 18, kind: input, shape index: {}]   ;;  %s10497_s19 = inlined_call_operand.hbm [shape: f32[8,8], index: 19, kind: output, shape index: {0}]   ;;  %s10498_s20 = inlined_call_operand.hbm [shape: f32[8,32], index: 20, kind: output, shape index: {1}]   ;;  %s10499_s21 = inlined_call_operand.hbm [shape: f32[1,128], index: 21, kind: output, shape index: {2}]   ;;  %s10500_s22 = inlined_call_operand.hbm [shape: f32[1,128], index: 22, kind: output, shape index: {3}]  }
   0x1   :  { %10505 = sst [smem:[#allocation12_spill]] %s10478_s0 }
   0x2   :  { %10506 = sst [smem:[#allocation13_spill]] %s10479_s1 }
   0x3   :  { %10507 = sst [smem:[#allocation14_spill]] %s10480_s2 }
   0x4   :  { %10508 = sst [smem:[#allocation15_spill]] %s10481_s3 }
   0x5   :  { %10509 = sst [smem:[#allocation16_spill]] %s10482_s4 }
   0x6   :  { %10510 = sst [smem:[#allocation17_spill]] %s10483_s5 }
   0x7   :  { %10511 = sst [smem:[#allocation18_spill]] %s10484_s6 }
   0x8   :  { %28 = vsyncpa [#allocation3], 0 }
   0x9   :  { %29 = vsyncpa [#allocation5], 0  ;;  %s10512_s29 = sld [smem:[#allocation14_spill]]  ;;  %vm2534_vm0 = vcmask 523264  }
   0xa   :  { %s10513_s25 = sld [smem:[#allocation12_spill]] }
   0xb   :  { %s10514_s0 = sld [smem:[#allocation15_spill]] }
   0xc   :  { %s10515_s27 = sld [smem:[#allocation16_spill]] }
   0xf   :  { %v7202_v0 = vld [vmem:[%s10512_s29 + $0x74] ss:$8 sps:$4 sm:$0xff]   ;;  %v7204_v1 = vld [vmem:[%s10512_s29 + $0x70] ss:$8 sps:$4 sm:$0xff]   ;;  %v7208_v4 = vld [vmem:[%s10512_s29 + $0x64] ss:$8 sps:$4 sm:$0xff]  }
  0x10   :  { %2538 = vmatprep.subr.bf16.mxu0 %v7202_v0  ;;  %v7205_v2 = vld [vmem:[%s10512_s29 + $0x174] ss:$8 sps:$4 sm:$0xff]   ;;  %v7207_v3 = vld [vmem:[%s10512_s29 + $0x170] ss:$8 sps:$4 sm:$0xff]   ;;  %v7210_v5 = vld [vmem:[%s10512_s29 + $0x60] ss:$8 sps:$4 sm:$0xff]  }
  0x11   :  { %2539 = vmatpush1.bf16.msra.mxu0 %v7204_v1  ;;  %2579 = vmatprep.subr.bf16.mxu1 %v7205_v2  ;;  %v7211_v6 = vld [vmem:[%s10512_s29 + $0x164] ss:$8 sps:$4 sm:$0xff]   ;;  %v7213_v7 = vld [vmem:[%s10512_s29 + $0x160] ss:$8 sps:$4 sm:$0xff]   ;;  %v7214_v8 = vld [vmem:[%s10512_s29 + $0x54] ss:$8 sps:$4 sm:$0xff]  }
  0x12   :  { %2580 = vmatpush1.bf16.msra.mxu1 %v7207_v3  ;;  %2540 = vmatprep.subr.bf16.mxu0 %v7208_v4  ;;  %v7216_v9 = vld [vmem:[%s10512_s29 + $0x50] ss:$8 sps:$4 sm:$0xff]   ;;  %v7217_v10 = vld [vmem:[%s10512_s29 + $0x154] ss:$8 sps:$4 sm:$0xff]   ;;  %v7220_v11 = vld [vmem:[%s10512_s29 + $0x44] ss:$8 sps:$4 sm:$0xff]  }
  0x13   :  { %2581 = vmatprep.subr.bf16.mxu1 %v7211_v6  ;;  %v7219_v12 = vld [vmem:[%s10512_s29 + $0x150] ss:$8 sps:$4 sm:$0xff]   ;;  %v7223_v13 = vld [vmem:[%s10512_s29 + $0x144] ss:$8 sps:$4 sm:$0xff]   ;;  %v7222_v14 = vld [vmem:[%s10512_s29 + $0x40] ss:$8 sps:$4 sm:$0xff]  }
  0x14   :  { %v7226_v15 = vld [vmem:[%s10512_s29 + $0x34] ss:$8 sps:$4 sm:$0xff]   ;;  %v7225_v16 = vld [vmem:[%s10512_s29 + $0x140] ss:$8 sps:$4 sm:$0xff]   ;;  %v7228_v18 = vld [vmem:[%s10512_s29 + $0x30] ss:$8 sps:$4 sm:$0xff]  }
  0x15   :  { %2541 = vmatpush1.bf16.msra.mxu0 %v7210_v5  ;;  %v7229_v17 = vld [vmem:[%s10512_s29 + $0x134] ss:$8 sps:$4 sm:$0xff]   ;;  %v7232_v19 = vld [vmem:[%s10512_s29 + $0x24] ss:$8 sps:$4 sm:$0xff]   ;;  %v7231_v20 = vld [vmem:[%s10512_s29 + $0x130] ss:$8 sps:$4 sm:$0xff]  }
  0x16   :  { %2542 = vmatprep.subr.bf16.mxu0 %v7214_v8  ;;  %2582 = vmatpush1.bf16.msra.mxu1 %v7213_v7  ;;  %v7235_v21 = vld [vmem:[%s10512_s29 + $0x124] ss:$8 sps:$4 sm:$0xff]   ;;  %v7234_v22 = vld [vmem:[%s10512_s29 + $0x20] ss:$8 sps:$4 sm:$0xff]   ;;  %v7238_v23 = vld [vmem:[%s10512_s29 + $0x14] ss:$8 sps:$4 sm:$0xff]  }
  0x17   :  { %2583 = vmatprep.subr.bf16.mxu1 %v7217_v10  ;;  %v7237_v24 = vld [vmem:[%s10512_s29 + $0x120] ss:$8 sps:$4 sm:$0xff]   ;;  %v7241_v25 = vld [vmem:[%s10512_s29 + $0x114] ss:$8 sps:$4 sm:$0xff]   ;;  %v7240_v26 = vld [vmem:[%s10512_s29 + $0x10] ss:$8 sps:$4 sm:$0xff]  }
  0x18   :  { %v7244_v27 = vld [vmem:[%s10512_s29 + $0x4] ss:$8 sps:$4 sm:$0xff]   ;;  %v7243_v28 = vld [vmem:[%s10512_s29 + $0x110] ss:$8 sps:$4 sm:$0xff]   ;;  %v7246_v30 = vld [vmem:[%s10512_s29] ss:$8 sps:$4 sm:$0xff]  }
  0x19   :  { %2543 = vmatpush1.bf16.msra.mxu0 %v7216_v9  ;;  %v7247_v29 = vld [vmem:[%s10512_s29 + $0x104] ss:$8 sps:$4 sm:$0xff]   ;;  %v7250_v31 = vld [vmem:[%s10512_s29 + $0xf4] ss:$8 sps:$4 sm:$0xff]   ;;  %v7249_v32 = vld [vmem:[%s10512_s29 + $0x100] ss:$8 sps:$4 sm:$0xff]  }
  0x1a   :  { %2544 = vmatprep.subr.bf16.mxu0 %v7220_v11  ;;  %2584 = vmatpush1.bf16.msra.mxu1 %v7219_v12  ;;  %v7253_v33 = vld [vmem:[%s10512_s29 + $0x1f4] ss:$8 sps:$4 sm:$0xff]   ;;  %v7252_v34 = vld [vmem:[%s10512_s29 + $0xf0] ss:$8 sps:$4 sm:$0xff]   ;;  %v7256_v35 = vld [vmem:[%s10512_s29 + $0xe4] ss:$8 sps:$4 sm:$0xff]  }
  0x1b   :  { %2585 = vmatprep.subr.bf16.mxu1 %v7223_v13  ;;  %v7255_v36 = vld [vmem:[%s10512_s29 + $0x1f0] ss:$8 sps:$4 sm:$0xff]   ;;  %v7259_v37 = vld [vmem:[%s10512_s29 + $0x1e4] ss:$8 sps:$4 sm:$0xff]   ;;  %v7258_v38 = vld [vmem:[%s10512_s29 + $0xe0] ss:$8 sps:$4 sm:$0xff]  }
  0x1c   :  { %v7262_v39 = vld [vmem:[%s10512_s29 + $0xd4] ss:$8 sps:$4 sm:$0xff]   ;;  %v7261_v40 = vld [vmem:[%s10512_s29 + $0x1e0] ss:$8 sps:$4 sm:$0xff]   ;;  %v7264_v42 = vld [vmem:[%s10512_s29 + $0xd0] ss:$8 sps:$4 sm:$0xff]  }
  0x1d   :  { %2545 = vmatpush1.bf16.msra.mxu0 %v7222_v14  ;;  %v7265_v41 = vld [vmem:[%s10512_s29 + $0x1d4] ss:$8 sps:$4 sm:$0xff]   ;;  %v7268_v43 = vld [vmem:[%s10512_s29 + $0xc4] ss:$8 sps:$4 sm:$0xff]   ;;  %v7267_v44 = vld [vmem:[%s10512_s29 + $0x1d0] ss:$8 sps:$4 sm:$0xff]  }
  0x1e   :  { %2546 = vmatprep.subr.bf16.mxu0 %v7226_v15  ;;  %2586 = vmatpush1.bf16.msra.mxu1 %v7225_v16  ;;  %v7271_v45 = vld [vmem:[%s10512_s29 + $0x1c4] ss:$8 sps:$4 sm:$0xff]   ;;  %v7270_v47 = vld [vmem:[%s10512_s29 + $0xc0] ss:$8 sps:$4 sm:$0xff]   ;;  %v7274_v49 = vld [vmem:[%s10512_s29 + $0xb4] ss:$8 sps:$4 sm:$0xff]  }
  0x1f   :  { %2587 = vmatprep.subr.bf16.mxu1 %v7229_v17  ;;  %v70_v46 = vld [vmem:[%s10513_s25] sm:$0xff]  ;;  %v71_v50 = vld [vmem:[%s10513_s25 + $0x8] sm:$0xff]  ;;  %v7277_v53 = vld [vmem:[%s10512_s29 + $0x1b4] ss:$8 sps:$4 sm:$0xff]  }
  0x20   :  { %v5927_v48 = vcombine.high %v70_v46, %v70_v46  ;;  %v7273_v51 = vld [vmem:[%s10512_s29 + $0x1c0] ss:$8 sps:$4 sm:$0xff]   ;;  %v5929_v52 = vcombine.high %v71_v50, %v71_v50  ;;  %v7276_v54 = vld [vmem:[%s10512_s29 + $0xb0] ss:$8 sps:$4 sm:$0xff]   ;;  %v7280_v55 = vld [vmem:[%s10512_s29 + $0xa4] ss:$8 sps:$4 sm:$0xff]   ;;  %v5926_v5 = vcombine.low %v70_v46, %v70_v46  ;;  %v5928_v8 = vcombine.low %v71_v50, %v71_v50 }
  0x21   :  { %2547 = vmatpush1.bf16.msra.mxu0 %v7228_v18  ;;  %v7279_v56 = vld [vmem:[%s10512_s29 + $0x1b0] ss:$8 sps:$4 sm:$0xff]   ;;  %v7283_v57 = vld [vmem:[%s10512_s29 + $0x1a4] ss:$8 sps:$4 sm:$0xff]   ;;  %v7282_v58 = vld [vmem:[%s10512_s29 + $0xa0] ss:$8 sps:$4 sm:$0xff]  }
  0x22   :  { %2548 = vmatprep.subr.bf16.mxu0 %v7232_v19  ;;  %2588 = vmatpush1.bf16.msra.mxu1 %v7231_v20  ;;  %v7286_v59 = vld [vmem:[%s10512_s29 + $0x94] ss:$8 sps:$4 sm:$0xff]   ;;  %v7285_v60 = vld [vmem:[%s10512_s29 + $0x1a0] ss:$8 sps:$4 sm:$0xff]   ;;  %v7288_v62 = vld [vmem:[%s10512_s29 + $0x90] ss:$8 sps:$4 sm:$0xff]  }
  0x23   :  { %2589 = vmatprep.subr.bf16.mxu1 %v7235_v21  ;;  %2570 = vmatprep.mubr.bf16.mxu0 %v5927_v48  ;;  %v7289_v61 = vld [vmem:[%s10512_s29 + $0x194] ss:$8 sps:$4 sm:$0xff]   ;;  %v7292_v63 = vld [vmem:[%s10512_s29 + $0x84] ss:$8 sps:$4 sm:$0xff]   ;;  %v7291_v0 = vld [vmem:[%s10512_s29 + $0x190] ss:$8 sps:$4 sm:$0xff]  }
  0x24   :  { %2611 = vmatprep.mubr.bf16.mxu1 %v5929_v52  ;;  %v7295_v1 = vld [vmem:[%s10512_s29 + $0x184] ss:$8 sps:$4 sm:$0xff]   ;;  %v7294_v2 = vld [vmem:[%s10512_s29 + $0x80] ss:$8 sps:$4 sm:$0xff]   ;;  %v7302_v3 = vld [vmem:[%s10512_s29 + $0x274] ss:$8 sps:$4 sm:$0xff]  }
  0x25   :  { %2549 = vmatpush1.bf16.msra.mxu0 %v7234_v22  ;;  %v7299_v4 = vld [vmem:[%s10512_s29 + $0x180] ss:$8 sps:$4 sm:$0xff]   ;;  %v7307_v6 = vld [vmem:[%s10512_s29 + $0x374] ss:$8 sps:$4 sm:$0xff]   ;;  %v7300_v7 = vld [vmem:[%s10512_s29 + $0x270] ss:$8 sps:$4 sm:$0xff]  }
  0x26   :  { %2550 = vmatprep.subr.bf16.mxu0 %v7238_v23  ;;  %2590 = vmatpush1.bf16.msra.mxu1 %v7237_v24  ;;  %v7310_v9 = vld [vmem:[%s10512_s29 + $0x264] ss:$8 sps:$4 sm:$0xff]   ;;  %v7305_v10 = vld [vmem:[%s10512_s29 + $0x370] ss:$8 sps:$4 sm:$0xff]   ;;  %v7308_v12 = vld [vmem:[%s10512_s29 + $0x260] ss:$8 sps:$4 sm:$0xff]  }
  0x27   :  { %2591 = vmatprep.subr.bf16.mxu1 %v7241_v25  ;;  %v7313_v11 = vld [vmem:[%s10512_s29 + $0x364] ss:$8 sps:$4 sm:$0xff]   ;;  %v7316_v13 = vld [vmem:[%s10512_s29 + $0x254] ss:$8 sps:$4 sm:$0xff]   ;;  %v7311_v14 = vld [vmem:[%s10512_s29 + $0x360] ss:$8 sps:$4 sm:$0xff]  }
  0x28   :  { %v7319_v15 = vld [vmem:[%s10512_s29 + $0x354] ss:$8 sps:$4 sm:$0xff]   ;;  %v7314_v16 = vld [vmem:[%s10512_s29 + $0x250] ss:$8 sps:$4 sm:$0xff]   ;;  %v7322_v17 = vld [vmem:[%s10512_s29 + $0x244] ss:$8 sps:$4 sm:$0xff]  }
  0x29   :  { %2551 = vmatpush1.bf16.msra.mxu0 %v7240_v26  ;;  %v7317_v18 = vld [vmem:[%s10512_s29 + $0x350] ss:$8 sps:$4 sm:$0xff]   ;;  %v7325_v19 = vld [vmem:[%s10512_s29 + $0x344] ss:$8 sps:$4 sm:$0xff]   ;;  %v7320_v20 = vld [vmem:[%s10512_s29 + $0x240] ss:$8 sps:$4 sm:$0xff]  }
  0x2a   :  { %2552 = vmatprep.subr.bf16.mxu0 %v7244_v27  ;;  %2592 = vmatpush1.bf16.msra.mxu1 %v7243_v28  ;;  %v7328_v21 = vld [vmem:[%s10512_s29 + $0x234] ss:$8 sps:$4 sm:$0xff]   ;;  %v7323_v22 = vld [vmem:[%s10512_s29 + $0x340] ss:$8 sps:$4 sm:$0xff]   ;;  %v7326_v24 = vld [vmem:[%s10512_s29 + $0x230] ss:$8 sps:$4 sm:$0xff]  }
  0x2b   :  { %2593 = vmatprep.subr.bf16.mxu1 %v7247_v29  ;;  %v7331_v23 = vld [vmem:[%s10512_s29 + $0x334] ss:$8 sps:$4 sm:$0xff]   ;;  %v7334_v25 = vld [vmem:[%s10512_s29 + $0x224] ss:$8 sps:$4 sm:$0xff]   ;;  %v7329_v26 = vld [vmem:[%s10512_s29 + $0x330] ss:$8 sps:$4 sm:$0xff]  }
  0x2c   :  { %v7337_v27 = vld [vmem:[%s10512_s29 + $0x324] ss:$8 sps:$4 sm:$0xff]   ;;  %v7332_v28 = vld [vmem:[%s10512_s29 + $0x220] ss:$8 sps:$4 sm:$0xff]   ;;  %v7340_v29 = vld [vmem:[%s10512_s29 + $0x214] ss:$8 sps:$4 sm:$0xff]  }
  0x2d   :  { %2553 = vmatpush1.bf16.msra.mxu0 %v7246_v30  ;;  %v7335_v30 = vld [vmem:[%s10512_s29 + $0x320] ss:$8 sps:$4 sm:$0xff]   ;;  %v7353_v46 = vld [vmem:[%s10512_s29 + $0x3f0] ss:$8 sps:$4 sm:$0xff]  }
  0x2e   :  { %2554 = vmatprep.subr.bf16.mxu0 %v7250_v31  ;;  %2594 = vmatpush1.bf16.msra.mxu1 %v7249_v32  ;;  %v7343_v31 = vld [vmem:[%s10512_s29 + $0x314] ss:$8 sps:$4 sm:$0xff]   ;;  %v7356_v48 = vld [vmem:[%s10512_s29 + $0x2e0] ss:$8 sps:$4 sm:$0xff]   ;;  %v7362_v52 = vld [vmem:[%s10512_s29 + $0x2d0] ss:$8 sps:$4 sm:$0xff]  }
  0x2f   :  { %2595 = vmatprep.subr.bf16.mxu1 %v7253_v33  ;;  %v8575_v32 = vld [vmem:[%s10513_s25 + $0x10] sm:$0xff]  ;;  %v7359_v50 = vld [vmem:[%s10512_s29 + $0x3e0] ss:$8 sps:$4 sm:$0xff]  }
  0x30   :  { %v7338_v33 = vld [vmem:[%s10512_s29 + $0x210] ss:$8 sps:$4 sm:$0xff]  }
  0x31   :  { %2555 = vmatpush2.bf16.msra.mxu0 %v7252_v34  ;;  %v5931_v34 = vcombine.high %v8575_v32, %v8575_v32 }
  0x32   :  { %2556 = vmatprep.subr.bf16.mxu0 %v7256_v35  ;;  %2596 = vmatpush2.bf16.msra.mxu1 %v7255_v36  ;;  %v8585_v35 = vld [vmem:[%s10513_s25 + $0x18] sm:$0xff]  ;;  %v7346_v36 = vld [vmem:[%s10512_s29 + $0x204] ss:$8 sps:$4 sm:$0xff]  }
  0x33   :  { %2597 = vmatprep.subr.bf16.mxu1 %v7259_v37  ;;  %v5933_v37 = vcombine.high %v8585_v35, %v8585_v35 }
  0x35   :  { %2557 = vmatpush2.bf16.msra.mxu0 %v7258_v38  ;;  %v7341_v38 = vld [vmem:[%s10512_s29 + $0x310] ss:$8 sps:$4 sm:$0xff]  }
  0x36   :  { %2558 = vmatprep.subr.bf16.mxu0 %v7262_v39  ;;  %2598 = vmatpush2.bf16.msra.mxu1 %v7261_v40  ;;  %v7349_v39 = vld [vmem:[%s10512_s29 + $0x304] ss:$8 sps:$4 sm:$0xff]   ;;  %v7344_v40 = vld [vmem:[%s10512_s29 + $0x200] ss:$8 sps:$4 sm:$0xff]  }
  0x37   :  { %2599 = vmatprep.subr.bf16.mxu1 %v7265_v41  ;;  %v7352_v41 = vld [vmem:[%s10512_s29 + $0x2f4] ss:$8 sps:$4 sm:$0xff]  }
  0x39   :  { %2559 = vmatpush2.bf16.msra.mxu0 %v7264_v42  ;;  %v7347_v42 = vld [vmem:[%s10512_s29 + $0x300] ss:$8 sps:$4 sm:$0xff]  }
  0x3a   :  { %2560 = vmatprep.subr.bf16.mxu0 %v7268_v43  ;;  %2600 = vmatpush2.bf16.msra.mxu1 %v7267_v44  ;;  %v7355_v43 = vld [vmem:[%s10512_s29 + $0x3f4] ss:$8 sps:$4 sm:$0xff]   ;;  %v7350_v44 = vld [vmem:[%s10512_s29 + $0x2f0] ss:$8 sps:$4 sm:$0xff]  }
  0x3b   :  { %2601 = vmatprep.subr.bf16.mxu1 %v7271_v45  ;;  %v7358_v45 = vld [vmem:[%s10512_s29 + $0x2e4] ss:$8 sps:$4 sm:$0xff]  }
  0x3d   :  { %2561 = vmatpush2.bf16.msra.mxu0 %v7270_v47  ;;  %v7361_v47 = vld [vmem:[%s10512_s29 + $0x3e4] ss:$8 sps:$4 sm:$0xff]  }
  0x3e   :  { %2562 = vmatprep.subr.bf16.mxu0 %v7274_v49  ;;  %2602 = vmatpush2.bf16.msra.mxu1 %v7273_v51  ;;  %v7364_v49 = vld [vmem:[%s10512_s29 + $0x2d4] ss:$8 sps:$4 sm:$0xff]  }
  0x3f   :  { %2603 = vmatprep.subr.bf16.mxu1 %v7277_v53  ;;  %v7367_v51 = vld [vmem:[%s10512_s29 + $0x3d4] ss:$8 sps:$4 sm:$0xff]   ;;  %v7370_v53 = vld [vmem:[%s10512_s29 + $0x2c4] ss:$8 sps:$4 sm:$0xff]  }
  0x41   :  { %2563 = vmatpush2.bf16.msra.mxu0 %v7276_v54  ;;  %v7365_v54 = vld [vmem:[%s10512_s29 + $0x3d0] ss:$8 sps:$4 sm:$0xff]  }
  0x42   :  { %2564 = vmatprep.subr.bf16.mxu0 %v7280_v55  ;;  %2604 = vmatpush2.bf16.msra.mxu1 %v7279_v56  ;;  %v7373_v55 = vld [vmem:[%s10512_s29 + $0x3c4] ss:$8 sps:$4 sm:$0xff]   ;;  %v7368_v56 = vld [vmem:[%s10512_s29 + $0x2c0] ss:$8 sps:$4 sm:$0xff]  }
  0x43   :  { %2605 = vmatprep.subr.bf16.mxu1 %v7283_v57  ;;  %v7376_v57 = vld [vmem:[%s10512_s29 + $0x2b4] ss:$8 sps:$4 sm:$0xff]  }
  0x45   :  { %2565 = vmatpush2.bf16.msra.mxu0 %v7282_v58  ;;  %v7371_v58 = vld [vmem:[%s10512_s29 + $0x3c0] ss:$8 sps:$4 sm:$0xff]  }
  0x46   :  { %2566 = vmatprep.subr.bf16.mxu0 %v7286_v59  ;;  %2606 = vmatpush2.bf16.msra.mxu1 %v7285_v60  ;;  %v7379_v59 = vld [vmem:[%s10512_s29 + $0x3b4] ss:$8 sps:$4 sm:$0xff]   ;;  %v7374_v60 = vld [vmem:[%s10512_s29 + $0x2b0] ss:$8 sps:$4 sm:$0xff]  }
  0x47   :  { %2607 = vmatprep.subr.bf16.mxu1 %v7289_v61  ;;  %v7382_v61 = vld [vmem:[%s10512_s29 + $0x2a4] ss:$8 sps:$4 sm:$0xff]  }
  0x49   :  { %2567 = vmatpush2.bf16.msra.mxu0 %v7288_v62  ;;  %v7377_v62 = vld [vmem:[%s10512_s29 + $0x3b0] ss:$8 sps:$4 sm:$0xff]  }
  0x4a   :  { %2568 = vmatprep.subr.bf16.mxu0 %v7292_v63  ;;  %2608 = vmatpush2.bf16.msra.mxu1 %v7291_v0  ;;  %v7385_v63 = vld [vmem:[%s10512_s29 + $0x3a4] ss:$8 sps:$4 sm:$0xff]   ;;  %v7380_v0 = vld [vmem:[%s10512_s29 + $0x2a0] ss:$8 sps:$4 sm:$0xff]  }
  0x4b   :  { %2609 = vmatprep.subr.bf16.mxu1 %v7295_v1  ;;  %v7388_v1 = vld [vmem:[%s10512_s29 + $0x294] ss:$8 sps:$4 sm:$0xff]  }
  0x4d   :  { %2569 = vmatpush2.bf16.msra.mxu0 %v7294_v2  ;;  %v7383_v2 = vld [vmem:[%s10512_s29 + $0x3a0] ss:$8 sps:$4 sm:$0xff]  }
  0x4e   :  { %2620 = vmatprep.subr.bf16.mxu0 %v7302_v3  ;;  %2610 = vmatpush2.bf16.msra.mxu1 %v7299_v4  ;;  %v7391_v3 = vld [vmem:[%s10512_s29 + $0x394] ss:$8 sps:$4 sm:$0xff]   ;;  %v7386_v4 = vld [vmem:[%s10512_s29 + $0x290] ss:$8 sps:$4 sm:$0xff]  }
  0x4f   :  { %2661 = vmatprep.subr.bf16.mxu1 %v7307_v6  ;;  %v7389_v6 = vld [vmem:[%s10512_s29 + $0x390] ss:$8 sps:$4 sm:$0xff]  }
  0x50   :  { %2571 = vmatmul.mubr.bf16.vlgmr.msra.gmra.mxu0 %v5926_v5  ;;  %v7394_v5 = vld [vmem:[%s10512_s29 + $0x284] ss:$8 sps:$4 sm:$0xff]  }
  0x51   :  { %2621 = vmatpush1.bf16.msra.mxu0 %v7300_v7  ;;  %2612 = vmatmul.mubr.bf16.vlgmr.msra.gmra.mxu1 %v5928_v8  ;;  %v7397_v7 = vld [vmem:[%s10512_s29 + $0x384] ss:$8 sps:$4 sm:$0xff]   ;;  %v7392_v8 = vld [vmem:[%s10512_s29 + $0x280] ss:$8 sps:$4 sm:$0xff]  }
  0x52   :  { %2622 = vmatprep.subr.bf16.mxu0 %v7310_v9  ;;  %2662 = vmatpush1.bf16.msra.mxu1 %v7305_v10  ;;  %v7402_v9 = vld [vmem:[%s10512_s29 + $0x474] ss:$8 sps:$4 sm:$0xff]   ;;  %v7395_v10 = vld [vmem:[%s10512_s29 + $0x380] ss:$8 sps:$4 sm:$0xff]  }
  0x53   :  { %2663 = vmatprep.subr.bf16.mxu1 %v7313_v11  ;;  %2652 = vmatprep.mubr.bf16.mxu0 %v5931_v34  ;;  %v5930_v11 = vcombine.low %v8575_v32, %v8575_v32  ;;  %v7423_v32 = vld [vmem:[%s10512_s29 + $0x540] ss:$8 sps:$4 sm:$0xff]   ;;  %v7426_v34 = vld [vmem:[%s10512_s29 + $0x430] ss:$8 sps:$4 sm:$0xff]  }
  0x54   :  { %2693 = vmatprep.mubr.bf16.mxu1 %v5933_v37  ;;  %v7437_v37 = vld [vmem:[%s10512_s29 + $0x524] ss:$8 sps:$4 sm:$0xff]  }
  0x55   :  { %2623 = vmatpush1.bf16.msra.mxu0 %v7308_v12  ;;  %v7407_v12 = vld [vmem:[%s10512_s29 + $0x574] ss:$8 sps:$4 sm:$0xff]  }
  0x56   :  { %2624 = vmatprep.subr.bf16.mxu0 %v7316_v13  ;;  %2664 = vmatpush1.bf16.msra.mxu1 %v7311_v14  ;;  %v7400_v13 = vld [vmem:[%s10512_s29 + $0x470] ss:$8 sps:$4 sm:$0xff]   ;;  %v5932_v14 = vcombine.low %v8585_v35, %v8585_v35  ;;  %v7434_v35 = vld [vmem:[%s10512_s29 + $0x424] ss:$8 sps:$4 sm:$0xff]  }
  0x57   :  { %2665 = vmatprep.subr.bf16.mxu1 %v7319_v15  ;;  %v7410_v15 = vld [vmem:[%s10512_s29 + $0x464] ss:$8 sps:$4 sm:$0xff]  }
  0x59   :  { %2625 = vmatpush1.bf16.msra.mxu0 %v7314_v16  ;;  %v7405_v16 = vld [vmem:[%s10512_s29 + $0x570] ss:$8 sps:$4 sm:$0xff]  }
  0x5a   :  { %2626 = vmatprep.subr.bf16.mxu0 %v7322_v17  ;;  %2666 = vmatpush1.bf16.msra.mxu1 %v7317_v18  ;;  %v8722_v17 = vld [vmem:[%s10513_s25 + $0x20] sm:$0xff] }
  0x5b   :  { %2667 = vmatprep.subr.bf16.mxu1 %v7325_v19  ;;  %v7408_v18 = vld [vmem:[%s10512_s29 + $0x460] ss:$8 sps:$4 sm:$0xff]   ;;  %v7413_v19 = vld [vmem:[%s10512_s29 + $0x564] ss:$8 sps:$4 sm:$0xff]  }
  0x5d   :  { %2627 = vmatpush1.bf16.msra.mxu0 %v7320_v20  ;;  %v5935_v20 = vcombine.high %v8722_v17, %v8722_v17 }
  0x5e   :  { %2628 = vmatprep.subr.bf16.mxu0 %v7328_v21  ;;  %2668 = vmatpush1.bf16.msra.mxu1 %v7323_v22  ;;  %v8735_v21 = vld [vmem:[%s10513_s25 + $0x28] sm:$0xff]  ;;  %v7416_v22 = vld [vmem:[%s10512_s29 + $0x454] ss:$8 sps:$4 sm:$0xff]  }
  0x5f   :  { %2669 = vmatprep.subr.bf16.mxu1 %v7331_v23  ;;  %v5937_v23 = vcombine.high %v8735_v21, %v8735_v21 }
  0x61   :  { %2629 = vmatpush1.bf16.msra.mxu0 %v7326_v24  ;;  %v7411_v24 = vld [vmem:[%s10512_s29 + $0x560] ss:$8 sps:$4 sm:$0xff]  }
  0x62   :  { %2630 = vmatprep.subr.bf16.mxu0 %v7334_v25  ;;  %2670 = vmatpush1.bf16.msra.mxu1 %v7329_v26  ;;  %v7419_v25 = vld [vmem:[%s10512_s29 + $0x554] ss:$8 sps:$4 sm:$0xff]   ;;  %v7414_v26 = vld [vmem:[%s10512_s29 + $0x450] ss:$8 sps:$4 sm:$0xff]  }
  0x63   :  { %2671 = vmatprep.subr.bf16.mxu1 %v7337_v27  ;;  %v7422_v27 = vld [vmem:[%s10512_s29 + $0x444] ss:$8 sps:$4 sm:$0xff]  }
  0x65   :  { %2631 = vmatpush1.bf16.msra.mxu0 %v7332_v28  ;;  %v7417_v28 = vld [vmem:[%s10512_s29 + $0x550] ss:$8 sps:$4 sm:$0xff]  }
  0x66   :  { %2632 = vmatprep.subr.bf16.mxu0 %v7340_v29  ;;  %2672 = vmatpush1.bf16.msra.mxu1 %v7335_v30  ;;  %v7425_v29 = vld [vmem:[%s10512_s29 + $0x544] ss:$8 sps:$4 sm:$0xff]   ;;  %v7420_v30 = vld [vmem:[%s10512_s29 + $0x440] ss:$8 sps:$4 sm:$0xff]  }
  0x67   :  { %2673 = vmatprep.subr.bf16.mxu1 %v7343_v31  ;;  %v7428_v31 = vld [vmem:[%s10512_s29 + $0x434] ss:$8 sps:$4 sm:$0xff]  }
  0x69   :  { %2633 = vmatpush1.bf16.msra.mxu0 %v7338_v33  ;;  %v7431_v33 = vld [vmem:[%s10512_s29 + $0x534] ss:$8 sps:$4 sm:$0xff]  }
  0x6a   :  { %2634 = vmatprep.subr.bf16.mxu0 %v7346_v36  ;;  %2674 = vmatpush1.bf16.msra.mxu1 %v7341_v38  ;;  %v7429_v36 = vld [vmem:[%s10512_s29 + $0x530] ss:$8 sps:$4 sm:$0xff]   ;;  %v7432_v38 = vld [vmem:[%s10512_s29 + $0x420] ss:$8 sps:$4 sm:$0xff]  }
  0x6b   :  { %2675 = vmatprep.subr.bf16.mxu1 %v7349_v39  ;;  %v7440_v39 = vld [vmem:[%s10512_s29 + $0x414] ss:$8 sps:$4 sm:$0xff]  }
  0x6d   :  { %2635 = vmatpush1.bf16.msra.mxu0 %v7344_v40  ;;  %v7435_v40 = vld [vmem:[%s10512_s29 + $0x520] ss:$8 sps:$4 sm:$0xff]  }
  0x6e   :  { %2636 = vmatprep.subr.bf16.mxu0 %v7352_v41  ;;  %2676 = vmatpush1.bf16.msra.mxu1 %v7347_v42  ;;  %v7443_v41 = vld [vmem:[%s10512_s29 + $0x514] ss:$8 sps:$4 sm:$0xff]   ;;  %v7438_v42 = vld [vmem:[%s10512_s29 + $0x410] ss:$8 sps:$4 sm:$0xff]  }
  0x6f   :  { %2677 = vmatprep.subr.bf16.mxu1 %v7355_v43  ;;  %v7446_v43 = vld [vmem:[%s10512_s29 + $0x404] ss:$8 sps:$4 sm:$0xff]  }
  0x71   :  { %2637 = vmatpush2.bf16.msra.mxu0 %v7350_v44  ;;  %v7441_v44 = vld [vmem:[%s10512_s29 + $0x510] ss:$8 sps:$4 sm:$0xff]  }
  0x72   :  { %2638 = vmatprep.subr.bf16.mxu0 %v7358_v45  ;;  %2678 = vmatpush2.bf16.msra.mxu1 %v7353_v46  ;;  %v7449_v45 = vld [vmem:[%s10512_s29 + $0x504] ss:$8 sps:$4 sm:$0xff]   ;;  %v7444_v46 = vld [vmem:[%s10512_s29 + $0x400] ss:$8 sps:$4 sm:$0xff]  }
  0x73   :  { %2679 = vmatprep.subr.bf16.mxu1 %v7361_v47  ;;  %v7452_v47 = vld [vmem:[%s10512_s29 + $0x4f4] ss:$8 sps:$4 sm:$0xff]  }
  0x75   :  { %2639 = vmatpush2.bf16.msra.mxu0 %v7356_v48  ;;  %v7447_v48 = vld [vmem:[%s10512_s29 + $0x500] ss:$8 sps:$4 sm:$0xff]  }
  0x76   :  { %2640 = vmatprep.subr.bf16.mxu0 %v7364_v49  ;;  %2680 = vmatpush2.bf16.msra.mxu1 %v7359_v50  ;;  %v7455_v49 = vld [vmem:[%s10512_s29 + $0x5f4] ss:$8 sps:$4 sm:$0xff]   ;;  %v7450_v50 = vld [vmem:[%s10512_s29 + $0x4f0] ss:$8 sps:$4 sm:$0xff]  }
  0x77   :  { %2681 = vmatprep.subr.bf16.mxu1 %v7367_v51  ;;  %v7458_v51 = vld [vmem:[%s10512_s29 + $0x4e4] ss:$8 sps:$4 sm:$0xff]  }
  0x79   :  { %2641 = vmatpush2.bf16.msra.mxu0 %v7362_v52  ;;  %v7453_v52 = vld [vmem:[%s10512_s29 + $0x5f0] ss:$8 sps:$4 sm:$0xff]  }
  0x7a   :  { %2642 = vmatprep.subr.bf16.mxu0 %v7370_v53  ;;  %2682 = vmatpush2.bf16.msra.mxu1 %v7365_v54  ;;  %v7461_v53 = vld [vmem:[%s10512_s29 + $0x5e4] ss:$8 sps:$4 sm:$0xff]   ;;  %v7456_v54 = vld [vmem:[%s10512_s29 + $0x4e0] ss:$8 sps:$4 sm:$0xff]  }
  0x7b   :  { %2683 = vmatprep.subr.bf16.mxu1 %v7373_v55  ;;  %v7464_v55 = vld [vmem:[%s10512_s29 + $0x4d4] ss:$8 sps:$4 sm:$0xff]  }
  0x7d   :  { %2643 = vmatpush2.bf16.msra.mxu0 %v7368_v56  ;;  %v7459_v56 = vld [vmem:[%s10512_s29 + $0x5e0] ss:$8 sps:$4 sm:$0xff]  }
  0x7e   :  { %2644 = vmatprep.subr.bf16.mxu0 %v7376_v57  ;;  %2684 = vmatpush2.bf16.msra.mxu1 %v7371_v58  ;;  %v7467_v57 = vld [vmem:[%s10512_s29 + $0x5d4] ss:$8 sps:$4 sm:$0xff]   ;;  %v7462_v58 = vld [vmem:[%s10512_s29 + $0x4d0] ss:$8 sps:$4 sm:$0xff]  }
  0x7f   :  { %2685 = vmatprep.subr.bf16.mxu1 %v7379_v59  ;;  %v7470_v59 = vld [vmem:[%s10512_s29 + $0x4c4] ss:$8 sps:$4 sm:$0xff]  }
  0x81   :  { %2645 = vmatpush2.bf16.msra.mxu0 %v7374_v60  ;;  %v7465_v60 = vld [vmem:[%s10512_s29 + $0x5d0] ss:$8 sps:$4 sm:$0xff]  }
  0x82   :  { %2646 = vmatprep.subr.bf16.mxu0 %v7382_v61  ;;  %2686 = vmatpush2.bf16.msra.mxu1 %v7377_v62  ;;  %v7473_v61 = vld [vmem:[%s10512_s29 + $0x5c4] ss:$8 sps:$4 sm:$0xff]   ;;  %v7468_v62 = vld [vmem:[%s10512_s29 + $0x4c0] ss:$8 sps:$4 sm:$0xff]  }
  0x83   :  { %2687 = vmatprep.subr.bf16.mxu1 %v7385_v63  ;;  %v7476_v63 = vld [vmem:[%s10512_s29 + $0x4b4] ss:$8 sps:$4 sm:$0xff]  }
  0x85   :  { %2647 = vmatpush2.bf16.msra.mxu0 %v7380_v0  ;;  %v7471_v0 = vld [vmem:[%s10512_s29 + $0x5c0] ss:$8 sps:$4 sm:$0xff]  }
  0x86   :  { %2648 = vmatprep.subr.bf16.mxu0 %v7388_v1  ;;  %2688 = vmatpush2.bf16.msra.mxu1 %v7383_v2  ;;  %v7479_v1 = vld [vmem:[%s10512_s29 + $0x5b4] ss:$8 sps:$4 sm:$0xff]   ;;  %v7474_v2 = vld [vmem:[%s10512_s29 + $0x4b0] ss:$8 sps:$4 sm:$0xff]  }
  0x87   :  { %2689 = vmatprep.subr.bf16.mxu1 %v7391_v3  ;;  %v7482_v3 = vld [vmem:[%s10512_s29 + $0x4a4] ss:$8 sps:$4 sm:$0xff]  }
  0x89   :  { %2649 = vmatpush2.bf16.msra.mxu0 %v7386_v4  ;;  %v7477_v4 = vld [vmem:[%s10512_s29 + $0x5b0] ss:$8 sps:$4 sm:$0xff]  }
  0x8a   :  { %2650 = vmatprep.subr.bf16.mxu0 %v7394_v5  ;;  %2690 = vmatpush2.bf16.msra.mxu1 %v7389_v6  ;;  %v7485_v5 = vld [vmem:[%s10512_s29 + $0x5a4] ss:$8 sps:$4 sm:$0xff]   ;;  %v7480_v6 = vld [vmem:[%s10512_s29 + $0x4a0] ss:$8 sps:$4 sm:$0xff]  }
  0x8b   :  { %2691 = vmatprep.subr.bf16.mxu1 %v7397_v7  ;;  %v7488_v7 = vld [vmem:[%s10512_s29 + $0x494] ss:$8 sps:$4 sm:$0xff]  }
  0x8d   :  { %2651 = vmatpush2.bf16.msra.mxu0 %v7392_v8  ;;  %v7483_v8 = vld [vmem:[%s10512_s29 + $0x5a0] ss:$8 sps:$4 sm:$0xff]  }
  0x8e   :  { %2702 = vmatprep.subr.bf16.mxu0 %v7402_v9  ;;  %2692 = vmatpush2.bf16.msra.mxu1 %v7395_v10  ;;  %v7491_v9 = vld [vmem:[%s10512_s29 + $0x594] ss:$8 sps:$4 sm:$0xff]   ;;  %v7486_v10 = vld [vmem:[%s10512_s29 + $0x490] ss:$8 sps:$4 sm:$0xff]  }
  0x8f   :  { %2743 = vmatprep.subr.bf16.mxu1 %v7407_v12  ;;  %v7489_v12 = vld [vmem:[%s10512_s29 + $0x590] ss:$8 sps:$4 sm:$0xff]  }
  0x90   :  { %2653 = vmatmul.mubr.bf16.vlgmr.msra.gmra.mxu0 %v5930_v11  ;;  %v7494_v11 = vld [vmem:[%s10512_s29 + $0x484] ss:$8 sps:$4 sm:$0xff]  }
  0x91   :  { %2703 = vmatpush1.bf16.msra.mxu0 %v7400_v13  ;;  %2694 = vmatmul.mubr.bf16.vlgmr.msra.gmra.mxu1 %v5932_v14  ;;  %v7492_v13 = vld [vmem:[%s10512_s29 + $0x480] ss:$8 sps:$4 sm:$0xff]   ;;  %v7497_v14 = vld [vmem:[%s10512_s29 + $0x584] ss:$8 sps:$4 sm:$0xff]  }
  0x92   :  { %2704 = vmatprep.subr.bf16.mxu0 %v7410_v15  ;;  %2744 = vmatpush1.bf16.msra.mxu1 %v7405_v16  ;;  %v7502_v15 = vld [vmem:[%s10512_s29 + $0x674] ss:$8 sps:$4 sm:$0xff]  }
  0x93   :  { %2734 = vmatprep.mubr.bf16.mxu0 %v5935_v20  ;;  %2745 = vmatprep.subr.bf16.mxu1 %v7413_v19  ;;  %v8913_v16 = vld [vmem:[%s10513_s25 + $0x30] sm:$0xff]  ;;  %v5934_v19 = vcombine.low %v8722_v17, %v8722_v17  ;;  %v5936_v17 = vcombine.low %v8735_v21, %v8735_v21  ;;  %v7508_v21 = vld [vmem:[%s10512_s29 + $0x660] ss:$8 sps:$4 sm:$0xff]  }
  0x94   :  { %2775 = vmatprep.mubr.bf16.mxu1 %v5937_v23  ;;  %v7507_v20 = vld [vmem:[%s10512_s29 + $0x774] ss:$8 sps:$4 sm:$0xff]   ;;  %v7500_v23 = vld [vmem:[%s10512_s29 + $0x670] ss:$8 sps:$4 sm:$0xff]  }
  0x95   :  { %2705 = vmatpush1.bf16.msra.mxu0 %v7408_v18  ;;  %v7495_v18 = vld [vmem:[%s10512_s29 + $0x580] ss:$8 sps:$4 sm:$0xff]  }
  0x96   :  { %2706 = vmatprep.subr.bf16.mxu0 %v7416_v22  ;;  %2746 = vmatpush1.bf16.msra.mxu1 %v7411_v24  ;;  %v8926_v22 = vld [vmem:[%s10513_s25 + $0x38] sm:$0xff]  ;;  %v5939_v24 = vcombine.high %v8913_v16, %v8913_v16 }
  0x97   :  { %2747 = vmatprep.subr.bf16.mxu1 %v7419_v25  ;;  %v7510_v25 = vld [vmem:[%s10512_s29 + $0x664] ss:$8 sps:$4 sm:$0xff]  }
  0x99   :  { %2707 = vmatpush1.bf16.msra.mxu0 %v7414_v26  ;;  %v7505_v26 = vld [vmem:[%s10512_s29 + $0x770] ss:$8 sps:$4 sm:$0xff]  }
  0x9a   :  { %2708 = vmatprep.subr.bf16.mxu0 %v7422_v27  ;;  %2748 = vmatpush1.bf16.msra.mxu1 %v7417_v28  ;;  %v5941_v27 = vcombine.high %v8926_v22, %v8926_v22  ;;  %v7513_v28 = vld [vmem:[%s10512_s29 + $0x764] ss:$8 sps:$4 sm:$0xff]  }
  0x9b   :  { %2749 = vmatprep.subr.bf16.mxu1 %v7425_v29  ;;  %v7516_v29 = vld [vmem:[%s10512_s29 + $0x654] ss:$8 sps:$4 sm:$0xff]  }
  0x9d   :  { %2709 = vmatpush1.bf16.msra.mxu0 %v7420_v30  ;;  %v7511_v30 = vld [vmem:[%s10512_s29 + $0x760] ss:$8 sps:$4 sm:$0xff]  }
  0x9e   :  { %2710 = vmatprep.subr.bf16.mxu0 %v7428_v31  ;;  %2750 = vmatpush1.bf16.msra.mxu1 %v7423_v32  ;;  %v7519_v31 = vld [vmem:[%s10512_s29 + $0x754] ss:$8 sps:$4 sm:$0xff]   ;;  %v7514_v32 = vld [vmem:[%s10512_s29 + $0x650] ss:$8 sps:$4 sm:$0xff]  }
  0x9f   :  { %2751 = vmatprep.subr.bf16.mxu1 %v7431_v33  ;;  %v7522_v33 = vld [vmem:[%s10512_s29 + $0x644] ss:$8 sps:$4 sm:$0xff]  }
  0xa1   :  { %2711 = vmatpush1.bf16.msra.mxu0 %v7426_v34  ;;  %v7517_v34 = vld [vmem:[%s10512_s29 + $0x750] ss:$8 sps:$4 sm:$0xff]  }
  0xa2   :  { %2712 = vmatprep.subr.bf16.mxu0 %v7434_v35  ;;  %2752 = vmatpush1.bf16.msra.mxu1 %v7429_v36  ;;  %v7525_v35 = vld [vmem:[%s10512_s29 + $0x744] ss:$8 sps:$4 sm:$0xff]   ;;  %v7520_v36 = vld [vmem:[%s10512_s29 + $0x640] ss:$8 sps:$4 sm:$0xff]  }
  0xa3   :  { %2753 = vmatprep.subr.bf16.mxu1 %v7437_v37  ;;  %v7528_v37 = vld [vmem:[%s10512_s29 + $0x634] ss:$8 sps:$4 sm:$0xff]  }
  0xa5   :  { %2713 = vmatpush1.bf16.msra.mxu0 %v7432_v38  ;;  %v7523_v38 = vld [vmem:[%s10512_s29 + $0x740] ss:$8 sps:$4 sm:$0xff]  }
  0xa6   :  { %2714 = vmatprep.subr.bf16.mxu0 %v7440_v39  ;;  %2754 = vmatpush1.bf16.msra.mxu1 %v7435_v40  ;;  %v7531_v39 = vld [vmem:[%s10512_s29 + $0x734] ss:$8 sps:$4 sm:$0xff]   ;;  %v7526_v40 = vld [vmem:[%s10512_s29 + $0x630] ss:$8 sps:$4 sm:$0xff]  }
  0xa7   :  { %2755 = vmatprep.subr.bf16.mxu1 %v7443_v41  ;;  %v7534_v41 = vld [vmem:[%s10512_s29 + $0x624] ss:$8 sps:$4 sm:$0xff]  }
  0xa9   :  { %2715 = vmatpush1.bf16.msra.mxu0 %v7438_v42  ;;  %v7529_v42 = vld [vmem:[%s10512_s29 + $0x730] ss:$8 sps:$4 sm:$0xff]  }
  0xaa   :  { %2716 = vmatprep.subr.bf16.mxu0 %v7446_v43  ;;  %2756 = vmatpush1.bf16.msra.mxu1 %v7441_v44  ;;  %v7537_v43 = vld [vmem:[%s10512_s29 + $0x724] ss:$8 sps:$4 sm:$0xff]   ;;  %v7532_v44 = vld [vmem:[%s10512_s29 + $0x620] ss:$8 sps:$4 sm:$0xff]  }
  0xab   :  { %2757 = vmatprep.subr.bf16.mxu1 %v7449_v45  ;;  %v7540_v45 = vld [vmem:[%s10512_s29 + $0x614] ss:$8 sps:$4 sm:$0xff]  }
  0xad   :  { %2717 = vmatpush1.bf16.msra.mxu0 %v7444_v46  ;;  %v7535_v46 = vld [vmem:[%s10512_s29 + $0x720] ss:$8 sps:$4 sm:$0xff]  }
  0xae   :  { %2718 = vmatprep.subr.bf16.mxu0 %v7452_v47  ;;  %2758 = vmatpush1.bf16.msra.mxu1 %v7447_v48  ;;  %v7543_v47 = vld [vmem:[%s10512_s29 + $0x714] ss:$8 sps:$4 sm:$0xff]   ;;  %v7538_v48 = vld [vmem:[%s10512_s29 + $0x610] ss:$8 sps:$4 sm:$0xff]  }
  0xaf   :  { %2759 = vmatprep.subr.bf16.mxu1 %v7455_v49  ;;  %v7546_v49 = vld [vmem:[%s10512_s29 + $0x604] ss:$8 sps:$4 sm:$0xff]  }
  0xb1   :  { %2719 = vmatpush2.bf16.msra.mxu0 %v7450_v50  ;;  %v7541_v50 = vld [vmem:[%s10512_s29 + $0x710] ss:$8 sps:$4 sm:$0xff]  }
  0xb2   :  { %2720 = vmatprep.subr.bf16.mxu0 %v7458_v51  ;;  %2760 = vmatpush2.bf16.msra.mxu1 %v7453_v52  ;;  %v7549_v51 = vld [vmem:[%s10512_s29 + $0x704] ss:$8 sps:$4 sm:$0xff]   ;;  %v7544_v52 = vld [vmem:[%s10512_s29 + $0x600] ss:$8 sps:$4 sm:$0xff]  }
  0xb3   :  { %2761 = vmatprep.subr.bf16.mxu1 %v7461_v53  ;;  %v7552_v53 = vld [vmem:[%s10512_s29 + $0x6f4] ss:$8 sps:$4 sm:$0xff]  }
  0xb5   :  { %2721 = vmatpush2.bf16.msra.mxu0 %v7456_v54  ;;  %v7547_v54 = vld [vmem:[%s10512_s29 + $0x700] ss:$8 sps:$4 sm:$0xff]  }
  0xb6   :  { %2722 = vmatprep.subr.bf16.mxu0 %v7464_v55  ;;  %2762 = vmatpush2.bf16.msra.mxu1 %v7459_v56  ;;  %v7555_v55 = vld [vmem:[%s10512_s29 + $0x7f4] ss:$8 sps:$4 sm:$0xff]   ;;  %v7550_v56 = vld [vmem:[%s10512_s29 + $0x6f0] ss:$8 sps:$4 sm:$0xff]  }
  0xb7   :  { %2763 = vmatprep.subr.bf16.mxu1 %v7467_v57  ;;  %v7558_v57 = vld [vmem:[%s10512_s29 + $0x6e4] ss:$8 sps:$4 sm:$0xff]  }
  0xb9   :  { %2723 = vmatpush2.bf16.msra.mxu0 %v7462_v58  ;;  %v7553_v58 = vld [vmem:[%s10512_s29 + $0x7f0] ss:$8 sps:$4 sm:$0xff]  }
  0xba   :  { %2724 = vmatprep.subr.bf16.mxu0 %v7470_v59  ;;  %2764 = vmatpush2.bf16.msra.mxu1 %v7465_v60  ;;  %v7561_v59 = vld [vmem:[%s10512_s29 + $0x7e4] ss:$8 sps:$4 sm:$0xff]   ;;  %v7556_v60 = vld [vmem:[%s10512_s29 + $0x6e0] ss:$8 sps:$4 sm:$0xff]  }
  0xbb   :  { %2765 = vmatprep.subr.bf16.mxu1 %v7473_v61  ;;  %v7564_v61 = vld [vmem:[%s10512_s29 + $0x6d4] ss:$8 sps:$4 sm:$0xff]  }
  0xbd   :  { %2725 = vmatpush2.bf16.msra.mxu0 %v7468_v62  ;;  %v7559_v62 = vld [vmem:[%s10512_s29 + $0x7e0] ss:$8 sps:$4 sm:$0xff]  }
  0xbe   :  { %2726 = vmatprep.subr.bf16.mxu0 %v7476_v63  ;;  %2766 = vmatpush2.bf16.msra.mxu1 %v7471_v0  ;;  %v7567_v63 = vld [vmem:[%s10512_s29 + $0x7d4] ss:$8 sps:$4 sm:$0xff]   ;;  %v7562_v0 = vld [vmem:[%s10512_s29 + $0x6d0] ss:$8 sps:$4 sm:$0xff]  }
  0xbf   :  { %2767 = vmatprep.subr.bf16.mxu1 %v7479_v1  ;;  %v7570_v1 = vld [vmem:[%s10512_s29 + $0x6c4] ss:$8 sps:$4 sm:$0xff]  }
  0xc1   :  { %2727 = vmatpush2.bf16.msra.mxu0 %v7474_v2  ;;  %v7565_v2 = vld [vmem:[%s10512_s29 + $0x7d0] ss:$8 sps:$4 sm:$0xff]  }
  0xc2   :  { %2728 = vmatprep.subr.bf16.mxu0 %v7482_v3  ;;  %2768 = vmatpush2.bf16.msra.mxu1 %v7477_v4  ;;  %v7573_v3 = vld [vmem:[%s10512_s29 + $0x7c4] ss:$8 sps:$4 sm:$0xff]   ;;  %v7568_v4 = vld [vmem:[%s10512_s29 + $0x6c0] ss:$8 sps:$4 sm:$0xff]  }
  0xc3   :  { %2769 = vmatprep.subr.bf16.mxu1 %v7485_v5  ;;  %v7576_v5 = vld [vmem:[%s10512_s29 + $0x6b4] ss:$8 sps:$4 sm:$0xff]  }
  0xc5   :  { %2729 = vmatpush2.bf16.msra.mxu0 %v7480_v6  ;;  %v7571_v6 = vld [vmem:[%s10512_s29 + $0x7c0] ss:$8 sps:$4 sm:$0xff]  }
  0xc6   :  { %2730 = vmatprep.subr.bf16.mxu0 %v7488_v7  ;;  %2770 = vmatpush2.bf16.msra.mxu1 %v7483_v8  ;;  %v7579_v7 = vld [vmem:[%s10512_s29 + $0x7b4] ss:$8 sps:$4 sm:$0xff]   ;;  %v7574_v8 = vld [vmem:[%s10512_s29 + $0x6b0] ss:$8 sps:$4 sm:$0xff]  }
  0xc7   :  { %2771 = vmatprep.subr.bf16.mxu1 %v7491_v9  ;;  %v7582_v9 = vld [vmem:[%s10512_s29 + $0x6a4] ss:$8 sps:$4 sm:$0xff]  }
  0xc9   :  { %2731 = vmatpush2.bf16.msra.mxu0 %v7486_v10  ;;  %v7577_v10 = vld [vmem:[%s10512_s29 + $0x7b0] ss:$8 sps:$4 sm:$0xff]  }
  0xca   :  { %2732 = vmatprep.subr.bf16.mxu0 %v7494_v11  ;;  %2772 = vmatpush2.bf16.msra.mxu1 %v7489_v12  ;;  %v7585_v11 = vld [vmem:[%s10512_s29 + $0x7a4] ss:$8 sps:$4 sm:$0xff]   ;;  %v7580_v12 = vld [vmem:[%s10512_s29 + $0x6a0] ss:$8 sps:$4 sm:$0xff]  }
  0xcb   :  { %2773 = vmatprep.subr.bf16.mxu1 %v7497_v14  ;;  %v7588_v14 = vld [vmem:[%s10512_s29 + $0x694] ss:$8 sps:$4 sm:$0xff]  }
  0xcd   :  { %2733 = vmatpush2.bf16.msra.mxu0 %v7492_v13  ;;  %v477_v13 = vlaneseq }
  0xce   :  { %2784 = vmatprep.subr.bf16.mxu0 %v7502_v15  ;;  %2774 = vmatpush2.bf16.msra.mxu1 %v7495_v18  ;;  %v7583_v15 = vld [vmem:[%s10512_s29 + $0x7a0] ss:$8 sps:$4 sm:$0xff]   ;;  %v7591_v18 = vld [vmem:[%s10512_s29 + $0x794] ss:$8 sps:$4 sm:$0xff]  }
  0xcf   :  { %2825 = vmatprep.subr.bf16.mxu1 %v7507_v20  ;;  %v9105_v20 = vshrl.u32 %v477_v13, 7  ;;  %v7644_v13 = vld [vmem:[%s10512_s29 + $0x800] ss:$8 sps:$4 sm:$0xff]  }
  0xd0   :  { %2735 = vmatmul.mubr.bf16.vlgmr.msra.gmra.mxu0 %v5934_v19  ;;  %v7586_v19 = vld [vmem:[%s10512_s29 + $0x690] ss:$8 sps:$4 sm:$0xff]  }
  0xd1   :  { %2785 = vmatpush1.bf16.msra.mxu0 %v7500_v23  ;;  %2816 = vmatprep.mubr.bf16.mxu0 %v5939_v24  ;;  %v7589_v23 = vld [vmem:[%s10512_s29 + $0x790] ss:$8 sps:$4 sm:$0xff]   ;;  %v7594_v24 = vld [vmem:[%s10512_s29 + $0x684] ss:$8 sps:$4 sm:$0xff]  }
  0xd2   :  { %2776 = vmatmul.mubr.bf16.vlgmr.msra.gmra.mxu1 %v5936_v17  ;;  %2786 = vmatprep.subr.bf16.mxu0 %v7510_v25  ;;  %v7592_v17 = vld [vmem:[%s10512_s29 + $0x680] ss:$8 sps:$4 sm:$0xff]   ;;  %v7597_v25 = vld [vmem:[%s10512_s29 + $0x784] ss:$8 sps:$4 sm:$0xff]  }
  0xd3   :  { %2826 = vmatpush1.bf16.msra.mxu1 %v7505_v26  ;;  %2857 = vmatprep.mubr.bf16.mxu1 %v5941_v27  ;;  %v7595_v26 = vld [vmem:[%s10512_s29 + $0x780] ss:$8 sps:$4 sm:$0xff]  }
  0xd4   :  { %2827 = vmatprep.subr.bf16.mxu1 %v7513_v28  ;;  %v475_v27 = vld [vmem:[%s10514_s0] sm:$0x3]  ;;  %v9126_v28 = vsub.s32 0, %v9105_v20 }
  0xd5   :  { %2787 = vmatpush1.bf16.msra.mxu0 %v7508_v21  ;;  %v7602_v21 = vld [vmem:[%s10512_s29 + $0x874] ss:$8 sps:$4 sm:$0xff]  }
  0xd6   :  { %2788 = vmatprep.subr.bf16.mxu0 %v7516_v29  ;;  %v9134_v29 = vld [vmem:[%s10513_s25 + $0x40] sm:$0xff] }
  0xd7   :  { %2828 = vmatpush1.bf16.msra.mxu1 %v7511_v30  ;;  %v483_v30 = vsub.s32 1, %v9105_v20 }
  0xd8   :  { %2829 = vmatprep.subr.bf16.mxu1 %v7519_v31  ;;  %v7607_v31 = vld [vmem:[%s10512_s29 + $0x974] ss:$8 sps:$4 sm:$0xff]  }
  0xd9   :  { %2789 = vmatpush1.bf16.msra.mxu0 %v7514_v32  ;;  %v5938_v32 = vcombine.low %v8913_v16, %v8913_v16  ;;  %v7610_v16 = vld [vmem:[%s10512_s29 + $0x864] ss:$8 sps:$4 sm:$0xff]  }
  0xda   :  { %2790 = vmatprep.subr.bf16.mxu0 %v7522_v33  ;;  %v9145_v33 = vld [vmem:[%s10513_s25 + $0x48] sm:$0xff] }
  0xdb   :  { %2830 = vmatpush1.bf16.msra.mxu1 %v7517_v34  ;;  %v480_v34 = vrot.slane %v475_v27, %v9126_v28 }
  0xdc   :  { %2831 = vmatprep.subr.bf16.mxu1 %v7525_v35  ;;  %v7600_v35 = vld [vmem:[%s10512_s29 + $0x870] ss:$8 sps:$4 sm:$0xff]  }
  0xdd   :  { %2791 = vmatpush1.bf16.msra.mxu0 %v7520_v36  ;;  %v5943_v36 = vcombine.high %v9134_v29, %v9134_v29 }
  0xde   :  { %2792 = vmatprep.subr.bf16.mxu0 %v7528_v37  ;;  %v5940_v37 = vcombine.low %v8926_v22, %v8926_v22  ;;  %v7613_v22 = vld [vmem:[%s10512_s29 + $0x964] ss:$8 sps:$4 sm:$0xff]  }
  0xdf   :  { %2832 = vmatpush1.bf16.msra.mxu1 %v7523_v38  ;;  %v484_v38 = vrot.slane %v475_v27, %v483_v30  ;;  %v7659_v27 = vld [vmem:[%s10512_s29 + $0x9e0] ss:$8 sps:$4 sm:$0xff]  }
  0xe0   :  { %2833 = vmatprep.subr.bf16.mxu1 %v7531_v39  ;;  %v7605_v39 = vld [vmem:[%s10512_s29 + $0x970] ss:$8 sps:$4 sm:$0xff]  }
  0xe1   :  { %2793 = vmatpush1.bf16.msra.mxu0 %v7526_v40  ;;  %v5945_v40 = vcombine.high %v9145_v33, %v9145_v33 }
  0xe2   :  { %2794 = vmatprep.subr.bf16.mxu0 %v7534_v41 }
  0xe3   :  { %2834 = vmatpush1.bf16.msra.mxu1 %v7529_v42 }
  0xe4   :  { %2835 = vmatprep.subr.bf16.mxu1 %v7537_v43  ;;  %v7608_v43 = vld [vmem:[%s10512_s29 + $0x860] ss:$8 sps:$4 sm:$0xff]  }
  0xe5   :  { %2795 = vmatpush1.bf16.msra.mxu0 %v7532_v44 }
  0xe6   :  { %2796 = vmatprep.subr.bf16.mxu0 %v7540_v45 }
  0xe7   :  { %2836 = vmatpush1.bf16.msra.mxu1 %v7535_v46  ;;  %v7616_v46 = vld [vmem:[%s10512_s29 + $0x854] ss:$8 sps:$4 sm:$0xff]  }
  0xe8   :  { %2837 = vmatprep.subr.bf16.mxu1 %v7543_v47 }
  0xe9   :  { %2797 = vmatpush1.bf16.msra.mxu0 %v7538_v48 }
  0xea   :  { %2798 = vmatprep.subr.bf16.mxu0 %v7546_v49  ;;  %v7611_v49 = vld [vmem:[%s10512_s29 + $0x960] ss:$8 sps:$4 sm:$0xff]  }
  0xeb   :  { %2838 = vmatpush1.bf16.msra.mxu1 %v7541_v50 }
  0xec   :  { %2839 = vmatprep.subr.bf16.mxu1 %v7549_v51 }
  0xed   :  { %2799 = vmatpush1.bf16.msra.mxu0 %v7544_v52  ;;  %v7614_v52 = vld [vmem:[%s10512_s29 + $0x850] ss:$8 sps:$4 sm:$0xff]  }
  0xee   :  { %2800 = vmatprep.subr.bf16.mxu0 %v7552_v53  ;;  %v7619_v53 = vld [vmem:[%s10512_s29 + $0x954] ss:$8 sps:$4 sm:$0xff]  }
  0xef   :  { %2840 = vmatpush1.bf16.msra.mxu1 %v7547_v54 }
  0xf0   :  { %2841 = vmatprep.subr.bf16.mxu1 %v7555_v55  ;;  %v7617_v55 = vld [vmem:[%s10512_s29 + $0x950] ss:$8 sps:$4 sm:$0xff]  }
  0xf1   :  { %2801 = vmatpush2.bf16.msra.mxu0 %v7550_v56 }
  0xf2   :  { %2802 = vmatprep.subr.bf16.mxu0 %v7558_v57  ;;  %v7622_v57 = vld [vmem:[%s10512_s29 + $0x844] ss:$8 sps:$4 sm:$0xff]  }
  0xf3   :  { %2842 = vmatpush2.bf16.msra.mxu1 %v7553_v58 }
  0xf4   :  { %2843 = vmatprep.subr.bf16.mxu1 %v7561_v59  ;;  %v7625_v59 = vld [vmem:[%s10512_s29 + $0x944] ss:$8 sps:$4 sm:$0xff]  }
  0xf5   :  { %2803 = vmatpush2.bf16.msra.mxu0 %v7556_v60  ;;  %v7620_v60 = vld [vmem:[%s10512_s29 + $0x840] ss:$8 sps:$4 sm:$0xff]  }
  0xf6   :  { %2804 = vmatprep.subr.bf16.mxu0 %v7564_v61 }
  0xf7   :  { %2844 = vmatpush2.bf16.msra.mxu1 %v7559_v62  ;;  %v7623_v62 = vld [vmem:[%s10512_s29 + $0x940] ss:$8 sps:$4 sm:$0xff]  }
  0xf8   :  { %2845 = vmatprep.subr.bf16.mxu1 %v7567_v63  ;;  %v7628_v63 = vld [vmem:[%s10512_s29 + $0x834] ss:$8 sps:$4 sm:$0xff]  }
  0xf9   :  { %2805 = vmatpush2.bf16.msra.mxu0 %v7562_v0  ;;  %v7631_v0 = vld [vmem:[%s10512_s29 + $0x934] ss:$8 sps:$4 sm:$0xff]  }
  0xfa   :  { %2806 = vmatprep.subr.bf16.mxu0 %v7570_v1  ;;  %v7626_v1 = vld [vmem:[%s10512_s29 + $0x830] ss:$8 sps:$4 sm:$0xff]  }
  0xfb   :  { %2846 = vmatpush2.bf16.msra.mxu1 %v7565_v2  ;;  %v7629_v2 = vld [vmem:[%s10512_s29 + $0x930] ss:$8 sps:$4 sm:$0xff]  }
  0xfc   :  { %2847 = vmatprep.subr.bf16.mxu1 %v7573_v3  ;;  %v7634_v3 = vld [vmem:[%s10512_s29 + $0x824] ss:$8 sps:$4 sm:$0xff]  }
  0xfd   :  { %2807 = vmatpush2.bf16.msra.mxu0 %v7568_v4  ;;  %v7637_v4 = vld [vmem:[%s10512_s29 + $0x924] ss:$8 sps:$4 sm:$0xff]  }
  0xfe   :  { %2808 = vmatprep.subr.bf16.mxu0 %v7576_v5  ;;  %v7632_v5 = vld [vmem:[%s10512_s29 + $0x820] ss:$8 sps:$4 sm:$0xff]  }
  0xff   :  { %2848 = vmatpush2.bf16.msra.mxu1 %v7571_v6  ;;  %v7640_v6 = vld [vmem:[%s10512_s29 + $0x814] ss:$8 sps:$4 sm:$0xff]  }
 0x100   :  { %2849 = vmatprep.subr.bf16.mxu1 %v7579_v7  ;;  %v7635_v7 = vld [vmem:[%s10512_s29 + $0x920] ss:$8 sps:$4 sm:$0xff]  }
 0x101   :  { %2809 = vmatpush2.bf16.msra.mxu0 %v7574_v8  ;;  %v7643_v8 = vld [vmem:[%s10512_s29 + $0x914] ss:$8 sps:$4 sm:$0xff]  }
 0x102   :  { %2810 = vmatprep.subr.bf16.mxu0 %v7582_v9  ;;  %v7638_v9 = vld [vmem:[%s10512_s29 + $0x810] ss:$8 sps:$4 sm:$0xff]  }
 0x103   :  { %2850 = vmatpush2.bf16.msra.mxu1 %v7577_v10  ;;  %v7646_v10 = vld [vmem:[%s10512_s29 + $0x804] ss:$8 sps:$4 sm:$0xff]  }
 0x104   :  { %2851 = vmatprep.subr.bf16.mxu1 %v7585_v11  ;;  %v7641_v11 = vld [vmem:[%s10512_s29 + $0x910] ss:$8 sps:$4 sm:$0xff]  }
 0x105   :  { %2811 = vmatpush2.bf16.msra.mxu0 %v7580_v12  ;;  %v7649_v12 = vld [vmem:[%s10512_s29 + $0x904] ss:$8 sps:$4 sm:$0xff]  }
 0x106   :  { %2812 = vmatprep.subr.bf16.mxu0 %v7588_v14  ;;  %v7652_v14 = vld [vmem:[%s10512_s29 + $0x8f4] ss:$8 sps:$4 sm:$0xff]  }
 0x107   :  { %2852 = vmatpush2.bf16.msra.mxu1 %v7583_v15  ;;  %v7647_v15 = vld [vmem:[%s10512_s29 + $0x900] ss:$8 sps:$4 sm:$0xff]  }
 0x108   :  { %2853 = vmatprep.subr.bf16.mxu1 %v7591_v18  ;;  %v7655_v18 = vld [vmem:[%s10512_s29 + $0x9f4] ss:$8 sps:$4 sm:$0xff]  }
 0x109   :  { %2813 = vmatpush2.bf16.msra.mxu0 %v7586_v19  ;;  %v7650_v19 = vld [vmem:[%s10512_s29 + $0x8f0] ss:$8 sps:$4 sm:$0xff]  }
 0x10a   :  { %2814 = vmatprep.subr.bf16.mxu0 %v7594_v24  ;;  %v7653_v24 = vld [vmem:[%s10512_s29 + $0x9f0] ss:$8 sps:$4 sm:$0xff]  }
 0x10b   :  { %2854 = vmatpush2.bf16.msra.mxu1 %v7589_v23  ;;  %v7658_v23 = vld [vmem:[%s10512_s29 + $0x8e4] ss:$8 sps:$4 sm:$0xff]  }
 0x10c   :  { %2855 = vmatprep.subr.bf16.mxu1 %v7597_v25  ;;  %v7656_v25 = vld [vmem:[%s10512_s29 + $0x8e0] ss:$8 sps:$4 sm:$0xff]  }
 0x10d   :  { %2815 = vmatpush2.bf16.msra.mxu0 %v7592_v17  ;;  %v7661_v17 = vld [vmem:[%s10512_s29 + $0x9e4] ss:$8 sps:$4 sm:$0xff]  }
 0x10e   :  { %2866 = vmatprep.subr.bf16.mxu0 %v7602_v21  ;;  %v7667_v21 = vld [vmem:[%s10512_s29 + $0x9d4] ss:$8 sps:$4 sm:$0xff]  }
 0x10f   :  { %2856 = vmatpush2.bf16.msra.mxu1 %v7595_v26  ;;  %v7664_v26 = vld [vmem:[%s10512_s29 + $0x8d4] ss:$8 sps:$4 sm:$0xff]  }
 0x110   :  { %v2572_v41 = vpop.f32.mrf.mxu0  ;;  %2817 = vmatmul.mubr.bf16.vlgmr.msra.gmra.mxu0 %v5938_v32  ;;  %2907 = vmatprep.subr.bf16.mxu1 %v7607_v31  ;;  %v7662_v31 = vld [vmem:[%s10512_s29 + $0x8d0] ss:$8 sps:$4 sm:$0xff]   ;;  %v7670_v32 = vld [vmem:[%s10512_s29 + $0x8c4] ss:$8 sps:$4 sm:$0xff]  }
 0x111   :  { %v2573_v42 = vadd.f32 %v2572_v41, %v480_v34  ;;  %2867 = vmatpush1.bf16.msra.mxu0 %v7600_v35  ;;  %2898 = vmatprep.mubr.bf16.mxu0 %v5943_v36  ;;  %v2613_v45 = vpop.f32.mrf.mxu1  ;;  %v7665_v34 = vld [vmem:[%s10512_s29 + $0x9d0] ss:$8 sps:$4 sm:$0xff]   ;;  %v7673_v35 = vld [vmem:[%s10512_s29 + $0x9c4] ss:$8 sps:$4 sm:$0xff]   ;;  %v7668_v36 = vld [vmem:[%s10512_s29 + $0x8c0] ss:$8 sps:$4 sm:$0xff]  }
 0x112   :  { %v2574_v44 = vpop.f32.mrf.mxu0  ;;  %2858 = vmatmul.mubr.bf16.vlgmr.msra.gmra.mxu1 %v5940_v37  ;;  %2868 = vmatprep.subr.bf16.mxu0 %v7610_v16  ;;  %v7676_v37 = vld [vmem:[%s10512_s29 + $0x8b4] ss:$8 sps:$4 sm:$0xff]   ;;  %v7671_v16 = vld [vmem:[%s10512_s29 + $0x9c0] ss:$8 sps:$4 sm:$0xff]   ;;  %v7677_v41 = vld [vmem:[%s10512_s29 + $0x9b0] ss:$8 sps:$4 sm:$0xff]  }
 0x113   :  { %v2575_v47 = vadd.f32 %v2574_v44, %v484_v38  ;;  %v9174_v48 = vadd.f32 %v2613_v45, %v2573_v42  ;;  %2908 = vmatpush1.bf16.msra.mxu1 %v7605_v39  ;;  %2939 = vmatprep.mubr.bf16.mxu1 %v5945_v40  ;;  %v2615_v51 = vpop.f32.mrf.mxu1  ;;  %v7679_v38 = vld [vmem:[%s10512_s29 + $0x9b4] ss:$8 sps:$4 sm:$0xff]   ;;  %v7674_v39 = vld [vmem:[%s10512_s29 + $0x8b0] ss:$8 sps:$4 sm:$0xff]   ;;  %v7682_v40 = vld [vmem:[%s10512_s29 + $0x8a4] ss:$8 sps:$4 sm:$0xff]  }
 0x114   :  { %v2576_v50 = vpop.f32.mrf.mxu0  ;;  %2909 = vmatprep.subr.bf16.mxu1 %v7613_v22  ;;  %v7685_v22 = vld [vmem:[%s10512_s29 + $0x9a4] ss:$8 sps:$4 sm:$0xff]   ;;  %v7680_v42 = vld [vmem:[%s10512_s29 + $0x8a0] ss:$8 sps:$4 sm:$0xff]   ;;  %v7691_v45 = vld [vmem:[%s10512_s29 + $0x994] ss:$8 sps:$4 sm:$0xff]  }
 0x115   :  { %v9185_v54 = vadd.f32 %v2615_v51, %v2575_v47  ;;  %2869 = vmatpush1.bf16.msra.mxu0 %v7608_v43  ;;  %v2617_v58 = vpop.f32.mrf.mxu1  ;;  %v7688_v43 = vld [vmem:[%s10512_s29 + $0x894] ss:$8 sps:$4 sm:$0xff]   ;;  %v7683_v44 = vld [vmem:[%s10512_s29 + $0x9a0] ss:$8 sps:$4 sm:$0xff]   ;;  %v7694_v47 = vld [vmem:[%s10512_s29 + $0x884] ss:$8 sps:$4 sm:$0xff]  }
 0x116   :  { %v2577_v56 = vpop.f32.mrf.mxu0  ;;  %2870 = vmatprep.subr.bf16.mxu0 %v7616_v46  ;;  %v7686_v46 = vld [vmem:[%s10512_s29 + $0x890] ss:$8 sps:$4 sm:$0xff]   ;;  %v7697_v50 = vld [vmem:[%s10512_s29 + $0x984] ss:$8 sps:$4 sm:$0xff]   ;;  %v7692_v51 = vld [vmem:[%s10512_s29 + $0x880] ss:$8 sps:$4 sm:$0xff]  }
 0x117   :  { %2910 = vmatpush1.bf16.msra.mxu1 %v7611_v49  ;;  %v2618_v61 = vpop.f32.mrf.mxu1  ;;  %v7689_v49 = vld [vmem:[%s10512_s29 + $0x990] ss:$8 sps:$4 sm:$0xff]   ;;  %v7707_v56 = vld [vmem:[%s10512_s29 + $0xb74] ss:$8 sps:$4 sm:$0xff]  }
 0x118   :  { %2911 = vmatprep.subr.bf16.mxu1 %v7619_v53  ;;  %v9349_v53 = vld [vmem:[%s10513_s25 + $0x50] sm:$0xff] }
 0x119   :  { %2871 = vmatpush1.bf16.msra.mxu0 %v7614_v52  ;;  %v7702_v52 = vld [vmem:[%s10512_s29 + $0xa74] ss:$8 sps:$4 sm:$0xff]   ;;  %v7700_v58 = vld [vmem:[%s10512_s29 + $0xa70] ss:$8 sps:$4 sm:$0xff]  }
 0x11a   :  { %2872 = vmatprep.subr.bf16.mxu0 %v7622_v57  ;;  %v9360_v57 = vld [vmem:[%s10513_s25 + $0x58] sm:$0xff] }
 0x11b   :  { %2912 = vmatpush1.bf16.msra.mxu1 %v7617_v55  ;;  %v7695_v55 = vld [vmem:[%s10512_s29 + $0x980] ss:$8 sps:$4 sm:$0xff]   ;;  %v7705_v61 = vld [vmem:[%s10512_s29 + $0xb70] ss:$8 sps:$4 sm:$0xff]  }
 0x11c   :  { %2913 = vmatprep.subr.bf16.mxu1 %v7625_v59  ;;  %v5942_v59 = vcombine.low %v9134_v29, %v9134_v29  ;;  %v7713_v29 = vld [vmem:[%s10512_s29 + $0xb64] ss:$8 sps:$4 sm:$0xff]  }
 0x11d   :  { %2873 = vmatpush1.bf16.msra.mxu0 %v7620_v60  ;;  %v7710_v60 = vld [vmem:[%s10512_s29 + $0xa64] ss:$8 sps:$4 sm:$0xff]  }
 0x11e   :  { %2874 = vmatprep.subr.bf16.mxu0 %v7628_v63  ;;  %v5944_v63 = vcombine.low %v9145_v33, %v9145_v33 }
 0x11f   :  { %2914 = vmatpush1.bf16.msra.mxu1 %v7623_v62  ;;  %v5947_v62 = vcombine.high %v9349_v53, %v9349_v53 }
 0x120   :  { %2915 = vmatprep.subr.bf16.mxu1 %v7631_v0  ;;  %v7708_v0 = vld [vmem:[%s10512_s29 + $0xa60] ss:$8 sps:$4 sm:$0xff]  }
 0x121   :  { %2875 = vmatpush1.bf16.msra.mxu0 %v7626_v1  ;;  %v5949_v1 = vcombine.high %v9360_v57, %v9360_v57 }
 0x122   :  { %2876 = vmatprep.subr.bf16.mxu0 %v7634_v3  ;;  %v7716_v3 = vld [vmem:[%s10512_s29 + $0xa54] ss:$8 sps:$4 sm:$0xff]  }
 0x123   :  { %2916 = vmatpush1.bf16.msra.mxu1 %v7629_v2 }
 0x124   :  { %2917 = vmatprep.subr.bf16.mxu1 %v7637_v4  ;;  %v7711_v4 = vld [vmem:[%s10512_s29 + $0xb60] ss:$8 sps:$4 sm:$0xff]  }
 0x125   :  { %2877 = vmatpush1.bf16.msra.mxu0 %v7632_v5 }
 0x126   :  { %2878 = vmatprep.subr.bf16.mxu0 %v7640_v6 }
 0x127   :  { %2918 = vmatpush1.bf16.msra.mxu1 %v7635_v7  ;;  %v7719_v7 = vld [vmem:[%s10512_s29 + $0xb54] ss:$8 sps:$4 sm:$0xff]  }
 0x128   :  { %2919 = vmatprep.subr.bf16.mxu1 %v7643_v8 }
 0x129   :  { %2879 = vmatpush1.bf16.msra.mxu0 %v7638_v9 }
 0x12a   :  { %2880 = vmatprep.subr.bf16.mxu0 %v7646_v10 }
 0x12b   :  { %2920 = vmatpush1.bf16.msra.mxu1 %v7641_v11 }
 0x12c   :  { %2921 = vmatprep.subr.bf16.mxu1 %v7649_v12  ;;  %v7722_v12 = vld [vmem:[%s10512_s29 + $0xa44] ss:$8 sps:$4 sm:$0xff]  }
 0x12d   :  { %2881 = vmatpush1.bf16.msra.mxu0 %v7644_v13 }
 0x12e   :  { %2882 = vmatprep.subr.bf16.mxu0 %v7652_v14 }
 0x12f   :  { %2922 = vmatpush1.bf16.msra.mxu1 %v7647_v15 }
 0x130   :  { %2923 = vmatprep.subr.bf16.mxu1 %v7655_v18  ;;  %v7725_v18 = vld [vmem:[%s10512_s29 + $0xb44] ss:$8 sps:$4 sm:$0xff]  }
 0x131   :  { %2883 = vmatpush2.bf16.msra.mxu0 %v7650_v19  ;;  %v7720_v19 = vld [vmem:[%s10512_s29 + $0xa40] ss:$8 sps:$4 sm:$0xff]  }
 0x132   :  { %2884 = vmatprep.subr.bf16.mxu0 %v7658_v23 }
 0x133   :  { %2924 = vmatpush2.bf16.msra.mxu1 %v7653_v24  ;;  %v7728_v24 = vld [vmem:[%s10512_s29 + $0xa34] ss:$8 sps:$4 sm:$0xff]  }
 0x134   :  { %2925 = vmatprep.subr.bf16.mxu1 %v7661_v17  ;;  %v7723_v17 = vld [vmem:[%s10512_s29 + $0xb40] ss:$8 sps:$4 sm:$0xff]  }
 0x135   :  { %2885 = vmatpush2.bf16.msra.mxu0 %v7656_v25  ;;  %v7731_v25 = vld [vmem:[%s10512_s29 + $0xb34] ss:$8 sps:$4 sm:$0xff]  }
 0x136   :  { %2886 = vmatprep.subr.bf16.mxu0 %v7664_v26  ;;  %v7726_v26 = vld [vmem:[%s10512_s29 + $0xa30] ss:$8 sps:$4 sm:$0xff]  }
 0x137   :  { %2926 = vmatpush2.bf16.msra.mxu1 %v7659_v27  ;;  %v7734_v27 = vld [vmem:[%s10512_s29 + $0xa24] ss:$8 sps:$4 sm:$0xff]  }
 0x138   :  { %2927 = vmatprep.subr.bf16.mxu1 %v7667_v21  ;;  %v7729_v21 = vld [vmem:[%s10512_s29 + $0xb30] ss:$8 sps:$4 sm:$0xff]  }
 0x139   :  { %2887 = vmatpush2.bf16.msra.mxu0 %v7662_v31  ;;  %v7737_v31 = vld [vmem:[%s10512_s29 + $0xb24] ss:$8 sps:$4 sm:$0xff]  }
 0x13a   :  { %2888 = vmatprep.subr.bf16.mxu0 %v7670_v32  ;;  %v7732_v32 = vld [vmem:[%s10512_s29 + $0xa20] ss:$8 sps:$4 sm:$0xff]  }
 0x13b   :  { %2928 = vmatpush2.bf16.msra.mxu1 %v7665_v34  ;;  %v7740_v34 = vld [vmem:[%s10512_s29 + $0xa14] ss:$8 sps:$4 sm:$0xff]  }
 0x13c   :  { %2929 = vmatprep.subr.bf16.mxu1 %v7673_v35  ;;  %v7735_v35 = vld [vmem:[%s10512_s29 + $0xb20] ss:$8 sps:$4 sm:$0xff]  }
 0x13d   :  { %2889 = vmatpush2.bf16.msra.mxu0 %v7668_v36  ;;  %v7743_v36 = vld [vmem:[%s10512_s29 + $0xb14] ss:$8 sps:$4 sm:$0xff]  }
 0x13e   :  { %2890 = vmatprep.subr.bf16.mxu0 %v7676_v37  ;;  %v7738_v37 = vld [vmem:[%s10512_s29 + $0xa10] ss:$8 sps:$4 sm:$0xff]  }
 0x13f   :  { %2930 = vmatpush2.bf16.msra.mxu1 %v7671_v16  ;;  %v7746_v16 = vld [vmem:[%s10512_s29 + $0xa04] ss:$8 sps:$4 sm:$0xff]  }
 0x140   :  { %2931 = vmatprep.subr.bf16.mxu1 %v7679_v38  ;;  %v7741_v38 = vld [vmem:[%s10512_s29 + $0xb10] ss:$8 sps:$4 sm:$0xff]  }
 0x141   :  { %2891 = vmatpush2.bf16.msra.mxu0 %v7674_v39  ;;  %v7749_v39 = vld [vmem:[%s10512_s29 + $0xb04] ss:$8 sps:$4 sm:$0xff]  }
 0x142   :  { %2892 = vmatprep.subr.bf16.mxu0 %v7682_v40  ;;  %v7744_v40 = vld [vmem:[%s10512_s29 + $0xa00] ss:$8 sps:$4 sm:$0xff]  }
 0x143   :  { %2932 = vmatpush2.bf16.msra.mxu1 %v7677_v41  ;;  %v7752_v41 = vld [vmem:[%s10512_s29 + $0xaf4] ss:$8 sps:$4 sm:$0xff]  }
 0x144   :  { %2933 = vmatprep.subr.bf16.mxu1 %v7685_v22  ;;  %v7747_v22 = vld [vmem:[%s10512_s29 + $0xb00] ss:$8 sps:$4 sm:$0xff]  }
 0x145   :  { %2893 = vmatpush2.bf16.msra.mxu0 %v7680_v42  ;;  %v7755_v42 = vld [vmem:[%s10512_s29 + $0xbf4] ss:$8 sps:$4 sm:$0xff]  }
 0x146   :  { %2894 = vmatprep.subr.bf16.mxu0 %v7688_v43  ;;  %v7750_v43 = vld [vmem:[%s10512_s29 + $0xaf0] ss:$8 sps:$4 sm:$0xff]  }
 0x147   :  { %2934 = vmatpush2.bf16.msra.mxu1 %v7683_v44  ;;  %v7758_v44 = vld [vmem:[%s10512_s29 + $0xae4] ss:$8 sps:$4 sm:$0xff]  }
 0x148   :  { %2935 = vmatprep.subr.bf16.mxu1 %v7691_v45  ;;  %v7753_v45 = vld [vmem:[%s10512_s29 + $0xbf0] ss:$8 sps:$4 sm:$0xff]  }
 0x149   :  { %2895 = vmatpush2.bf16.msra.mxu0 %v7686_v46  ;;  %v7761_v46 = vld [vmem:[%s10512_s29 + $0xbe4] ss:$8 sps:$4 sm:$0xff]  }
 0x14a   :  { %2896 = vmatprep.subr.bf16.mxu0 %v7694_v47  ;;  %v7756_v47 = vld [vmem:[%s10512_s29 + $0xae0] ss:$8 sps:$4 sm:$0xff]  }
 0x14b   :  { %2936 = vmatpush2.bf16.msra.mxu1 %v7689_v49  ;;  %v7764_v49 = vld [vmem:[%s10512_s29 + $0xad4] ss:$8 sps:$4 sm:$0xff]  }
 0x14c   :  { %2937 = vmatprep.subr.bf16.mxu1 %v7697_v50  ;;  %v7759_v50 = vld [vmem:[%s10512_s29 + $0xbe0] ss:$8 sps:$4 sm:$0xff]  }
 0x14d   :  { %2897 = vmatpush2.bf16.msra.mxu0 %v7692_v51  ;;  %v7767_v51 = vld [vmem:[%s10512_s29 + $0xbd4] ss:$8 sps:$4 sm:$0xff]  }
 0x14e   :  { %2948 = vmatprep.subr.bf16.mxu0 %v7702_v52  ;;  %v7762_v52 = vld [vmem:[%s10512_s29 + $0xad0] ss:$8 sps:$4 sm:$0xff]  }
 0x14f   :  { %2938 = vmatpush2.bf16.msra.mxu1 %v7695_v55  ;;  %v7770_v55 = vld [vmem:[%s10512_s29 + $0xac4] ss:$8 sps:$4 sm:$0xff]  }
 0x150   :  { %v2654_v2 = vpop.f32.mrf.mxu0  ;;  %2899 = vmatmul.mubr.bf16.vlgmr.msra.gmra.mxu0 %v5942_v59  ;;  %2989 = vmatprep.subr.bf16.mxu1 %v7707_v56  ;;  %v7765_v56 = vld [vmem:[%s10512_s29 + $0xbd0] ss:$8 sps:$4 sm:$0xff]   ;;  %v7768_v59 = vld [vmem:[%s10512_s29 + $0xac0] ss:$8 sps:$4 sm:$0xff]  }
 0x151   :  { %v2655_v33 = vadd.f32 %v2654_v2, %v9174_v48  ;;  %2949 = vmatpush1.bf16.msra.mxu0 %v7700_v58  ;;  %2980 = vmatprep.mubr.bf16.mxu0 %v5947_v62  ;;  %v2695_v6 = vpop.f32.mrf.mxu1  ;;  %v7714_v48 = vld [vmem:[%s10512_s29 + $0xa50] ss:$8 sps:$4 sm:$0xff]   ;;  %v7773_v58 = vld [vmem:[%s10512_s29 + $0xbc4] ss:$8 sps:$4 sm:$0xff]   ;;  %v7779_v62 = vld [vmem:[%s10512_s29 + $0xbb4] ss:$8 sps:$4 sm:$0xff]  }
 0x152   :  { %v2656_v5 = vpop.f32.mrf.mxu0  ;;  %2940 = vmatmul.mubr.bf16.vlgmr.msra.gmra.mxu1 %v5944_v63  ;;  %2950 = vmatprep.subr.bf16.mxu0 %v7710_v60  ;;  %v7776_v60 = vld [vmem:[%s10512_s29 + $0xab4] ss:$8 sps:$4 sm:$0xff]   ;;  %v7774_v63 = vld [vmem:[%s10512_s29 + $0xab0] ss:$8 sps:$4 sm:$0xff]   ;;  %v7780_v2 = vld [vmem:[%s10512_s29 + $0xaa0] ss:$8 sps:$4 sm:$0xff]  }
 0x153   :  { %v2657_v8 = vadd.f32 %v2656_v5, %v9185_v54  ;;  %v9396_v9 = vadd.f32 %v2695_v6, %v2655_v33  ;;  %2990 = vmatpush1.bf16.msra.mxu1 %v7705_v61  ;;  %3021 = vmatprep.mubr.bf16.mxu1 %v5949_v1  ;;  %v2697_v11 = vpop.f32.mrf.mxu1  ;;  %v7717_v54 = vld [vmem:[%s10512_s29 + $0xb50] ss:$8 sps:$4 sm:$0xff]   ;;  %v7771_v61 = vld [vmem:[%s10512_s29 + $0xbc0] ss:$8 sps:$4 sm:$0xff]   ;;  %v7785_v1 = vld [vmem:[%s10512_s29 + $0xba4] ss:$8 sps:$4 sm:$0xff]  }
 0x154   :  { %v2658_v10 = vpop.f32.mrf.mxu0  ;;  %2991 = vmatprep.subr.bf16.mxu1 %v7713_v29  ;;  %v7782_v29 = vld [vmem:[%s10512_s29 + $0xaa4] ss:$8 sps:$4 sm:$0xff]   ;;  %v7783_v33 = vld [vmem:[%s10512_s29 + $0xba0] ss:$8 sps:$4 sm:$0xff]   ;;  %v7786_v5 = vld [vmem:[%s10512_s29 + $0xa90] ss:$8 sps:$4 sm:$0xff]  }
 0x155   :  { %v9404_v13 = vadd.f32 %v2697_v11, %v2657_v8  ;;  %2951 = vmatpush1.bf16.msra.mxu0 %v7708_v0  ;;  %v2699_v15 = vpop.f32.mrf.mxu1  ;;  %v7777_v0 = vld [vmem:[%s10512_s29 + $0xbb0] ss:$8 sps:$4 sm:$0xff]   ;;  %v7794_v6 = vld [vmem:[%s10512_s29 + $0xa84] ss:$8 sps:$4 sm:$0xff]   ;;  %v7802_v10 = vld [vmem:[%s10512_s29 + $0xc34] ss:$8 sps:$4 sm:$0xff]  }
 0x156   :  { %v2659_v14 = vpop.f32.mrf.mxu0  ;;  %2952 = vmatprep.subr.bf16.mxu0 %v7716_v3  ;;  %v7788_v3 = vld [vmem:[%s10512_s29 + $0xa94] ss:$8 sps:$4 sm:$0xff]   ;;  %v7797_v8 = vld [vmem:[%s10512_s29 + $0xb84] ss:$8 sps:$4 sm:$0xff]   ;;  %v7795_v11 = vld [vmem:[%s10512_s29 + $0xb80] ss:$8 sps:$4 sm:$0xff]   ;;  %v5948_v15 = vcombine.low %v9360_v57, %v9360_v57 }
 0x157   :  { %2992 = vmatpush1.bf16.msra.mxu1 %v7711_v4  ;;  %v2700_v23 = vpop.f32.mrf.mxu1  ;;  %v7791_v4 = vld [vmem:[%s10512_s29 + $0xb94] ss:$8 sps:$4 sm:$0xff]   ;;  %v7807_v14 = vld [vmem:[%s10512_s29 + $0xc24] ss:$8 sps:$4 sm:$0xff]  }
 0x158   :  { %2993 = vmatprep.subr.bf16.mxu1 %v7719_v7  ;;  %v7789_v7 = vld [vmem:[%s10512_s29 + $0xb90] ss:$8 sps:$4 sm:$0xff]  }
 0x159   :  { %2953 = vmatpush1.bf16.msra.mxu0 %v7714_v48  ;;  %v7792_v48 = vld [vmem:[%s10512_s29 + $0xa80] ss:$8 sps:$4 sm:$0xff]  }
 0x15a   :  { %2954 = vmatprep.subr.bf16.mxu0 %v7722_v12  ;;  %v7800_v12 = vld [vmem:[%s10512_s29 + $0xc30] ss:$8 sps:$4 sm:$0xff]  }
 0x15b   :  { %2994 = vmatpush1.bf16.msra.mxu1 %v7717_v54  ;;  %v5946_v54 = vcombine.low %v9349_v53, %v9349_v53  ;;  %v7810_v53 = vld [vmem:[%s10512_s29 + $0xc14] ss:$8 sps:$4 sm:$0xff]  }
 0x15c   :  { %2995 = vmatprep.subr.bf16.mxu1 %v7725_v18  ;;  %v7805_v18 = vld [vmem:[%s10512_s29 + $0xc20] ss:$8 sps:$4 sm:$0xff]  }
 0x15d   :  { %2955 = vmatpush1.bf16.msra.mxu0 %v7720_v19 }
 0x15e   :  { %2956 = vmatprep.subr.bf16.mxu0 %v7728_v24  ;;  %v8173_v24 = vmov 0  }
 0x15f   :  { %2996 = vmatpush1.bf16.msra.mxu1 %v7723_v17 }
 0x160   :  { %2997 = vmatprep.subr.bf16.mxu1 %v7731_v25 }
 0x161   :  { %2957 = vmatpush1.bf16.msra.mxu0 %v7726_v26 }
 0x162   :  { %2958 = vmatprep.subr.bf16.mxu0 %v7734_v27  ;;  %v7808_v27 = vld [vmem:[%s10512_s29 + $0xc10] ss:$8 sps:$4 sm:$0xff]  }
 0x163   :  { %2998 = vmatpush1.bf16.msra.mxu1 %v7729_v21 }
 0x164   :  { %2999 = vmatprep.subr.bf16.mxu1 %v7737_v31 }
 0x165   :  { %2959 = vmatpush1.bf16.msra.mxu0 %v7732_v32 }
 0x166   :  { %2960 = vmatprep.subr.bf16.mxu0 %v7740_v34 }
 0x167   :  { %3000 = vmatpush1.bf16.msra.mxu1 %v7735_v35 }
 0x168   :  { %3001 = vmatprep.subr.bf16.mxu1 %v7743_v36 }
 0x169   :  { %2961 = vmatpush1.bf16.msra.mxu0 %v7738_v37  ;;  %v7817_v37 = vld [vmem:[%s10515_s27 + $0x74] ss:$8 sps:$4 sm:$0xff]  }
 0x16a   :  { %2962 = vmatprep.subr.bf16.mxu0 %v7746_v16  ;;  %v7811_v16 = vld [vmem:[%s10512_s29 + $0xc00] ss:$8 sps:$4 sm:$0xff]  }
 0x16b   :  { %3002 = vmatpush1.bf16.msra.mxu1 %v7741_v38  ;;  %v7820_v38 = vld [vmem:[%s10515_s27 + $0x64] ss:$8 sps:$4 sm:$0xff]  }
 0x16c   :  { %3003 = vmatprep.subr.bf16.mxu1 %v7749_v39  ;;  %v7818_v39 = vld [vmem:[%s10515_s27 + $0x60] ss:$8 sps:$4 sm:$0xff]  }
 0x16d   :  { %2963 = vmatpush1.bf16.msra.mxu0 %v7744_v40  ;;  %v7814_v40 = vld [vmem:[%s10513_s25 + $0x60] ss:$0 sps:$4 sm:$0xff]  }
 0x16e   :  { %2964 = vmatprep.subr.bf16.mxu0 %v7752_v41  ;;  %v7823_v41 = vld [vmem:[%s10515_s27 + $0x54] ss:$8 sps:$4 sm:$0xff]  }
 0x16f   :  { %3004 = vmatpush1.bf16.msra.mxu1 %v7747_v22  ;;  %v7821_v22 = vld [vmem:[%s10515_s27 + $0x50] ss:$8 sps:$4 sm:$0xff]  }
 0x170   :  { %3005 = vmatprep.subr.bf16.mxu1 %v7755_v42  ;;  %v7826_v42 = vld [vmem:[%s10515_s27 + $0x44] ss:$8 sps:$4 sm:$0xff]  }
 0x171   :  { %2965 = vmatpush2.bf16.msra.mxu0 %v7750_v43  ;;  %v7824_v43 = vld [vmem:[%s10515_s27 + $0x40] ss:$8 sps:$4 sm:$0xff]  }
 0x172   :  { %2966 = vmatprep.subr.bf16.mxu0 %v7758_v44  ;;  %v7829_v44 = vld [vmem:[%s10515_s27 + $0x34] ss:$8 sps:$4 sm:$0xff]  }
 0x173   :  { %3006 = vmatpush2.bf16.msra.mxu1 %v7753_v45  ;;  %v7827_v45 = vld [vmem:[%s10515_s27 + $0x30] ss:$8 sps:$4 sm:$0xff]  }
 0x174   :  { %3007 = vmatprep.subr.bf16.mxu1 %v7761_v46  ;;  %v7832_v46 = vld [vmem:[%s10515_s27 + $0x24] ss:$8 sps:$4 sm:$0xff]  }
 0x175   :  { %2967 = vmatpush2.bf16.msra.mxu0 %v7756_v47  ;;  %v7830_v47 = vld [vmem:[%s10515_s27 + $0x20] ss:$8 sps:$4 sm:$0xff]  }
 0x176   :  { %2968 = vmatprep.subr.bf16.mxu0 %v7764_v49  ;;  %v7835_v49 = vld [vmem:[%s10515_s27 + $0x14] ss:$8 sps:$4 sm:$0xff]  }
 0x177   :  { %3008 = vmatpush2.bf16.msra.mxu1 %v7759_v50  ;;  %v7833_v50 = vld [vmem:[%s10515_s27 + $0x10] ss:$8 sps:$4 sm:$0xff]  }
 0x178   :  { %3009 = vmatprep.subr.bf16.mxu1 %v7767_v51  ;;  %v7838_v51 = vld [vmem:[%s10515_s27 + $0x4] ss:$8 sps:$4 sm:$0xff]  }
 0x179   :  { %2969 = vmatpush2.bf16.msra.mxu0 %v7762_v52  ;;  %v7836_v52 = vld [vmem:[%s10515_s27] ss:$8 sps:$4 sm:$0xff]  }
 0x17a   :  { %2970 = vmatprep.subr.bf16.mxu0 %v7770_v55  ;;  %v7841_v55 = vld [vmem:[%s10515_s27 + $0xf4] ss:$8 sps:$4 sm:$0xff]  }
 0x17b   :  { %3010 = vmatpush2.bf16.msra.mxu1 %v7765_v56 }
 0x17c   :  { %3011 = vmatprep.subr.bf16.mxu1 %v7773_v58 }
 0x17d   :  { %2971 = vmatpush2.bf16.msra.mxu0 %v7768_v59 }
 0x17e   :  { %2972 = vmatprep.subr.bf16.mxu0 %v7776_v60 }
 0x17f   :  { %3012 = vmatpush2.bf16.msra.mxu1 %v7771_v61 }
 0x180   :  { %3013 = vmatprep.subr.bf16.mxu1 %v7779_v62 }
 0x181   :  { %2973 = vmatpush2.bf16.msra.mxu0 %v7774_v63 }
 0x182   :  { %2974 = vmatprep.subr.bf16.mxu0 %v7782_v29 }
 0x183   :  { %3014 = vmatpush2.bf16.msra.mxu1 %v7777_v0 }
 0x184   :  { %3015 = vmatprep.subr.bf16.mxu1 %v7785_v1 }
 0x185   :  { %2975 = vmatpush2.bf16.msra.mxu0 %v7780_v2 }
 0x186   :  { %2976 = vmatprep.subr.bf16.mxu0 %v7788_v3 }
 0x187   :  { %3016 = vmatpush2.bf16.msra.mxu1 %v7783_v33 }
 0x188   :  { %3017 = vmatprep.subr.bf16.mxu1 %v7791_v4 }
 0x189   :  { %2977 = vmatpush2.bf16.msra.mxu0 %v7786_v5 }
 0x18a   :  { %2978 = vmatprep.subr.bf16.mxu0 %v7794_v6 }
 0x18b   :  { %3018 = vmatpush2.bf16.msra.mxu1 %v7789_v7 }
 0x18c   :  { %3019 = vmatprep.subr.bf16.mxu1 %v7797_v8 }
 0x18d   :  { %2979 = vmatpush2.bf16.msra.mxu0 %v7792_v48 }
 0x18e   :  { %3038 = vmatprep.subr.bf16.mxu0 %v7802_v10 }
 0x18f   :  { %3020 = vmatpush2.bf16.msra.mxu1 %v7795_v11 }
 0x190   :  { %v2736_v19 = vpop.f32.mrf.mxu0  ;;  %2981 = vmatmul.mubr.bf16.vlgmr.msra.gmra.mxu0 %v5946_v54  ;;  %3279 = vmatprep.subr.bf16.mxu1 %v7817_v37 }
 0x191   :  { %v2737_v23 = vadd.f32 %v2736_v19, %v9396_v9  ;;  %3039 = vmatpush1.bf16.msra.mxu0 %v7800_v12  ;;  %3062 = vmatprep.mubr.bf16.mxu0 %v8173_v24  ;;  %v7813_v9 = vld [vmem:[%s10512_s29 + $0xc04] ss:$8 sps:$4 sm:$0xff]  }
 0x192   :  { %v2738_v17 = vpop.f32.mrf.mxu0  ;;  %v2777_v25 = vpop.f32.mrf.mxu1  ;;  %3022 = vmatmul.mubr.bf16.vlgmr.msra.gmra.mxu1 %v5948_v15  ;;  %3040 = vmatprep.subr.bf16.mxu0 %v7807_v14 }
 0x193   :  { %v2739_v57 = vadd.f32 %v2738_v17, %v9404_v13  ;;  %v2778_v26 = vadd.f32 %v2777_v25, %v2737_v23  ;;  %v7815_v13 = vld [vmem:[%s10515_s27 + $0x70] ss:$8 sps:$4 sm:$0xff]  }
 0x194   :  { %v2740_v21 = vpop.f32.mrf.mxu0  ;;  %v2779_v31 = vpop.f32.mrf.mxu1  ;;  %3280 = vmatpush1.bf16.msra.mxu1 %v7815_v13 }
 0x195   :  { %v2780_v32 = vadd.f32 %v2779_v31, %v2739_v57  ;;  %3041 = vmatpush1.bf16.msra.mxu0 %v7805_v18  ;;  %3281 = vmatprep.subr.bf16.mxu1 %v7820_v38 }
 0x196   :  { %v2741_v34 = vpop.f32.mrf.mxu0  ;;  %3042 = vmatprep.subr.bf16.mxu0 %v7810_v53  ;;  %v2781_v35 = vpop.f32.mrf.mxu1 }
 0x198   :  { %v2782_v36 = vpop.f32.mrf.mxu1  ;;  %3282 = vmatpush1.bf16.msra.mxu1 %v7818_v39 }
 0x199   :  { %3043 = vmatpush1.bf16.msra.mxu0 %v7808_v27  ;;  %3283 = vmatprep.subr.bf16.mxu1 %v7823_v41 }
 0x19a   :  { %3044 = vmatprep.subr.bf16.mxu0 %v7813_v9 }
 0x19c   :  { %3284 = vmatpush1.bf16.msra.mxu1 %v7821_v22 }
 0x19d   :  { %3045 = vmatpush1.bf16.msra.mxu0 %v7811_v16  ;;  %3285 = vmatprep.subr.bf16.mxu1 %v7826_v42 }
 0x1a0   :  { %6343 = vmatmul.mubr.msk.bf16.vlgmr.msra.gmra.mxu0 %vm2534_vm0, %v7814_v40  ;;  %3286 = vmatpush1.bf16.msra.mxu1 %v7824_v43 }
 0x1a1   :  { %3287 = vmatprep.subr.bf16.mxu1 %v7829_v44 }
 0x1a4   :  { %3288 = vmatpush1.bf16.msra.mxu1 %v7827_v45 }
 0x1a5   :  { %3289 = vmatprep.subr.bf16.mxu1 %v7832_v46 }
 0x1a8   :  { %3290 = vmatpush1.bf16.msra.mxu1 %v7830_v47 }
 0x1a9   :  { %3291 = vmatprep.subr.bf16.mxu1 %v7835_v49 }
 0x1ac   :  { %3292 = vmatpush1.bf16.msra.mxu1 %v7833_v50 }
 0x1ad   :  { %3293 = vmatprep.subr.bf16.mxu1 %v7838_v51 }
 0x1ae   :  { %30 = vsyncpa [#allocation8], 0  ;;  %v7839_v56 = vld [vmem:[%s10515_s27 + $0xf0] ss:$8 sps:$4 sm:$0xff]   ;;  %v7844_v58 = vld [vmem:[%s10515_s27 + $0xe4] ss:$8 sps:$4 sm:$0xff]  }
 0x1af   :  { %v7842_v59 = vld [vmem:[%s10515_s27 + $0xe0] ss:$8 sps:$4 sm:$0xff]   ;;  %v7847_v61 = vld [vmem:[%s10515_s27 + $0xd4] ss:$8 sps:$4 sm:$0xff]   ;;  %v7845_v63 = vld [vmem:[%s10515_s27 + $0xd0] ss:$8 sps:$4 sm:$0xff]  }
 0x1b0   :  { %3294 = vmatpush1.bf16.msra.mxu1 %v7836_v52  ;;  %v7850_v4 = vld [vmem:[%s10515_s27 + $0xc4] ss:$8 sps:$4 sm:$0xff]   ;;  %v7848_v6 = vld [vmem:[%s10515_s27 + $0xc0] ss:$8 sps:$4 sm:$0xff]   ;;  %v7853_v48 = vld [vmem:[%s10515_s27 + $0xb4] ss:$8 sps:$4 sm:$0xff]  }
 0x1b1   :  { %3295 = vmatprep.subr.bf16.mxu1 %v7841_v55  ;;  %v7851_v10 = vld [vmem:[%s10515_s27 + $0xb0] ss:$8 sps:$4 sm:$0xff]   ;;  %v7856_v12 = vld [vmem:[%s10515_s27 + $0xa4] ss:$8 sps:$4 sm:$0xff]   ;;  %v7854_v54 = vld [vmem:[%s10515_s27 + $0xa0] ss:$8 sps:$4 sm:$0xff]  }
 0x1b2   :  { %v7859_v14 = vld [vmem:[%s10515_s27 + $0x94] ss:$8 sps:$4 sm:$0xff]   ;;  %v7857_v15 = vld [vmem:[%s10515_s27 + $0x90] ss:$8 sps:$4 sm:$0xff]   ;;  %v7862_v18 = vld [vmem:[%s10515_s27 + $0x84] ss:$8 sps:$4 sm:$0xff]  }
 0x1b3   :  { %v7860_v19 = vld [vmem:[%s10515_s27 + $0x80] ss:$8 sps:$4 sm:$0xff]   ;;  %v7863_v53 = vld [vmem:[%s10485_s7 + $0x78] sm:$0xff]   ;;  %v7865_v24 = vld [vmem:[%s10485_s7 + $0x70] sm:$0xff]   ;;  %v8174_v17 = vmov 1966171168  }
 0x1b4   :  { %3296 = vmatpush2.bf16.msra.mxu1 %v7839_v56  ;;  %v7864_v23 = vld [vmem:[%s10485_s7 + $0x38] sm:$0xff]   ;;  %v3399_v25 = vunpack.c.l.s4 %v8174_v17  ;;  %6794 = vmatprep.subr.bf16.mxu0 %v7863_v53  ;;  %v7866_v57 = vld [vmem:[%s10485_s7 + $0x30] sm:$0xff]   ;;  %v7867_v27 = vld [vmem:[%s10485_s7 + $0x68] sm:$0xff]   ;;  %s10516_s5 = sld [smem:[#allocation13_spill]]  ;;  %vm8176_vm1 = vmmov 0   ;;  %vm3935_vm2 = vcmask 7168  }
 0x1b5   :  { %3297 = vmatprep.subr.bf16.mxu1 %v7844_v58  ;;  %6795 = vmatpush3.bf16.msra.mxu0 %v7864_v23  ;;  %v7869_v34 = vld [vmem:[%s10485_s7 + $0x60] sm:$0xff]   ;;  %v7871_v13 = vld [vmem:[%s10485_s7 + $0x58] sm:$0xff]   ;;  %v7873_v16 = vld [vmem:[%s10485_s7 + $0x50] sm:$0xff]   ;;  %s10517_s27 = sld [smem:[#allocation18_spill]]  ;;  %vm5508_vm3 = vcmask 64512   ;;  %vm5869_vm4 = vcmask 261120  }
 0x1b6   :  { %6796 = vmatprep.subr.bf16.mxu0 %v7865_v24  ;;  %v7870_v36 = vld [vmem:[%s10485_s7 + $0x20] sm:$0xff]   ;;  %v7872_v37 = vld [vmem:[%s10485_s7 + $0x18] sm:$0xff]   ;;  %v7874_v38 = vld [vmem:[%s10485_s7 + $0x10] sm:$0xff]   ;;  %s10518_s25 = sld [smem:[#allocation17_spill]] }
 0x1b7   :  { %v7875_v39 = vld [vmem:[%s10485_s7 + $0x48] sm:$0xff]   ;;  %v7877_v41 = vld [vmem:[%s10485_s7 + $0x40] sm:$0xff]  }
 0x1b8   :  { %3298 = vmatpush2.bf16.msra.mxu1 %v7842_v59  ;;  %v7876_v40 = vld [vmem:[%s10485_s7 + $0x8] sm:$0xff]   ;;  %v7878_v22 = vld [vmem:[%s10485_s7] sm:$0xff]  }
 0x1b9   :  { %3299 = vmatprep.subr.bf16.mxu1 %v7847_v61  ;;  %6797 = vmatpush3.bf16.msra.mxu0 %v7866_v57 }
 0x1ba   :  { %v6376_v21 = vld.sshfl [vmem:[%s10516_s5] sm:$0x11 pattern:$0x75316420]  ;;  %6798 = vmatprep.subr.bf16.mxu0 %v7867_v27 }
 0x1bb   :  { %v3397_v9 = vcombine.high %v6376_v21, %v6376_v21  ;;  %v7879_v42 = vld [vmem:[%s10517_s27 + $0x78] sm:$0xff]   ;;  %v7881_v45 = vld [vmem:[%s10517_s27 + $0x70] sm:$0xff]   ;;  %v7883_v47 = vld [vmem:[%s10517_s27 + $0x68] sm:$0xff]  }
 0x1bc   :  { %3300 = vmatpush2.bf16.msra.mxu1 %v7845_v63  ;;  %v7880_v44 = vld [vmem:[%s10517_s27 + $0x38] sm:$0xff]   ;;  %v7882_v46 = vld [vmem:[%s10517_s27 + $0x30] sm:$0xff]   ;;  %v7884_v51 = vld [vmem:[%s10517_s27 + $0x28] sm:$0xff]  }
 0x1bd   :  { %3301 = vmatprep.subr.bf16.mxu1 %v7850_v4  ;;  %v7885_v56 = vld [vmem:[%s10517_s27 + $0x60] sm:$0xff]   ;;  %v7890_v4 = vld [vmem:[%s10517_s27 + $0x10] sm:$0xff]  }
 0x1be   :  { %v7886_v63 = vld [vmem:[%s10517_s27 + $0x20] sm:$0xff]  }
 0x1c0   :  { %3302 = vmatpush2.bf16.msra.mxu1 %v7848_v6 }
 0x1c1   :  { %3303 = vmatprep.subr.bf16.mxu1 %v7853_v48 }
 0x1c4   :  { %3304 = vmatpush2.bf16.msra.mxu1 %v7851_v10 }
 0x1c5   :  { %3305 = vmatprep.subr.bf16.mxu1 %v7856_v12 }
 0x1c8   :  { %3306 = vmatpush2.bf16.msra.mxu1 %v7854_v54 }
 0x1c9   :  { %3307 = vmatprep.subr.bf16.mxu1 %v7859_v14 }
 0x1cc   :  { %3308 = vmatpush2.bf16.msra.mxu1 %v7857_v15 }
 0x1cd   :  { %3309 = vmatprep.subr.bf16.mxu1 %v7862_v18 }
 0x1d0   :  { %v2818_v60 = vpop.f32.mrf.mxu0  ;;  %3310 = vmatpush2.bf16.msra.mxu1 %v7860_v19 }
 0x1d1   :  { %v2819_v62 = vadd.f32 %v2818_v60, %v2778_v26  ;;  %v3400_v26 = vunpack.c.0.s8 %v3399_v25 }
 0x1d2   :  { %v2820_v29 = vpop.f32.mrf.mxu0  ;;  %v2859_v0 = vpop.f32.mrf.mxu1 }
 0x1d3   :  { %v2821_v1 = vadd.f32 %v2820_v29, %v2780_v32  ;;  %v9661_v2 = vadd.f32 %v2859_v0, %v2819_v62  ;;  %v3403_v31 = vsub.s32 %v3400_v26, %v9105_v20  ;;  %v7868_v32 = vld [vmem:[%s10485_s7 + $0x28] sm:$0xff]   ;;  %v7900_v20 = vld [vmem:[%s10487_s9 + $0x10] sm:$0xff]  }
 0x1d4   :  { %v2822_v3 = vpop.f32.mrf.mxu0  ;;  %v2861_v33 = vpop.f32.mrf.mxu1  ;;  %6799 = vmatpush3.bf16.msra.mxu0 %v7868_v32  ;;  %v7893_v32 = vld [vmem:[%s10517_s27 + $0x40] sm:$0xff]  }
 0x1d5   :  { %v9666_v5 = vadd.f32 %v2861_v33, %v2821_v1  ;;  %v9720_v35 = vrot.slane %v3397_v9, %v3403_v31  ;;  %6800 = vmatprep.subr.bf16.mxu0 %v7869_v34  ;;  %v9753_v43 = vrot.slane %v6376_v21, %v3403_v31  ;;  %v7887_v1 = vld [vmem:[%s10517_s27 + $0x58] sm:$0xff]   ;;  %v7889_v33 = vld [vmem:[%s10517_s27 + $0x50] sm:$0xff]   ;;  %v7891_v31 = vld [vmem:[%s10517_s27 + $0x48] sm:$0xff]  }
 0x1d6   :  { %v2823_v7 = vpop.f32.mrf.mxu0  ;;  %v2863_v8 = vpop.f32.mrf.mxu1  ;;  %v7888_v3 = vld [vmem:[%s10517_s27 + $0x18] sm:$0xff]   ;;  %v7892_v9 = vld [vmem:[%s10517_s27 + $0x8] sm:$0xff]   ;;  %v7894_v34 = vld [vmem:[%s10517_s27] sm:$0xff]  }
 0x1d7   :  { %3542 = vmatprep.mubr.bf16.mxu0 %v9720_v35 }
 0x1d8   :  { %v2864_v11 = vpop.f32.mrf.mxu1  ;;  %6801 = vmatpush3.bf16.msra.mxu0 %v7870_v36  ;;  %v7895_v36 = vld [vmem:[%s10487_s9 + $0x38] sm:$0xff]  }
 0x1d9   :  { %6802 = vmatprep.subr.bf16.mxu0 %v7871_v13  ;;  %v8175_v13 = vmov 0.0  }
 0x1da   :  { %7068 = vmatprep.subr.bf16.mxu1 %v8175_v13 }
 0x1dc   :  { %6803 = vmatpush3.bf16.msra.mxu0 %v7872_v37  ;;  %v7896_v37 = vld [vmem:[%s10487_s9 + $0x30] sm:$0xff]  }
 0x1dd   :  { %6804 = vmatprep.subr.bf16.mxu0 %v7873_v16  ;;  %v7897_v16 = vld [vmem:[%s10487_s9 + $0x28] sm:$0xff]  }
 0x1e0   :  { %6805 = vmatpush3.bf16.msra.mxu0 %v7874_v38  ;;  %v7898_v38 = vld [vmem:[%s10487_s9 + $0x20] sm:$0xff]  }
 0x1e1   :  { %6806 = vmatprep.subr.bf16.mxu0 %v7875_v39  ;;  %v7899_v39 = vld [vmem:[%s10487_s9 + $0x18] sm:$0xff]  }
 0x1e4   :  { %6807 = vmatpush3.bf16.msra.mxu0 %v7876_v40 }
 0x1e5   :  { %6808 = vmatprep.subr.bf16.mxu0 %v7877_v41 }
 0x1e8   :  { %6809 = vmatpush3.bf16.msra.mxu0 %v7878_v22 }
 0x1e9   :  { %6816 = vmatprep.subr.bf16.mxu0 %v7879_v42 }
 0x1eb   :  { %3543 = vmatmul.mubr.bf16.vlgmr.msra.gmra.mxu0 %v9753_v43 }
 0x1ec   :  { %6817 = vmatpush3.bf16.msra.mxu0 %v7880_v44 }
 0x1ed   :  { %6818 = vmatprep.subr.bf16.mxu0 %v7881_v45  ;;  %v3107_v45 = vld [vmem:[%s10518_s25] sm:$0x3] }
 0x1f0   :  { %6819 = vmatpush3.bf16.msra.mxu0 %v7882_v46  ;;  %v3112_v46 = vrot.slane %v3107_v45, %v9126_v28 }
 0x1f1   :  { %6820 = vmatprep.subr.bf16.mxu0 %v7883_v47  ;;  %v3116_v47 = vrot.slane %v3107_v45, %v483_v30  ;;  %v7901_v30 = vld [vmem:[%s10487_s9 + $0x8] sm:$0xff]   ;;  %v7920_v45 = vld [vmem:[%s10517_s27 + $0xf0] sm:$0xff]  }
 0x1f4   :  { %6821 = vmatpush3.bf16.msra.mxu0 %v7884_v51 }
 0x1f5   :  { %6822 = vmatprep.subr.bf16.mxu0 %v7885_v56 }
 0x1f8   :  { %6823 = vmatpush3.bf16.msra.mxu0 %v7886_v63  ;;  %v7903_v63 = vld [vmem:[%s10489_s11 + $0x38] sm:$0xff]  }
 0x1f9   :  { %6824 = vmatprep.subr.bf16.mxu0 %v7887_v1  ;;  %v7905_v1 = vld [vmem:[%s10489_s11 + $0x28] sm:$0xff]  }
 0x1fc   :  { %6825 = vmatpush3.bf16.msra.mxu0 %v7888_v3  ;;  %v7907_v3 = vld [vmem:[%s10489_s11 + $0x18] sm:$0xff]  }
 0x1fd   :  { %6826 = vmatprep.subr.bf16.mxu0 %v7889_v33  ;;  %v7908_v33 = vld [vmem:[%s10489_s11 + $0x10] sm:$0xff]  }
 0x200   :  { %6827 = vmatpush3.bf16.msra.mxu0 %v7890_v4  ;;  %v7910_v4 = vld [vmem:[%s10489_s11 + $0x8] sm:$0xff]  }
 0x201   :  { %6828 = vmatprep.subr.bf16.mxu0 %v7891_v31  ;;  %v7927_v31 = vld [vmem:[%s10485_s7 + $0xd0] sm:$0xff]  }
 0x204   :  { %6829 = vmatpush3.bf16.msra.mxu0 %v7892_v9  ;;  %v7929_v9 = vld [vmem:[%s10485_s7 + $0x90] sm:$0xff]  }
 0x205   :  { %6830 = vmatprep.subr.bf16.mxu0 %v7893_v32  ;;  %v7931_v32 = vld [vmem:[%s10485_s7 + $0xc8] sm:$0xff]  }
 0x208   :  { %6831 = vmatpush3.bf16.msra.mxu0 %v7894_v34  ;;  %v7933_v34 = vld [vmem:[%s10485_s7 + $0x88] sm:$0xff]  }
 0x209   :  { %7088 = vmatprep.subr.bf16.mxu0 %v8175_v13 }
 0x210   :  { %v2900_v49 = vpop.f32.mrf.mxu0 }
 0x211   :  { %v2901_v50 = vadd.f32 %v2900_v49, %v9661_v2 }
 0x212   :  { %v2902_v52 = vpop.f32.mrf.mxu0  ;;  %v2941_v55 = vpop.f32.mrf.mxu1 }
 0x213   :  { %v2903_v58 = vadd.f32 %v2902_v52, %v9666_v5  ;;  %v2942_v59 = vadd.f32 %v2941_v55, %v2901_v50 }
 0x214   :  { %v2904_v60 = vpop.f32.mrf.mxu0  ;;  %v2943_v61 = vpop.f32.mrf.mxu1 }
 0x215   :  { %v2944_v62 = vadd.f32 %v2943_v61, %v2903_v58 }
 0x216   :  { %v2905_v29 = vpop.f32.mrf.mxu0  ;;  %v2945_v0 = vpop.f32.mrf.mxu1 }
 0x217   :  { %v7904_v29 = vld [vmem:[%s10489_s11 + $0x30] sm:$0xff]   ;;  %v7909_v0 = vld [vmem:[%s10485_s7 + $0xf8] sm:$0xff]  }
 0x218   :  { %v2946_v2 = vpop.f32.mrf.mxu1 }
 0x219   :  { %v7906_v2 = vld [vmem:[%s10489_s11 + $0x20] sm:$0xff]  }
 0x250   :  { %v2982_v5 = vpop.f32.mrf.mxu0 }
 0x251   :  { %v2983_v54 = vadd.f32 %v2982_v5, %v2942_v59 }
 0x252   :  { %v2984_v6 = vpop.f32.mrf.mxu0  ;;  %v3023_v7 = vpop.f32.mrf.mxu1 }
 0x253   :  { %v2985_v14 = vadd.f32 %v2984_v6, %v2944_v62  ;;  %v3024_v15 = vadd.f32 %v3023_v7, %v2983_v54  ;;  %v7902_v62 = vld [vmem:[%s10487_s9] sm:$0xff]  }
 0x254   :  { %v2986_v8 = vpop.f32.mrf.mxu0  ;;  %v3025_v48 = vpop.f32.mrf.mxu1 }
 0x255   :  { %v3026_v19 = vadd.f32 %v3025_v48, %v2985_v14  ;;  %v6409_v48 = vld [vmem:[%s10486_s8] ss:$0 sm:$0xff] }
 0x256   :  { %v2987_v10 = vpop.f32.mrf.mxu0  ;;  %v3027_v11 = vpop.f32.mrf.mxu1 }
 0x258   :  { %v3028_v12 = vpop.f32.mrf.mxu1 }
 0x260   :  { %v3064_v18 = vpop.f32.mrf.mxu0 }
 0x261   :  { %v3065_v53 = vadd.f32 %v3064_v18, %v3024_v15  ;;  %v7911_v15 = vld [vmem:[%s10485_s7 + $0xb8] sm:$0xff]  }
 0x262   :  { %v3066_v23 = vpop.f32.mrf.mxu0 }
 0x263   :  { %v3067_v24 = vadd.f32 %v3066_v23, %v3026_v19  ;;  %v3071_v17 = vmax.f32 %v3065_v53, 0.0  ;;  %v7912_v19 = vld [vmem:[%s10485_s7 + $0xf0] sm:$0xff]   ;;  %v7913_v53 = vld [vmem:[%s10489_s11] sm:$0xff]  }
 0x264   :  { %v3068_v25 = vpop.f32.mrf.mxu0  ;;  %v7914_v23 = vld [vmem:[%s10485_s7 + $0xb0] sm:$0xff]  }
 0x265   :  { %v3072_v57 = vmax.f32 %v3067_v24, 0.0  ;;  %v3073_v21 = vpack.c.bf16 %v3071_v17, %v3071_v17  ;;  %v7915_v24 = vld [vmem:[%s10485_s7 + $0xe8] sm:$0xff]   ;;  %v7916_v17 = vld [vmem:[%s10517_s27 + $0xf8] sm:$0xff]  }
 0x266   :  { %v3069_v26 = vpop.f32.mrf.mxu0  ;;  %v7917_v25 = vld [vmem:[%s10485_s7 + $0xa8] sm:$0xff]  }
 0x267   :  { %v3074_v27 = vpack.c.bf16 %v3072_v57, %v3072_v57  ;;  %v7919_v57 = vld [vmem:[%s10485_s7 + $0xe0] sm:$0xff]  }
 0x268   :  { %v7921_v26 = vld [vmem:[%s10485_s7 + $0xa0] sm:$0xff]  }
 0x269   :  { %3311 = vmatprep.mubr.bf16.mxu1 %v3074_v27  ;;  %v7923_v27 = vld [vmem:[%s10485_s7 + $0xd8] sm:$0xff]  }
 0x26a   :  { %3312 = vmatmul.mubr.bf16.vlgmr.msra.gmra.mxu1 %v3073_v21  ;;  %v7925_v21 = vld [vmem:[%s10485_s7 + $0x98] sm:$0xff]  }
 0x26b   :  { %7069 = vmatpush3.bf16.msra.mxu1 %v7895_v36  ;;  %7084 = vmatprep.mubr.msk.bf16.mxu1 %vm8176_vm1, %v8175_v13  ;;  %v7935_v36 = vld [vmem:[%s10485_s7 + $0xc0] sm:$0xff]  }
 0x26c   :  { %7070 = vmatprep.subr.bf16.mxu1 %v8175_v13 }
 0x26f   :  { %7071 = vmatpush3.bf16.msra.mxu1 %v7896_v37  ;;  %v7937_v37 = vld [vmem:[%s10485_s7 + $0x80] sm:$0xff]  }
 0x270   :  { %7072 = vmatprep.subr.bf16.mxu1 %v8175_v13 }
 0x273   :  { %7073 = vmatpush3.bf16.msra.mxu1 %v7897_v16  ;;  %v6410_v16 = vld [vmem:[%s10488_s10] ss:$0 sm:$0xff] }
 0x274   :  { %7074 = vmatprep.subr.bf16.mxu1 %v8175_v13 }
 0x277   :  { %7075 = vmatpush3.bf16.msra.mxu1 %v7898_v38 }
 0x278   :  { %7076 = vmatprep.subr.bf16.mxu1 %v8175_v13 }
 0x27b   :  { %7077 = vmatpush3.bf16.msra.mxu1 %v7899_v39 }
 0x27c   :  { %7078 = vmatprep.subr.bf16.mxu1 %v8175_v13 }
 0x27f   :  { %7079 = vmatpush3.bf16.msra.mxu1 %v7900_v20  ;;  %v7939_v20 = vld [vmem:[%s10517_s27 + $0xc8] sm:$0xff]  }
 0x280   :  { %7080 = vmatprep.subr.bf16.mxu1 %v8175_v13 }
 0x283   :  { %7081 = vmatpush3.bf16.msra.mxu1 %v7901_v30  ;;  %v7940_v30 = vld [vmem:[%s10517_s27 + $0x88] sm:$0xff]  }
 0x284   :  { %7082 = vmatprep.subr.bf16.mxu1 %v8175_v13 }
 0x287   :  { %7083 = vmatpush3.bf16.msra.mxu1 %v7902_v62  ;;  %v7941_v62 = vld [vmem:[%s10517_s27 + $0xc0] sm:$0xff]  }
 0x288   :  { %6856 = vmatprep.subr.bf16.mxu1 %v7909_v0  ;;  %v7944_v0 = vld [vmem:[%s10487_s9 + $0x70] sm:$0xff]  }
 0x2ab   :  { %v6810_v40 = vpop.f32.mrf.mxu0 }
 0x2ad   :  { %v6811_v41 = vpop.f32.mrf.mxu0 }
 0x2ae   :  { %v6812_v22 = vadd.f32 %v6811_v41, %v6810_v40 }
 0x2af   :  { %v6813_v42 = vpop.f32.mrf.mxu0 }
 0x2b0   :  { %v3553_v7 = vrot.slane %v6812_v22, %v9126_v28  ;;  %v7918_v42 = vld [vmem:[%s10517_s27 + $0xb8] sm:$0xff]  }
 0x2b1   :  { %v6814_v44 = vpop.f32.mrf.mxu0 }
 0x32a   :  { %v3313_v49 = vpop.f32.mrf.mxu1 }
 0x32b   :  { %v3314_v50 = vadd.f32 %v3313_v49, %v3112_v46  ;;  %v7924_v49 = vld [vmem:[%s10517_s27 + $0xe8] sm:$0xff]  }
 0x32c   :  { %v3315_v51 = vpop.f32.mrf.mxu1 }
 0x32d   :  { %v3316_v52 = vadd.f32 %v3315_v51, %v3116_v47  ;;  %v3320_v55 = vmax.f32 %v3314_v50, 0.0  ;;  %v7922_v47 = vld [vmem:[%s10517_s27 + $0xb0] sm:$0xff]   ;;  %v7926_v50 = vld [vmem:[%s10517_s27 + $0xa8] sm:$0xff]   ;;  %v7928_v51 = vld [vmem:[%s10517_s27 + $0xe0] sm:$0xff]  }
 0x32e   :  { %v3317_v56 = vpop.f32.mrf.mxu1 }
 0x32f   :  { %v3321_v58 = vmax.f32 %v3316_v52, 0.0  ;;  %v9833_v61 = vpack.c.bf16 %v3320_v55, %v3320_v55  ;;  %v7930_v52 = vld [vmem:[%s10517_s27 + $0xa0] sm:$0xff]   ;;  %v7932_v55 = vld [vmem:[%s10517_s27 + $0xd8] sm:$0xff]  }
 0x330   :  { %v3318_v59 = vpop.f32.mrf.mxu1  ;;  %v7934_v56 = vld [vmem:[%s10517_s27 + $0x98] sm:$0xff]  }
 0x331   :  { %v9831_v60 = vpack.c.bf16 %v3321_v58, %v3321_v58  ;;  %v7936_v58 = vld [vmem:[%s10517_s27 + $0xd0] sm:$0xff]  }
 0x332   :  { %v7938_v59 = vld [vmem:[%s10517_s27 + $0x90] sm:$0xff]  }
 0x333   :  { %3682 = vmatprep.mubr.bf16.mxu0 %v9831_v60 }
 0x334   :  { %3683 = vmatmul.mubr.bf16.vlgmr.msra.gmra.mxu0 %v9833_v61 }
 0x335   :  { %7104 = vmatprep.mubr.msk.bf16.mxu0 %vm8176_vm1, %v8175_v13  ;;  %7089 = vmatpush3.bf16.msra.mxu0 %v7903_v63  ;;  %v7942_v63 = vld [vmem:[%s10517_s27 + $0x80] sm:$0xff]  }
 0x336   :  { %7090 = vmatprep.subr.bf16.mxu0 %v8175_v13 }
 0x339   :  { %7091 = vmatpush3.bf16.msra.mxu0 %v7904_v29  ;;  %v7943_v29 = vld [vmem:[%s10487_s9 + $0x78] sm:$0xff]  }
 0x33a   :  { %7092 = vmatprep.subr.bf16.mxu0 %v8175_v13 }
 0x33d   :  { %7093 = vmatpush3.bf16.msra.mxu0 %v7905_v1  ;;  %v7945_v1 = vld [vmem:[%s10487_s9 + $0x68] sm:$0xff]  }
 0x33e   :  { %7094 = vmatprep.subr.bf16.mxu0 %v8175_v13 }
 0x341   :  { %7095 = vmatpush3.bf16.msra.mxu0 %v7906_v2  ;;  %v7946_v2 = vld [vmem:[%s10487_s9 + $0x60] sm:$0xff]  }
 0x342   :  { %7096 = vmatprep.subr.bf16.mxu0 %v8175_v13 }
 0x345   :  { %7097 = vmatpush3.bf16.msra.mxu0 %v7907_v3 }
 0x346   :  { %7098 = vmatprep.subr.bf16.mxu0 %v8175_v13 }
 0x349   :  { %7099 = vmatpush3.bf16.msra.mxu0 %v7908_v33  ;;  %v7947_v33 = vld [vmem:[%s10487_s9 + $0x58] sm:$0xff]  }
 0x34a   :  { %7100 = vmatprep.subr.bf16.mxu0 %v8175_v13 }
 0x34d   :  { %7101 = vmatpush3.bf16.msra.mxu0 %v7910_v4 }
 0x34e   :  { %7102 = vmatprep.subr.bf16.mxu0 %v8175_v13 }
 0x351   :  { %7103 = vmatpush3.bf16.msra.mxu0 %v7913_v53  ;;  %v7958_v53 = vld [vmem:[%s10489_s11 + $0x48] sm:$0xff]  }
 0x352   :  { %6878 = vmatprep.subr.bf16.mxu0 %v7916_v17 }
 0x3f4   :  { %v6832_v5 = vpop.f32.mrf.mxu0 }
 0x3f6   :  { %v6833_v6 = vpop.f32.mrf.mxu0 }
 0x3f7   :  { %v6834_v8 = vadd.f32 %v6833_v6, %v6832_v5 }
 0x3f8   :  { %v6835_v10 = vpop.f32.mrf.mxu0 }
 0x3f9   :  { %v3685_v11 = vadd.f32 %v6834_v8, %v3553_v7  ;;  %v7948_v8 = vld [vmem:[%s10487_s9 + $0x50] sm:$0xff]   ;;  %v7950_v10 = vld [vmem:[%s10487_s9 + $0x40] sm:$0xff]  }
 0x3fa   :  { %v6836_v12 = vpop.f32.mrf.mxu0 }
 0x3fb   :  { %v3697_v54 = vadd.f32 %v6409_v48, %v3685_v11  ;;  %v7949_v48 = vld [vmem:[%s10487_s9 + $0x48] sm:$0xff]   ;;  %v7951_v11 = vld [vmem:[%s10489_s11 + $0x78] sm:$0xff]   ;;  %v7952_v12 = vld [vmem:[%s10489_s11 + $0x70] sm:$0xff]  }
 0x3fd   :  { %v3698_v14 = vmax.f32 %v3697_v54, 0.0  ;;  %v7957_v54 = vld [vmem:[%s10485_s7 + $0x178] sm:$0xff]  }
 0x3ff   :  { %v3699_v18 = vpack.c.bf16 %v3698_v14, %v3698_v14  ;;  %v7953_v14 = vld [vmem:[%s10489_s11 + $0x68] sm:$0xff]  }
 0x401   :  { %7085 = vmatmul.mubr.bf16.vlgmr.msra.gmra.mxu1 %v3699_v18  ;;  %v7955_v18 = vld [vmem:[%s10489_s11 + $0x58] sm:$0xff]  }
 0x402   :  { %6857 = vmatpush3.bf16.msra.mxu1 %v7911_v15  ;;  %4141 = vmatprep.mubr.bf16.mxu1 %v9720_v35  ;;  %v7954_v15 = vld [vmem:[%s10489_s11 + $0x60] sm:$0xff]  }
 0x403   :  { %6858 = vmatprep.subr.bf16.mxu1 %v7912_v19  ;;  %v7956_v19 = vld [vmem:[%s10489_s11 + $0x50] sm:$0xff]  }
 0x406   :  { %6859 = vmatpush3.bf16.msra.mxu1 %v7914_v23 }
 0x407   :  { %6860 = vmatprep.subr.bf16.mxu1 %v7915_v24 }
 0x40a   :  { %6861 = vmatpush3.bf16.msra.mxu1 %v7917_v25 }
 0x40b   :  { %6862 = vmatprep.subr.bf16.mxu1 %v7919_v57 }
 0x40e   :  { %6863 = vmatpush3.bf16.msra.mxu1 %v7921_v26 }
 0x40f   :  { %6864 = vmatprep.subr.bf16.mxu1 %v7923_v27 }
 0x412   :  { %6865 = vmatpush3.bf16.msra.mxu1 %v7925_v21 }
 0x413   :  { %6866 = vmatprep.subr.bf16.mxu1 %v7927_v31  ;;  %v6525_v31 = vld [vmem:[%s10486_s8 + $0x1] ss:$0 sm:$0xff] }
 0x416   :  { %6867 = vmatpush3.bf16.msra.mxu1 %v7929_v9 }
 0x417   :  { %6868 = vmatprep.subr.bf16.mxu1 %v7931_v32 }
 0x41a   :  { %6869 = vmatpush3.bf16.msra.mxu1 %v7933_v34 }
 0x41b   :  { %6870 = vmatprep.subr.bf16.mxu1 %v7935_v36 }
 0x41e   :  { %6871 = vmatpush3.bf16.msra.mxu1 %v7937_v37 }
 0x41f   :  { %7108 = vmatprep.subr.bf16.mxu1 %v8175_v13 }
 0x421   :  { %4142 = vmatmul.mubr.bf16.vlgmr.msra.gmra.mxu1 %v9753_v43 }
 0x422   :  { %7124 = vmatprep.mubr.msk.bf16.mxu1 %vm8176_vm1, %v8175_v13  ;;  %7109 = vmatpush3.bf16.msra.mxu1 %v7943_v29 }
 0x423   :  { %7110 = vmatprep.subr.bf16.mxu1 %v8175_v13 }
 0x426   :  { %7111 = vmatpush3.bf16.msra.mxu1 %v7944_v0  ;;  %v7966_v0 = vld [vmem:[%s10517_s27 + $0x138] sm:$0xff]  }
 0x427   :  { %7112 = vmatprep.subr.bf16.mxu1 %v8175_v13 }
 0x42a   :  { %7113 = vmatpush3.bf16.msra.mxu1 %v7945_v1 }
 0x42b   :  { %7114 = vmatprep.subr.bf16.mxu1 %v8175_v13 }
 0x42e   :  { %7115 = vmatpush3.bf16.msra.mxu1 %v7946_v2  ;;  %v7968_v2 = vld [vmem:[%s10517_s27 + $0x170] sm:$0xff]  }
 0x42f   :  { %7116 = vmatprep.subr.bf16.mxu1 %v8175_v13 }
 0x432   :  { %7117 = vmatpush3.bf16.msra.mxu1 %v7947_v33  ;;  %v7970_v33 = vld [vmem:[%s10517_s27 + $0x130] sm:$0xff]  }
 0x433   :  { %7118 = vmatprep.subr.bf16.mxu1 %v8175_v13 }
 0x436   :  { %7119 = vmatpush3.bf16.msra.mxu1 %v7948_v8  ;;  %v7980_v8 = vld [vmem:[%s10517_s27 + $0x158] sm:$0xff]  }
 0x437   :  { %7120 = vmatprep.subr.bf16.mxu1 %v8175_v13 }
 0x43a   :  { %7121 = vmatpush3.bf16.msra.mxu1 %v7949_v48  ;;  %v7982_v48 = vld [vmem:[%s10517_s27 + $0x118] sm:$0xff]  }
 0x43b   :  { %7122 = vmatprep.subr.bf16.mxu1 %v8175_v13 }
 0x43e   :  { %7123 = vmatpush3.bf16.msra.mxu1 %v7950_v10  ;;  %v7984_v10 = vld [vmem:[%s10517_s27 + $0x150] sm:$0xff]  }
 0x43f   :  { %6918 = vmatprep.subr.bf16.mxu1 %v7957_v54  ;;  %v7988_v54 = vld [vmem:[%s10517_s27 + $0x108] sm:$0xff]  }
 0x4c1   :  { %v3805_v38 = vpop.f32.mrf.mxu1 }
 0x4c2   :  { %v3806_v39 = vadd.f32 %v6410_v16, %v3805_v38  ;;  %v7959_v16 = vld [vmem:[%s10485_s7 + $0x138] sm:$0xff]  }
 0x4c3   :  { %v7086_v40 = vpop.f32.mrf.mxu1 }
 0x4c4   :  { %v3811_v41 = vmax.f32 %v3806_v39, 0.0  ;;  %v7960_v39 = vld [vmem:[%s10485_s7 + $0x170] sm:$0xff]   ;;  %v7961_v40 = vld [vmem:[%s10489_s11 + $0x40] sm:$0xff]  }
 0x4c5   :  { %v3808_v22 = vpop.f32.mrf.mxu1 }
 0x4c6   :  { %v3812_v44 = vpack.c.bf16 %v3811_v41, %v3811_v41  ;;  %v7962_v41 = vld [vmem:[%s10485_s7 + $0x130] sm:$0xff]   ;;  %v7963_v22 = vld [vmem:[%s10485_s7 + $0x168] sm:$0xff]  }
 0x4c7   :  { %v7087_v46 = vpop.f32.mrf.mxu1 }
 0x4c8   :  { %7105 = vmatmul.mubr.bf16.vlgmr.msra.gmra.mxu0 %v3812_v44  ;;  %v7965_v44 = vld [vmem:[%s10485_s7 + $0x128] sm:$0xff]   ;;  %v7969_v46 = vld [vmem:[%s10485_s7 + $0x120] sm:$0xff]  }
 0x4c9   :  { %6879 = vmatpush3.bf16.msra.mxu0 %v7918_v42  ;;  %4281 = vmatprep.mubr.bf16.mxu0 %v9831_v60  ;;  %v7964_v42 = vld [vmem:[%s10517_s27 + $0x178] sm:$0xff]  }
 0x4ca   :  { %6880 = vmatprep.subr.bf16.mxu0 %v7920_v45  ;;  %v7967_v45 = vld [vmem:[%s10485_s7 + $0x160] sm:$0xff]  }
 0x4cd   :  { %6881 = vmatpush3.bf16.msra.mxu0 %v7922_v47  ;;  %v7971_v47 = vld [vmem:[%s10485_s7 + $0x158] sm:$0xff]  }
 0x4ce   :  { %6882 = vmatprep.subr.bf16.mxu0 %v7924_v49  ;;  %v7973_v49 = vld [vmem:[%s10485_s7 + $0x118] sm:$0xff]  }
 0x4d1   :  { %6883 = vmatpush3.bf16.msra.mxu0 %v7926_v50  ;;  %v7975_v50 = vld [vmem:[%s10485_s7 + $0x150] sm:$0xff]  }
 0x4d2   :  { %6884 = vmatprep.subr.bf16.mxu0 %v7928_v51  ;;  %v7977_v51 = vld [vmem:[%s10485_s7 + $0x110] sm:$0xff]  }
 0x4d5   :  { %6885 = vmatpush3.bf16.msra.mxu0 %v7930_v52  ;;  %v7979_v52 = vld [vmem:[%s10485_s7 + $0x148] sm:$0xff]  }
 0x4d6   :  { %6886 = vmatprep.subr.bf16.mxu0 %v7932_v55  ;;  %v7981_v55 = vld [vmem:[%s10485_s7 + $0x108] sm:$0xff]  }
 0x4d9   :  { %6887 = vmatpush3.bf16.msra.mxu0 %v7934_v56  ;;  %v7983_v56 = vld [vmem:[%s10485_s7 + $0x140] sm:$0xff]  }
 0x4da   :  { %6888 = vmatprep.subr.bf16.mxu0 %v7936_v58  ;;  %v7985_v58 = vld [vmem:[%s10485_s7 + $0x100] sm:$0xff]  }
 0x4dd   :  { %6889 = vmatpush3.bf16.msra.mxu0 %v7938_v59  ;;  %v6543_v59 = vld [vmem:[%s10488_s10 + $0x1] ss:$0 sm:$0xff] }
 0x4de   :  { %6890 = vmatprep.subr.bf16.mxu0 %v7939_v20 }
 0x4e1   :  { %6891 = vmatpush3.bf16.msra.mxu0 %v7940_v30  ;;  %v6872_v3 = vpop.f32.mrf.mxu1 }
 0x4e2   :  { %6892 = vmatprep.subr.bf16.mxu0 %v7941_v62 }
 0x4e3   :  { %v6873_v4 = vpop.f32.mrf.mxu1 }
 0x4e4   :  { %v6874_v5 = vadd.f32 %v6873_v4, %v6872_v3  ;;  %v7972_v4 = vld [vmem:[%s10517_s27 + $0x168] sm:$0xff]  }
 0x4e5   :  { %6893 = vmatpush3.bf16.msra.mxu0 %v7942_v63  ;;  %v6875_v6 = vpop.f32.mrf.mxu1 }
 0x4e6   :  { %7128 = vmatprep.subr.bf16.mxu0 %v8175_v13  ;;  %v4152_v27 = vrot.slane %v6874_v5, %v9126_v28  ;;  %v7974_v5 = vld [vmem:[%s10517_s27 + $0x128] sm:$0xff]   ;;  %v7976_v6 = vld [vmem:[%s10517_s27 + $0x160] sm:$0xff]  }
 0x4e7   :  { %v6876_v7 = vpop.f32.mrf.mxu1 }
 0x4e8   :  { %4282 = vmatmul.mubr.bf16.vlgmr.msra.gmra.mxu0 %v9833_v61  ;;  %v7978_v7 = vld [vmem:[%s10517_s27 + $0x120] sm:$0xff]  }
 0x4e9   :  { %7144 = vmatprep.mubr.msk.bf16.mxu0 %vm8176_vm1, %v8175_v13  ;;  %7129 = vmatpush3.bf16.msra.mxu0 %v7951_v11  ;;  %v7986_v11 = vld [vmem:[%s10517_s27 + $0x110] sm:$0xff]  }
 0x4ea   :  { %7130 = vmatprep.subr.bf16.mxu0 %v8175_v13 }
 0x4ed   :  { %7131 = vmatpush3.bf16.msra.mxu0 %v7952_v12  ;;  %v7987_v12 = vld [vmem:[%s10517_s27 + $0x148] sm:$0xff]  }
 0x4ee   :  { %7132 = vmatprep.subr.bf16.mxu0 %v8175_v13 }
 0x4f1   :  { %7133 = vmatpush3.bf16.msra.mxu0 %v7953_v14  ;;  %v7989_v14 = vld [vmem:[%s10517_s27 + $0x140] sm:$0xff]  }
 0x4f2   :  { %7134 = vmatprep.subr.bf16.mxu0 %v8175_v13 }
 0x4f5   :  { %7135 = vmatpush3.bf16.msra.mxu0 %v7954_v15  ;;  %v7990_v15 = vld [vmem:[%s10517_s27 + $0x100] sm:$0xff]  }
 0x4f6   :  { %7136 = vmatprep.subr.bf16.mxu0 %v8175_v13 }
 0x4f9   :  { %7137 = vmatpush3.bf16.msra.mxu0 %v7955_v18  ;;  %v7991_v18 = vld [vmem:[%s10487_s9 + $0xb8] sm:$0xff]  }
 0x4fa   :  { %7138 = vmatprep.subr.bf16.mxu0 %v8175_v13 }
 0x4fd   :  { %7139 = vmatpush3.bf16.msra.mxu0 %v7956_v19  ;;  %v7992_v19 = vld [vmem:[%s10487_s9 + $0xb0] sm:$0xff]  }
 0x4fe   :  { %7140 = vmatprep.subr.bf16.mxu0 %v8175_v13 }
 0x501   :  { %7141 = vmatpush3.bf16.msra.mxu0 %v7958_v53  ;;  %v7993_v53 = vld [vmem:[%s10487_s9 + $0xa8] sm:$0xff]  }
 0x502   :  { %7142 = vmatprep.subr.bf16.mxu0 %v8175_v13 }
 0x505   :  { %7143 = vmatpush3.bf16.msra.mxu0 %v7961_v40 }
 0x506   :  { %6940 = vmatprep.subr.bf16.mxu0 %v7964_v42 }
 0x588   :  { %v10058_v23 = vpop.f32.mrf.mxu0 }
 0x58a   :  { %v7106_v24 = vpop.f32.mrf.mxu0 }
 0x58b   :  { %v7994_v24 = vld [vmem:[%s10487_s9 + $0xa0] sm:$0xff]  }
 0x58c   :  { %v3921_v17 = vpop.f32.mrf.mxu0 }
 0x58e   :  { %v7107_v25 = vpop.f32.mrf.mxu0 }
 0x58f   :  { %v7995_v25 = vld [vmem:[%s10487_s9 + $0x98] sm:$0xff]  }
 0x5a8   :  { %v6894_v57 = vpop.f32.mrf.mxu0 }
 0x5aa   :  { %v6895_v26 = vpop.f32.mrf.mxu0 }
 0x5ab   :  { %v6896_v21 = vadd.f32 %v6895_v26, %v6894_v57 }
 0x5ac   :  { %v6897_v9 = vpop.f32.mrf.mxu0 }
 0x5ad   :  { %v4284_v32 = vadd.f32 %v6896_v21, %v4152_v27  ;;  %v7997_v9 = vld [vmem:[%s10487_s9 + $0x88] sm:$0xff]  }
 0x5ae   :  { %v6898_v34 = vpop.f32.mrf.mxu0 }
 0x5af   :  { %v4297_v36 = vadd.f32 %v6525_v31, %v4284_v32  ;;  %v7996_v31 = vld [vmem:[%s10487_s9 + $0x90] sm:$0xff]   ;;  %v7998_v32 = vld [vmem:[%s10487_s9 + $0x80] sm:$0xff]  }
 0x5b0   :  { %v6569_v34 = vld [vmem:[%s10490_s12 + $0x1] ss:$0 sm:$0xff] }
 0x5b1   :  { %v4298_v37 = vmax.f32 %v4297_v36, 0.0 }
 0x5b3   :  { %v4299_v38 = vpack.c.bf16 %v4298_v37, %v4298_v37 }
 0x5b5   :  { %7125 = vmatmul.mubr.bf16.vlgmr.msra.gmra.mxu1 %v4299_v38 }
 0x5b6   :  { %6919 = vmatpush3.bf16.msra.mxu1 %v7959_v16  ;;  %4744 = vmatprep.mubr.bf16.mxu1 %v9720_v35 }
 0x5b7   :  { %6920 = vmatprep.subr.bf16.mxu1 %v7960_v39 }
 0x5ba   :  { %6921 = vmatpush3.bf16.msra.mxu1 %v7962_v41 }
 0x5bb   :  { %6922 = vmatprep.subr.bf16.mxu1 %v7963_v22 }
 0x5be   :  { %6923 = vmatpush3.bf16.msra.mxu1 %v7965_v44 }
 0x5bf   :  { %6924 = vmatprep.subr.bf16.mxu1 %v7967_v45 }
 0x5c2   :  { %6925 = vmatpush3.bf16.msra.mxu1 %v7969_v46 }
 0x5c3   :  { %6926 = vmatprep.subr.bf16.mxu1 %v7971_v47 }
 0x5c6   :  { %6927 = vmatpush3.bf16.msra.mxu1 %v7973_v49 }
 0x5c7   :  { %6928 = vmatprep.subr.bf16.mxu1 %v7975_v50 }
 0x5ca   :  { %6929 = vmatpush3.bf16.msra.mxu1 %v7977_v51 }
 0x5cb   :  { %6930 = vmatprep.subr.bf16.mxu1 %v7979_v52  ;;  %v6675_v52 = vld [vmem:[%s10486_s8 + $0x2] ss:$0 sm:$0xff] }
 0x5ce   :  { %6931 = vmatpush3.bf16.msra.mxu1 %v7981_v55 }
 0x5cf   :  { %6932 = vmatprep.subr.bf16.mxu1 %v7983_v56 }
 0x5d2   :  { %6933 = vmatpush3.bf16.msra.mxu1 %v7985_v58 }
 0x5d3   :  { %7148 = vmatprep.subr.bf16.mxu1 %v8175_v13 }
 0x5d5   :  { %4745 = vmatmul.mubr.bf16.vlgmr.msra.gmra.mxu1 %v9753_v43 }
 0x5d6   :  { %7164 = vmatprep.mubr.msk.bf16.mxu1 %vm8176_vm1, %v8175_v13  ;;  %7149 = vmatpush3.bf16.msra.mxu1 %v7991_v18  ;;  %v8017_v18 = vld [vmem:[%s10492_s14 + $0x20] sm:$0xff]  }
 0x5d7   :  { %7150 = vmatprep.subr.bf16.mxu1 %v8175_v13 }
 0x5da   :  { %7151 = vmatpush3.bf16.msra.mxu1 %v7992_v19  ;;  %v8019_v19 = vld [vmem:[%s10492_s14 + $0x58] sm:$0xff]  }
 0x5db   :  { %7152 = vmatprep.subr.bf16.mxu1 %v8175_v13 }
 0x5de   :  { %7153 = vmatpush3.bf16.msra.mxu1 %v7993_v53  ;;  %v8021_v53 = vld [vmem:[%s10492_s14 + $0x18] sm:$0xff]  }
 0x5df   :  { %7154 = vmatprep.subr.bf16.mxu1 %v8175_v13 }
 0x5e2   :  { %7155 = vmatpush3.bf16.msra.mxu1 %v7994_v24  ;;  %v8023_v24 = vld [vmem:[%s10492_s14 + $0x50] sm:$0xff]  }
 0x5e3   :  { %7156 = vmatprep.subr.bf16.mxu1 %v8175_v13 }
 0x5e6   :  { %7157 = vmatpush3.bf16.msra.mxu1 %v7995_v25  ;;  %v8027_v25 = vld [vmem:[%s10492_s14 + $0x48] sm:$0xff]  }
 0x5e7   :  { %7158 = vmatprep.subr.bf16.mxu1 %v8175_v13 }
 0x5ea   :  { %7159 = vmatpush3.bf16.msra.mxu1 %v7996_v31  ;;  %v8040_v31 = vld [vmem:[%s10495_s17 + $0x38] sm:$0xff]  }
 0x5eb   :  { %7160 = vmatprep.subr.bf16.mxu1 %v8175_v13 }
 0x5ee   :  { %7161 = vmatpush3.bf16.msra.mxu1 %v7997_v9  ;;  %v8043_v9 = vld [vmem:[%s10495_s17 + $0x70] sm:$0xff]  }
 0x5ef   :  { %7162 = vmatprep.subr.bf16.mxu1 %v8175_v13 }
 0x5f2   :  { %7163 = vmatpush3.bf16.msra.mxu1 %v7998_v32  ;;  %v8044_v32 = vld [vmem:[%s10495_s17 + $0x30] sm:$0xff]  }
 0x675   :  { %v4407_v20 = vpop.f32.mrf.mxu1 }
 0x676   :  { %v4408_v30 = vadd.f32 %v6543_v59, %v4407_v20 }
 0x677   :  { %v7126_v62 = vpop.f32.mrf.mxu1 }
 0x678   :  { %v4413_v63 = vmax.f32 %v4408_v30, 0.0 }
 0x679   :  { %v4410_v29 = vpop.f32.mrf.mxu1 }
 0x67a   :  { %v4414_v1 = vpack.c.bf16 %v4413_v63, %v4413_v63 }
 0x67b   :  { %v7127_v3 = vpop.f32.mrf.mxu1 }
 0x67c   :  { %7145 = vmatmul.mubr.bf16.vlgmr.msra.gmra.mxu0 %v4414_v1  ;;  %v8000_v3 = vld [vmem:[%s10489_s11 + $0xb0] sm:$0xff]  }
 0x67d   :  { %6941 = vmatpush3.bf16.msra.mxu0 %v7966_v0  ;;  %4884 = vmatprep.mubr.bf16.mxu0 %v9831_v60 }
 0x67e   :  { %6942 = vmatprep.subr.bf16.mxu0 %v7968_v2  ;;  %v7999_v2 = vld [vmem:[%s10489_s11 + $0xb8] sm:$0xff]  }
 0x681   :  { %6943 = vmatpush3.bf16.msra.mxu0 %v7970_v33  ;;  %v8005_v33 = vld [vmem:[%s10492_s14 + $0x78] sm:$0xff]  }
 0x682   :  { %6944 = vmatprep.subr.bf16.mxu0 %v7972_v4  ;;  %v8007_v4 = vld [vmem:[%s10492_s14 + $0x38] sm:$0xff]   ;;  %6980 = vmatprep.subr.bf16.mxu1 %v8005_v33  ;;  %v8037_v33 = vld [vmem:[%s10491_s13 + $0x40] sm:$0xff]  }
 0x685   :  { %6945 = vmatpush3.bf16.msra.mxu0 %v7974_v5  ;;  %v8001_v5 = vld [vmem:[%s10489_s11 + $0xa8] sm:$0xff]  }
 0x686   :  { %6946 = vmatprep.subr.bf16.mxu0 %v7976_v6  ;;  %v8002_v6 = vld [vmem:[%s10489_s11 + $0xa0] sm:$0xff]  }
 0x689   :  { %6947 = vmatpush3.bf16.msra.mxu0 %v7978_v7  ;;  %v8003_v7 = vld [vmem:[%s10489_s11 + $0x98] sm:$0xff]  }
 0x68a   :  { %6948 = vmatprep.subr.bf16.mxu0 %v7980_v8  ;;  %v8004_v8 = vld [vmem:[%s10489_s11 + $0x90] sm:$0xff]  }
 0x68d   :  { %6949 = vmatpush3.bf16.msra.mxu0 %v7982_v48  ;;  %v8006_v48 = vld [vmem:[%s10489_s11 + $0x88] sm:$0xff]  }
 0x68e   :  { %6950 = vmatprep.subr.bf16.mxu0 %v7984_v10  ;;  %v8008_v10 = vld [vmem:[%s10492_s14 + $0x70] sm:$0xff]  }
 0x691   :  { %6951 = vmatpush3.bf16.msra.mxu0 %v7986_v11  ;;  %v8009_v11 = vld [vmem:[%s10489_s11 + $0x80] sm:$0xff]  }
 0x692   :  { %6952 = vmatprep.subr.bf16.mxu0 %v7987_v12  ;;  %v8010_v12 = vld [vmem:[%s10492_s14 + $0x30] sm:$0xff]  }
 0x695   :  { %6953 = vmatpush3.bf16.msra.mxu0 %v7988_v54  ;;  %v6934_v17 = vpop.f32.mrf.mxu1  ;;  %v8011_v54 = vld [vmem:[%s10492_s14 + $0x68] sm:$0xff]  }
 0x696   :  { %6954 = vmatprep.subr.bf16.mxu0 %v7989_v14  ;;  %v8013_v14 = vld [vmem:[%s10492_s14 + $0x28] sm:$0xff]  }
 0x697   :  { %v6935_v57 = vpop.f32.mrf.mxu1 }
 0x698   :  { %v6936_v26 = vadd.f32 %v6935_v57, %v6934_v17  ;;  %v8025_v17 = vld [vmem:[%s10492_s14 + $0x10] sm:$0xff]   ;;  %v8029_v57 = vld [vmem:[%s10492_s14 + $0x8] sm:$0xff]  }
 0x699   :  { %6955 = vmatpush3.bf16.msra.mxu0 %v7990_v15  ;;  %v6937_v27 = vpop.f32.mrf.mxu1  ;;  %v8015_v15 = vld [vmem:[%s10492_s14 + $0x60] sm:$0xff]  }
 0x69a   :  { %7168 = vmatprep.subr.bf16.mxu0 %v8175_v13  ;;  %v4755_v50 = vrot.slane %v6936_v26, %v9126_v28  ;;  %v8031_v26 = vld [vmem:[%s10492_s14 + $0x40] sm:$0xff]  }
 0x69b   :  { %v6938_v21 = vpop.f32.mrf.mxu1  ;;  %v8033_v27 = vld [vmem:[%s10492_s14] sm:$0xff]  }
 0x69c   :  { %4885 = vmatmul.mubr.bf16.vlgmr.msra.gmra.mxu0 %v9833_v61  ;;  %v8039_v21 = vld [vmem:[%s10495_s17 + $0x78] sm:$0xff]  }
 0x69d   :  { %7184 = vmatprep.mubr.msk.bf16.mxu0 %vm8176_vm1, %v8175_v13  ;;  %7169 = vmatpush3.bf16.msra.mxu0 %v7999_v2  ;;  %v8035_v2 = vld [vmem:[%s10491_s13 + $0x48] sm:$0xff]  }
 0x69e   :  { %7170 = vmatprep.subr.bf16.mxu0 %v8175_v13 }
 0x6a1   :  { %7171 = vmatpush3.bf16.msra.mxu0 %v8000_v3  ;;  %v8036_v3 = vld [vmem:[%s10491_s13 + $0x8] sm:$0xff]  }
 0x6a2   :  { %7172 = vmatprep.subr.bf16.mxu0 %v8175_v13 }
 0x6a5   :  { %7173 = vmatpush3.bf16.msra.mxu0 %v8001_v5  ;;  %v8041_v5 = vld [vmem:[%s10494_s16 + $0x78] sm:$0xff]  }
 0x6a6   :  { %7174 = vmatprep.subr.bf16.mxu0 %v8175_v13 }
 0x6a9   :  { %7175 = vmatpush3.bf16.msra.mxu0 %v8002_v6  ;;  %v8042_v6 = vld [vmem:[%s10494_s16 + $0x38] sm:$0xff]  }
 0x6aa   :  { %7176 = vmatprep.subr.bf16.mxu0 %v8175_v13 }
 0x6ad   :  { %7177 = vmatpush3.bf16.msra.mxu0 %v8003_v7  ;;  %v8045_v7 = vld [vmem:[%s10494_s16 + $0x70] sm:$0xff]  }
 0x6ae   :  { %7178 = vmatprep.subr.bf16.mxu0 %v8175_v13 }
 0x6b1   :  { %7179 = vmatpush3.bf16.msra.mxu0 %v8004_v8  ;;  %v8046_v8 = vld [vmem:[%s10494_s16 + $0x30] sm:$0xff]  }
 0x6b2   :  { %7180 = vmatprep.subr.bf16.mxu0 %v8175_v13 }
 0x6b5   :  { %7181 = vmatpush3.bf16.msra.mxu0 %v8006_v48  ;;  %v8049_v48 = vld [vmem:[%s10494_s16 + $0x68] sm:$0xff]  }
 0x6b6   :  { %7182 = vmatprep.subr.bf16.mxu0 %v8175_v13  ;;  %v8012_v13 = vld [vmem:[%s10491_s13 + $0x78] sm:$0xff]  }
 0x6b9   :  { %7183 = vmatpush3.bf16.msra.mxu0 %v8009_v11  ;;  %v8053_v11 = vld [vmem:[%s10494_s16 + $0x60] sm:$0xff]  }
 0x6ba   :  { %7002 = vmatprep.subr.bf16.mxu0 %v8012_v13  ;;  %v8061_v13 = vld [vmem:[%s10494_s16 + $0x50] sm:$0xff]  }
 0x73c   :  { %v4522_v36 = vpop.f32.mrf.mxu0 }
 0x73d   :  { %v4523_v37 = vadd.f32 %v6569_v34, %v4522_v36  ;;  %v8048_v34 = vld [vmem:[%s10495_s17 + $0x28] sm:$0xff]   ;;  %v8051_v36 = vld [vmem:[%s10495_s17 + $0x60] sm:$0xff]  }
 0x73e   :  { %v7146_v16 = vpop.f32.mrf.mxu0 }
 0x73f   :  { %v4531_v38 = vand.u32 2147483647, %v4523_v37  ;;  %v4528_v47 = vmax.f32 %v4523_v37, 0.0  ;;  %v4529_v49 = vmul.f32 0.0, %v4523_v37  ;;  %v8052_v37 = vld [vmem:[%s10495_s17 + $0x20] sm:$0xff]   ;;  %v8055_v16 = vld [vmem:[%s10495_s17 + $0x58] sm:$0xff]  }
 0x740   :  { %v4525_v39 = vpop.f32.mrf.mxu0 }
 0x741   :  { %v4532_v40 = vsub.f32 0.0, %v4531_v38  ;;  %v4530_v30 = vsub.f32 %v4528_v47, %v4529_v49  ;;  %v8056_v38 = vld [vmem:[%s10495_s17 + $0x18] sm:$0xff]   ;;  %v8059_v39 = vld [vmem:[%s10495_s17 + $0x50] sm:$0xff]  }
 0x742   :  { %v7147_v41 = vpop.f32.mrf.mxu0 }
 0x743   :  { %v4533_v22 = vmul.f32 1.442695, %v4532_v40  ;;  %v8060_v40 = vld [vmem:[%s10495_s17 + $0x10] sm:$0xff]   ;;  %v8063_v41 = vld [vmem:[%s10495_s17 + $0x48] sm:$0xff]  }
 0x745   :  { %8071 = vpow2.f32 %v4533_v22  ;;  %v8064_v22 = vld [vmem:[%s10495_s17 + $0x8] sm:$0xff]  }
 0x752   :  { %v8072_v42 = vpop.eup %8071 }
 0x753   :  { %v4535_v44 = vadd.f32 1.0, %v8072_v42  ;;  %v8067_v42 = vld [vmem:[%s10495_s17 + $0x40] sm:$0xff]  }
 0x755   :  { %8073 = vlog2.f32 %v4535_v44  ;;  %v8068_v44 = vld [vmem:[%s10495_s17] sm:$0xff]  }
 0x75c   :  { %v6956_v45 = vpop.f32.mrf.mxu0 }
 0x75e   :  { %v6957_v46 = vpop.f32.mrf.mxu0 }
 0x75f   :  { %v6958_v51 = vadd.f32 %v6957_v46, %v6956_v45  ;;  %v6693_v45 = vld [vmem:[%s10488_s10 + $0x2] ss:$0 sm:$0xff] }
 0x760   :  { %v6959_v55 = vpop.f32.mrf.mxu0 }
 0x761   :  { %v4887_v56 = vadd.f32 %v6958_v51, %v4755_v50 }
 0x762   :  { %v8074_v58 = vpop.eup %8073  ;;  %v6960_v59 = vpop.f32.mrf.mxu0 }
 0x763   :  { %v4900_v20 = vadd.f32 %v6675_v52, %v4887_v56  ;;  %v4537_v62 = vmul.f32 0.6931472, %v8074_v58  ;;  %v8014_v52 = vld [vmem:[%s10491_s13 + $0x38] sm:$0xff]   ;;  %v8016_v56 = vld [vmem:[%s10491_s13 + $0x70] sm:$0xff]   ;;  %v8020_v59 = vld [vmem:[%s10491_s13 + $0x68] sm:$0xff]  }
 0x765   :  { %v4901_v63 = vmax.f32 %v4900_v20, 0.0  ;;  %v4538_v29 = vadd.f32 %v4537_v62, %v4530_v30  ;;  %v8022_v20 = vld [vmem:[%s10491_s13 + $0x28] sm:$0xff]   ;;  %v8024_v30 = vld [vmem:[%s10491_s13 + $0x60] sm:$0xff]  }
 0x766   :  { %v8026_v62 = vld [vmem:[%s10491_s13 + $0x20] sm:$0xff]  }
 0x767   :  { %v4902_v0 = vpack.c.bf16 %v4901_v63, %v4901_v63  ;;  %v4539_v1 = vsel %vm3935_vm2, %v4538_v29, 0.0  ;;  %v8028_v63 = vld [vmem:[%s10491_s13 + $0x58] sm:$0xff]  }
 0x768   :  { %4540 = vadd.xlane.f32.xlu1 %v4539_v1  ;;  %v8030_v29 = vld [vmem:[%s10491_s13 + $0x18] sm:$0xff]   ;;  %v8034_v1 = vld [vmem:[%s10491_s13 + $0x10] sm:$0xff]  }
 0x769   :  { %7165 = vmatmul.mubr.bf16.vlgmr.msra.gmra.mxu1 %v4902_v0  ;;  %v8032_v0 = vld [vmem:[%s10491_s13 + $0x50] sm:$0xff]  }
 0x76a   :  { %5352 = vmatprep.mubr.bf16.mxu1 %v9720_v35  ;;  %6981 = vmatpush3.bf16.msra.mxu1 %v8007_v4  ;;  %v8038_v4 = vld [vmem:[%s10491_s13] sm:$0xff]  }
 0x76b   :  { %6982 = vmatprep.subr.bf16.mxu1 %v8008_v10  ;;  %v8050_v10 = vld [vmem:[%s10494_s16 + $0x28] sm:$0xff]  }
 0x76e   :  { %6983 = vmatpush3.bf16.msra.mxu1 %v8010_v12  ;;  %v8057_v12 = vld [vmem:[%s10494_s16 + $0x58] sm:$0xff]  }
 0x76f   :  { %6984 = vmatprep.subr.bf16.mxu1 %v8011_v54  ;;  %v8058_v54 = vld [vmem:[%s10494_s16 + $0x18] sm:$0xff]  }
 0x772   :  { %6985 = vmatpush3.bf16.msra.mxu1 %v8013_v14  ;;  %v8062_v14 = vld [vmem:[%s10494_s16 + $0x10] sm:$0xff]  }
 0x773   :  { %6986 = vmatprep.subr.bf16.mxu1 %v8015_v15  ;;  %v8065_v15 = vld [vmem:[%s10494_s16 + $0x48] sm:$0xff]  }
 0x776   :  { %6987 = vmatpush3.bf16.msra.mxu1 %v8017_v18  ;;  %v8066_v18 = vld [vmem:[%s10494_s16 + $0x8] sm:$0xff]  }
 0x777   :  { %6988 = vmatprep.subr.bf16.mxu1 %v8019_v19  ;;  %v8069_v19 = vld [vmem:[%s10494_s16 + $0x40] sm:$0xff]  }
 0x77a   :  { %6989 = vmatpush3.bf16.msra.mxu1 %v8021_v53  ;;  %v8070_v53 = vld [vmem:[%s10494_s16] sm:$0xff]  }
 0x77b   :  { %6990 = vmatprep.subr.bf16.mxu1 %v8023_v24 }
 0x77e   :  { %6991 = vmatpush3.bf16.msra.mxu1 %v8025_v17 }
 0x77f   :  { %6992 = vmatprep.subr.bf16.mxu1 %v8027_v25 }
 0x782   :  { %6993 = vmatpush3.bf16.msra.mxu1 %v8029_v57 }
 0x783   :  { %6994 = vmatprep.subr.bf16.mxu1 %v8031_v26 }
 0x786   :  { %6995 = vmatpush3.bf16.msra.mxu1 %v8033_v27 }
 0x787   :  { %7024 = vmatprep.subr.bf16.mxu1 %v8039_v21 }
 0x789   :  { %5353 = vmatmul.mubr.bf16.vlgmr.msra.gmra.mxu1 %v9753_v43 }
 0x78a   :  { %5713 = vmatprep.mubr.bf16.mxu1 %v9720_v35  ;;  %7025 = vmatpush3.bf16.msra.mxu1 %v8040_v31  ;;  %v8047_v35 = vld [vmem:[%s10495_s17 + $0x68] sm:$0xff]  }
 0x78b   :  { %7026 = vmatprep.subr.bf16.mxu1 %v8043_v9 }
 0x78e   :  { %7027 = vmatpush3.bf16.msra.mxu1 %v8044_v32 }
 0x78f   :  { %7028 = vmatprep.subr.bf16.mxu1 %v8047_v35  ;;  %v6419_v35 = vld [vmem:[%s10490_s12] ss:$0 sm:$0xff] }
 0x792   :  { %7029 = vmatpush3.bf16.msra.mxu1 %v8048_v34  ;;  %v3919_v34 = vadd.f32 %v6419_v35, %v10058_v23 }
 0x793   :  { %7030 = vmatprep.subr.bf16.mxu1 %v8051_v36 }
 0x794   :  { %v3927_v36 = vand.u32 2147483647, %v3919_v34 }
 0x796   :  { %7031 = vmatpush3.bf16.msra.mxu1 %v8052_v37  ;;  %v3928_v37 = vsub.f32 0.0, %v3927_v36 }
 0x797   :  { %7032 = vmatprep.subr.bf16.mxu1 %v8055_v16 }
 0x798   :  { %v3929_v16 = vmul.f32 1.442695, %v3928_v37 }
 0x79a   :  { %7033 = vmatpush3.bf16.msra.mxu1 %v8056_v38  ;;  %8075 = vpow2.f32 %v3929_v16 }
 0x79b   :  { %7034 = vmatprep.subr.bf16.mxu1 %v8059_v39 }
 0x79e   :  { %7035 = vmatpush3.bf16.msra.mxu1 %v8060_v40 }
 0x79f   :  { %7036 = vmatprep.subr.bf16.mxu1 %v8063_v41 }
 0x7a2   :  { %7037 = vmatpush3.bf16.msra.mxu1 %v8064_v22 }
 0x7a3   :  { %7038 = vmatprep.subr.bf16.mxu1 %v8067_v42 }
 0x7a6   :  { %7039 = vmatpush3.bf16.msra.mxu1 %v8068_v44 }
 0x7a9   :  { %5714 = vmatmul.mubr.bf16.vlgmr.msra.gmra.mxu1 %v9753_v43  ;;  %v8018_v43 = vld [vmem:[%s10491_s13 + $0x30] sm:$0xff]  }
 0x829   :  { %v5010_v46 = vpop.f32.mrf.mxu1 }
 0x82a   :  { %v5011_v47 = vadd.f32 %v6693_v45, %v5010_v46  ;;  %v8076_v46 = vpop.eup %8075 }
 0x82b   :  { %v7166_v49 = vpop.f32.mrf.mxu1 }
 0x82c   :  { %v5016_v50 = vmax.f32 %v5011_v47, 0.0  ;;  %v3931_v47 = vadd.f32 1.0, %v8076_v46 }
 0x82d   :  { %v5013_v51 = vpop.f32.mrf.mxu1 }
 0x82e   :  { %v5017_v55 = vpack.c.bf16 %v5016_v50, %v5016_v50 }
 0x82f   :  { %v7167_v58 = vpop.f32.mrf.mxu1 }
 0x830   :  { %7185 = vmatmul.mubr.bf16.vlgmr.msra.gmra.mxu0 %v5017_v55  ;;  %v3925_v55 = vmul.f32 0.0, %v3919_v34 }
 0x831   :  { %7003 = vmatpush3.bf16.msra.mxu0 %v8014_v52  ;;  %5492 = vmatprep.mubr.bf16.mxu0 %v9831_v60  ;;  %v3924_v52 = vmax.f32 %v3919_v34, 0.0 }
 0x832   :  { %7004 = vmatprep.subr.bf16.mxu0 %v8016_v56 }
 0x835   :  { %7005 = vmatpush3.bf16.msra.mxu0 %v8018_v43 }
 0x836   :  { %7006 = vmatprep.subr.bf16.mxu0 %v8020_v59 }
 0x839   :  { %7007 = vmatpush3.bf16.msra.mxu0 %v8022_v20 }
 0x83a   :  { %7008 = vmatprep.subr.bf16.mxu0 %v8024_v30 }
 0x83d   :  { %7009 = vmatpush3.bf16.msra.mxu0 %v8026_v62  ;;  %v6760_v62 = vld [vmem:[%s10493_s15] ss:$0 sm:$0xff] }
 0x83e   :  { %7010 = vmatprep.subr.bf16.mxu0 %v8028_v63 }
 0x841   :  { %7011 = vmatpush3.bf16.msra.mxu0 %v8030_v29 }
 0x842   :  { %7012 = vmatprep.subr.bf16.mxu0 %v8032_v0 }
 0x845   :  { %7013 = vmatpush3.bf16.msra.mxu0 %v8034_v1 }
 0x846   :  { %7014 = vmatprep.subr.bf16.mxu0 %v8035_v2 }
 0x849   :  { %7015 = vmatpush3.bf16.msra.mxu0 %v8036_v3  ;;  %v6996_v24 = vpop.f32.mrf.mxu1 }
 0x84a   :  { %7016 = vmatprep.subr.bf16.mxu0 %v8037_v33 }
 0x84b   :  { %v6997_v17 = vpop.f32.mrf.mxu1 }
 0x84c   :  { %v6998_v25 = vadd.f32 %v6997_v17, %v6996_v24 }
 0x84d   :  { %7017 = vmatpush3.bf16.msra.mxu0 %v8038_v4  ;;  %v6999_v57 = vpop.f32.mrf.mxu1  ;;  %v3926_v4 = vsub.f32 %v3924_v52, %v3925_v55 }
 0x84e   :  { %7046 = vmatprep.subr.bf16.mxu0 %v8041_v5  ;;  %v5363_v59 = vrot.slane %v6998_v25, %v9126_v28 }
 0x84f   :  { %v7000_v26 = vpop.f32.mrf.mxu1 }
 0x850   :  { %5493 = vmatmul.mubr.bf16.vlgmr.msra.gmra.mxu0 %v9833_v61 }
 0x851   :  { %7047 = vmatpush3.bf16.msra.mxu0 %v8042_v6  ;;  %5853 = vmatprep.mubr.bf16.mxu0 %v9831_v60  ;;  %v8054_v60 = vld [vmem:[%s10494_s16 + $0x20] sm:$0xff]  }
 0x852   :  { %7048 = vmatprep.subr.bf16.mxu0 %v8045_v7 }
 0x855   :  { %7049 = vmatpush3.bf16.msra.mxu0 %v8046_v8 }
 0x856   :  { %7050 = vmatprep.subr.bf16.mxu0 %v8049_v48 }
 0x859   :  { %7051 = vmatpush3.bf16.msra.mxu0 %v8050_v10 }
 0x85a   :  { %7052 = vmatprep.subr.bf16.mxu0 %v8053_v11 }
 0x85d   :  { %7053 = vmatpush3.bf16.msra.mxu0 %v8054_v60 }
 0x85e   :  { %7054 = vmatprep.subr.bf16.mxu0 %v8057_v12 }
 0x861   :  { %7055 = vmatpush3.bf16.msra.mxu0 %v8058_v54 }
 0x862   :  { %7056 = vmatprep.subr.bf16.mxu0 %v8061_v13  ;;  %v6793_v13 = vld [vmem:[%s10496_s18] ss:$0 sm:$0xff]  ;;  %s8177_s18 = smov [#allocation4]  }
 0x863   :  { %s5887_s4 = sshll.u32 %s8177_s18, 4  ;;  %s5888_s4 = int_to_ptr.vmem [resolvable:$true] %s5887_s4 }
 0x864   :  { %s8087_s25 = scalar_lea.vmem %s5888_s4, 128  ;;  %p8092_p1 = scmp.lt.s32.totalorder %s5888_s4, %s5888_s4 }
 0x865   :  { %7057 = vmatpush3.bf16.msra.mxu0 %v8062_v14  ;;  %p8088_p0 = scmp.ne.s32.totalorder %s5888_s4, %s8087_s25  ;;  %p8093_p2 = scmp.lt.s32.totalorder %s8087_s25, %s8087_s25 }
 0x866   :  { %7058 = vmatprep.subr.bf16.mxu0 %v8065_v15 }
 0x867   :  { %p8094_p3 = por %p8093_p2, %p8092_p1 }
 0x869   :  { %7059 = vmatpush3.bf16.msra.mxu0 %v8066_v18  ;;  %v7040_v27 = vpop.f32.mrf.mxu1  ;;  %p8095_p4 = pnand %p8094_p3, %p8088_p0 }
 0x86a   :  { %7060 = vmatprep.subr.bf16.mxu0 %v8069_v19  ;;  %v4541_v19 = vpop.xlane.xlu1 %4540 }
 0x86b   :  { %v7041_v21 = vpop.f32.mrf.mxu1 }
 0x86c   :  { %v7042_v31 = vadd.f32 %v7041_v21, %v7040_v27 }
 0x86d   :  { %7061 = vmatpush3.bf16.msra.mxu0 %v8070_v53  ;;  %v7043_v9 = vpop.f32.mrf.mxu1  ;;  %v4542_v53 = vrot.slane %v4541_v19, 4 }
 0x86e   :  { %v5724_v11 = vrot.slane %v7042_v31, %v9126_v28 }
 0x86f   :  { %v7044_v32 = vpop.f32.mrf.mxu1  ;;  %v4543_v24 = vadd.f32 %v4542_v53, %v4541_v19 }
 0x870   :  { %5854 = vmatmul.mubr.bf16.vlgmr.msra.gmra.mxu0 %v9833_v61  ;;  %v6719_v61 = vld [vmem:[%s10490_s12 + $0x2] ss:$0 sm:$0xff] }
 0x871   :  { %v4544_v27 = vrot.slane %v4543_v24, 2 }
 0x873   :  { %v4545_v34 = vadd.f32 %v4544_v27, %v4543_v24 }
 0x8f0   :  { %v5125_v38 = vpop.f32.mrf.mxu0 }
 0x8f1   :  { %v5126_v39 = vadd.f32 %v6719_v61, %v5125_v38  ;;  %v4546_v38 = vrot.slane %v4545_v34, 1 }
 0x8f2   :  { %v7186_v40 = vpop.f32.mrf.mxu0 }
 0x8f3   :  { %v5134_v41 = vand.u32 2147483647, %v5126_v39  ;;  %v5131_v58 = vmax.f32 %v5126_v39, 0.0  ;;  %v5132_v43 = vmul.f32 0.0, %v5126_v39 }
 0x8f4   :  { %v5128_v22 = vpop.f32.mrf.mxu0 }
 0x8f5   :  { %v5135_v42 = vsub.f32 0.0, %v5134_v41  ;;  %v5133_v3 = vsub.f32 %v5131_v58, %v5132_v43  ;;  %v4547_v22 = vadd.f32 %v4546_v38, %v4545_v34 }
 0x8f6   :  { %v7187_v44 = vpop.f32.mrf.mxu0 }
 0x8f7   :  { %v5136_v45 = vmul.f32 1.442695, %v5135_v42 }
 0x8f9   :  { %8077 = vpow2.f32 %v5136_v45 }
 0x8fa   :  { %8079 = vlog2.f32 %v3931_v47 }
 0x906   :  { %v8078_v23 = vpop.eup %8077 }
 0x907   :  { %v5138_v49 = vadd.f32 1.0, %v8078_v23  ;;  %v8080_v51 = vpop.eup %8079 }
 0x908   :  { %v3933_v29 = vmul.f32 0.6931472, %v8080_v51 }
 0x909   :  { %8081 = vlog2.f32 %v5138_v49 }
 0x90a   :  { %v3934_v7 = vadd.f32 %v3933_v29, %v3926_v4 }
 0x90c   :  { %v3936_v48 = vsel %vm3935_vm2, %v3934_v7, 0.0 }
 0x910   :  { %v7018_v50 = vpop.f32.mrf.mxu0 }
 0x912   :  { %v7019_v56 = vpop.f32.mrf.mxu0 }
 0x913   :  { %v7020_v20 = vadd.f32 %v7019_v56, %v7018_v50 }
 0x914   :  { %v7021_v30 = vpop.f32.mrf.mxu0 }
 0x915   :  { %v5495_v63 = vadd.f32 %v7020_v20, %v5363_v59 }
 0x916   :  { %v8082_v0 = vpop.eup %8081  ;;  %v7022_v1 = vpop.f32.mrf.mxu0 }
 0x917   :  { %v5507_v2 = vadd.f32 %v6760_v62, %v5495_v63  ;;  %v5140_v33 = vmul.f32 0.6931472, %v8082_v0 }
 0x919   :  { %v5509_v5 = vsel %vm5508_vm3, %v5507_v2, -inf  ;;  %v5141_v6 = vadd.f32 %v5140_v33, %v5133_v3 }
 0x91a   :  { %5510 = vmax.xlane.f32.xlu0 %v5509_v5 }
 0x91b   :  { %v5142_v8 = vsel %vm3935_vm2, %v5141_v6, 0.0 }
 0x91c   :  { %5143 = vadd.xlane.f32.xlu1 %v5142_v8 }
 0x91e   :  { %3937 = vadd.xlane.f32.xlu0 %v3936_v48 }
 0x930   :  { %v7062_v10 = vpop.f32.mrf.mxu0 }
 0x932   :  { %v7063_v60 = vpop.f32.mrf.mxu0 }
 0x933   :  { %v7064_v12 = vadd.f32 %v7063_v60, %v7062_v10 }
 0x934   :  { %v7065_v54 = vpop.f32.mrf.mxu0 }
 0x935   :  { %v5856_v14 = vadd.f32 %v7064_v12, %v5724_v11 }
 0x936   :  { %v7066_v15 = vpop.f32.mrf.mxu0 }
 0x937   :  { %v5868_v18 = vadd.f32 %v6793_v13, %v5856_v14 }
 0x939   :  { %5870 = vst.msk [vmem:[#allocation4] sm:$0xff] %vm5869_vm4, %v5868_v18 }
 0x9a3   :  { %v5511_v17 = vpop.xlane.xlu0 %5510 }
 0x9a4   :  { %v5512_v25 = vsub.f32 %v5507_v2, %v5511_v17 }
 0x9a5   :  { %v5144_v57 = vpop.xlane.xlu1 %5143 }
 0x9a6   :  { %v5513_v26 = vmul.f32 1.442695, %v5512_v25  ;;  %v5145_v28 = vrot.slane %v5144_v57, 4 }
 0x9a7   :  { %v3938_v21 = vpop.xlane.xlu0 %3937 }
 0x9a8   :  { %8083 = vpow2.f32 %v5513_v26  ;;  %v5146_v31 = vadd.f32 %v5145_v28, %v5144_v57  ;;  %v3939_v9 = vrot.slane %v3938_v21, 4 }
 0x9aa   :  { %v5147_v32 = vrot.slane %v5146_v31, 2  ;;  %v3940_v35 = vadd.f32 %v3939_v9, %v3938_v21 }
 0x9ac   :  { %v5148_v36 = vadd.f32 %v5147_v32, %v5146_v31  ;;  %v3941_v37 = vrot.slane %v3940_v35, 2 }
 0x9ae   :  { %v3942_v16 = vadd.f32 %v3941_v37, %v3940_v35  ;;  %v5149_v61 = vrot.slane %v5148_v36, 1 }
 0x9b0   :  { %v3943_v39 = vrot.slane %v3942_v16, 1  ;;  %v5150_v41 = vadd.f32 %v5149_v61, %v5148_v36 }
 0x9b2   :  { %v3944_v40 = vadd.f32 %v3943_v39, %v3942_v16 }
 0x9b4   :  { %7188 = vpush %v3944_v40 }
 0x9b5   :  { %v8084_v42 = vpop.eup %8083  ;;  %7190 = vpush %v4547_v22 }
 0x9b6   :  { %7192 = vpush %v5150_v41  ;;  %v5515_v44 = vsel %vm5508_vm3, %v8084_v42, 0.0 }
 0x9b7   :  { %5516 = vadd.xlane.f32.xlu0 %v5515_v44 }
 0x9b8   :  { %8098 = shalt.err (!%p8095_p4)
}
 0x9b9   :  { %5890 = dma.vmem_to_hbm [thread:$0]  %s5888_s4, 128, %s10498_s20, [#allocation5]  }
 0x9ba   :  { %s8178_s17 = smov [#allocation6]   ;;  %s8179_s5 = smov [#allocation7]  }
 0x9bb   :  { %s5897_s10 = sshll.u32 %s8178_s17, 4  ;;  %s5907_s11 = sshll.u32 %s8179_s5, 4  ;;  %s5898_s10 = int_to_ptr.vmem [resolvable:$true] %s5897_s10  ;;  %s5908_s11 = int_to_ptr.vmem [resolvable:$true] %s5907_s11 }
 0x9bc   :  { %s8107_s13 = scalar_lea.vmem %s5898_s10, 16  ;;  %s8111_s14 = scalar_lea.vmem %s5898_s10, 32 }
 0x9bd   :  { %p8108_p5 = scmp.ne.s32.totalorder %s5898_s10, %s8107_s13  ;;  %p8112_p6 = scmp.lt.s32.totalorder %s5898_s10, %s5898_s10 }
 0x9be   :  { %p8113_p7 = scmp.lt.s32.totalorder %s8111_s14, %s8107_s13 }
 0x9c0   :  { %p8114_p8 = por %p8113_p7, %p8112_p6 }
 0x9c2   :  { %p8115_p9 = pnand %p8114_p8, %p8108_p5 }
 0x9e5   :  { %s7189_s1 = spop %7188 }
 0x9e6   :  { %s3946_s24 = smul.f32 0.125, %s7189_s1  ;;  %s7191_s6 = spop %7190 }
 0x9e7   :  { %s4549_s26 = smul.f32 0.125, %s7191_s6  ;;  %s7193_s7 = spop %7192 }
 0x9e8   :  { %v5153_v45 = vstv %s3946_s24  ;;  %s5152_s9 = smul.f32 0.125, %s7193_s7 }
 0x9e9   :  { %5155 = vst [vmem:[#allocation6] sm:$0x1] %v5153_v45 }
 0x9ea   :  { %s5156_s2 = sadd.f32 %s5152_s9, %s4549_s26 }
 0x9eb   :  { %8118 = shalt.err (!%p8115_p9)
}
 0x9ec   :  { %5900 = dma.vmem_to_hbm [thread:$0]  %s5898_s10, 16, %s10499_s21, [#allocation5]   ;;  %v5157_v46 = vstv %s5156_s2 }
 0x9ed   :  { %5159 = vst [vmem:[#allocation7] sm:$0x1] %v5157_v46  ;;  %s8127_s27 = scalar_lea.vmem %s5908_s11, 16  ;;  %s8131_s8 = scalar_lea.vmem %s5908_s11, 32 }
 0x9ee   :  { %p8128_p10 = scmp.ne.s32.totalorder %s5908_s11, %s8127_s27  ;;  %p8132_p11 = scmp.lt.s32.totalorder %s5908_s11, %s5908_s11 }
 0x9ef   :  { %p8133_p12 = scmp.lt.s32.totalorder %s8131_s8, %s8127_s27 }
 0x9f1   :  { %p8134_p13 = por %p8133_p12, %p8132_p11 }
 0x9f3   :  { %p8135_p0 = pnand %p8134_p13, %p8128_p10 }
 0x9f5   :  { %8138 = shalt.err (!%p8135_p0)
}
 0x9f6   :  { %5910 = dma.vmem_to_hbm [thread:$0]  %s5908_s11, 16, %s10500_s22, [#allocation8]  }
 0x9f7   :  { %s8180_s12 = smov [#allocation2]  }
 0x9f8   :  { %s5877_s28 = sshll.u32 %s8180_s12, 4  ;;  %s5878_s28 = int_to_ptr.vmem [resolvable:$true] %s5877_s28 }
 0x9f9   :  { %s8147_s21 = scalar_lea.vmem %s5878_s28, 128  ;;  %p8152_p2 = scmp.lt.s32.totalorder %s5878_s28, %s5878_s28 }
 0x9fa   :  { %p8148_p1 = scmp.ne.s32.totalorder %s5878_s28, %s8147_s21  ;;  %p8153_p3 = scmp.lt.s32.totalorder %s8147_s21, %s8147_s21 }
 0x9fc   :  { %p8154_p4 = por %p8153_p3, %p8152_p2 }
 0x9fe   :  { %p8155_p5 = pnand %p8154_p4, %p8148_p1 }
 0xa40   :  { %v5517_v47 = vpop.xlane.xlu0 %5516 }
 0xa41   :  { %8085 = vrcp.f32 %v5517_v47 }
 0xa4e   :  { %v8086_v23 = vpop.eup %8085 }
 0xa4f   :  { %v5519_v49 = vmul.f32 %v8086_v23, %v8084_v42 }
 0xa51   :  { %5520 = vst.msk [vmem:[#allocation2] sm:$0xff] %vm5508_vm3, %v5519_v49 }
 0xa52   :  { %8158 = shalt.err (!%p8155_p5)
}
 0xa53   :  { %5880 = dma.vmem_to_hbm [thread:$0]  %s5878_s28, 128, %s10497_s19, [#allocation3]  }
 0xa54   :  { %8167 = dma.done.wait [#allocation3], 128  }
 0xa55   :  { %8168 = vsyncadd [#allocation3], 4294967168 }
 0xa56   :  { %8169 = dma.done.wait [#allocation5], 144  }
 0xa57   :  { %8170 = vsyncadd [#allocation5], 4294967152 }
 0xa58   :  { %8171 = dma.done.wait [#allocation8], 16  }
 0xa59   :  { %8172 = vsyncadd [#allocation8], 4294967280 }
 0xa5a   :  { %5923 = vsyncpa [#allocation3], 1 }
 0xa5b   :  { %5924 = vsyncpa [#allocation5], 1 }
 0xa5c   :  { %5925 = vsyncpa [#allocation8], 1 }

</bundles_post_ra>
